<compile_context>
chip_gen: v7x
topology: tpu7x:2x2x1
jax: 0.10.0
libtpu: 0.0.40
codegen_flags: <defaults>
</compile_context>

<pallas_src>
import functools

import jax
import jax.numpy as jnp
from jax.experimental import pallas as pl
from jax.experimental.pallas import tpu as pltpu

EPS = 1e-5
LANE = 128


def _detect_vmem_bytes():
    try:
        return int(pltpu.get_tpu_info().vmem_capacity_bytes)
    except Exception:
        return 64 * 1024 * 1024  # conservative (v7x-sized) fallback


_VMEM_PHYS = _detect_vmem_bytes()
if _VMEM_PHYS >= 100 * 1024 * 1024:      # v5e / v6e: 128 MiB VMEM per core
    TM_MAX = 1024
    VMEM_LIMIT = 96 * 1024 * 1024
else:                                     # v7x: 64 MiB VMEM per core (or unknown)
    TM_MAX = 512
    VMEM_LIMIT = 48 * 1024 * 1024
FUSED_Y_MAX = VMEM_LIMIT // 8            # budget for the persistent bf16 y scratch

_COMPILER_PARAMS = pltpu.CompilerParams(
    dimension_semantics=("parallel",),
    vmem_limit_bytes=VMEM_LIMIT,
)
_FUSED_COMPILER_PARAMS = pltpu.CompilerParams(
    dimension_semantics=("arbitrary", "arbitrary"),
    vmem_limit_bytes=VMEM_LIMIT,
)


def _round_up(x, m):
    return ((x + m - 1) // m) * m


def _choose_tm(m):
    # multiple of 16 (bf16 sublane tiling), capped per-generation
    return min(TM_MAX, _round_up(m, 16))


def _use_fused(Mp, K, Np, tm):
    y_bytes = Mp * Np * 2                                   # persistent bf16 y
    stream = 2 * (tm * K + K * Np + 2 * tm * Np) * 2        # double-buffered operands
    return y_bytes <= FUSED_Y_MAX and (y_bytes + stream) <= (VMEM_LIMIT * 3) // 4


# ----------------------------------------------------------------------------
# Pallas kernels
# ----------------------------------------------------------------------------
def _gemm_stats_kernel(a_ref, b_ref, o_ref, sum_ref, ssq_ref):
    # one M-tile of the conv GEMM (no bias: cancelled by BN) + per-tile
    # per-channel sum / sumsq for the fused BatchNorm statistics.
    acc = jnp.dot(a_ref[...], b_ref[...], preferred_element_type=jnp.float32)
    o_ref[...] = acc.astype(o_ref.dtype)                    # bf16 intermediate
    sum_ref[...] = jnp.sum(acc, axis=0, keepdims=True).reshape(1, 1, -1)
    ssq_ref[...] = jnp.sum(acc * acc, axis=0, keepdims=True).reshape(1, 1, -1)


def _gemm_bias_tanh_kernel(a_ref, b_ref, bias_ref, o_ref):
    # head conv: GEMM + bias + tanh fused in the epilogue (EUP slot), bf16 out.
    acc = jnp.dot(a_ref[...], b_ref[...], preferred_element_type=jnp.float32)
    o_ref[...] = jnp.tanh(acc + bias_ref[...]).astype(o_ref.dtype)


def _bn_apply_kernel(x_ref, scale_ref, shift_ref, o_ref, *, relu):
    y = x_ref[...].astype(jnp.float32) * scale_ref[...] + shift_ref[...]
    if relu:
        y = jnp.maximum(y, 0.0)
    o_ref[...] = y.astype(o_ref.dtype)


def _bn_apply_add_kernel(x_ref, skip_ref, scale_ref, shift_ref, o_ref):
    # BN (no activation) fused with the residual skip-add.
    y = (x_ref[...].astype(jnp.float32) * scale_ref[...] + shift_ref[...]
         + skip_ref[...].astype(jnp.float32))
    o_ref[...] = y.astype(o_ref.dtype)


def _fused_conv_bn_kernel(a_ref, b_ref, gamma_ref, beta_ref, o_ref,
                          y_sc, sum_sc, ssq_sc, scale_sc, shift_sc,
                          *, count, relu):
    """grid=(2, nt): phase 0 = GEMM+stats into VMEM, phase 1 = BN apply."""
    ph = pl.program_id(0)
    j = pl.program_id(1)

    @pl.when(ph == 0)
    def _phase0():
        @pl.when(j == 0)
        def _():
            sum_sc[...] = jnp.zeros_like(sum_sc)
            ssq_sc[...] = jnp.zeros_like(ssq_sc)
        acc = jnp.dot(a_ref[...], b_ref[...], preferred_element_type=jnp.float32)
        y_sc[j] = acc.astype(y_sc.dtype)
        sum_sc[...] += jnp.sum(acc, axis=0, keepdims=True)
        ssq_sc[...] += jnp.sum(acc * acc, axis=0, keepdims=True)

    @pl.when(ph == 1)
    def _phase1():
        @pl.when(j == 0)
        def _():
            mean = sum_sc[...] / count
            var = jnp.maximum(ssq_sc[...] / count - mean * mean, 0.0)
            scale = gamma_ref[...] * jax.lax.rsqrt(var + EPS)
            scale_sc[...] = scale
            shift_sc[...] = beta_ref[...] - mean * scale
        y = y_sc[j].astype(jnp.float32) * scale_sc[...] + shift_sc[...]
        if relu:
            y = jnp.maximum(y, 0.0)
        o_ref[...] = y.astype(o_ref.dtype)


def _fused_conv_bn_add_kernel(a_ref, b_ref, gamma_ref, beta_ref, skip_ref, o_ref,
                              y_sc, sum_sc, ssq_sc, scale_sc, shift_sc, *, count):
    """Same as above, BN (no activation) fused with the residual skip-add."""
    ph = pl.program_id(0)
    j = pl.program_id(1)

    @pl.when(ph == 0)
    def _phase0():
        @pl.when(j == 0)
        def _():
            sum_sc[...] = jnp.zeros_like(sum_sc)
            ssq_sc[...] = jnp.zeros_like(ssq_sc)
        acc = jnp.dot(a_ref[...], b_ref[...], preferred_element_type=jnp.float32)
        y_sc[j] = acc.astype(y_sc.dtype)
        sum_sc[...] += jnp.sum(acc, axis=0, keepdims=True)
        ssq_sc[...] += jnp.sum(acc * acc, axis=0, keepdims=True)

    @pl.when(ph == 1)
    def _phase1():
        @pl.when(j == 0)
        def _():
            mean = sum_sc[...] / count
            var = jnp.maximum(ssq_sc[...] / count - mean * mean, 0.0)
            scale = gamma_ref[...] * jax.lax.rsqrt(var + EPS)
            scale_sc[...] = scale
            shift_sc[...] = beta_ref[...] - mean * scale
        y = (y_sc[j].astype(jnp.float32) * scale_sc[...] + shift_sc[...]
             + skip_ref[...].astype(jnp.float32))
        o_ref[...] = y.astype(o_ref.dtype)


# ----------------------------------------------------------------------------
# Pallas wrappers
# ----------------------------------------------------------------------------
def _gemm_stats(a_bf16, b_bf16, tm):
    """a:(Mp,K) bf16, b:(K,Np) bf16 -> y (Mp,Np) bf16, ch_sum/ch_ssq (Np,) f32."""
    Mp, K = a_bf16.shape
    _, Np = b_bf16.shape
    nt = Mp // tm
    out, tsum, tssq = pl.pallas_call(
        _gemm_stats_kernel,
        out_shape=(
            jax.ShapeDtypeStruct((Mp, Np), jnp.bfloat16),
            jax.ShapeDtypeStruct((nt, 1, Np), jnp.float32),
            jax.ShapeDtypeStruct((nt, 1, Np), jnp.float32),
        ),
        grid_spec=pltpu.PrefetchScalarGridSpec(
            num_scalar_prefetch=0,
            grid=(nt,),
            in_specs=[
                pl.BlockSpec((tm, K), lambda i: (i, 0)),
                pl.BlockSpec((K, Np), lambda i: (0, 0)),
            ],
            out_specs=[
                pl.BlockSpec((tm, Np), lambda i: (i, 0)),
                pl.BlockSpec((1, 1, Np), lambda i: (i, 0, 0)),
                pl.BlockSpec((1, 1, Np), lambda i: (i, 0, 0)),
            ],
        ),
        compiler_params=_COMPILER_PARAMS,
    )(a_bf16, b_bf16)
    # tiny cross-tile reduce (keeps the M grid axis fully parallel / 2-TC safe)
    return out, jnp.sum(tsum, axis=(0, 1)), jnp.sum(tssq, axis=(0, 1))


def _gemm_bias_tanh(a_bf16, b_bf16, bias_p, tm):
    Mp, K = a_bf16.shape
    _, Np = b_bf16.shape
    nt = Mp // tm
    return pl.pallas_call(
        _gemm_bias_tanh_kernel,
        out_shape=jax.ShapeDtypeStruct((Mp, Np), jnp.bfloat16),
        grid_spec=pltpu.PrefetchScalarGridSpec(
            num_scalar_prefetch=0,
            grid=(nt,),
            in_specs=[
                pl.BlockSpec((tm, K), lambda i: (i, 0)),
                pl.BlockSpec((K, Np), lambda i: (0, 0)),
                pl.BlockSpec((1, Np), lambda i: (0, 0)),
            ],
            out_specs=pl.BlockSpec((tm, Np), lambda i: (i, 0)),
        ),
        compiler_params=_COMPILER_PARAMS,
    )(a_bf16, b_bf16, bias_p)


def _bn_apply(y2d, scale, shift, tm, relu=True, skip2d=None):
    """P-tiled scale/shift (+ReLU / +skip) pass on a (Mp, Np) bf16 activation."""
    Mp, Np = y2d.shape
    nt = Mp // tm
    if skip2d is None:
        return pl.pallas_call(
            functools.partial(_bn_apply_kernel, relu=relu),
            out_shape=jax.ShapeDtypeStruct((Mp, Np), jnp.bfloat16),
            grid_spec=pltpu.PrefetchScalarGridSpec(
                num_scalar_prefetch=0,
                grid=(nt,),
                in_specs=[
                    pl.BlockSpec((tm, Np), lambda i: (i, 0)),
                    pl.BlockSpec((1, Np), lambda i: (0, 0)),
                    pl.BlockSpec((1, Np), lambda i: (0, 0)),
                ],
                out_specs=pl.BlockSpec((tm, Np), lambda i: (i, 0)),
            ),
            compiler_params=_COMPILER_PARAMS,
        )(y2d, scale, shift)
    return pl.pallas_call(
        _bn_apply_add_kernel,
        out_shape=jax.ShapeDtypeStruct((Mp, Np), jnp.bfloat16),
        grid_spec=pltpu.PrefetchScalarGridSpec(
            num_scalar_prefetch=0,
            grid=(nt,),
            in_specs=[
                pl.BlockSpec((tm, Np), lambda i: (i, 0)),
                pl.BlockSpec((tm, Np), lambda i: (i, 0)),
                pl.BlockSpec((1, Np), lambda i: (0, 0)),
                pl.BlockSpec((1, Np), lambda i: (0, 0)),
            ],
            out_specs=pl.BlockSpec((tm, Np), lambda i: (i, 0)),
        ),
        compiler_params=_COMPILER_PARAMS,
    )(y2d, skip2d, scale, shift)


def _fused_conv_bn(a_bf16, b_bf16, gamma_p, beta_p, tm, *, count, relu,
                   skip2d=None):
    """Single-call conv GEMM + BN stats + scale/shift apply (+ReLU / +skip)."""
    Mp, K = a_bf16.shape
    _, Np = b_bf16.shape
    nt = Mp // tm

    a_spec = pl.BlockSpec((tm, K), lambda ph, j: ((1 - ph) * j, 0))
    b_spec = pl.BlockSpec((K, Np), lambda ph, j: (0, 0))
    vec_spec = pl.BlockSpec((1, Np), lambda ph, j: (0, 0))
    out_spec = pl.BlockSpec((tm, Np), lambda ph, j: (ph * j, 0))
    scratch = [
        pltpu.VMEM((nt, tm, Np), jnp.bfloat16),   # resident y
        pltpu.VMEM((1, Np), jnp.float32),         # sum
        pltpu.VMEM((1, Np), jnp.float32),         # sumsq
        pltpu.VMEM((1, Np), jnp.float32),         # scale
        pltpu.VMEM((1, Np), jnp.float32),         # shift
    ]
    if skip2d is None:
        kern = functools.partial(_fused_conv_bn_kernel, count=count, relu=relu)
        in_specs = [a_spec, b_spec, vec_spec, vec_spec]
        args = (a_bf16, b_bf16, gamma_p, beta_p)
    else:
        kern = functools.partial(_fused_conv_bn_add_kernel, count=count)
        skip_spec = pl.BlockSpec((tm, Np), lambda ph, j: (ph * j, 0))
        in_specs = [a_spec, b_spec, vec_spec, vec_spec, skip_spec]
        args = (a_bf16, b_bf16, gamma_p, beta_p, skip2d)
    return pl.pallas_call(
        kern,
        out_shape=jax.ShapeDtypeStruct((Mp, Np), jnp.bfloat16),
        grid_spec=pltpu.PrefetchScalarGridSpec(
            num_scalar_prefetch=0,
            grid=(2, nt),
            in_specs=in_specs,
            out_specs=out_spec,
            scratch_shapes=scratch,
        ),
        compiler_params=_FUSED_COMPILER_PARAMS,
    )(*args)


# ----------------------------------------------------------------------------
# Host-side glue (patch building, weight packing, BN stats -> scale/shift)
# ----------------------------------------------------------------------------
def _im2col(x, ksize, stride, pad, mode):
    """x: (N,H,W,C) exact channels -> bf16 patches (N*OH*OW, ksize*ksize*C)."""
    N, H, W, C = x.shape
    if pad > 0:
        x = jnp.pad(x, ((0, 0), (pad, pad), (pad, pad), (0, 0)), mode=mode)
    Hp, Wp = x.shape[1], x.shape[2]
    OH = (Hp - ksize) // stride + 1
    OW = (Wp - ksize) // stride + 1
    taps = []
    for kh in range(ksize):
        for kw in range(ksize):
            taps.append(x[:, kh:kh + (OH - 1) * stride + 1:stride,
                          kw:kw + (OW - 1) * stride + 1:stride, :])
    p = jnp.stack(taps, axis=3).reshape(N * OH * OW, ksize * ksize * C)
    return p.astype(jnp.bfloat16), OH, OW


def _pack_conv_weight(w):
    """PyTorch (Cout,Cin,KH,KW) -> bf16 (KH*KW*Cin, Np) with zero-padded cols."""
    Cout, Cin, KH, KW = w.shape
    Np = _round_up(Cout, LANE)
    wm = jnp.transpose(w, (2, 3, 1, 0)).reshape(KH * KW * Cin, Cout)
    wm = jnp.pad(wm, ((0, 0), (0, Np - Cout)))
    return wm.astype(jnp.bfloat16), Np


def _pack_dconv_weight(w):
    """ConvTranspose2d weight (Cin,Cout,3,3) -> sub-pixel GEMM matrix.

    Rows ordered (da, db, cin) over the 2x2 taps of the (zero-appended) input;
    columns ordered (r, s, cout) over the 4 output phases.  out[2i+r, 2j+s]
    uses kernel element (1+r-2*da, 1+s-2*db) when it is in range.
    """
    Cin, Cout, KH, KW = w.shape
    blocks = []
    for da in (0, 1):
        for db in (0, 1):
            cols = []
            for r in (0, 1):
                for s in (0, 1):
                    kh = 1 + r - 2 * da
                    kw = 1 + s - 2 * db
                    if 0 <= kh < KH and 0 <= kw < KW:
                        cols.append(w[:, :, kh, kw])
                    else:
                        cols.append(jnp.zeros((Cin, Cout), w.dtype))
            blocks.append(jnp.concatenate(cols, axis=1))      # (Cin, 4*Cout)
    wpk = jnp.concatenate(blocks, axis=0)                      # (4*Cin, 4*Cout)
    Np4 = _round_up(4 * Cout, LANE)
    wpk = jnp.pad(wpk, ((0, 0), (0, Np4 - 4 * Cout)))
    return wpk.astype(jnp.bfloat16), Np4


def _dconv_taps(x):
    """x: (N,H,W,C) -> bf16 (N*H*W, 4*C): 2x2 taps of x with a zero row/col."""
    N, H, W, C = x.shape
    xp = jnp.pad(x, ((0, 0), (0, 1), (0, 1), (0, 0)))
    taps = []
    for da in (0, 1):
        for db in (0, 1):
            taps.append(xp[:, da:da + H, db:db + W, :])
    return jnp.stack(taps, axis=3).reshape(N * H * W, 4 * C).astype(jnp.bfloat16)


def _bn_scale_shift(ch_sum, ch_ssq, count, gamma, beta):
    """Per-channel batch-stats (padded rows contributed 0) -> scale / shift."""
    Np = ch_sum.shape[0]
    mean = ch_sum / count
    var = jnp.maximum(ch_ssq / count - mean * mean, 0.0)
    g = jnp.pad(gamma, (0, Np - gamma.shape[0]))
    b = jnp.pad(beta, (0, Np - beta.shape[0]))
    scale = g * jax.lax.rsqrt(var + EPS)
    shift = b - mean * scale
    return scale.reshape(1, Np), shift.reshape(1, Np)


# ----------------------------------------------------------------------------
# Layers
# ----------------------------------------------------------------------------
def _conv_bn_layer(act, C, w, gamma, beta, *, stride, pad, pad_mode,
                   relu=True, skip=None):
    """Conv(no bias) + training-mode BN (+ReLU / +residual skip).

    act: (N,H,W,Cp) with the first C channels valid.  Returns bf16
    (N,OH,OW,Np) channel-padded output (padded channels are exactly zero).
    """
    N, H, W, _ = act.shape
    x = act[..., :C]
    patches, OH, OW = _im2col(x, w.shape[2], stride, pad, pad_mode)
    wm, Np = _pack_conv_weight(w)

    M = N * OH * OW
    tm = _choose_tm(M)
    Mp = _round_up(M, tm)
    if Mp > M:
        patches = jnp.pad(patches, ((0, Mp - M), (0, 0)))

    skip2d = None
    if skip is not None:
        skip2d = skip.reshape(M, -1).astype(jnp.bfloat16)
        if Mp > M:
            skip2d = jnp.pad(skip2d, ((0, Mp - M), (0, 0)))

    K = patches.shape[1]
    if _use_fused(Mp, K, Np, tm):
        gamma_p = jnp.pad(gamma, (0, Np - gamma.shape[0])).reshape(1, Np)
        beta_p = jnp.pad(beta, (0, Np - beta.shape[0])).reshape(1, Np)
        out = _fused_conv_bn(patches, wm, gamma_p.astype(jnp.float32),
                             beta_p.astype(jnp.float32), tm,
                             count=float(M), relu=relu, skip2d=skip2d)
    else:
        y, ch_sum, ch_ssq = _gemm_stats(patches, wm, tm)
        scale, shift = _bn_scale_shift(ch_sum, ch_ssq, float(M), gamma, beta)
        out = _bn_apply(y, scale, shift, tm, relu=relu, skip2d=skip2d)
    return out[:M].reshape(N, OH, OW, Np)


def _res_block(x_act, C, rp):
    h = _conv_bn_layer(x_act, C, rp["w1"], rp["g1"], rp["be1"],
                       stride=1, pad=1, pad_mode="reflect", relu=True)
    return _conv_bn_layer(h, C, rp["w2"], rp["g2"], rp["be2"],
                          stride=1, pad=1, pad_mode="reflect",
                          relu=False, skip=x_act)


def _dconv_bn_layer(act, C, w, gamma, beta):
    """ConvTranspose2d(C,Cout,3,s=2,p=1,op=1) + BN + ReLU via sub-pixel GEMM."""
    N, H, W, _ = act.shape
    Cout = w.shape[1]
    x = act[..., :C]
    patches = _dconv_taps(x)
    wpk, Np4 = _pack_dconv_weight(w)

    M = N * H * W
    tm = _choose_tm(M)
    Mp = _round_up(M, tm)
    if Mp > M:
        patches = jnp.pad(patches, ((0, Mp - M), (0, 0)))

    y, s, ss = _gemm_stats(patches, wpk, tm)
    # combine the 4 output phases into per-channel BN statistics
    count = float(4 * M)
    ch_sum = jnp.sum(s[:4 * Cout].reshape(4, Cout), axis=0)
    ch_ssq = jnp.sum(ss[:4 * Cout].reshape(4, Cout), axis=0)
    mean = ch_sum / count
    var = jnp.maximum(ch_ssq / count - mean * mean, 0.0)
    scale_c = gamma * jax.lax.rsqrt(var + EPS)
    shift_c = beta - mean * scale_c
    scale4 = jnp.pad(jnp.tile(scale_c, 4), (0, Np4 - 4 * Cout)).reshape(1, Np4)
    shift4 = jnp.pad(jnp.tile(shift_c, 4), (0, Np4 - 4 * Cout)).reshape(1, Np4)

    out = _bn_apply(y, scale4, shift4, tm, relu=True)
    # pixel shuffle on bf16: (M, 4*Cout) phases -> (N, 2H, 2W, Cout)
    # TODO(synk): fold the shuffle into the out_spec once patches are built in-kernel.
    out = out[:M, :4 * Cout].reshape(N, H, W, 2, 2, Cout)
    return jnp.transpose(out, (0, 1, 3, 2, 4, 5)).reshape(N, 2 * H, 2 * W, Cout)


def _head_conv_tanh(act, C, w, b):
    """ReflectionPad(3) + Conv7 (with bias) + tanh, fused in the GEMM epilogue."""
    N = act.shape[0]
    Cout = w.shape[0]
    x = act[..., :C]
    patches, OH, OW = _im2col(x, 7, 1, 3, "reflect")
    wm, Np = _pack_conv_weight(w)
    bias_p = jnp.pad(b, (0, Np - Cout)).reshape(1, Np).astype(jnp.float32)

    M = N * OH * OW
    tm = _choose_tm(M)
    Mp = _round_up(M, tm)
    if Mp > M:
        patches = jnp.pad(patches, ((0, Mp - M), (0, 0)))

    y = _gemm_bias_tanh(patches, wm, bias_p, tm)
    return y[:M, :Cout].reshape(N, OH, OW, Cout)


# ----------------------------------------------------------------------------
# Generator: parameters + forward
# ----------------------------------------------------------------------------
def init_params(key, dim=8):
    keys = iter(jax.random.split(key, 128))

    def conv_w(cin, cout, k):
        return 0.05 * jax.random.normal(next(keys), (cout, cin, k, k), jnp.float32)

    def dconv_w(cin, cout, k):
        return 0.05 * jax.random.normal(next(keys), (cin, cout, k, k), jnp.float32)

    def bn_p(c):
        g = 1.0 + 0.05 * jax.random.normal(next(keys), (c,), jnp.float32)
        b = 0.05 * jax.random.normal(next(keys), (c,), jnp.float32)
        return g, b

    # Conv biases before BatchNorm are omitted: training-mode BN subtracts the
    # per-channel batch mean, so such biases cancel exactly.
    p = {}
    p["c1_w"] = conv_w(3, dim, 7)
    p["bn1_g"], p["bn1_b"] = bn_p(dim)
    p["c2_w"] = conv_w(dim, dim * 2, 3)
    p["bn2_g"], p["bn2_b"] = bn_p(dim * 2)
    p["c3_w"] = conv_w(dim * 2, dim * 4, 3)
    p["bn3_g"], p["bn3_b"] = bn_p(dim * 4)
    res = []
    for _ in range(9):
        w1 = conv_w(dim * 4, dim * 4, 3)
        g1, be1 = bn_p(dim * 4)
        w2 = conv_w(dim * 4, dim * 4, 3)
        g2, be2 = bn_p(dim * 4)
        res.append(dict(w1=w1, g1=g1, be1=be1, w2=w2, g2=g2, be2=be2))
    p["res"] = res
    p["d1_w"] = dconv_w(dim * 4, dim * 2, 3)
    p["dbn1_g"], p["dbn1_b"] = bn_p(dim * 2)
    p["d2_w"] = dconv_w(dim * 2, dim, 3)
    p["dbn2_g"], p["dbn2_b"] = bn_p(dim)
    p["c4_w"] = conv_w(dim, 3, 7)
    p["c4_b"] = 0.05 * jax.random.normal(next(keys), (3,), jnp.float32)
    return p


def generator_forward(params, x_nchw):
    p = params
    x = jnp.transpose(x_nchw, (0, 2, 3, 1)).astype(jnp.float32)  # NCHW -> NHWC

    # stem: ReflectionPad(3) + conv7 s1 + BN + ReLU
    a = _conv_bn_layer(x, 3, p["c1_w"], p["bn1_g"], p["bn1_b"],
                       stride=1, pad=3, pad_mode="reflect")
    C = p["c1_w"].shape[0]
    # downsample: conv3 s2 p1 (zero pad) + BN + ReLU (x2)
    a = _conv_bn_layer(a, C, p["c2_w"], p["bn2_g"], p["bn2_b"],
                       stride=2, pad=1, pad_mode="constant")
    C = p["c2_w"].shape[0]
    a = _conv_bn_layer(a, C, p["c3_w"], p["bn3_g"], p["bn3_b"],
                       stride=2, pad=1, pad_mode="constant")
    C = p["c3_w"].shape[0]

    # 9 residual blocks (BN of the 2nd conv fused with the skip-add)
    for rp in p["res"]:
        a = _res_block(a, C, rp)

    # upsample: sub-pixel ConvTranspose + BN + ReLU (x2)
    a = _dconv_bn_layer(a, C, p["d1_w"], p["dbn1_g"], p["dbn1_b"])
    C = p["d1_w"].shape[1]
    a = _dconv_bn_layer(a, C, p["d2_w"], p["dbn2_g"], p["dbn2_b"])
    C = p["d2_w"].shape[1]

    # head: ReflectionPad(3) + conv7 -> 3 channels + tanh
    y = _head_conv_tanh(a, C, p["c4_w"], p["c4_b"])
    return jnp.transpose(y, (0, 3, 1, 2)).astype(jnp.float32)  # NHWC -> NCHW


# ----------------------------------------------------------------------------
if __name__ == "__main__":
    dim = 8            # small dim for the synthetic run (module default is 64)
    key = jax.random.PRNGKey(0)
    pkey, xkey = jax.random.split(key)

    params = init_params(pkey, dim=dim)
    x = jax.random.normal(xkey, (2, 3, 16, 16), jnp.float32)  # NCHW like PyTorch

    fwd = jax.jit(generator_forward)
    out = jax.block_until_ready(fwd(params, x))

    assert out.shape == (2, 3, 16, 16), out.shape
    assert bool(jnp.all(jnp.isfinite(out)))
    assert bool(jnp.all(jnp.abs(out) <= 1.0))  # tanh range
    print("KERNEL_OK")
</pallas_src>

<mosaic_0001>
module attributes {stable_mosaic.version = 11 : i64} {
  func.func @_fused_conv_bn_kernel(%arg0: i32, %arg1: i32, %arg2: memref<512x147xbf16, #tpu.memory_space<vmem>>, %arg3: memref<147x128xbf16, #tpu.memory_space<vmem>>, %arg4: memref<1x128xf32, #tpu.memory_space<vmem>>, %arg5: memref<1x128xf32, #tpu.memory_space<vmem>>, %arg6: memref<512x128xbf16, #tpu.memory_space<vmem>>, %arg7: memref<1x512x128xbf16, #tpu.memory_space<vmem>>, %arg8: memref<1x128xf32, #tpu.memory_space<vmem>>, %arg9: memref<1x128xf32, #tpu.memory_space<vmem>>, %arg10: memref<1x128xf32, #tpu.memory_space<vmem>>, %arg11: memref<1x128xf32, #tpu.memory_space<vmem>>) attributes {dimension_semantics = [#tpu.dimension_semantics<arbitrary>, #tpu.dimension_semantics<arbitrary>], iteration_bounds = array<i64: 2, 1>, scalar_prefetch = 0 : i64, scratch_operands = 5 : i64, tpu.core_type = #tpu.core_type<tc>, window_params = [{transform_indices = @transform_0, window_bounds = array<i64: 512, 147>}, {pipeline_mode = #tpu.pipeline_mode<synchronous>, transform_indices = @transform_1, window_bounds = array<i64: 147, 128>}, {pipeline_mode = #tpu.pipeline_mode<synchronous>, transform_indices = @transform_2, window_bounds = array<i64: 1, 128>}, {pipeline_mode = #tpu.pipeline_mode<synchronous>, transform_indices = @transform_3, window_bounds = array<i64: 1, 128>}, {transform_indices = @transform_4, window_bounds = array<i64: 512, 128>}]} {
    %c0_i32 = arith.constant 0 : i32
    %0 = arith.cmpi eq, %arg0, %c0_i32 : i32
    %1 = arith.extui %0 : i1 to i32
    %c0_i32_0 = arith.constant 0 : i32
    %2 = arith.cmpi ne, %1, %c0_i32_0 : i32
    scf.if %2 {
      %c0_i32_2 = arith.constant 0 : i32
      %6 = arith.cmpi eq, %arg1, %c0_i32_2 : i32
      %7 = arith.extui %6 : i1 to i32
      %c0_i32_3 = arith.constant 0 : i32
      %8 = arith.cmpi ne, %7, %c0_i32_3 : i32
      scf.if %8 {
        %cst_19 = arith.constant 0.000000e+00 : f32
        %28 = vector.broadcast %cst_19 : f32 to vector<1x128xf32>
        %c0_20 = arith.constant 0 : index
        %c0_21 = arith.constant 0 : index
        %29 = vector.load %arg8[%c0_20, %c0_21] : memref<1x128xf32, #tpu.memory_space<vmem>>, vector<1x128xf32>
        tpu.vector_store %arg8[%c0_20, %c0_21], %28 {strides = array<i32>} : memref<1x128xf32, #tpu.memory_space<vmem>>, vector<1x128xf32>,
        %cst_22 = arith.constant 0.000000e+00 : f32
        %30 = vector.broadcast %cst_22 : f32 to vector<1x128xf32>
        %c0_23 = arith.constant 0 : index
        %c0_24 = arith.constant 0 : index
        %31 = vector.load %arg9[%c0_23, %c0_24] : memref<1x128xf32, #tpu.memory_space<vmem>>, vector<1x128xf32>
        tpu.vector_store %arg9[%c0_23, %c0_24], %30 {strides = array<i32>} : memref<1x128xf32, #tpu.memory_space<vmem>>, vector<1x128xf32>,
      } else {
      }
      %c0 = arith.constant 0 : index
      %c0_4 = arith.constant 0 : index
      %9 = vector.load %arg2[%c0, %c0_4] : memref<512x147xbf16, #tpu.memory_space<vmem>>, vector<512x147xbf16>
      %c0_5 = arith.constant 0 : index
      %c0_6 = arith.constant 0 : index
      %10 = vector.load %arg3[%c0_5, %c0_6] : memref<147x128xbf16, #tpu.memory_space<vmem>>, vector<147x128xbf16>
      %cst = arith.constant dense<0.000000e+00> : vector<512x128xf32>
      %11 = tpu.matmul %9, %10, %cst {dimension_numbers = #tpu.dot_dimension_numbers<[1], [0], [0], [1], [0, 0, 1, 1], [], []>} : vector<512x147xbf16>, vector<147x128xbf16>, vector<512x128xf32> -> vector<512x128xf32>
      %12 = arith.truncf %11 : vector<512x128xf32> to vector<512x128xbf16>
      %13 = arith.index_cast %arg1 : i32 to index
      %c0_7 = arith.constant 0 : index
      %c0_8 = arith.constant 0 : index
      %14 = vector.load %arg7[%13, %c0_7, %c0_8] : memref<1x512x128xbf16, #tpu.memory_space<vmem>>, vector<1x512x128xbf16>
      %15 = vector.shape_cast %14 : vector<1x512x128xbf16> to vector<512x128xbf16>
      %16 = vector.shape_cast %12 : vector<512x128xbf16> to vector<1x512x128xbf16>
      tpu.vector_store %arg7[%13, %c0_7, %c0_8], %16 {strides = array<i32>} : memref<1x512x128xbf16, #tpu.memory_space<vmem>>, vector<1x512x128xbf16>,
      %c0_9 = arith.constant 0 : index
      %c0_10 = arith.constant 0 : index
      %17 = vector.load %arg8[%c0_9, %c0_10] : memref<1x128xf32, #tpu.memory_space<vmem>>, vector<1x128xf32>
      %cst_11 = arith.constant dense<0.000000e+00> : vector<128xf32>
      %18 = vector.multi_reduction <add>, %11, %cst_11 [0] : vector<512x128xf32> to vector<128xf32>
      %19 = vector.shape_cast %18 : vector<128xf32> to vector<1x128xf32>
      %20 = arith.addf %17, %19 : vector<1x128xf32>
      %c0_12 = arith.constant 0 : index
      %c0_13 = arith.constant 0 : index
      %21 = vector.load %arg8[%c0_12, %c0_13] : memref<1x128xf32, #tpu.memory_space<vmem>>, vector<1x128xf32>
      tpu.vector_store %arg8[%c0_12, %c0_13], %20 {strides = array<i32>} : memref<1x128xf32, #tpu.memory_space<vmem>>, vector<1x128xf32>,
      %c0_14 = arith.constant 0 : index
      %c0_15 = arith.constant 0 : index
      %22 = vector.load %arg9[%c0_14, %c0_15] : memref<1x128xf32, #tpu.memory_space<vmem>>, vector<1x128xf32>
      %23 = arith.mulf %11, %11 : vector<512x128xf32>
      %cst_16 = arith.constant dense<0.000000e+00> : vector<128xf32>
      %24 = vector.multi_reduction <add>, %23, %cst_16 [0] : vector<512x128xf32> to vector<128xf32>
      %25 = vector.shape_cast %24 : vector<128xf32> to vector<1x128xf32>
      %26 = arith.addf %22, %25 : vector<1x128xf32>
      %c0_17 = arith.constant 0 : index
      %c0_18 = arith.constant 0 : index
      %27 = vector.load %arg9[%c0_17, %c0_18] : memref<1x128xf32, #tpu.memory_space<vmem>>, vector<1x128xf32>
      tpu.vector_store %arg9[%c0_17, %c0_18], %26 {strides = array<i32>} : memref<1x128xf32, #tpu.memory_space<vmem>>, vector<1x128xf32>,
    } else {
    }
    %c1_i32 = arith.constant 1 : i32
    %3 = arith.cmpi eq, %arg0, %c1_i32 : i32
    %4 = arith.extui %3 : i1 to i32
    %c0_i32_1 = arith.constant 0 : i32
    %5 = arith.cmpi ne, %4, %c0_i32_1 : i32
    scf.if %5 {
      %c0_i32_2 = arith.constant 0 : i32
      %6 = arith.cmpi eq, %arg1, %c0_i32_2 : i32
      %7 = arith.extui %6 : i1 to i32
      %c0_i32_3 = arith.constant 0 : i32
      %8 = arith.cmpi ne, %7, %c0_i32_3 : i32
      scf.if %8 {
        %c0_11 = arith.constant 0 : index
        %c0_12 = arith.constant 0 : index
        %23 = vector.load %arg8[%c0_11, %c0_12] : memref<1x128xf32, #tpu.memory_space<vmem>>, vector<1x128xf32>
        %cst_13 = arith.constant 5.120000e+02 : f32
        %24 = vector.broadcast %cst_13 : f32 to vector<1x128xf32>
        %25 = arith.divf %23, %24 : vector<1x128xf32>
        %c0_14 = arith.constant 0 : index
        %c0_15 = arith.constant 0 : index
        %26 = vector.load %arg9[%c0_14, %c0_15] : memref<1x128xf32, #tpu.memory_space<vmem>>, vector<1x128xf32>
        %cst_16 = arith.constant 5.120000e+02 : f32
        %27 = vector.broadcast %cst_16 : f32 to vector<1x128xf32>
        %28 = arith.divf %26, %27 : vector<1x128xf32>
        %29 = arith.mulf %25, %25 : vector<1x128xf32>
        %30 = arith.subf %28, %29 : vector<1x128xf32>
        %cst_17 = arith.constant 0.000000e+00 : f32
        %31 = vector.broadcast %cst_17 : f32 to vector<1x128xf32>
        %32 = arith.maximumf %30, %31 : vector<1x128xf32>
        %c0_18 = arith.constant 0 : index
        %c0_19 = arith.constant 0 : index
        %33 = vector.load %arg4[%c0_18, %c0_19] : memref<1x128xf32, #tpu.memory_space<vmem>>, vector<1x128xf32>
        %cst_20 = arith.constant 9.99999974E-6 : f32
        %34 = vector.broadcast %cst_20 : f32 to vector<1x128xf32>
        %35 = arith.addf %32, %34 : vector<1x128xf32>
        %36 = math.rsqrt %35 : vector<1x128xf32>
        %37 = arith.mulf %33, %36 : vector<1x128xf32>
        %c0_21 = arith.constant 0 : index
        %c0_22 = arith.constant 0 : index
        %38 = vector.load %arg10[%c0_21, %c0_22] : memref<1x128xf32, #tpu.memory_space<vmem>>, vector<1x128xf32>
        tpu.vector_store %arg10[%c0_21, %c0_22], %37 {strides = array<i32>} : memref<1x128xf32, #tpu.memory_space<vmem>>, vector<1x128xf32>,
        %c0_23 = arith.constant 0 : index
        %c0_24 = arith.constant 0 : index
        %39 = vector.load %arg5[%c0_23, %c0_24] : memref<1x128xf32, #tpu.memory_space<vmem>>, vector<1x128xf32>
        %40 = arith.mulf %25, %37 : vector<1x128xf32>
        %41 = arith.subf %39, %40 : vector<1x128xf32>
        %c0_25 = arith.constant 0 : index
        %c0_26 = arith.constant 0 : index
        %42 = vector.load %arg11[%c0_25, %c0_26] : memref<1x128xf32, #tpu.memory_space<vmem>>, vector<1x128xf32>
        tpu.vector_store %arg11[%c0_25, %c0_26], %41 {strides = array<i32>} : memref<1x128xf32, #tpu.memory_space<vmem>>, vector<1x128xf32>,
      } else {
      }
      %9 = arith.index_cast %arg1 : i32 to index
      %c0 = arith.constant 0 : index
      %c0_4 = arith.constant 0 : index
      %10 = vector.load %arg7[%9, %c0, %c0_4] : memref<1x512x128xbf16, #tpu.memory_space<vmem>>, vector<1x512x128xbf16>
      %11 = vector.shape_cast %10 : vector<1x512x128xbf16> to vector<512x128xbf16>
      %12 = arith.extf %11 : vector<512x128xbf16> to vector<512x128xf32>
      %c0_5 = arith.constant 0 : index
      %c0_6 = arith.constant 0 : index
      %13 = vector.load %arg10[%c0_5, %c0_6] : memref<1x128xf32, #tpu.memory_space<vmem>>, vector<1x128xf32>
      %14 = vector.broadcast %13 : vector<1x128xf32> to vector<512x128xf32>
      %15 = arith.mulf %12, %14 : vector<512x128xf32>
      %c0_7 = arith.constant 0 : index
      %c0_8 = arith.constant 0 : index
      %16 = vector.load %arg11[%c0_7, %c0_8] : memref<1x128xf32, #tpu.memory_space<vmem>>, vector<1x128xf32>
      %17 = vector.broadcast %16 : vector<1x128xf32> to vector<512x128xf32>
      %18 = arith.addf %15, %17 : vector<512x128xf32>
      %cst = arith.constant 0.000000e+00 : f32
      %19 = vector.broadcast %cst : f32 to vector<512x128xf32>
      %20 = arith.maximumf %18, %19 : vector<512x128xf32>
      %21 = arith.truncf %20 : vector<512x128xf32> to vector<512x128xbf16>
      %c0_9 = arith.constant 0 : index
      %c0_10 = arith.constant 0 : index
      %22 = vector.load %arg6[%c0_9, %c0_10] : memref<512x128xbf16, #tpu.memory_space<vmem>>, vector<512x128xbf16>
      tpu.vector_store %arg6[%c0_9, %c0_10], %21 {strides = array<i32>} : memref<512x128xbf16, #tpu.memory_space<vmem>>, vector<512x128xbf16>,
    } else {
    }
    return
  }
  func.func @transform_0(%arg0: i32, %arg1: i32) -> (i32, i32) {
    %c1_i32 = arith.constant 1 : i32
    %0 = arith.subi %c1_i32, %arg0 : i32
    %1 = arith.muli %0, %arg1 : i32
    %c0_i32 = arith.constant 0 : i32
    %c0_i32_0 = arith.constant 0 : i32
    return %1, %c0_i32 : i32, i32
  }
  func.func @transform_1(%arg0: i32, %arg1: i32) -> (i32, i32) {
    %c0_i32 = arith.constant 0 : i32
    %c0_i32_0 = arith.constant 0 : i32
    %c0_i32_1 = arith.constant 0 : i32
    return %c0_i32, %c0_i32_0 : i32, i32
  }
  func.func @transform_2(%arg0: i32, %arg1: i32) -> (i32, i32) {
    %c0_i32 = arith.constant 0 : i32
    %c0_i32_0 = arith.constant 0 : i32
    %c0_i32_1 = arith.constant 0 : i32
    return %c0_i32, %c0_i32_0 : i32, i32
  }
  func.func @transform_3(%arg0: i32, %arg1: i32) -> (i32, i32) {
    %c0_i32 = arith.constant 0 : i32
    %c0_i32_0 = arith.constant 0 : i32
    %c0_i32_1 = arith.constant 0 : i32
    return %c0_i32, %c0_i32_0 : i32, i32
  }
  func.func @transform_4(%arg0: i32, %arg1: i32) -> (i32, i32) {
    %0 = arith.muli %arg0, %arg1 : i32
    %c0_i32 = arith.constant 0 : i32
    %c0_i32_0 = arith.constant 0 : i32
    return %0, %c0_i32 : i32, i32
  }
}

module attributes {stable_mosaic.version = 11 : i64} {
  func.func @_fused_conv_bn_kernel(%arg0: i32, %arg1: i32, %arg2: memref<128x72xbf16, #tpu.memory_space<vmem>>, %arg3: memref<72x128xbf16, #tpu.memory_space<vmem>>, %arg4: memref<1x128xf32, #tpu.memory_space<vmem>>, %arg5: memref<1x128xf32, #tpu.memory_space<vmem>>, %arg6: memref<128x128xbf16, #tpu.memory_space<vmem>>, %arg7: memref<1x128x128xbf16, #tpu.memory_space<vmem>>, %arg8: memref<1x128xf32, #tpu.memory_space<vmem>>, %arg9: memref<1x128xf32, #tpu.memory_space<vmem>>, %arg10: memref<1x128xf32, #tpu.memory_space<vmem>>, %arg11: memref<1x128xf32, #tpu.memory_space<vmem>>) attributes {dimension_semantics = [#tpu.dimension_semantics<arbitrary>, #tpu.dimension_semantics<arbitrary>], iteration_bounds = array<i64: 2, 1>, scalar_prefetch = 0 : i64, scratch_operands = 5 : i64, tpu.core_type = #tpu.core_type<tc>, window_params = [{transform_indices = @transform_0, window_bounds = array<i64: 128, 72>}, {pipeline_mode = #tpu.pipeline_mode<synchronous>, transform_indices = @transform_1, window_bounds = array<i64: 72, 128>}, {pipeline_mode = #tpu.pipeline_mode<synchronous>, transform_indices = @transform_2, window_bounds = array<i64: 1, 128>}, {pipeline_mode = #tpu.pipeline_mode<synchronous>, transform_indices = @transform_3, window_bounds = array<i64: 1, 128>}, {transform_indices = @transform_4, window_bounds = array<i64: 128, 128>}]} {
    %c0_i32 = arith.constant 0 : i32
    %0 = arith.cmpi eq, %arg0, %c0_i32 : i32
    %1 = arith.extui %0 : i1 to i32
    %c0_i32_0 = arith.constant 0 : i32
    %2 = arith.cmpi ne, %1, %c0_i32_0 : i32
    scf.if %2 {
      %c0_i32_2 = arith.constant 0 : i32
      %6 = arith.cmpi eq, %arg1, %c0_i32_2 : i32
      %7 = arith.extui %6 : i1 to i32
      %c0_i32_3 = arith.constant 0 : i32
      %8 = arith.cmpi ne, %7, %c0_i32_3 : i32
      scf.if %8 {
        %cst_19 = arith.constant 0.000000e+00 : f32
        %28 = vector.broadcast %cst_19 : f32 to vector<1x128xf32>
        %c0_20 = arith.constant 0 : index
        %c0_21 = arith.constant 0 : index
        %29 = vector.load %arg8[%c0_20, %c0_21] : memref<1x128xf32, #tpu.memory_space<vmem>>, vector<1x128xf32>
        tpu.vector_store %arg8[%c0_20, %c0_21], %28 {strides = array<i32>} : memref<1x128xf32, #tpu.memory_space<vmem>>, vector<1x128xf32>,
        %cst_22 = arith.constant 0.000000e+00 : f32
        %30 = vector.broadcast %cst_22 : f32 to vector<1x128xf32>
        %c0_23 = arith.constant 0 : index
        %c0_24 = arith.constant 0 : index
        %31 = vector.load %arg9[%c0_23, %c0_24] : memref<1x128xf32, #tpu.memory_space<vmem>>, vector<1x128xf32>
        tpu.vector_store %arg9[%c0_23, %c0_24], %30 {strides = array<i32>} : memref<1x128xf32, #tpu.memory_space<vmem>>, vector<1x128xf32>,
      } else {
      }
      %c0 = arith.constant 0 : index
      %c0_4 = arith.constant 0 : index
      %9 = vector.load %arg2[%c0, %c0_4] : memref<128x72xbf16, #tpu.memory_space<vmem>>, vector<128x72xbf16>
      %c0_5 = arith.constant 0 : index
      %c0_6 = arith.constant 0 : index
      %10 = vector.load %arg3[%c0_5, %c0_6] : memref<72x128xbf16, #tpu.memory_space<vmem>>, vector<72x128xbf16>
      %cst = arith.constant dense<0.000000e+00> : vector<128x128xf32>
      %11 = tpu.matmul %9, %10, %cst {dimension_numbers = #tpu.dot_dimension_numbers<[1], [0], [0], [1], [0, 0, 1, 1], [], []>} : vector<128x72xbf16>, vector<72x128xbf16>, vector<128x128xf32> -> vector<128x128xf32>
      %12 = arith.truncf %11 : vector<128x128xf32> to vector<128x128xbf16>
      %13 = arith.index_cast %arg1 : i32 to index
      %c0_7 = arith.constant 0 : index
      %c0_8 = arith.constant 0 : index
      %14 = vector.load %arg7[%13, %c0_7, %c0_8] : memref<1x128x128xbf16, #tpu.memory_space<vmem>>, vector<1x128x128xbf16>
      %15 = vector.shape_cast %14 : vector<1x128x128xbf16> to vector<128x128xbf16>
      %16 = vector.shape_cast %12 : vector<128x128xbf16> to vector<1x128x128xbf16>
      tpu.vector_store %arg7[%13, %c0_7, %c0_8], %16 {strides = array<i32>} : memref<1x128x128xbf16, #tpu.memory_space<vmem>>, vector<1x128x128xbf16>,
      %c0_9 = arith.constant 0 : index
      %c0_10 = arith.constant 0 : index
      %17 = vector.load %arg8[%c0_9, %c0_10] : memref<1x128xf32, #tpu.memory_space<vmem>>, vector<1x128xf32>
      %cst_11 = arith.constant dense<0.000000e+00> : vector<128xf32>
      %18 = vector.multi_reduction <add>, %11, %cst_11 [0] : vector<128x128xf32> to vector<128xf32>
      %19 = vector.shape_cast %18 : vector<128xf32> to vector<1x128xf32>
      %20 = arith.addf %17, %19 : vector<1x128xf32>
      %c0_12 = arith.constant 0 : index
      %c0_13 = arith.constant 0 : index
      %21 = vector.load %arg8[%c0_12, %c0_13] : memref<1x128xf32, #tpu.memory_space<vmem>>, vector<1x128xf32>
      tpu.vector_store %arg8[%c0_12, %c0_13], %20 {strides = array<i32>} : memref<1x128xf32, #tpu.memory_space<vmem>>, vector<1x128xf32>,
      %c0_14 = arith.constant 0 : index
      %c0_15 = arith.constant 0 : index
      %22 = vector.load %arg9[%c0_14, %c0_15] : memref<1x128xf32, #tpu.memory_space<vmem>>, vector<1x128xf32>
      %23 = arith.mulf %11, %11 : vector<128x128xf32>
      %cst_16 = arith.constant dense<0.000000e+00> : vector<128xf32>
      %24 = vector.multi_reduction <add>, %23, %cst_16 [0] : vector<128x128xf32> to vector<128xf32>
      %25 = vector.shape_cast %24 : vector<128xf32> to vector<1x128xf32>
      %26 = arith.addf %22, %25 : vector<1x128xf32>
      %c0_17 = arith.constant 0 : index
      %c0_18 = arith.constant 0 : index
      %27 = vector.load %arg9[%c0_17, %c0_18] : memref<1x128xf32, #tpu.memory_space<vmem>>, vector<1x128xf32>
      tpu.vector_store %arg9[%c0_17, %c0_18], %26 {strides = array<i32>} : memref<1x128xf32, #tpu.memory_space<vmem>>, vector<1x128xf32>,
    } else {
    }
    %c1_i32 = arith.constant 1 : i32
    %3 = arith.cmpi eq, %arg0, %c1_i32 : i32
    %4 = arith.extui %3 : i1 to i32
    %c0_i32_1 = arith.constant 0 : i32
    %5 = arith.cmpi ne, %4, %c0_i32_1 : i32
    scf.if %5 {
      %c0_i32_2 = arith.constant 0 : i32
      %6 = arith.cmpi eq, %arg1, %c0_i32_2 : i32
      %7 = arith.extui %6 : i1 to i32
      %c0_i32_3 = arith.constant 0 : i32
      %8 = arith.cmpi ne, %7, %c0_i32_3 : i32
      scf.if %8 {
        %c0_11 = arith.constant 0 : index
        %c0_12 = arith.constant 0 : index
        %23 = vector.load %arg8[%c0_11, %c0_12] : memref<1x128xf32, #tpu.memory_space<vmem>>, vector<1x128xf32>
        %cst_13 = arith.constant 1.280000e+02 : f32
        %24 = vector.broadcast %cst_13 : f32 to vector<1x128xf32>
        %25 = arith.divf %23, %24 : vector<1x128xf32>
        %c0_14 = arith.constant 0 : index
        %c0_15 = arith.constant 0 : index
        %26 = vector.load %arg9[%c0_14, %c0_15] : memref<1x128xf32, #tpu.memory_space<vmem>>, vector<1x128xf32>
        %cst_16 = arith.constant 1.280000e+02 : f32
        %27 = vector.broadcast %cst_16 : f32 to vector<1x128xf32>
        %28 = arith.divf %26, %27 : vector<1x128xf32>
        %29 = arith.mulf %25, %25 : vector<1x128xf32>
        %30 = arith.subf %28, %29 : vector<1x128xf32>
        %cst_17 = arith.constant 0.000000e+00 : f32
        %31 = vector.broadcast %cst_17 : f32 to vector<1x128xf32>
        %32 = arith.maximumf %30, %31 : vector<1x128xf32>
        %c0_18 = arith.constant 0 : index
        %c0_19 = arith.constant 0 : index
        %33 = vector.load %arg4[%c0_18, %c0_19] : memref<1x128xf32, #tpu.memory_space<vmem>>, vector<1x128xf32>
        %cst_20 = arith.constant 9.99999974E-6 : f32
        %34 = vector.broadcast %cst_20 : f32 to vector<1x128xf32>
        %35 = arith.addf %32, %34 : vector<1x128xf32>
        %36 = math.rsqrt %35 : vector<1x128xf32>
        %37 = arith.mulf %33, %36 : vector<1x128xf32>
        %c0_21 = arith.constant 0 : index
        %c0_22 = arith.constant 0 : index
        %38 = vector.load %arg10[%c0_21, %c0_22] : memref<1x128xf32, #tpu.memory_space<vmem>>, vector<1x128xf32>
        tpu.vector_store %arg10[%c0_21, %c0_22], %37 {strides = array<i32>} : memref<1x128xf32, #tpu.memory_space<vmem>>, vector<1x128xf32>,
        %c0_23 = arith.constant 0 : index
        %c0_24 = arith.constant 0 : index
        %39 = vector.load %arg5[%c0_23, %c0_24] : memref<1x128xf32, #tpu.memory_space<vmem>>, vector<1x128xf32>
        %40 = arith.mulf %25, %37 : vector<1x128xf32>
        %41 = arith.subf %39, %40 : vector<1x128xf32>
        %c0_25 = arith.constant 0 : index
        %c0_26 = arith.constant 0 : index
        %42 = vector.load %arg11[%c0_25, %c0_26] : memref<1x128xf32, #tpu.memory_space<vmem>>, vector<1x128xf32>
        tpu.vector_store %arg11[%c0_25, %c0_26], %41 {strides = array<i32>} : memref<1x128xf32, #tpu.memory_space<vmem>>, vector<1x128xf32>,
      } else {
      }
      %9 = arith.index_cast %arg1 : i32 to index
      %c0 = arith.constant 0 : index
      %c0_4 = arith.constant 0 : index
      %10 = vector.load %arg7[%9, %c0, %c0_4] : memref<1x128x128xbf16, #tpu.memory_space<vmem>>, vector<1x128x128xbf16>
      %11 = vector.shape_cast %10 : vector<1x128x128xbf16> to vector<128x128xbf16>
      %12 = arith.extf %11 : vector<128x128xbf16> to vector<128x128xf32>
      %c0_5 = arith.constant 0 : index
      %c0_6 = arith.constant 0 : index
      %13 = vector.load %arg10[%c0_5, %c0_6] : memref<1x128xf32, #tpu.memory_space<vmem>>, vector<1x128xf32>
      %14 = vector.broadcast %13 : vector<1x128xf32> to vector<128x128xf32>
      %15 = arith.mulf %12, %14 : vector<128x128xf32>
      %c0_7 = arith.constant 0 : index
      %c0_8 = arith.constant 0 : index
      %16 = vector.load %arg11[%c0_7, %c0_8] : memref<1x128xf32, #tpu.memory_space<vmem>>, vector<1x128xf32>
      %17 = vector.broadcast %16 : vector<1x128xf32> to vector<128x128xf32>
      %18 = arith.addf %15, %17 : vector<128x128xf32>
      %cst = arith.constant 0.000000e+00 : f32
      %19 = vector.broadcast %cst : f32 to vector<128x128xf32>
      %20 = arith.maximumf %18, %19 : vector<128x128xf32>
      %21 = arith.truncf %20 : vector<128x128xf32> to vector<128x128xbf16>
      %c0_9 = arith.constant 0 : index
      %c0_10 = arith.constant 0 : index
      %22 = vector.load %arg6[%c0_9, %c0_10] : memref<128x128xbf16, #tpu.memory_space<vmem>>, vector<128x128xbf16>
      tpu.vector_store %arg6[%c0_9, %c0_10], %21 {strides = array<i32>} : memref<128x128xbf16, #tpu.memory_space<vmem>>, vector<128x128xbf16>,
    } else {
    }
    return
  }
  func.func @transform_0(%arg0: i32, %arg1: i32) -> (i32, i32) {
    %c1_i32 = arith.constant 1 : i32
    %0 = arith.subi %c1_i32, %arg0 : i32
    %1 = arith.muli %0, %arg1 : i32
    %c0_i32 = arith.constant 0 : i32
    %c0_i32_0 = arith.constant 0 : i32
    return %1, %c0_i32 : i32, i32
  }
  func.func @transform_1(%arg0: i32, %arg1: i32) -> (i32, i32) {
    %c0_i32 = arith.constant 0 : i32
    %c0_i32_0 = arith.constant 0 : i32
    %c0_i32_1 = arith.constant 0 : i32
    return %c0_i32, %c0_i32_0 : i32, i32
  }
  func.func @transform_2(%arg0: i32, %arg1: i32) -> (i32, i32) {
    %c0_i32 = arith.constant 0 : i32
    %c0_i32_0 = arith.constant 0 : i32
    %c0_i32_1 = arith.constant 0 : i32
    return %c0_i32, %c0_i32_0 : i32, i32
  }
  func.func @transform_3(%arg0: i32, %arg1: i32) -> (i32, i32) {
    %c0_i32 = arith.constant 0 : i32
    %c0_i32_0 = arith.constant 0 : i32
    %c0_i32_1 = arith.constant 0 : i32
    return %c0_i32, %c0_i32_0 : i32, i32
  }
  func.func @transform_4(%arg0: i32, %arg1: i32) -> (i32, i32) {
    %0 = arith.muli %arg0, %arg1 : i32
    %c0_i32 = arith.constant 0 : i32
    %c0_i32_0 = arith.constant 0 : i32
    return %0, %c0_i32 : i32, i32
  }
}

module attributes {stable_mosaic.version = 11 : i64} {
  func.func @_fused_conv_bn_kernel(%arg0: i32, %arg1: i32, %arg2: memref<32x144xbf16, #tpu.memory_space<vmem>>, %arg3: memref<144x128xbf16, #tpu.memory_space<vmem>>, %arg4: memref<1x128xf32, #tpu.memory_space<vmem>>, %arg5: memref<1x128xf32, #tpu.memory_space<vmem>>, %arg6: memref<32x128xbf16, #tpu.memory_space<vmem>>, %arg7: memref<1x32x128xbf16, #tpu.memory_space<vmem>>, %arg8: memref<1x128xf32, #tpu.memory_space<vmem>>, %arg9: memref<1x128xf32, #tpu.memory_space<vmem>>, %arg10: memref<1x128xf32, #tpu.memory_space<vmem>>, %arg11: memref<1x128xf32, #tpu.memory_space<vmem>>) attributes {dimension_semantics = [#tpu.dimension_semantics<arbitrary>, #tpu.dimension_semantics<arbitrary>], iteration_bounds = array<i64: 2, 1>, scalar_prefetch = 0 : i64, scratch_operands = 5 : i64, tpu.core_type = #tpu.core_type<tc>, window_params = [{transform_indices = @transform_0, window_bounds = array<i64: 32, 144>}, {pipeline_mode = #tpu.pipeline_mode<synchronous>, transform_indices = @transform_1, window_bounds = array<i64: 144, 128>}, {pipeline_mode = #tpu.pipeline_mode<synchronous>, transform_indices = @transform_2, window_bounds = array<i64: 1, 128>}, {pipeline_mode = #tpu.pipeline_mode<synchronous>, transform_indices = @transform_3, window_bounds = array<i64: 1, 128>}, {transform_indices = @transform_4, window_bounds = array<i64: 32, 128>}]} {
    %c0_i32 = arith.constant 0 : i32
    %0 = arith.cmpi eq, %arg0, %c0_i32 : i32
    %1 = arith.extui %0 : i1 to i32
    %c0_i32_0 = arith.constant 0 : i32
    %2 = arith.cmpi ne, %1, %c0_i32_0 : i32
    scf.if %2 {
      %c0_i32_2 = arith.constant 0 : i32
      %6 = arith.cmpi eq, %arg1, %c0_i32_2 : i32
      %7 = arith.extui %6 : i1 to i32
      %c0_i32_3 = arith.constant 0 : i32
      %8 = arith.cmpi ne, %7, %c0_i32_3 : i32
      scf.if %8 {
        %cst_19 = arith.constant 0.000000e+00 : f32
        %28 = vector.broadcast %cst_19 : f32 to vector<1x128xf32>
        %c0_20 = arith.constant 0 : index
        %c0_21 = arith.constant 0 : index
        %29 = vector.load %arg8[%c0_20, %c0_21] : memref<1x128xf32, #tpu.memory_space<vmem>>, vector<1x128xf32>
        tpu.vector_store %arg8[%c0_20, %c0_21], %28 {strides = array<i32>} : memref<1x128xf32, #tpu.memory_space<vmem>>, vector<1x128xf32>,
        %cst_22 = arith.constant 0.000000e+00 : f32
        %30 = vector.broadcast %cst_22 : f32 to vector<1x128xf32>
        %c0_23 = arith.constant 0 : index
        %c0_24 = arith.constant 0 : index
        %31 = vector.load %arg9[%c0_23, %c0_24] : memref<1x128xf32, #tpu.memory_space<vmem>>, vector<1x128xf32>
        tpu.vector_store %arg9[%c0_23, %c0_24], %30 {strides = array<i32>} : memref<1x128xf32, #tpu.memory_space<vmem>>, vector<1x128xf32>,
      } else {
      }
      %c0 = arith.constant 0 : index
      %c0_4 = arith.constant 0 : index
      %9 = vector.load %arg2[%c0, %c0_4] : memref<32x144xbf16, #tpu.memory_space<vmem>>, vector<32x144xbf16>
      %c0_5 = arith.constant 0 : index
      %c0_6 = arith.constant 0 : index
      %10 = vector.load %arg3[%c0_5, %c0_6] : memref<144x128xbf16, #tpu.memory_space<vmem>>, vector<144x128xbf16>
      %cst = arith.constant dense<0.000000e+00> : vector<32x128xf32>
      %11 = tpu.matmul %9, %10, %cst {dimension_numbers = #tpu.dot_dimension_numbers<[1], [0], [0], [1], [0, 0, 1, 1], [], []>} : vector<32x144xbf16>, vector<144x128xbf16>, vector<32x128xf32> -> vector<32x128xf32>
      %12 = arith.truncf %11 : vector<32x128xf32> to vector<32x128xbf16>
      %13 = arith.index_cast %arg1 : i32 to index
      %c0_7 = arith.constant 0 : index
      %c0_8 = arith.constant 0 : index
      %14 = vector.load %arg7[%13, %c0_7, %c0_8] : memref<1x32x128xbf16, #tpu.memory_space<vmem>>, vector<1x32x128xbf16>
      %15 = vector.shape_cast %14 : vector<1x32x128xbf16> to vector<32x128xbf16>
      %16 = vector.shape_cast %12 : vector<32x128xbf16> to vector<1x32x128xbf16>
      tpu.vector_store %arg7[%13, %c0_7, %c0_8], %16 {strides = array<i32>} : memref<1x32x128xbf16, #tpu.memory_space<vmem>>, vector<1x32x128xbf16>,
      %c0_9 = arith.constant 0 : index
      %c0_10 = arith.constant 0 : index
      %17 = vector.load %arg8[%c0_9, %c0_10] : memref<1x128xf32, #tpu.memory_space<vmem>>, vector<1x128xf32>
      %cst_11 = arith.constant dense<0.000000e+00> : vector<128xf32>
      %18 = vector.multi_reduction <add>, %11, %cst_11 [0] : vector<32x128xf32> to vector<128xf32>
      %19 = vector.shape_cast %18 : vector<128xf32> to vector<1x128xf32>
      %20 = arith.addf %17, %19 : vector<1x128xf32>
      %c0_12 = arith.constant 0 : index
      %c0_13 = arith.constant 0 : index
      %21 = vector.load %arg8[%c0_12, %c0_13] : memref<1x128xf32, #tpu.memory_space<vmem>>, vector<1x128xf32>
      tpu.vector_store %arg8[%c0_12, %c0_13], %20 {strides = array<i32>} : memref<1x128xf32, #tpu.memory_space<vmem>>, vector<1x128xf32>,
      %c0_14 = arith.constant 0 : index
      %c0_15 = arith.constant 0 : index
      %22 = vector.load %arg9[%c0_14, %c0_15] : memref<1x128xf32, #tpu.memory_space<vmem>>, vector<1x128xf32>
      %23 = arith.mulf %11, %11 : vector<32x128xf32>
      %cst_16 = arith.constant dense<0.000000e+00> : vector<128xf32>
      %24 = vector.multi_reduction <add>, %23, %cst_16 [0] : vector<32x128xf32> to vector<128xf32>
      %25 = vector.shape_cast %24 : vector<128xf32> to vector<1x128xf32>
      %26 = arith.addf %22, %25 : vector<1x128xf32>
      %c0_17 = arith.constant 0 : index
      %c0_18 = arith.constant 0 : index
      %27 = vector.load %arg9[%c0_17, %c0_18] : memref<1x128xf32, #tpu.memory_space<vmem>>, vector<1x128xf32>
      tpu.vector_store %arg9[%c0_17, %c0_18], %26 {strides = array<i32>} : memref<1x128xf32, #tpu.memory_space<vmem>>, vector<1x128xf32>,
    } else {
    }
    %c1_i32 = arith.constant 1 : i32
    %3 = arith.cmpi eq, %arg0, %c1_i32 : i32
    %4 = arith.extui %3 : i1 to i32
    %c0_i32_1 = arith.constant 0 : i32
    %5 = arith.cmpi ne, %4, %c0_i32_1 : i32
    scf.if %5 {
      %c0_i32_2 = arith.constant 0 : i32
      %6 = arith.cmpi eq, %arg1, %c0_i32_2 : i32
      %7 = arith.extui %6 : i1 to i32
      %c0_i32_3 = arith.constant 0 : i32
      %8 = arith.cmpi ne, %7, %c0_i32_3 : i32
      scf.if %8 {
        %c0_11 = arith.constant 0 : index
        %c0_12 = arith.constant 0 : index
        %23 = vector.load %arg8[%c0_11, %c0_12] : memref<1x128xf32, #tpu.memory_space<vmem>>, vector<1x128xf32>
        %cst_13 = arith.constant 3.200000e+01 : f32
        %24 = vector.broadcast %cst_13 : f32 to vector<1x128xf32>
        %25 = arith.divf %23, %24 : vector<1x128xf32>
        %c0_14 = arith.constant 0 : index
        %c0_15 = arith.constant 0 : index
        %26 = vector.load %arg9[%c0_14, %c0_15] : memref<1x128xf32, #tpu.memory_space<vmem>>, vector<1x128xf32>
        %cst_16 = arith.constant 3.200000e+01 : f32
        %27 = vector.broadcast %cst_16 : f32 to vector<1x128xf32>
        %28 = arith.divf %26, %27 : vector<1x128xf32>
        %29 = arith.mulf %25, %25 : vector<1x128xf32>
        %30 = arith.subf %28, %29 : vector<1x128xf32>
        %cst_17 = arith.constant 0.000000e+00 : f32
        %31 = vector.broadcast %cst_17 : f32 to vector<1x128xf32>
        %32 = arith.maximumf %30, %31 : vector<1x128xf32>
        %c0_18 = arith.constant 0 : index
        %c0_19 = arith.constant 0 : index
        %33 = vector.load %arg4[%c0_18, %c0_19] : memref<1x128xf32, #tpu.memory_space<vmem>>, vector<1x128xf32>
        %cst_20 = arith.constant 9.99999974E-6 : f32
        %34 = vector.broadcast %cst_20 : f32 to vector<1x128xf32>
        %35 = arith.addf %32, %34 : vector<1x128xf32>
        %36 = math.rsqrt %35 : vector<1x128xf32>
        %37 = arith.mulf %33, %36 : vector<1x128xf32>
        %c0_21 = arith.constant 0 : index
        %c0_22 = arith.constant 0 : index
        %38 = vector.load %arg10[%c0_21, %c0_22] : memref<1x128xf32, #tpu.memory_space<vmem>>, vector<1x128xf32>
        tpu.vector_store %arg10[%c0_21, %c0_22], %37 {strides = array<i32>} : memref<1x128xf32, #tpu.memory_space<vmem>>, vector<1x128xf32>,
        %c0_23 = arith.constant 0 : index
        %c0_24 = arith.constant 0 : index
        %39 = vector.load %arg5[%c0_23, %c0_24] : memref<1x128xf32, #tpu.memory_space<vmem>>, vector<1x128xf32>
        %40 = arith.mulf %25, %37 : vector<1x128xf32>
        %41 = arith.subf %39, %40 : vector<1x128xf32>
        %c0_25 = arith.constant 0 : index
        %c0_26 = arith.constant 0 : index
        %42 = vector.load %arg11[%c0_25, %c0_26] : memref<1x128xf32, #tpu.memory_space<vmem>>, vector<1x128xf32>
        tpu.vector_store %arg11[%c0_25, %c0_26], %41 {strides = array<i32>} : memref<1x128xf32, #tpu.memory_space<vmem>>, vector<1x128xf32>,
      } else {
      }
      %9 = arith.index_cast %arg1 : i32 to index
      %c0 = arith.constant 0 : index
      %c0_4 = arith.constant 0 : index
      %10 = vector.load %arg7[%9, %c0, %c0_4] : memref<1x32x128xbf16, #tpu.memory_space<vmem>>, vector<1x32x128xbf16>
      %11 = vector.shape_cast %10 : vector<1x32x128xbf16> to vector<32x128xbf16>
      %12 = arith.extf %11 : vector<32x128xbf16> to vector<32x128xf32>
      %c0_5 = arith.constant 0 : index
      %c0_6 = arith.constant 0 : index
      %13 = vector.load %arg10[%c0_5, %c0_6] : memref<1x128xf32, #tpu.memory_space<vmem>>, vector<1x128xf32>
      %14 = vector.broadcast %13 : vector<1x128xf32> to vector<32x128xf32>
      %15 = arith.mulf %12, %14 : vector<32x128xf32>
      %c0_7 = arith.constant 0 : index
      %c0_8 = arith.constant 0 : index
      %16 = vector.load %arg11[%c0_7, %c0_8] : memref<1x128xf32, #tpu.memory_space<vmem>>, vector<1x128xf32>
      %17 = vector.broadcast %16 : vector<1x128xf32> to vector<32x128xf32>
      %18 = arith.addf %15, %17 : vector<32x128xf32>
      %cst = arith.constant 0.000000e+00 : f32
      %19 = vector.broadcast %cst : f32 to vector<32x128xf32>
      %20 = arith.maximumf %18, %19 : vector<32x128xf32>
      %21 = arith.truncf %20 : vector<32x128xf32> to vector<32x128xbf16>
      %c0_9 = arith.constant 0 : index
      %c0_10 = arith.constant 0 : index
      %22 = vector.load %arg6[%c0_9, %c0_10] : memref<32x128xbf16, #tpu.memory_space<vmem>>, vector<32x128xbf16>
      tpu.vector_store %arg6[%c0_9, %c0_10], %21 {strides = array<i32>} : memref<32x128xbf16, #tpu.memory_space<vmem>>, vector<32x128xbf16>,
    } else {
    }
    return
  }
  func.func @transform_0(%arg0: i32, %arg1: i32) -> (i32, i32) {
    %c1_i32 = arith.constant 1 : i32
    %0 = arith.subi %c1_i32, %arg0 : i32
    %1 = arith.muli %0, %arg1 : i32
    %c0_i32 = arith.constant 0 : i32
    %c0_i32_0 = arith.constant 0 : i32
    return %1, %c0_i32 : i32, i32
  }
  func.func @transform_1(%arg0: i32, %arg1: i32) -> (i32, i32) {
    %c0_i32 = arith.constant 0 : i32
    %c0_i32_0 = arith.constant 0 : i32
    %c0_i32_1 = arith.constant 0 : i32
    return %c0_i32, %c0_i32_0 : i32, i32
  }
  func.func @transform_2(%arg0: i32, %arg1: i32) -> (i32, i32) {
    %c0_i32 = arith.constant 0 : i32
    %c0_i32_0 = arith.constant 0 : i32
    %c0_i32_1 = arith.constant 0 : i32
    return %c0_i32, %c0_i32_0 : i32, i32
  }
  func.func @transform_3(%arg0: i32, %arg1: i32) -> (i32, i32) {
    %c0_i32 = arith.constant 0 : i32
    %c0_i32_0 = arith.constant 0 : i32
    %c0_i32_1 = arith.constant 0 : i32
    return %c0_i32, %c0_i32_0 : i32, i32
  }
  func.func @transform_4(%arg0: i32, %arg1: i32) -> (i32, i32) {
    %0 = arith.muli %arg0, %arg1 : i32
    %c0_i32 = arith.constant 0 : i32
    %c0_i32_0 = arith.constant 0 : i32
    return %0, %c0_i32 : i32, i32
  }
}

module attributes {stable_mosaic.version = 11 : i64} {
  func.func @_fused_conv_bn_kernel(%arg0: i32, %arg1: i32, %arg2: memref<32x288xbf16, #tpu.memory_space<vmem>>, %arg3: memref<288x128xbf16, #tpu.memory_space<vmem>>, %arg4: memref<1x128xf32, #tpu.memory_space<vmem>>, %arg5: memref<1x128xf32, #tpu.memory_space<vmem>>, %arg6: memref<32x128xbf16, #tpu.memory_space<vmem>>, %arg7: memref<1x32x128xbf16, #tpu.memory_space<vmem>>, %arg8: memref<1x128xf32, #tpu.memory_space<vmem>>, %arg9: memref<1x128xf32, #tpu.memory_space<vmem>>, %arg10: memref<1x128xf32, #tpu.memory_space<vmem>>, %arg11: memref<1x128xf32, #tpu.memory_space<vmem>>) attributes {dimension_semantics = [#tpu.dimension_semantics<arbitrary>, #tpu.dimension_semantics<arbitrary>], iteration_bounds = array<i64: 2, 1>, scalar_prefetch = 0 : i64, scratch_operands = 5 : i64, tpu.core_type = #tpu.core_type<tc>, window_params = [{transform_indices = @transform_0, window_bounds = array<i64: 32, 288>}, {pipeline_mode = #tpu.pipeline_mode<synchronous>, transform_indices = @transform_1, window_bounds = array<i64: 288, 128>}, {pipeline_mode = #tpu.pipeline_mode<synchronous>, transform_indices = @transform_2, window_bounds = array<i64: 1, 128>}, {pipeline_mode = #tpu.pipeline_mode<synchronous>, transform_indices = @transform_3, window_bounds = array<i64: 1, 128>}, {transform_indices = @transform_4, window_bounds = array<i64: 32, 128>}]} {
    %c0_i32 = arith.constant 0 : i32
    %0 = arith.cmpi eq, %arg0, %c0_i32 : i32
    %1 = arith.extui %0 : i1 to i32
    %c0_i32_0 = arith.constant 0 : i32
    %2 = arith.cmpi ne, %1, %c0_i32_0 : i32
    scf.if %2 {
      %c0_i32_2 = arith.constant 0 : i32
      %6 = arith.cmpi eq, %arg1, %c0_i32_2 : i32
      %7 = arith.extui %6 : i1 to i32
      %c0_i32_3 = arith.constant 0 : i32
      %8 = arith.cmpi ne, %7, %c0_i32_3 : i32
      scf.if %8 {
        %cst_19 = arith.constant 0.000000e+00 : f32
        %28 = vector.broadcast %cst_19 : f32 to vector<1x128xf32>
        %c0_20 = arith.constant 0 : index
        %c0_21 = arith.constant 0 : index
        %29 = vector.load %arg8[%c0_20, %c0_21] : memref<1x128xf32, #tpu.memory_space<vmem>>, vector<1x128xf32>
        tpu.vector_store %arg8[%c0_20, %c0_21], %28 {strides = array<i32>} : memref<1x128xf32, #tpu.memory_space<vmem>>, vector<1x128xf32>,
        %cst_22 = arith.constant 0.000000e+00 : f32
        %30 = vector.broadcast %cst_22 : f32 to vector<1x128xf32>
        %c0_23 = arith.constant 0 : index
        %c0_24 = arith.constant 0 : index
        %31 = vector.load %arg9[%c0_23, %c0_24] : memref<1x128xf32, #tpu.memory_space<vmem>>, vector<1x128xf32>
        tpu.vector_store %arg9[%c0_23, %c0_24], %30 {strides = array<i32>} : memref<1x128xf32, #tpu.memory_space<vmem>>, vector<1x128xf32>,
      } else {
      }
      %c0 = arith.constant 0 : index
      %c0_4 = arith.constant 0 : index
      %9 = vector.load %arg2[%c0, %c0_4] : memref<32x288xbf16, #tpu.memory_space<vmem>>, vector<32x288xbf16>
      %c0_5 = arith.constant 0 : index
      %c0_6 = arith.constant 0 : index
      %10 = vector.load %arg3[%c0_5, %c0_6] : memref<288x128xbf16, #tpu.memory_space<vmem>>, vector<288x128xbf16>
      %cst = arith.constant dense<0.000000e+00> : vector<32x128xf32>
      %11 = tpu.matmul %9, %10, %cst {dimension_numbers = #tpu.dot_dimension_numbers<[1], [0], [0], [1], [0, 0, 1, 1], [], []>} : vector<32x288xbf16>, vector<288x128xbf16>, vector<32x128xf32> -> vector<32x128xf32>
      %12 = arith.truncf %11 : vector<32x128xf32> to vector<32x128xbf16>
      %13 = arith.index_cast %arg1 : i32 to index
      %c0_7 = arith.constant 0 : index
      %c0_8 = arith.constant 0 : index
      %14 = vector.load %arg7[%13, %c0_7, %c0_8] : memref<1x32x128xbf16, #tpu.memory_space<vmem>>, vector<1x32x128xbf16>
      %15 = vector.shape_cast %14 : vector<1x32x128xbf16> to vector<32x128xbf16>
      %16 = vector.shape_cast %12 : vector<32x128xbf16> to vector<1x32x128xbf16>
      tpu.vector_store %arg7[%13, %c0_7, %c0_8], %16 {strides = array<i32>} : memref<1x32x128xbf16, #tpu.memory_space<vmem>>, vector<1x32x128xbf16>,
      %c0_9 = arith.constant 0 : index
      %c0_10 = arith.constant 0 : index
      %17 = vector.load %arg8[%c0_9, %c0_10] : memref<1x128xf32, #tpu.memory_space<vmem>>, vector<1x128xf32>
      %cst_11 = arith.constant dense<0.000000e+00> : vector<128xf32>
      %18 = vector.multi_reduction <add>, %11, %cst_11 [0] : vector<32x128xf32> to vector<128xf32>
      %19 = vector.shape_cast %18 : vector<128xf32> to vector<1x128xf32>
      %20 = arith.addf %17, %19 : vector<1x128xf32>
      %c0_12 = arith.constant 0 : index
      %c0_13 = arith.constant 0 : index
      %21 = vector.load %arg8[%c0_12, %c0_13] : memref<1x128xf32, #tpu.memory_space<vmem>>, vector<1x128xf32>
      tpu.vector_store %arg8[%c0_12, %c0_13], %20 {strides = array<i32>} : memref<1x128xf32, #tpu.memory_space<vmem>>, vector<1x128xf32>,
      %c0_14 = arith.constant 0 : index
      %c0_15 = arith.constant 0 : index
      %22 = vector.load %arg9[%c0_14, %c0_15] : memref<1x128xf32, #tpu.memory_space<vmem>>, vector<1x128xf32>
      %23 = arith.mulf %11, %11 : vector<32x128xf32>
      %cst_16 = arith.constant dense<0.000000e+00> : vector<128xf32>
      %24 = vector.multi_reduction <add>, %23, %cst_16 [0] : vector<32x128xf32> to vector<128xf32>
      %25 = vector.shape_cast %24 : vector<128xf32> to vector<1x128xf32>
      %26 = arith.addf %22, %25 : vector<1x128xf32>
      %c0_17 = arith.constant 0 : index
      %c0_18 = arith.constant 0 : index
      %27 = vector.load %arg9[%c0_17, %c0_18] : memref<1x128xf32, #tpu.memory_space<vmem>>, vector<1x128xf32>
      tpu.vector_store %arg9[%c0_17, %c0_18], %26 {strides = array<i32>} : memref<1x128xf32, #tpu.memory_space<vmem>>, vector<1x128xf32>,
    } else {
    }
    %c1_i32 = arith.constant 1 : i32
    %3 = arith.cmpi eq, %arg0, %c1_i32 : i32
    %4 = arith.extui %3 : i1 to i32
    %c0_i32_1 = arith.constant 0 : i32
    %5 = arith.cmpi ne, %4, %c0_i32_1 : i32
    scf.if %5 {
      %c0_i32_2 = arith.constant 0 : i32
      %6 = arith.cmpi eq, %arg1, %c0_i32_2 : i32
      %7 = arith.extui %6 : i1 to i32
      %c0_i32_3 = arith.constant 0 : i32
      %8 = arith.cmpi ne, %7, %c0_i32_3 : i32
      scf.if %8 {
        %c0_11 = arith.constant 0 : index
        %c0_12 = arith.constant 0 : index
        %23 = vector.load %arg8[%c0_11, %c0_12] : memref<1x128xf32, #tpu.memory_space<vmem>>, vector<1x128xf32>
        %cst_13 = arith.constant 3.200000e+01 : f32
        %24 = vector.broadcast %cst_13 : f32 to vector<1x128xf32>
        %25 = arith.divf %23, %24 : vector<1x128xf32>
        %c0_14 = arith.constant 0 : index
        %c0_15 = arith.constant 0 : index
        %26 = vector.load %arg9[%c0_14, %c0_15] : memref<1x128xf32, #tpu.memory_space<vmem>>, vector<1x128xf32>
        %cst_16 = arith.constant 3.200000e+01 : f32
        %27 = vector.broadcast %cst_16 : f32 to vector<1x128xf32>
        %28 = arith.divf %26, %27 : vector<1x128xf32>
        %29 = arith.mulf %25, %25 : vector<1x128xf32>
        %30 = arith.subf %28, %29 : vector<1x128xf32>
        %cst_17 = arith.constant 0.000000e+00 : f32
        %31 = vector.broadcast %cst_17 : f32 to vector<1x128xf32>
        %32 = arith.maximumf %30, %31 : vector<1x128xf32>
        %c0_18 = arith.constant 0 : index
        %c0_19 = arith.constant 0 : index
        %33 = vector.load %arg4[%c0_18, %c0_19] : memref<1x128xf32, #tpu.memory_space<vmem>>, vector<1x128xf32>
        %cst_20 = arith.constant 9.99999974E-6 : f32
        %34 = vector.broadcast %cst_20 : f32 to vector<1x128xf32>
        %35 = arith.addf %32, %34 : vector<1x128xf32>
        %36 = math.rsqrt %35 : vector<1x128xf32>
        %37 = arith.mulf %33, %36 : vector<1x128xf32>
        %c0_21 = arith.constant 0 : index
        %c0_22 = arith.constant 0 : index
        %38 = vector.load %arg10[%c0_21, %c0_22] : memref<1x128xf32, #tpu.memory_space<vmem>>, vector<1x128xf32>
        tpu.vector_store %arg10[%c0_21, %c0_22], %37 {strides = array<i32>} : memref<1x128xf32, #tpu.memory_space<vmem>>, vector<1x128xf32>,
        %c0_23 = arith.constant 0 : index
        %c0_24 = arith.constant 0 : index
        %39 = vector.load %arg5[%c0_23, %c0_24] : memref<1x128xf32, #tpu.memory_space<vmem>>, vector<1x128xf32>
        %40 = arith.mulf %25, %37 : vector<1x128xf32>
        %41 = arith.subf %39, %40 : vector<1x128xf32>
        %c0_25 = arith.constant 0 : index
        %c0_26 = arith.constant 0 : index
        %42 = vector.load %arg11[%c0_25, %c0_26] : memref<1x128xf32, #tpu.memory_space<vmem>>, vector<1x128xf32>
        tpu.vector_store %arg11[%c0_25, %c0_26], %41 {strides = array<i32>} : memref<1x128xf32, #tpu.memory_space<vmem>>, vector<1x128xf32>,
      } else {
      }
      %9 = arith.index_cast %arg1 : i32 to index
      %c0 = arith.constant 0 : index
      %c0_4 = arith.constant 0 : index
      %10 = vector.load %arg7[%9, %c0, %c0_4] : memref<1x32x128xbf16, #tpu.memory_space<vmem>>, vector<1x32x128xbf16>
      %11 = vector.shape_cast %10 : vector<1x32x128xbf16> to vector<32x128xbf16>
      %12 = arith.extf %11 : vector<32x128xbf16> to vector<32x128xf32>
      %c0_5 = arith.constant 0 : index
      %c0_6 = arith.constant 0 : index
      %13 = vector.load %arg10[%c0_5, %c0_6] : memref<1x128xf32, #tpu.memory_space<vmem>>, vector<1x128xf32>
      %14 = vector.broadcast %13 : vector<1x128xf32> to vector<32x128xf32>
      %15 = arith.mulf %12, %14 : vector<32x128xf32>
      %c0_7 = arith.constant 0 : index
      %c0_8 = arith.constant 0 : index
      %16 = vector.load %arg11[%c0_7, %c0_8] : memref<1x128xf32, #tpu.memory_space<vmem>>, vector<1x128xf32>
      %17 = vector.broadcast %16 : vector<1x128xf32> to vector<32x128xf32>
      %18 = arith.addf %15, %17 : vector<32x128xf32>
      %cst = arith.constant 0.000000e+00 : f32
      %19 = vector.broadcast %cst : f32 to vector<32x128xf32>
      %20 = arith.maximumf %18, %19 : vector<32x128xf32>
      %21 = arith.truncf %20 : vector<32x128xf32> to vector<32x128xbf16>
      %c0_9 = arith.constant 0 : index
      %c0_10 = arith.constant 0 : index
      %22 = vector.load %arg6[%c0_9, %c0_10] : memref<32x128xbf16, #tpu.memory_space<vmem>>, vector<32x128xbf16>
      tpu.vector_store %arg6[%c0_9, %c0_10], %21 {strides = array<i32>} : memref<32x128xbf16, #tpu.memory_space<vmem>>, vector<32x128xbf16>,
    } else {
    }
    return
  }
  func.func @transform_0(%arg0: i32, %arg1: i32) -> (i32, i32) {
    %c1_i32 = arith.constant 1 : i32
    %0 = arith.subi %c1_i32, %arg0 : i32
    %1 = arith.muli %0, %arg1 : i32
    %c0_i32 = arith.constant 0 : i32
    %c0_i32_0 = arith.constant 0 : i32
    return %1, %c0_i32 : i32, i32
  }
  func.func @transform_1(%arg0: i32, %arg1: i32) -> (i32, i32) {
    %c0_i32 = arith.constant 0 : i32
    %c0_i32_0 = arith.constant 0 : i32
    %c0_i32_1 = arith.constant 0 : i32
    return %c0_i32, %c0_i32_0 : i32, i32
  }
  func.func @transform_2(%arg0: i32, %arg1: i32) -> (i32, i32) {
    %c0_i32 = arith.constant 0 : i32
    %c0_i32_0 = arith.constant 0 : i32
    %c0_i32_1 = arith.constant 0 : i32
    return %c0_i32, %c0_i32_0 : i32, i32
  }
  func.func @transform_3(%arg0: i32, %arg1: i32) -> (i32, i32) {
    %c0_i32 = arith.constant 0 : i32
    %c0_i32_0 = arith.constant 0 : i32
    %c0_i32_1 = arith.constant 0 : i32
    return %c0_i32, %c0_i32_0 : i32, i32
  }
  func.func @transform_4(%arg0: i32, %arg1: i32) -> (i32, i32) {
    %0 = arith.muli %arg0, %arg1 : i32
    %c0_i32 = arith.constant 0 : i32
    %c0_i32_0 = arith.constant 0 : i32
    return %0, %c0_i32 : i32, i32
  }
}

module attributes {stable_mosaic.version = 11 : i64} {
  func.func @_fused_conv_bn_add_kernel(%arg0: i32, %arg1: i32, %arg2: memref<32x288xbf16, #tpu.memory_space<vmem>>, %arg3: memref<288x128xbf16, #tpu.memory_space<vmem>>, %arg4: memref<1x128xf32, #tpu.memory_space<vmem>>, %arg5: memref<1x128xf32, #tpu.memory_space<vmem>>, %arg6: memref<32x128xbf16, #tpu.memory_space<vmem>>, %arg7: memref<32x128xbf16, #tpu.memory_space<vmem>>, %arg8: memref<1x32x128xbf16, #tpu.memory_space<vmem>>, %arg9: memref<1x128xf32, #tpu.memory_space<vmem>>, %arg10: memref<1x128xf32, #tpu.memory_space<vmem>>, %arg11: memref<1x128xf32, #tpu.memory_space<vmem>>, %arg12: memref<1x128xf32, #tpu.memory_space<vmem>>) attributes {dimension_semantics = [#tpu.dimension_semantics<arbitrary>, #tpu.dimension_semantics<arbitrary>], iteration_bounds = array<i64: 2, 1>, scalar_prefetch = 0 : i64, scratch_operands = 5 : i64, tpu.core_type = #tpu.core_type<tc>, window_params = [{transform_indices = @transform_0, window_bounds = array<i64: 32, 288>}, {pipeline_mode = #tpu.pipeline_mode<synchronous>, transform_indices = @transform_1, window_bounds = array<i64: 288, 128>}, {pipeline_mode = #tpu.pipeline_mode<synchronous>, transform_indices = @transform_2, window_bounds = array<i64: 1, 128>}, {pipeline_mode = #tpu.pipeline_mode<synchronous>, transform_indices = @transform_3, window_bounds = array<i64: 1, 128>}, {transform_indices = @transform_4, window_bounds = array<i64: 32, 128>}, {transform_indices = @transform_5, window_bounds = array<i64: 32, 128>}]} {
    %c0_i32 = arith.constant 0 : i32
    %0 = arith.cmpi eq, %arg0, %c0_i32 : i32
    %1 = arith.extui %0 : i1 to i32
    %c0_i32_0 = arith.constant 0 : i32
    %2 = arith.cmpi ne, %1, %c0_i32_0 : i32
    scf.if %2 {
      %c0_i32_2 = arith.constant 0 : i32
      %6 = arith.cmpi eq, %arg1, %c0_i32_2 : i32
      %7 = arith.extui %6 : i1 to i32
      %c0_i32_3 = arith.constant 0 : i32
      %8 = arith.cmpi ne, %7, %c0_i32_3 : i32
      scf.if %8 {
        %cst_19 = arith.constant 0.000000e+00 : f32
        %28 = vector.broadcast %cst_19 : f32 to vector<1x128xf32>
        %c0_20 = arith.constant 0 : index
        %c0_21 = arith.constant 0 : index
        %29 = vector.load %arg9[%c0_20, %c0_21] : memref<1x128xf32, #tpu.memory_space<vmem>>, vector<1x128xf32>
        tpu.vector_store %arg9[%c0_20, %c0_21], %28 {strides = array<i32>} : memref<1x128xf32, #tpu.memory_space<vmem>>, vector<1x128xf32>,
        %cst_22 = arith.constant 0.000000e+00 : f32
        %30 = vector.broadcast %cst_22 : f32 to vector<1x128xf32>
        %c0_23 = arith.constant 0 : index
        %c0_24 = arith.constant 0 : index
        %31 = vector.load %arg10[%c0_23, %c0_24] : memref<1x128xf32, #tpu.memory_space<vmem>>, vector<1x128xf32>
        tpu.vector_store %arg10[%c0_23, %c0_24], %30 {strides = array<i32>} : memref<1x128xf32, #tpu.memory_space<vmem>>, vector<1x128xf32>,
      } else {
      }
      %c0 = arith.constant 0 : index
      %c0_4 = arith.constant 0 : index
      %9 = vector.load %arg2[%c0, %c0_4] : memref<32x288xbf16, #tpu.memory_space<vmem>>, vector<32x288xbf16>
      %c0_5 = arith.constant 0 : index
      %c0_6 = arith.constant 0 : index
      %10 = vector.load %arg3[%c0_5, %c0_6] : memref<288x128xbf16, #tpu.memory_space<vmem>>, vector<288x128xbf16>
      %cst = arith.constant dense<0.000000e+00> : vector<32x128xf32>
      %11 = tpu.matmul %9, %10, %cst {dimension_numbers = #tpu.dot_dimension_numbers<[1], [0], [0], [1], [0, 0, 1, 1], [], []>} : vector<32x288xbf16>, vector<288x128xbf16>, vector<32x128xf32> -> vector<32x128xf32>
      %12 = arith.truncf %11 : vector<32x128xf32> to vector<32x128xbf16>
      %13 = arith.index_cast %arg1 : i32 to index
      %c0_7 = arith.constant 0 : index
      %c0_8 = arith.constant 0 : index
      %14 = vector.load %arg8[%13, %c0_7, %c0_8] : memref<1x32x128xbf16, #tpu.memory_space<vmem>>, vector<1x32x128xbf16>
      %15 = vector.shape_cast %14 : vector<1x32x128xbf16> to vector<32x128xbf16>
      %16 = vector.shape_cast %12 : vector<32x128xbf16> to vector<1x32x128xbf16>
      tpu.vector_store %arg8[%13, %c0_7, %c0_8], %16 {strides = array<i32>} : memref<1x32x128xbf16, #tpu.memory_space<vmem>>, vector<1x32x128xbf16>,
      %c0_9 = arith.constant 0 : index
      %c0_10 = arith.constant 0 : index
      %17 = vector.load %arg9[%c0_9, %c0_10] : memref<1x128xf32, #tpu.memory_space<vmem>>, vector<1x128xf32>
      %cst_11 = arith.constant dense<0.000000e+00> : vector<128xf32>
      %18 = vector.multi_reduction <add>, %11, %cst_11 [0] : vector<32x128xf32> to vector<128xf32>
      %19 = vector.shape_cast %18 : vector<128xf32> to vector<1x128xf32>
      %20 = arith.addf %17, %19 : vector<1x128xf32>
      %c0_12 = arith.constant 0 : index
      %c0_13 = arith.constant 0 : index
      %21 = vector.load %arg9[%c0_12, %c0_13] : memref<1x128xf32, #tpu.memory_space<vmem>>, vector<1x128xf32>
      tpu.vector_store %arg9[%c0_12, %c0_13], %20 {strides = array<i32>} : memref<1x128xf32, #tpu.memory_space<vmem>>, vector<1x128xf32>,
      %c0_14 = arith.constant 0 : index
      %c0_15 = arith.constant 0 : index
      %22 = vector.load %arg10[%c0_14, %c0_15] : memref<1x128xf32, #tpu.memory_space<vmem>>, vector<1x128xf32>
      %23 = arith.mulf %11, %11 : vector<32x128xf32>
      %cst_16 = arith.constant dense<0.000000e+00> : vector<128xf32>
      %24 = vector.multi_reduction <add>, %23, %cst_16 [0] : vector<32x128xf32> to vector<128xf32>
      %25 = vector.shape_cast %24 : vector<128xf32> to vector<1x128xf32>
      %26 = arith.addf %22, %25 : vector<1x128xf32>
      %c0_17 = arith.constant 0 : index
      %c0_18 = arith.constant 0 : index
      %27 = vector.load %arg10[%c0_17, %c0_18] : memref<1x128xf32, #tpu.memory_space<vmem>>, vector<1x128xf32>
      tpu.vector_store %arg10[%c0_17, %c0_18], %26 {strides = array<i32>} : memref<1x128xf32, #tpu.memory_space<vmem>>, vector<1x128xf32>,
    } else {
    }
    %c1_i32 = arith.constant 1 : i32
    %3 = arith.cmpi eq, %arg0, %c1_i32 : i32
    %4 = arith.extui %3 : i1 to i32
    %c0_i32_1 = arith.constant 0 : i32
    %5 = arith.cmpi ne, %4, %c0_i32_1 : i32
    scf.if %5 {
      %c0_i32_2 = arith.constant 0 : i32
      %6 = arith.cmpi eq, %arg1, %c0_i32_2 : i32
      %7 = arith.extui %6 : i1 to i32
      %c0_i32_3 = arith.constant 0 : i32
      %8 = arith.cmpi ne, %7, %c0_i32_3 : i32
      scf.if %8 {
        %c0_13 = arith.constant 0 : index
        %c0_14 = arith.constant 0 : index
        %24 = vector.load %arg9[%c0_13, %c0_14] : memref<1x128xf32, #tpu.memory_space<vmem>>, vector<1x128xf32>
        %cst = arith.constant 3.200000e+01 : f32
        %25 = vector.broadcast %cst : f32 to vector<1x128xf32>
        %26 = arith.divf %24, %25 : vector<1x128xf32>
        %c0_15 = arith.constant 0 : index
        %c0_16 = arith.constant 0 : index
        %27 = vector.load %arg10[%c0_15, %c0_16] : memref<1x128xf32, #tpu.memory_space<vmem>>, vector<1x128xf32>
        %cst_17 = arith.constant 3.200000e+01 : f32
        %28 = vector.broadcast %cst_17 : f32 to vector<1x128xf32>
        %29 = arith.divf %27, %28 : vector<1x128xf32>
        %30 = arith.mulf %26, %26 : vector<1x128xf32>
        %31 = arith.subf %29, %30 : vector<1x128xf32>
        %cst_18 = arith.constant 0.000000e+00 : f32
        %32 = vector.broadcast %cst_18 : f32 to vector<1x128xf32>
        %33 = arith.maximumf %31, %32 : vector<1x128xf32>
        %c0_19 = arith.constant 0 : index
        %c0_20 = arith.constant 0 : index
        %34 = vector.load %arg4[%c0_19, %c0_20] : memref<1x128xf32, #tpu.memory_space<vmem>>, vector<1x128xf32>
        %cst_21 = arith.constant 9.99999974E-6 : f32
        %35 = vector.broadcast %cst_21 : f32 to vector<1x128xf32>
        %36 = arith.addf %33, %35 : vector<1x128xf32>
        %37 = math.rsqrt %36 : vector<1x128xf32>
        %38 = arith.mulf %34, %37 : vector<1x128xf32>
        %c0_22 = arith.constant 0 : index
        %c0_23 = arith.constant 0 : index
        %39 = vector.load %arg11[%c0_22, %c0_23] : memref<1x128xf32, #tpu.memory_space<vmem>>, vector<1x128xf32>
        tpu.vector_store %arg11[%c0_22, %c0_23], %38 {strides = array<i32>} : memref<1x128xf32, #tpu.memory_space<vmem>>, vector<1x128xf32>,
        %c0_24 = arith.constant 0 : index
        %c0_25 = arith.constant 0 : index
        %40 = vector.load %arg5[%c0_24, %c0_25] : memref<1x128xf32, #tpu.memory_space<vmem>>, vector<1x128xf32>
        %41 = arith.mulf %26, %38 : vector<1x128xf32>
        %42 = arith.subf %40, %41 : vector<1x128xf32>
        %c0_26 = arith.constant 0 : index
        %c0_27 = arith.constant 0 : index
        %43 = vector.load %arg12[%c0_26, %c0_27] : memref<1x128xf32, #tpu.memory_space<vmem>>, vector<1x128xf32>
        tpu.vector_store %arg12[%c0_26, %c0_27], %42 {strides = array<i32>} : memref<1x128xf32, #tpu.memory_space<vmem>>, vector<1x128xf32>,
      } else {
      }
      %9 = arith.index_cast %arg1 : i32 to index
      %c0 = arith.constant 0 : index
      %c0_4 = arith.constant 0 : index
      %10 = vector.load %arg8[%9, %c0, %c0_4] : memref<1x32x128xbf16, #tpu.memory_space<vmem>>, vector<1x32x128xbf16>
      %11 = vector.shape_cast %10 : vector<1x32x128xbf16> to vector<32x128xbf16>
      %12 = arith.extf %11 : vector<32x128xbf16> to vector<32x128xf32>
      %c0_5 = arith.constant 0 : index
      %c0_6 = arith.constant 0 : index
      %13 = vector.load %arg11[%c0_5, %c0_6] : memref<1x128xf32, #tpu.memory_space<vmem>>, vector<1x128xf32>
      %14 = vector.broadcast %13 : vector<1x128xf32> to vector<32x128xf32>
      %15 = arith.mulf %12, %14 : vector<32x128xf32>
      %c0_7 = arith.constant 0 : index
      %c0_8 = arith.constant 0 : index
      %16 = vector.load %arg12[%c0_7, %c0_8] : memref<1x128xf32, #tpu.memory_space<vmem>>, vector<1x128xf32>
      %17 = vector.broadcast %16 : vector<1x128xf32> to vector<32x128xf32>
      %18 = arith.addf %15, %17 : vector<32x128xf32>
      %c0_9 = arith.constant 0 : index
      %c0_10 = arith.constant 0 : index
      %19 = vector.load %arg6[%c0_9, %c0_10] : memref<32x128xbf16, #tpu.memory_space<vmem>>, vector<32x128xbf16>
      %20 = arith.extf %19 : vector<32x128xbf16> to vector<32x128xf32>
      %21 = arith.addf %18, %20 : vector<32x128xf32>
      %22 = arith.truncf %21 : vector<32x128xf32> to vector<32x128xbf16>
      %c0_11 = arith.constant 0 : index
      %c0_12 = arith.constant 0 : index
      %23 = vector.load %arg7[%c0_11, %c0_12] : memref<32x128xbf16, #tpu.memory_space<vmem>>, vector<32x128xbf16>
      tpu.vector_store %arg7[%c0_11, %c0_12], %22 {strides = array<i32>} : memref<32x128xbf16, #tpu.memory_space<vmem>>, vector<32x128xbf16>,
    } else {
    }
    return
  }
  func.func @transform_0(%arg0: i32, %arg1: i32) -> (i32, i32) {
    %c1_i32 = arith.constant 1 : i32
    %0 = arith.subi %c1_i32, %arg0 : i32
    %1 = arith.muli %0, %arg1 : i32
    %c0_i32 = arith.constant 0 : i32
    %c0_i32_0 = arith.constant 0 : i32
    return %1, %c0_i32 : i32, i32
  }
  func.func @transform_1(%arg0: i32, %arg1: i32) -> (i32, i32) {
    %c0_i32 = arith.constant 0 : i32
    %c0_i32_0 = arith.constant 0 : i32
    %c0_i32_1 = arith.constant 0 : i32
    return %c0_i32, %c0_i32_0 : i32, i32
  }
  func.func @transform_2(%arg0: i32, %arg1: i32) -> (i32, i32) {
    %c0_i32 = arith.constant 0 : i32
    %c0_i32_0 = arith.constant 0 : i32
    %c0_i32_1 = arith.constant 0 : i32
    return %c0_i32, %c0_i32_0 : i32, i32
  }
  func.func @transform_3(%arg0: i32, %arg1: i32) -> (i32, i32) {
    %c0_i32 = arith.constant 0 : i32
    %c0_i32_0 = arith.constant 0 : i32
    %c0_i32_1 = arith.constant 0 : i32
    return %c0_i32, %c0_i32_0 : i32, i32
  }
  func.func @transform_4(%arg0: i32, %arg1: i32) -> (i32, i32) {
    %0 = arith.muli %arg0, %arg1 : i32
    %c0_i32 = arith.constant 0 : i32
    %c0_i32_0 = arith.constant 0 : i32
    return %0, %c0_i32 : i32, i32
  }
  func.func @transform_5(%arg0: i32, %arg1: i32) -> (i32, i32) {
    %0 = arith.muli %arg0, %arg1 : i32
    %c0_i32 = arith.constant 0 : i32
    %c0_i32_0 = arith.constant 0 : i32
    return %0, %c0_i32 : i32, i32
  }
}

module attributes {stable_mosaic.version = 11 : i64} {
  func.func @_gemm_stats_kernel(%arg0: i32, %arg1: memref<32x128xbf16, #tpu.memory_space<vmem>>, %arg2: memref<128x128xbf16, #tpu.memory_space<vmem>>, %arg3: memref<32x128xbf16, #tpu.memory_space<vmem>>, %arg4: memref<1x1x128xf32, #tpu.memory_space<vmem>>, %arg5: memref<1x1x128xf32, #tpu.memory_space<vmem>>) attributes {dimension_semantics = [#tpu.dimension_semantics<parallel>], iteration_bounds = array<i64: 1>, scalar_prefetch = 0 : i64, scratch_operands = 0 : i64, tpu.core_type = #tpu.core_type<tc>, window_params = [{transform_indices = @transform_0, window_bounds = array<i64: 32, 128>}, {pipeline_mode = #tpu.pipeline_mode<synchronous>, transform_indices = @transform_1, window_bounds = array<i64: 128, 128>}, {transform_indices = @transform_2, window_bounds = array<i64: 32, 128>}, {transform_indices = @transform_3, window_bounds = array<i64: 1, 1, 128>}, {transform_indices = @transform_4, window_bounds = array<i64: 1, 1, 128>}]} {
    %c0 = arith.constant 0 : index
    %c0_0 = arith.constant 0 : index
    %0 = vector.load %arg1[%c0, %c0_0] : memref<32x128xbf16, #tpu.memory_space<vmem>>, vector<32x128xbf16>
    %c0_1 = arith.constant 0 : index
    %c0_2 = arith.constant 0 : index
    %1 = vector.load %arg2[%c0_1, %c0_2] : memref<128x128xbf16, #tpu.memory_space<vmem>>, vector<128x128xbf16>
    %cst = arith.constant dense<0.000000e+00> : vector<32x128xf32>
    %2 = tpu.matmul %0, %1, %cst {dimension_numbers = #tpu.dot_dimension_numbers<[1], [0], [0], [1], [0, 0, 1, 1], [], []>} : vector<32x128xbf16>, vector<128x128xbf16>, vector<32x128xf32> -> vector<32x128xf32>
    %3 = arith.truncf %2 : vector<32x128xf32> to vector<32x128xbf16>
    %c0_3 = arith.constant 0 : index
    %c0_4 = arith.constant 0 : index
    %4 = vector.load %arg3[%c0_3, %c0_4] : memref<32x128xbf16, #tpu.memory_space<vmem>>, vector<32x128xbf16>
    tpu.vector_store %arg3[%c0_3, %c0_4], %3 {strides = array<i32>} : memref<32x128xbf16, #tpu.memory_space<vmem>>, vector<32x128xbf16>,
    %cst_5 = arith.constant dense<0.000000e+00> : vector<128xf32>
    %5 = vector.multi_reduction <add>, %2, %cst_5 [0] : vector<32x128xf32> to vector<128xf32>
    %6 = vector.shape_cast %5 : vector<128xf32> to vector<1x128xf32>
    %7 = vector.shape_cast %6 : vector<1x128xf32> to vector<1x1x128xf32>
    %c0_6 = arith.constant 0 : index
    %c0_7 = arith.constant 0 : index
    %c0_8 = arith.constant 0 : index
    %8 = vector.load %arg4[%c0_6, %c0_7, %c0_8] : memref<1x1x128xf32, #tpu.memory_space<vmem>>, vector<1x1x128xf32>
    tpu.vector_store %arg4[%c0_6, %c0_7, %c0_8], %7 {strides = array<i32>} : memref<1x1x128xf32, #tpu.memory_space<vmem>>, vector<1x1x128xf32>,
    %9 = arith.mulf %2, %2 : vector<32x128xf32>
    %cst_9 = arith.constant dense<0.000000e+00> : vector<128xf32>
    %10 = vector.multi_reduction <add>, %9, %cst_9 [0] : vector<32x128xf32> to vector<128xf32>
    %11 = vector.shape_cast %10 : vector<128xf32> to vector<1x128xf32>
    %12 = vector.shape_cast %11 : vector<1x128xf32> to vector<1x1x128xf32>
    %c0_10 = arith.constant 0 : index
    %c0_11 = arith.constant 0 : index
    %c0_12 = arith.constant 0 : index
    %13 = vector.load %arg5[%c0_10, %c0_11, %c0_12] : memref<1x1x128xf32, #tpu.memory_space<vmem>>, vector<1x1x128xf32>
    tpu.vector_store %arg5[%c0_10, %c0_11, %c0_12], %12 {strides = array<i32>} : memref<1x1x128xf32, #tpu.memory_space<vmem>>, vector<1x1x128xf32>,
    return
  }
  func.func @transform_0(%arg0: i32) -> (i32, i32) {
    %c0_i32 = arith.constant 0 : i32
    %c0_i32_0 = arith.constant 0 : i32
    return %arg0, %c0_i32 : i32, i32
  }
  func.func @transform_1(%arg0: i32) -> (i32, i32) {
    %c0_i32 = arith.constant 0 : i32
    %c0_i32_0 = arith.constant 0 : i32
    %c0_i32_1 = arith.constant 0 : i32
    return %c0_i32, %c0_i32_0 : i32, i32
  }
  func.func @transform_2(%arg0: i32) -> (i32, i32) {
    %c0_i32 = arith.constant 0 : i32
    %c0_i32_0 = arith.constant 0 : i32
    return %arg0, %c0_i32 : i32, i32
  }
  func.func @transform_3(%arg0: i32) -> (i32, i32, i32) {
    %c0_i32 = arith.constant 0 : i32
    %c0_i32_0 = arith.constant 0 : i32
    %c0_i32_1 = arith.constant 0 : i32
    return %arg0, %c0_i32, %c0_i32_0 : i32, i32, i32
  }
  func.func @transform_4(%arg0: i32) -> (i32, i32, i32) {
    %c0_i32 = arith.constant 0 : i32
    %c0_i32_0 = arith.constant 0 : i32
    %c0_i32_1 = arith.constant 0 : i32
    return %arg0, %c0_i32, %c0_i32_0 : i32, i32, i32
  }
}

module attributes {stable_mosaic.version = 11 : i64} {
  func.func @_bn_apply_kernel(%arg0: i32, %arg1: memref<32x128xbf16, #tpu.memory_space<vmem>>, %arg2: memref<1x128xf32, #tpu.memory_space<vmem>>, %arg3: memref<1x128xf32, #tpu.memory_space<vmem>>, %arg4: memref<32x128xbf16, #tpu.memory_space<vmem>>) attributes {dimension_semantics = [#tpu.dimension_semantics<parallel>], iteration_bounds = array<i64: 1>, scalar_prefetch = 0 : i64, scratch_operands = 0 : i64, tpu.core_type = #tpu.core_type<tc>, window_params = [{transform_indices = @transform_0, window_bounds = array<i64: 32, 128>}, {pipeline_mode = #tpu.pipeline_mode<synchronous>, transform_indices = @transform_1, window_bounds = array<i64: 1, 128>}, {pipeline_mode = #tpu.pipeline_mode<synchronous>, transform_indices = @transform_2, window_bounds = array<i64: 1, 128>}, {transform_indices = @transform_3, window_bounds = array<i64: 32, 128>}]} {
    %c0 = arith.constant 0 : index
    %c0_0 = arith.constant 0 : index
    %0 = vector.load %arg1[%c0, %c0_0] : memref<32x128xbf16, #tpu.memory_space<vmem>>, vector<32x128xbf16>
    %1 = arith.extf %0 : vector<32x128xbf16> to vector<32x128xf32>
    %c0_1 = arith.constant 0 : index
    %c0_2 = arith.constant 0 : index
    %2 = vector.load %arg2[%c0_1, %c0_2] : memref<1x128xf32, #tpu.memory_space<vmem>>, vector<1x128xf32>
    %3 = vector.broadcast %2 : vector<1x128xf32> to vector<32x128xf32>
    %4 = arith.mulf %1, %3 : vector<32x128xf32>
    %c0_3 = arith.constant 0 : index
    %c0_4 = arith.constant 0 : index
    %5 = vector.load %arg3[%c0_3, %c0_4] : memref<1x128xf32, #tpu.memory_space<vmem>>, vector<1x128xf32>
    %6 = vector.broadcast %5 : vector<1x128xf32> to vector<32x128xf32>
    %7 = arith.addf %4, %6 : vector<32x128xf32>
    %cst = arith.constant 0.000000e+00 : f32
    %8 = vector.broadcast %cst : f32 to vector<32x128xf32>
    %9 = arith.maximumf %7, %8 : vector<32x128xf32>
    %10 = arith.truncf %9 : vector<32x128xf32> to vector<32x128xbf16>
    %c0_5 = arith.constant 0 : index
    %c0_6 = arith.constant 0 : index
    %11 = vector.load %arg4[%c0_5, %c0_6] : memref<32x128xbf16, #tpu.memory_space<vmem>>, vector<32x128xbf16>
    tpu.vector_store %arg4[%c0_5, %c0_6], %10 {strides = array<i32>} : memref<32x128xbf16, #tpu.memory_space<vmem>>, vector<32x128xbf16>,
    return
  }
  func.func @transform_0(%arg0: i32) -> (i32, i32) {
    %c0_i32 = arith.constant 0 : i32
    %c0_i32_0 = arith.constant 0 : i32
    return %arg0, %c0_i32 : i32, i32
  }
  func.func @transform_1(%arg0: i32) -> (i32, i32) {
    %c0_i32 = arith.constant 0 : i32
    %c0_i32_0 = arith.constant 0 : i32
    %c0_i32_1 = arith.constant 0 : i32
    return %c0_i32, %c0_i32_0 : i32, i32
  }
  func.func @transform_2(%arg0: i32) -> (i32, i32) {
    %c0_i32 = arith.constant 0 : i32
    %c0_i32_0 = arith.constant 0 : i32
    %c0_i32_1 = arith.constant 0 : i32
    return %c0_i32, %c0_i32_0 : i32, i32
  }
  func.func @transform_3(%arg0: i32) -> (i32, i32) {
    %c0_i32 = arith.constant 0 : i32
    %c0_i32_0 = arith.constant 0 : i32
    return %arg0, %c0_i32 : i32, i32
  }
}

module attributes {stable_mosaic.version = 11 : i64} {
  func.func @_gemm_stats_kernel(%arg0: i32, %arg1: memref<128x64xbf16, #tpu.memory_space<vmem>>, %arg2: memref<64x128xbf16, #tpu.memory_space<vmem>>, %arg3: memref<128x128xbf16, #tpu.memory_space<vmem>>, %arg4: memref<1x1x128xf32, #tpu.memory_space<vmem>>, %arg5: memref<1x1x128xf32, #tpu.memory_space<vmem>>) attributes {dimension_semantics = [#tpu.dimension_semantics<parallel>], iteration_bounds = array<i64: 1>, scalar_prefetch = 0 : i64, scratch_operands = 0 : i64, tpu.core_type = #tpu.core_type<tc>, window_params = [{transform_indices = @transform_0, window_bounds = array<i64: 128, 64>}, {pipeline_mode = #tpu.pipeline_mode<synchronous>, transform_indices = @transform_1, window_bounds = array<i64: 64, 128>}, {transform_indices = @transform_2, window_bounds = array<i64: 128, 128>}, {transform_indices = @transform_3, window_bounds = array<i64: 1, 1, 128>}, {transform_indices = @transform_4, window_bounds = array<i64: 1, 1, 128>}]} {
    %c0 = arith.constant 0 : index
    %c0_0 = arith.constant 0 : index
    %0 = vector.load %arg1[%c0, %c0_0] : memref<128x64xbf16, #tpu.memory_space<vmem>>, vector<128x64xbf16>
    %c0_1 = arith.constant 0 : index
    %c0_2 = arith.constant 0 : index
    %1 = vector.load %arg2[%c0_1, %c0_2] : memref<64x128xbf16, #tpu.memory_space<vmem>>, vector<64x128xbf16>
    %cst = arith.constant dense<0.000000e+00> : vector<128x128xf32>
    %2 = tpu.matmul %0, %1, %cst {dimension_numbers = #tpu.dot_dimension_numbers<[1], [0], [0], [1], [0, 0, 1, 1], [], []>} : vector<128x64xbf16>, vector<64x128xbf16>, vector<128x128xf32> -> vector<128x128xf32>
    %3 = arith.truncf %2 : vector<128x128xf32> to vector<128x128xbf16>
    %c0_3 = arith.constant 0 : index
    %c0_4 = arith.constant 0 : index
    %4 = vector.load %arg3[%c0_3, %c0_4] : memref<128x128xbf16, #tpu.memory_space<vmem>>, vector<128x128xbf16>
    tpu.vector_store %arg3[%c0_3, %c0_4], %3 {strides = array<i32>} : memref<128x128xbf16, #tpu.memory_space<vmem>>, vector<128x128xbf16>,
    %cst_5 = arith.constant dense<0.000000e+00> : vector<128xf32>
    %5 = vector.multi_reduction <add>, %2, %cst_5 [0] : vector<128x128xf32> to vector<128xf32>
    %6 = vector.shape_cast %5 : vector<128xf32> to vector<1x128xf32>
    %7 = vector.shape_cast %6 : vector<1x128xf32> to vector<1x1x128xf32>
    %c0_6 = arith.constant 0 : index
    %c0_7 = arith.constant 0 : index
    %c0_8 = arith.constant 0 : index
    %8 = vector.load %arg4[%c0_6, %c0_7, %c0_8] : memref<1x1x128xf32, #tpu.memory_space<vmem>>, vector<1x1x128xf32>
    tpu.vector_store %arg4[%c0_6, %c0_7, %c0_8], %7 {strides = array<i32>} : memref<1x1x128xf32, #tpu.memory_space<vmem>>, vector<1x1x128xf32>,
    %9 = arith.mulf %2, %2 : vector<128x128xf32>
    %cst_9 = arith.constant dense<0.000000e+00> : vector<128xf32>
    %10 = vector.multi_reduction <add>, %9, %cst_9 [0] : vector<128x128xf32> to vector<128xf32>
    %11 = vector.shape_cast %10 : vector<128xf32> to vector<1x128xf32>
    %12 = vector.shape_cast %11 : vector<1x128xf32> to vector<1x1x128xf32>
    %c0_10 = arith.constant 0 : index
    %c0_11 = arith.constant 0 : index
    %c0_12 = arith.constant 0 : index
    %13 = vector.load %arg5[%c0_10, %c0_11, %c0_12] : memref<1x1x128xf32, #tpu.memory_space<vmem>>, vector<1x1x128xf32>
    tpu.vector_store %arg5[%c0_10, %c0_11, %c0_12], %12 {strides = array<i32>} : memref<1x1x128xf32, #tpu.memory_space<vmem>>, vector<1x1x128xf32>,
    return
  }
  func.func @transform_0(%arg0: i32) -> (i32, i32) {
    %c0_i32 = arith.constant 0 : i32
    %c0_i32_0 = arith.constant 0 : i32
    return %arg0, %c0_i32 : i32, i32
  }
  func.func @transform_1(%arg0: i32) -> (i32, i32) {
    %c0_i32 = arith.constant 0 : i32
    %c0_i32_0 = arith.constant 0 : i32
    %c0_i32_1 = arith.constant 0 : i32
    return %c0_i32, %c0_i32_0 : i32, i32
  }
  func.func @transform_2(%arg0: i32) -> (i32, i32) {
    %c0_i32 = arith.constant 0 : i32
    %c0_i32_0 = arith.constant 0 : i32
    return %arg0, %c0_i32 : i32, i32
  }
  func.func @transform_3(%arg0: i32) -> (i32, i32, i32) {
    %c0_i32 = arith.constant 0 : i32
    %c0_i32_0 = arith.constant 0 : i32
    %c0_i32_1 = arith.constant 0 : i32
    return %arg0, %c0_i32, %c0_i32_0 : i32, i32, i32
  }
  func.func @transform_4(%arg0: i32) -> (i32, i32, i32) {
    %c0_i32 = arith.constant 0 : i32
    %c0_i32_0 = arith.constant 0 : i32
    %c0_i32_1 = arith.constant 0 : i32
    return %arg0, %c0_i32, %c0_i32_0 : i32, i32, i32
  }
}

module attributes {stable_mosaic.version = 11 : i64} {
  func.func @_bn_apply_kernel(%arg0: i32, %arg1: memref<128x128xbf16, #tpu.memory_space<vmem>>, %arg2: memref<1x128xf32, #tpu.memory_space<vmem>>, %arg3: memref<1x128xf32, #tpu.memory_space<vmem>>, %arg4: memref<128x128xbf16, #tpu.memory_space<vmem>>) attributes {dimension_semantics = [#tpu.dimension_semantics<parallel>], iteration_bounds = array<i64: 1>, scalar_prefetch = 0 : i64, scratch_operands = 0 : i64, tpu.core_type = #tpu.core_type<tc>, window_params = [{transform_indices = @transform_0, window_bounds = array<i64: 128, 128>}, {pipeline_mode = #tpu.pipeline_mode<synchronous>, transform_indices = @transform_1, window_bounds = array<i64: 1, 128>}, {pipeline_mode = #tpu.pipeline_mode<synchronous>, transform_indices = @transform_2, window_bounds = array<i64: 1, 128>}, {transform_indices = @transform_3, window_bounds = array<i64: 128, 128>}]} {
    %c0 = arith.constant 0 : index
    %c0_0 = arith.constant 0 : index
    %0 = vector.load %arg1[%c0, %c0_0] : memref<128x128xbf16, #tpu.memory_space<vmem>>, vector<128x128xbf16>
    %1 = arith.extf %0 : vector<128x128xbf16> to vector<128x128xf32>
    %c0_1 = arith.constant 0 : index
    %c0_2 = arith.constant 0 : index
    %2 = vector.load %arg2[%c0_1, %c0_2] : memref<1x128xf32, #tpu.memory_space<vmem>>, vector<1x128xf32>
    %3 = vector.broadcast %2 : vector<1x128xf32> to vector<128x128xf32>
    %4 = arith.mulf %1, %3 : vector<128x128xf32>
    %c0_3 = arith.constant 0 : index
    %c0_4 = arith.constant 0 : index
    %5 = vector.load %arg3[%c0_3, %c0_4] : memref<1x128xf32, #tpu.memory_space<vmem>>, vector<1x128xf32>
    %6 = vector.broadcast %5 : vector<1x128xf32> to vector<128x128xf32>
    %7 = arith.addf %4, %6 : vector<128x128xf32>
    %cst = arith.constant 0.000000e+00 : f32
    %8 = vector.broadcast %cst : f32 to vector<128x128xf32>
    %9 = arith.maximumf %7, %8 : vector<128x128xf32>
    %10 = arith.truncf %9 : vector<128x128xf32> to vector<128x128xbf16>
    %c0_5 = arith.constant 0 : index
    %c0_6 = arith.constant 0 : index
    %11 = vector.load %arg4[%c0_5, %c0_6] : memref<128x128xbf16, #tpu.memory_space<vmem>>, vector<128x128xbf16>
    tpu.vector_store %arg4[%c0_5, %c0_6], %10 {strides = array<i32>} : memref<128x128xbf16, #tpu.memory_space<vmem>>, vector<128x128xbf16>,
    return
  }
  func.func @transform_0(%arg0: i32) -> (i32, i32) {
    %c0_i32 = arith.constant 0 : i32
    %c0_i32_0 = arith.constant 0 : i32
    return %arg0, %c0_i32 : i32, i32
  }
  func.func @transform_1(%arg0: i32) -> (i32, i32) {
    %c0_i32 = arith.constant 0 : i32
    %c0_i32_0 = arith.constant 0 : i32
    %c0_i32_1 = arith.constant 0 : i32
    return %c0_i32, %c0_i32_0 : i32, i32
  }
  func.func @transform_2(%arg0: i32) -> (i32, i32) {
    %c0_i32 = arith.constant 0 : i32
    %c0_i32_0 = arith.constant 0 : i32
    %c0_i32_1 = arith.constant 0 : i32
    return %c0_i32, %c0_i32_0 : i32, i32
  }
  func.func @transform_3(%arg0: i32) -> (i32, i32) {
    %c0_i32 = arith.constant 0 : i32
    %c0_i32_0 = arith.constant 0 : i32
    return %arg0, %c0_i32 : i32, i32
  }
}

module attributes {stable_mosaic.version = 11 : i64} {
  func.func @_gemm_bias_tanh_kernel(%arg0: i32, %arg1: memref<512x392xbf16, #tpu.memory_space<vmem>>, %arg2: memref<392x128xbf16, #tpu.memory_space<vmem>>, %arg3: memref<1x128xf32, #tpu.memory_space<vmem>>, %arg4: memref<512x128xbf16, #tpu.memory_space<vmem>>) attributes {dimension_semantics = [#tpu.dimension_semantics<parallel>], iteration_bounds = array<i64: 1>, scalar_prefetch = 0 : i64, scratch_operands = 0 : i64, tpu.core_type = #tpu.core_type<tc>, window_params = [{transform_indices = @transform_0, window_bounds = array<i64: 512, 392>}, {pipeline_mode = #tpu.pipeline_mode<synchronous>, transform_indices = @transform_1, window_bounds = array<i64: 392, 128>}, {pipeline_mode = #tpu.pipeline_mode<synchronous>, transform_indices = @transform_2, window_bounds = array<i64: 1, 128>}, {transform_indices = @transform_3, window_bounds = array<i64: 512, 128>}]} {
    %c0 = arith.constant 0 : index
    %c0_0 = arith.constant 0 : index
    %0 = vector.load %arg1[%c0, %c0_0] : memref<512x392xbf16, #tpu.memory_space<vmem>>, vector<512x392xbf16>
    %c0_1 = arith.constant 0 : index
    %c0_2 = arith.constant 0 : index
    %1 = vector.load %arg2[%c0_1, %c0_2] : memref<392x128xbf16, #tpu.memory_space<vmem>>, vector<392x128xbf16>
    %cst = arith.constant dense<0.000000e+00> : vector<512x128xf32>
    %2 = tpu.matmul %0, %1, %cst {dimension_numbers = #tpu.dot_dimension_numbers<[1], [0], [0], [1], [0, 0, 1, 1], [], []>} : vector<512x392xbf16>, vector<392x128xbf16>, vector<512x128xf32> -> vector<512x128xf32>
    %c0_3 = arith.constant 0 : index
    %c0_4 = arith.constant 0 : index
    %3 = vector.load %arg3[%c0_3, %c0_4] : memref<1x128xf32, #tpu.memory_space<vmem>>, vector<1x128xf32>
    %4 = vector.broadcast %3 : vector<1x128xf32> to vector<512x128xf32>
    %5 = arith.addf %2, %4 : vector<512x128xf32>
    %6 = math.tanh %5 : vector<512x128xf32>
    %7 = arith.truncf %6 : vector<512x128xf32> to vector<512x128xbf16>
    %c0_5 = arith.constant 0 : index
    %c0_6 = arith.constant 0 : index
    %8 = vector.load %arg4[%c0_5, %c0_6] : memref<512x128xbf16, #tpu.memory_space<vmem>>, vector<512x128xbf16>
    tpu.vector_store %arg4[%c0_5, %c0_6], %7 {strides = array<i32>} : memref<512x128xbf16, #tpu.memory_space<vmem>>, vector<512x128xbf16>,
    return
  }
  func.func @transform_0(%arg0: i32) -> (i32, i32) {
    %c0_i32 = arith.constant 0 : i32
    %c0_i32_0 = arith.constant 0 : i32
    return %arg0, %c0_i32 : i32, i32
  }
  func.func @transform_1(%arg0: i32) -> (i32, i32) {
    %c0_i32 = arith.constant 0 : i32
    %c0_i32_0 = arith.constant 0 : i32
    %c0_i32_1 = arith.constant 0 : i32
    return %c0_i32, %c0_i32_0 : i32, i32
  }
  func.func @transform_2(%arg0: i32) -> (i32, i32) {
    %c0_i32 = arith.constant 0 : i32
    %c0_i32_0 = arith.constant 0 : i32
    %c0_i32_1 = arith.constant 0 : i32
    return %c0_i32, %c0_i32_0 : i32, i32
  }
  func.func @transform_3(%arg0: i32) -> (i32, i32) {
    %c0_i32 = arith.constant 0 : i32
    %c0_i32_0 = arith.constant 0 : i32
    return %arg0, %c0_i32 : i32, i32
  }
}

</mosaic_0001>

<bundles_post_ra>
// kernel: generator_forward.26
= control target key start
LH: loop header
LB: loop body
LE: loop exit
PB: predicated region body
PF: predicated region fallthrough
CT: control target
= control target key end

     0   :  { %s2710_s15 = smov 0   ;;  %s2712_s16 = smov 0   ;;  %s3682_s0 = inlined_call_operand.vmem [shape: bf16[512,147], index: 0, kind: input, shape index: {}]   ;;  %s3683_s1 = inlined_call_operand.vmem [shape: bf16[147,128], index: 1, kind: input, shape index: {}]   ;;  %s3684_s2 = inlined_call_operand.vmem [shape: f32[1,128], index: 2, kind: input, shape index: {}]   ;;  %s3685_s3 = inlined_call_operand.vmem [shape: f32[1,128], index: 3, kind: input, shape index: {}]   ;;  %s3686_s4 = inlined_call_operand.vmem [shape: bf16[512,128], index: 4, kind: output, shape index: {}]  }
   0x1   :  { %s2714_s17 = smov 0  }
   0x2 LB: > { %s26_s18 = sadd.s32 1, %s2676_s16  ;;  %p2069_p0 = scmp.ge.s32.totalorder %s2680_s17, 1  ;;  %s2680_s17 = sphi %s2714_s17, %s14_s17   ;;  %s2676_s16 = sphi %s2712_s16, %s3730_s16   ;;  %s2672_s15 = sphi %s2710_s15, %s3729_s15  }
   0x3   : > { %p28_p1 = scmp.ge.s32.totalorder %s26_s18, 2  ;;  %p186_p2 = scmp.lt.s32.totalorder %s2680_s17, 3 }
   0x5   : > { %s3732_s18 = smov (%p28_p1, %s26_s18), 0  ;;  %p187_p3 = pnand %p2069_p0, %p186_p2 }
   0x6   : > { %p2070_p4 = scmp.ne.s32.totalorder (!%p187_p3), %s2672_s15, 0 }
   0x7   : > { %190 = sbr.rel (%p187_p3) target bundleno = 581 (0x245), region = 36 }
   0xe   : > { %239 = sbr.rel (%p2070_p4) target bundleno = 472 (0x1d8), region = 40  ;;  %v2550_v0 = vld [vmem:[%s3683_s1] sm:$0xff] (!%p2070_p4)   ;;  %v2682_v1 = vmov (!%p2070_p4), 0   ;;  %v2551_v2 = vld [vmem:[%s3683_s1 + $0x8] sm:$0xff] (!%p2070_p4)   ;;  %v2552_v3 = vld [vmem:[%s3683_s1 + $0x10] sm:$0xff] (!%p2070_p4)   ;;  %vm674_vm0 = vcmask (!%p2070_p4), 154624  }
   0xf   : > { %778 = vmatprep.subr.bf16.mxu0 (!%p2070_p4), %v2682_v1  ;;  %2503 = vmatprep.subr.bf16.mxu1 (!%p2070_p4), %v2682_v1  ;;  %v2553_v4 = vld [vmem:[%s3683_s1 + $0x18] sm:$0xff] (!%p2070_p4)   ;;  %v2562_v5 = vld [vmem:[%s3682_s0 + $0x4] ss:$8 sps:$4 sm:$0xff] (!%p2070_p4)   ;;  %v2556_v9 = vld [vmem:[%s3683_s1 + $0x30] sm:$0xff] (!%p2070_p4)   ;;  %vm771_vm1 = vcmask (!%p2070_p4), 1040384   ;;  %vm772_vm2 = vcmask (!%p2070_p4), 1041408  }
  0x10   : > { %779 = vmatpush1.bf16.msra.mxu0 (!%p2070_p4), %v2550_v0  ;;  %2513 = vmatpush1.bf16.msra.mxu1 (!%p2070_p4), %v2550_v0  ;;  %v2554_v6 = vld [vmem:[%s3683_s1 + $0x20] sm:$0xff] (!%p2070_p4)   ;;  %v2555_v7 = vld [vmem:[%s3683_s1 + $0x28] sm:$0xff] (!%p2070_p4)   ;;  %v2557_v10 = vld [vmem:[%s3683_s1 + $0x38] sm:$0xff] (!%p2070_p4)   ;;  %v2683_v11 = vmov (!%p2070_p4), 65535  }
  0x11   : > { %780 = vmatprep.subr.bf16.mxu0 (!%p2070_p4), %v2682_v1  ;;  %2504 = vmatprep.subr.bf16.mxu1 (!%p2070_p4), %v2682_v1  ;;  %v2586_v8 = vld [vmem:[%s3682_s0 + $0x104] ss:$8 sps:$4 sm:$0xff] (!%p2070_p4)   ;;  %v773_v12 = vsel (!%p2070_p4), %vm771_vm1, 4294967295, %v2683_v11  ;;  %v2559_v14 = vld [vmem:[%s3683_s1 + $0x48] ss:$0 sps:$4 sm:$0x33] (!%p2070_p4)  }
  0x12   : > { %2145 = vmatprep.mubr.msk.bf16.mxu0 (!%p2070_p4), %vm674_vm0, %v2562_v5  ;;  %2161 = vmatprep.mubr.msk.bf16.mxu1 (!%p2070_p4), %vm674_vm0, %v2586_v8  ;;  %v2558_v13 = vld [vmem:[%s3683_s1 + $0x40] sm:$0xff] (!%p2070_p4)   ;;  %v774_v15 = vsel (!%p2070_p4), %vm772_vm2, %v773_v12, 0  ;;  %v2563_v19 = vld [vmem:[%s3682_s0 + $0x14] ss:$8 sps:$4 sm:$0xff] (!%p2070_p4)   ;;  %v2565_v21 = vld [vmem:[%s3682_s0 + $0x10] ss:$8 sps:$4 sm:$0xff] (!%p2070_p4)  }
  0x13   : > { %v776_v16 = vand.u32 (!%p2070_p4), %v2559_v14, %v774_v15  ;;  %v2560_v17 = vld [vmem:[%s3682_s0] ss:$8 sps:$4 sm:$0xff] (!%p2070_p4)   ;;  %v2590_v20 = vld [vmem:[%s3682_s0 + $0x114] ss:$8 sps:$4 sm:$0xff] (!%p2070_p4)   ;;  %v2592_v22 = vld [vmem:[%s3682_s0 + $0x110] ss:$8 sps:$4 sm:$0xff] (!%p2070_p4)  }
  0x14   : > { %781 = vmatpush1.bf16.msra.mxu0 (!%p2070_p4), %v2551_v2  ;;  %2514 = vmatpush1.bf16.msra.mxu1 (!%p2070_p4), %v2551_v2  ;;  %v2584_v18 = vld [vmem:[%s3682_s0 + $0x100] ss:$8 sps:$4 sm:$0xff] (!%p2070_p4)   ;;  %v2566_v23 = vld [vmem:[%s3682_s0 + $0x24] ss:$8 sps:$4 sm:$0xff] (!%p2070_p4)   ;;  %v2569_v27 = vld [vmem:[%s3682_s0 + $0x34] ss:$8 sps:$4 sm:$0xff] (!%p2070_p4)  }
  0x15   : > { %782 = vmatprep.subr.bf16.mxu0 %v2682_v1  ;;  %2505 = vmatprep.subr.bf16.mxu1 %v2682_v1  ;;  %v2596_v24 = vld [vmem:[%s3682_s0 + $0x124] ss:$8 sps:$4 sm:$0xff]   ;;  %v2568_v25 = vld [vmem:[%s3682_s0 + $0x20] ss:$8 sps:$4 sm:$0xff]   ;;  %v2602_v28 = vld [vmem:[%s3682_s0 + $0x134] ss:$8 sps:$4 sm:$0xff]  }
  0x16   : > { %v2598_v26 = vld [vmem:[%s3682_s0 + $0x120] ss:$8 sps:$4 sm:$0xff]   ;;  %v2571_v29 = vld [vmem:[%s3682_s0 + $0x30] ss:$8 sps:$4 sm:$0xff]   ;;  %v2572_v31 = vld [vmem:[%s3682_s0 + $0x44] ss:$8 sps:$4 sm:$0xff]  }
  0x17   : > { %v2604_v30 = vld [vmem:[%s3682_s0 + $0x130] ss:$8 sps:$4 sm:$0xff]   ;;  %v2608_v32 = vld [vmem:[%s3682_s0 + $0x144] ss:$8 sps:$4 sm:$0xff]   ;;  %v2574_v33 = vld [vmem:[%s3682_s0 + $0x40] ss:$8 sps:$4 sm:$0xff]  }
  0x18   : > { %783 = vmatpush1.bf16.msra.mxu0 %v2552_v3  ;;  %2515 = vmatpush1.bf16.msra.mxu1 %v2552_v3  ;;  %v2610_v34 = vld [vmem:[%s3682_s0 + $0x140] ss:$8 sps:$4 sm:$0xff]   ;;  %v2575_v35 = vld [vmem:[%s3682_s0 + $0x54] ss:$8 sps:$4 sm:$0xff]   ;;  %v2577_v37 = vld [vmem:[%s3682_s0 + $0x50] ss:$8 sps:$4 sm:$0xff]  }
  0x19   : > { %784 = vmatprep.subr.bf16.mxu0 %v2682_v1  ;;  %2506 = vmatprep.subr.bf16.mxu1 %v2682_v1  ;;  %v2614_v36 = vld [vmem:[%s3682_s0 + $0x154] ss:$8 sps:$4 sm:$0xff]   ;;  %v2616_v38 = vld [vmem:[%s3682_s0 + $0x150] ss:$8 sps:$4 sm:$0xff]   ;;  %v2578_v39 = vld [vmem:[%s3682_s0 + $0x64] ss:$8 sps:$4 sm:$0xff]  }
  0x1a   : > { %v2620_v40 = vld [vmem:[%s3682_s0 + $0x164] ss:$8 sps:$4 sm:$0xff]   ;;  %v2580_v41 = vld [vmem:[%s3682_s0 + $0x60] ss:$8 sps:$4 sm:$0xff]   ;;  %v2581_v43 = vld [vmem:[%s3682_s0 + $0x74] ss:$8 sps:$4 sm:$0xff]  }
  0x1b   : > { %v2622_v42 = vld [vmem:[%s3682_s0 + $0x160] ss:$8 sps:$4 sm:$0xff]   ;;  %v2626_v44 = vld [vmem:[%s3682_s0 + $0x174] ss:$8 sps:$4 sm:$0xff]   ;;  %v2583_v45 = vld [vmem:[%s3682_s0 + $0x70] ss:$8 sps:$4 sm:$0xff]  }
  0x1c   : > { %785 = vmatpush1.bf16.msra.mxu0 %v2553_v4  ;;  %2516 = vmatpush1.bf16.msra.mxu1 %v2553_v4  ;;  %v2628_v46 = vld [vmem:[%s3682_s0 + $0x170] ss:$8 sps:$4 sm:$0xff]   ;;  %v2587_v47 = vld [vmem:[%s3682_s0 + $0x84] ss:$8 sps:$4 sm:$0xff]   ;;  %v2589_v49 = vld [vmem:[%s3682_s0 + $0x80] ss:$8 sps:$4 sm:$0xff]  }
  0x1d   : > { %786 = vmatprep.subr.bf16.mxu0 %v2682_v1  ;;  %2507 = vmatprep.subr.bf16.mxu1 %v2682_v1  ;;  %v2632_v48 = vld [vmem:[%s3682_s0 + $0x184] ss:$8 sps:$4 sm:$0xff]   ;;  %v2634_v50 = vld [vmem:[%s3682_s0 + $0x180] ss:$8 sps:$4 sm:$0xff]   ;;  %v2593_v51 = vld [vmem:[%s3682_s0 + $0x94] ss:$8 sps:$4 sm:$0xff]  }
  0x1e   : > { %v2635_v52 = vld [vmem:[%s3682_s0 + $0x194] ss:$8 sps:$4 sm:$0xff]   ;;  %v2595_v53 = vld [vmem:[%s3682_s0 + $0x90] ss:$8 sps:$4 sm:$0xff]   ;;  %v2599_v55 = vld [vmem:[%s3682_s0 + $0xa4] ss:$8 sps:$4 sm:$0xff]  }
  0x1f   : > { %v2637_v54 = vld [vmem:[%s3682_s0 + $0x190] ss:$8 sps:$4 sm:$0xff]   ;;  %v2638_v56 = vld [vmem:[%s3682_s0 + $0x1a4] ss:$8 sps:$4 sm:$0xff]   ;;  %v2601_v57 = vld [vmem:[%s3682_s0 + $0xa0] ss:$8 sps:$4 sm:$0xff]  }
  0x20   : > { %787 = vmatpush1.bf16.msra.mxu0 %v2554_v6  ;;  %2517 = vmatpush1.bf16.msra.mxu1 %v2554_v6  ;;  %v2640_v58 = vld [vmem:[%s3682_s0 + $0x1a0] ss:$8 sps:$4 sm:$0xff]   ;;  %v2605_v59 = vld [vmem:[%s3682_s0 + $0xb4] ss:$8 sps:$4 sm:$0xff]   ;;  %v2607_v61 = vld [vmem:[%s3682_s0 + $0xb0] ss:$8 sps:$4 sm:$0xff]  }
  0x21   : > { %788 = vmatprep.subr.bf16.mxu0 %v2682_v1  ;;  %2508 = vmatprep.subr.bf16.mxu1 %v2682_v1  ;;  %v2641_v60 = vld [vmem:[%s3682_s0 + $0x1b4] ss:$8 sps:$4 sm:$0xff]   ;;  %v2643_v62 = vld [vmem:[%s3682_s0 + $0x1b0] ss:$8 sps:$4 sm:$0xff]   ;;  %v2611_v63 = vld [vmem:[%s3682_s0 + $0xc4] ss:$8 sps:$4 sm:$0xff]  }
  0x22   : > { %v2644_v0 = vld [vmem:[%s3682_s0 + $0x1c4] ss:$8 sps:$4 sm:$0xff]   ;;  %v2646_v2 = vld [vmem:[%s3682_s0 + $0x1c0] ss:$8 sps:$4 sm:$0xff]   ;;  %v2617_v3 = vld [vmem:[%s3682_s0 + $0xd4] ss:$8 sps:$4 sm:$0xff]  }
  0x23   : > { %v2647_v4 = vld [vmem:[%s3682_s0 + $0x1d4] ss:$8 sps:$4 sm:$0xff]   ;;  %v2619_v5 = vld [vmem:[%s3682_s0 + $0xd0] ss:$8 sps:$4 sm:$0xff]   ;;  %v2650_v8 = vld [vmem:[%s3682_s0 + $0x1e4] ss:$8 sps:$4 sm:$0xff]  }
  0x24   : > { %789 = vmatpush1.bf16.msra.mxu0 %v2555_v7  ;;  %2518 = vmatpush1.bf16.msra.mxu1 %v2555_v7  ;;  %v2649_v6 = vld [vmem:[%s3682_s0 + $0x1d0] ss:$8 sps:$4 sm:$0xff]   ;;  %v2623_v7 = vld [vmem:[%s3682_s0 + $0xe4] ss:$8 sps:$4 sm:$0xff]   ;;  %v2629_v11 = vld [vmem:[%s3682_s0 + $0xf4] ss:$8 sps:$4 sm:$0xff]  }
  0x25   : > { %790 = vmatprep.subr.bf16.mxu0 %v2682_v1  ;;  %2509 = vmatprep.subr.bf16.mxu1 %v2682_v1  ;;  %v2653_v12 = vld [vmem:[%s3682_s0 + $0x1f4] ss:$8 sps:$4 sm:$0xff]   ;;  %v2655_v14 = vld [vmem:[%s3682_s0 + $0x1f0] ss:$8 sps:$4 sm:$0xff]  }
  0x28   : > { %791 = vmatpush1.bf16.msra.mxu0 %v2556_v9  ;;  %2519 = vmatpush1.bf16.msra.mxu1 %v2556_v9  ;;  %v2625_v9 = vld [vmem:[%s3682_s0 + $0xe0] ss:$8 sps:$4 sm:$0xff]  }
  0x29   : > { %792 = vmatprep.subr.bf16.mxu0 %v2682_v1  ;;  %2510 = vmatprep.subr.bf16.mxu1 %v2682_v1 }
  0x2c   : > { %793 = vmatpush1.bf16.msra.mxu0 %v2557_v10  ;;  %2520 = vmatpush1.bf16.msra.mxu1 %v2557_v10  ;;  %v2652_v10 = vld [vmem:[%s3682_s0 + $0x1e0] ss:$8 sps:$4 sm:$0xff]  }
  0x2d   : > { %794 = vmatprep.subr.bf16.mxu0 %v2682_v1  ;;  %2511 = vmatprep.subr.bf16.mxu1 %v2682_v1 }
  0x30   : > { %795 = vmatpush1.bf16.msra.mxu0 %v2558_v13  ;;  %2521 = vmatpush1.bf16.msra.mxu1 %v2558_v13  ;;  %v2631_v13 = vld [vmem:[%s3682_s0 + $0xf0] ss:$8 sps:$4 sm:$0xff]  }
  0x31   : > { %796 = vmatprep.subr.bf16.mxu0 %v2682_v1  ;;  %2512 = vmatprep.subr.bf16.mxu1 %v2682_v1  ;;  %v2613_v1 = vld [vmem:[%s3682_s0 + $0xc0] ss:$8 sps:$4 sm:$0xff]  }
  0x34   : > { %797 = vmatpush1.bf16.msra.mxu0 %v776_v16  ;;  %2522 = vmatpush1.bf16.msra.mxu1 %v776_v16 }
  0x37   : > { %811 = vmatmul.mubr.bf16.vlgmr.msra.gmra.mrb[0].mxu0 %v2560_v17  ;;  %939 = vmatmul.mubr.bf16.vlgmr.msra.gmra.mrb[0].mxu1 %v2584_v18 }
  0x38   : > { %2146 = vmatprep.mubr.msk.bf16.mxu0 %vm674_vm0, %v2563_v19  ;;  %2162 = vmatprep.mubr.msk.bf16.mxu1 %vm674_vm0, %v2590_v20 }
  0x3f   : > { %819 = vmatmul.mubr.bf16.gmra.mrb[4].mxu0 %v2565_v21  ;;  %947 = vmatmul.mubr.bf16.gmra.mrb[4].mxu1 %v2592_v22 }
  0x40   : > { %2147 = vmatprep.mubr.msk.bf16.mxu0 %vm674_vm0, %v2566_v23  ;;  %2163 = vmatprep.mubr.msk.bf16.mxu1 %vm674_vm0, %v2596_v24 }
  0x47   : > { %827 = vmatmul.mubr.bf16.gmra.mrb[8].mxu0 %v2568_v25  ;;  %955 = vmatmul.mubr.bf16.gmra.mrb[8].mxu1 %v2598_v26 }
  0x48   : > { %2148 = vmatprep.mubr.msk.bf16.mxu0 %vm674_vm0, %v2569_v27  ;;  %2164 = vmatprep.mubr.msk.bf16.mxu1 %vm674_vm0, %v2602_v28 }
  0x4f   : > { %835 = vmatmul.mubr.bf16.gmra.mrb[12].mxu0 %v2571_v29  ;;  %963 = vmatmul.mubr.bf16.gmra.mrb[12].mxu1 %v2604_v30 }
  0x50   : > { %2149 = vmatprep.mubr.msk.bf16.mxu0 %vm674_vm0, %v2572_v31  ;;  %2165 = vmatprep.mubr.msk.bf16.mxu1 %vm674_vm0, %v2608_v32 }
  0x57   : > { %843 = vmatmul.mubr.bf16.gmra.mrb[16].mxu0 %v2574_v33  ;;  %971 = vmatmul.mubr.bf16.gmra.mrb[16].mxu1 %v2610_v34 }
  0x58   : > { %2150 = vmatprep.mubr.msk.bf16.mxu0 %vm674_vm0, %v2575_v35  ;;  %2166 = vmatprep.mubr.msk.bf16.mxu1 %vm674_vm0, %v2614_v36 }
  0x5f   : > { %851 = vmatmul.mubr.bf16.gmra.mrb[20].mxu0 %v2577_v37  ;;  %979 = vmatmul.mubr.bf16.gmra.mrb[20].mxu1 %v2616_v38 }
  0x60   : > { %2151 = vmatprep.mubr.msk.bf16.mxu0 %vm674_vm0, %v2578_v39  ;;  %2167 = vmatprep.mubr.msk.bf16.mxu1 %vm674_vm0, %v2620_v40 }
  0x67   : > { %859 = vmatmul.mubr.bf16.gmra.mrb[24].mxu0 %v2580_v41  ;;  %987 = vmatmul.mubr.bf16.gmra.mrb[24].mxu1 %v2622_v42 }
  0x68   : > { %2152 = vmatprep.mubr.msk.bf16.mxu0 %vm674_vm0, %v2581_v43  ;;  %2168 = vmatprep.mubr.msk.bf16.mxu1 %vm674_vm0, %v2626_v44 }
  0x6f   : > { %867 = vmatmul.mubr.bf16.gmra.mrb[28].mxu0 %v2583_v45  ;;  %995 = vmatmul.mubr.bf16.gmra.mrb[28].mxu1 %v2628_v46 }
  0x70   : > { %2153 = vmatprep.mubr.msk.bf16.mxu0 %vm674_vm0, %v2587_v47  ;;  %2169 = vmatprep.mubr.msk.bf16.mxu1 %vm674_vm0, %v2632_v48 }
  0x77   : > { %875 = vmatmul.mubr.bf16.gmra.mrb[32].mxu0 %v2589_v49  ;;  %1003 = vmatmul.mubr.bf16.gmra.mrb[32].mxu1 %v2634_v50 }
  0x78   : > { %2154 = vmatprep.mubr.msk.bf16.mxu0 %vm674_vm0, %v2593_v51  ;;  %2170 = vmatprep.mubr.msk.bf16.mxu1 %vm674_vm0, %v2635_v52 }
  0x7f   : > { %883 = vmatmul.mubr.bf16.gmra.mrb[36].mxu0 %v2595_v53  ;;  %1011 = vmatmul.mubr.bf16.gmra.mrb[36].mxu1 %v2637_v54 }
  0x80   : > { %2155 = vmatprep.mubr.msk.bf16.mxu0 %vm674_vm0, %v2599_v55  ;;  %2171 = vmatprep.mubr.msk.bf16.mxu1 %vm674_vm0, %v2638_v56 }
  0x87   : > { %891 = vmatmul.mubr.bf16.gmra.mrb[40].mxu0 %v2601_v57  ;;  %1019 = vmatmul.mubr.bf16.gmra.mrb[40].mxu1 %v2640_v58 }
  0x88   : > { %2156 = vmatprep.mubr.msk.bf16.mxu0 %vm674_vm0, %v2605_v59  ;;  %2172 = vmatprep.mubr.msk.bf16.mxu1 %vm674_vm0, %v2641_v60 }
  0x8f   : > { %899 = vmatmul.mubr.bf16.gmra.mrb[44].mxu0 %v2607_v61  ;;  %1027 = vmatmul.mubr.bf16.gmra.mrb[44].mxu1 %v2643_v62 }
  0x90   : > { %2157 = vmatprep.mubr.msk.bf16.mxu0 %vm674_vm0, %v2611_v63  ;;  %2173 = vmatprep.mubr.msk.bf16.mxu1 %vm674_vm0, %v2644_v0 }
  0x97   : > { %907 = vmatmul.mubr.bf16.gmra.mrb[48].mxu0 %v2613_v1  ;;  %1035 = vmatmul.mubr.bf16.gmra.mrb[48].mxu1 %v2646_v2 }
  0x98   : > { %2158 = vmatprep.mubr.msk.bf16.mxu0 %vm674_vm0, %v2617_v3  ;;  %2174 = vmatprep.mubr.msk.bf16.mxu1 %vm674_vm0, %v2647_v4 }
  0x9f   : > { %915 = vmatmul.mubr.bf16.gmra.mrb[52].mxu0 %v2619_v5  ;;  %1043 = vmatmul.mubr.bf16.gmra.mrb[52].mxu1 %v2649_v6 }
  0xa0   : > { %2159 = vmatprep.mubr.msk.bf16.mxu0 %vm674_vm0, %v2623_v7  ;;  %2175 = vmatprep.mubr.msk.bf16.mxu1 %vm674_vm0, %v2650_v8 }
  0xa7   : > { %923 = vmatmul.mubr.bf16.gmra.mrb[56].mxu0 %v2625_v9  ;;  %1051 = vmatmul.mubr.bf16.gmra.mrb[56].mxu1 %v2652_v10 }
  0xa8   : > { %2160 = vmatprep.mubr.msk.bf16.mxu0 %vm674_vm0, %v2629_v11  ;;  %2176 = vmatprep.mubr.msk.bf16.mxu1 %vm674_vm0, %v2653_v12 }
  0xaf   : > { %931 = vmatmul.mubr.bf16.gmra.mrb[60].mxu0 %v2631_v13  ;;  %1059 = vmatmul.mubr.bf16.gmra.mrb[60].mxu1 %v2655_v14 }
 0x10a   : > { %v812_v15 = vpop.f32.mrb[0].mxu0  ;;  %v2985_v16 = vpop.f32.mrb[0].mxu1 }
 0x10b   : > { %v814_v17 = vpop.f32.mrb[1].mxu0  ;;  %v942_v18 = vpop.f32.mrb[1].mxu1  ;;  %v1207_v19 = vmul.f32 %v812_v15, %v812_v15 }
 0x10c   : > { %v815_v20 = vpop.f32.mrb[2].mxu0  ;;  %v2987_v21 = vpop.f32.mrb[2].mxu1 }
 0x10d   : > { %v1067_v22 = vpack.c.bf16 %v815_v20, %v812_v15  ;;  %v1135_v23 = vadd.f32 %v815_v20, %v812_v15  ;;  %v1208_v24 = vmul.f32 %v815_v20, %v815_v20  ;;  %v817_v25 = vpop.f32.mrb[3].mxu0  ;;  %v1083_v26 = vpack.c.bf16 %v2987_v21, %v2985_v16  ;;  %v945_v27 = vpop.f32.mrb[3].mxu1 }
 0x10f   : > { %1102 = vst [vmem:[#allocation2] sm:$0xff] %v1067_v22  ;;  %v1271_v28 = vadd.f32 %v1208_v24, %v1207_v19  ;;  %1118 = vst [vmem:[#allocation2 + $0x80] sm:$0xff] %v1083_v26 }
 0x112   : > { %v820_v29 = vpop.f32.mrb[4].mxu0  ;;  %v2991_v30 = vpop.f32.mrb[4].mxu1 }
 0x113   : > { %v1136_v31 = vadd.f32 %v1135_v23, %v820_v29  ;;  %v1209_v32 = vmul.f32 %v820_v29, %v820_v29  ;;  %v822_v33 = vpop.f32.mrb[5].mxu0  ;;  %v950_v34 = vpop.f32.mrb[5].mxu1 }
 0x114   : > { %v823_v35 = vpop.f32.mrb[6].mxu0  ;;  %v2993_v36 = vpop.f32.mrb[6].mxu1 }
 0x115   : > { %v1272_v37 = vadd.f32 %v1271_v28, %v1209_v32  ;;  %v1068_v38 = vpack.c.bf16 %v823_v35, %v820_v29  ;;  %v1137_v39 = vadd.f32 %v1136_v31, %v823_v35  ;;  %v1210_v40 = vmul.f32 %v823_v35, %v823_v35  ;;  %v825_v41 = vpop.f32.mrb[7].mxu0  ;;  %v953_v42 = vpop.f32.mrb[7].mxu1 }
 0x116   : > { %v1084_v43 = vpack.c.bf16 %v2993_v36, %v2991_v30 }
 0x117   : > { %1103 = vst [vmem:[#allocation2 + $0x8] sm:$0xff] %v1068_v38  ;;  %v1273_v44 = vadd.f32 %v1272_v37, %v1210_v40 }
 0x118   : > { %1119 = vst [vmem:[#allocation2 + $0x88] sm:$0xff] %v1084_v43 }
 0x11a   : > { %v828_v45 = vpop.f32.mrb[8].mxu0  ;;  %v2997_v46 = vpop.f32.mrb[8].mxu1 }
 0x11b   : > { %v1138_v47 = vadd.f32 %v1137_v39, %v828_v45  ;;  %v1211_v48 = vmul.f32 %v828_v45, %v828_v45  ;;  %v830_v49 = vpop.f32.mrb[9].mxu0  ;;  %v958_v50 = vpop.f32.mrb[9].mxu1 }
 0x11c   : > { %v831_v51 = vpop.f32.mrb[10].mxu0  ;;  %v2999_v52 = vpop.f32.mrb[10].mxu1 }
 0x11d   : > { %v1274_v53 = vadd.f32 %v1273_v44, %v1211_v48  ;;  %v1069_v54 = vpack.c.bf16 %v831_v51, %v828_v45  ;;  %v1139_v55 = vadd.f32 %v1138_v47, %v831_v51  ;;  %v1212_v56 = vmul.f32 %v831_v51, %v831_v51  ;;  %v833_v57 = vpop.f32.mrb[11].mxu0  ;;  %v961_v58 = vpop.f32.mrb[11].mxu1 }
 0x11e   : > { %v1085_v59 = vpack.c.bf16 %v2999_v52, %v2997_v46 }
 0x11f   : > { %1104 = vst [vmem:[#allocation2 + $0x10] sm:$0xff] %v1069_v54  ;;  %v1275_v60 = vadd.f32 %v1274_v53, %v1212_v56 }
 0x120   : > { %1120 = vst [vmem:[#allocation2 + $0x90] sm:$0xff] %v1085_v59 }
 0x122   : > { %v836_v61 = vpop.f32.mrb[12].mxu0  ;;  %v3003_v62 = vpop.f32.mrb[12].mxu1 }
 0x123   : > { %v1140_v63 = vadd.f32 %v1139_v55, %v836_v61  ;;  %v1213_v0 = vmul.f32 %v836_v61, %v836_v61  ;;  %v838_v1 = vpop.f32.mrb[13].mxu0  ;;  %v966_v2 = vpop.f32.mrb[13].mxu1 }
 0x124   : > { %v839_v3 = vpop.f32.mrb[14].mxu0  ;;  %v3005_v4 = vpop.f32.mrb[14].mxu1 }
 0x125   : > { %v1276_v5 = vadd.f32 %v1275_v60, %v1213_v0  ;;  %v1070_v6 = vpack.c.bf16 %v839_v3, %v836_v61  ;;  %v1141_v7 = vadd.f32 %v1140_v63, %v839_v3  ;;  %v1214_v8 = vmul.f32 %v839_v3, %v839_v3  ;;  %v841_v9 = vpop.f32.mrb[15].mxu0  ;;  %v969_v10 = vpop.f32.mrb[15].mxu1 }
 0x126   : > { %v1086_v11 = vpack.c.bf16 %v3005_v4, %v3003_v62 }
 0x127   : > { %1105 = vst [vmem:[#allocation2 + $0x18] sm:$0xff] %v1070_v6  ;;  %v1277_v12 = vadd.f32 %v1276_v5, %v1214_v8 }
 0x128   : > { %1121 = vst [vmem:[#allocation2 + $0x98] sm:$0xff] %v1086_v11 }
 0x12a   : > { %v844_v13 = vpop.f32.mrb[16].mxu0  ;;  %v3009_v14 = vpop.f32.mrb[16].mxu1 }
 0x12b   : > { %v1142_v15 = vadd.f32 %v1141_v7, %v844_v13  ;;  %v1215_v17 = vmul.f32 %v844_v13, %v844_v13  ;;  %v846_v18 = vpop.f32.mrb[17].mxu0  ;;  %v974_v19 = vpop.f32.mrb[17].mxu1 }
 0x12c   : > { %v847_v20 = vpop.f32.mrb[18].mxu0  ;;  %v3011_v22 = vpop.f32.mrb[18].mxu1 }
 0x12d   : > { %v1278_v23 = vadd.f32 %v1277_v12, %v1215_v17  ;;  %v1071_v24 = vpack.c.bf16 %v847_v20, %v844_v13  ;;  %v1143_v25 = vadd.f32 %v1142_v15, %v847_v20  ;;  %v1216_v26 = vmul.f32 %v847_v20, %v847_v20  ;;  %v849_v27 = vpop.f32.mrb[19].mxu0  ;;  %v977_v28 = vpop.f32.mrb[19].mxu1 }
 0x12e   : > { %v1087_v29 = vpack.c.bf16 %v3011_v22, %v3009_v14 }
 0x12f   : > { %1106 = vst [vmem:[#allocation2 + $0x20] sm:$0xff] %v1071_v24  ;;  %v1279_v31 = vadd.f32 %v1278_v23, %v1216_v26 }
 0x130   : > { %1122 = vst [vmem:[#allocation2 + $0xa0] sm:$0xff] %v1087_v29 }
 0x132   : > { %v852_v32 = vpop.f32.mrb[20].mxu0  ;;  %v3015_v33 = vpop.f32.mrb[20].mxu1 }
 0x133   : > { %v1144_v34 = vadd.f32 %v1143_v25, %v852_v32  ;;  %v1217_v35 = vmul.f32 %v852_v32, %v852_v32  ;;  %v854_v37 = vpop.f32.mrb[21].mxu0  ;;  %v982_v38 = vpop.f32.mrb[21].mxu1  ;;  %v2684_v25 = vmov 0.0  }
 0x134   : > { %v855_v39 = vpop.f32.mrb[22].mxu0  ;;  %v3017_v40 = vpop.f32.mrb[22].mxu1  ;;  %244 = vst [vmem:[#allocation3] sm:$0x1] %v2684_v25  ;;  %245 = vst [vmem:[#allocation4] sm:$0x1] %v2684_v25 }
 0x135   : > { %v1280_v41 = vadd.f32 %v1279_v31, %v1217_v35  ;;  %v1072_v42 = vpack.c.bf16 %v855_v39, %v852_v32  ;;  %v1145_v43 = vadd.f32 %v1144_v34, %v855_v39  ;;  %v1218_v44 = vmul.f32 %v855_v39, %v855_v39  ;;  %v857_v45 = vpop.f32.mrb[23].mxu0  ;;  %v985_v47 = vpop.f32.mrb[23].mxu1 }
 0x136   : > { %v1088_v48 = vpack.c.bf16 %v3017_v40, %v3015_v33 }
 0x137   : > { %1107 = vst [vmem:[#allocation2 + $0x28] sm:$0xff] %v1072_v42  ;;  %v1281_v49 = vadd.f32 %v1280_v41, %v1218_v44 }
 0x138   : > { %1123 = vst [vmem:[#allocation2 + $0xa8] sm:$0xff] %v1088_v48 }
 0x13a   : > { %v860_v50 = vpop.f32.mrb[24].mxu0  ;;  %v3021_v51 = vpop.f32.mrb[24].mxu1 }
 0x13b   : > { %v1146_v53 = vadd.f32 %v1145_v43, %v860_v50  ;;  %v1219_v54 = vmul.f32 %v860_v50, %v860_v50  ;;  %v862_v55 = vpop.f32.mrb[25].mxu0  ;;  %v990_v56 = vpop.f32.mrb[25].mxu1 }
 0x13c   : > { %v863_v57 = vpop.f32.mrb[26].mxu0  ;;  %v3023_v58 = vpop.f32.mrb[26].mxu1 }
 0x13d   : > { %v1282_v59 = vadd.f32 %v1281_v49, %v1219_v54  ;;  %v1073_v60 = vpack.c.bf16 %v863_v57, %v860_v50  ;;  %v1147_v61 = vadd.f32 %v1146_v53, %v863_v57  ;;  %v1220_v63 = vmul.f32 %v863_v57, %v863_v57  ;;  %v865_v0 = vpop.f32.mrb[27].mxu0  ;;  %v993_v1 = vpop.f32.mrb[27].mxu1 }
 0x13e   : > { %v1089_v2 = vpack.c.bf16 %v3023_v58, %v3021_v51 }
 0x13f   : > { %1108 = vst [vmem:[#allocation2 + $0x30] sm:$0xff] %v1073_v60  ;;  %v1283_v3 = vadd.f32 %v1282_v59, %v1220_v63 }
 0x140   : > { %1124 = vst [vmem:[#allocation2 + $0xb0] sm:$0xff] %v1089_v2 }
 0x142   : > { %v868_v5 = vpop.f32.mrb[28].mxu0  ;;  %v3027_v6 = vpop.f32.mrb[28].mxu1 }
 0x143   : > { %v1148_v7 = vadd.f32 %v1147_v61, %v868_v5  ;;  %v1221_v8 = vmul.f32 %v868_v5, %v868_v5  ;;  %v870_v9 = vpop.f32.mrb[29].mxu0  ;;  %v998_v10 = vpop.f32.mrb[29].mxu1 }
 0x144   : > { %v871_v11 = vpop.f32.mrb[30].mxu0  ;;  %v3029_v12 = vpop.f32.mrb[30].mxu1 }
 0x145   : > { %v1284_v13 = vadd.f32 %v1283_v3, %v1221_v8  ;;  %v1074_v15 = vpack.c.bf16 %v871_v11, %v868_v5  ;;  %v1149_v17 = vadd.f32 %v1148_v7, %v871_v11  ;;  %v1222_v18 = vmul.f32 %v871_v11, %v871_v11  ;;  %v873_v19 = vpop.f32.mrb[31].mxu0  ;;  %v1001_v20 = vpop.f32.mrb[31].mxu1 }
 0x146   : > { %v1090_v23 = vpack.c.bf16 %v3029_v12, %v3027_v6 }
 0x147   : > { %1109 = vst [vmem:[#allocation2 + $0x38] sm:$0xff] %v1074_v15  ;;  %v1285_v24 = vadd.f32 %v1284_v13, %v1222_v18 }
 0x148   : > { %1125 = vst [vmem:[#allocation2 + $0xb8] sm:$0xff] %v1090_v23 }
 0x14a   : > { %v876_v26 = vpop.f32.mrb[32].mxu0  ;;  %v3033_v27 = vpop.f32.mrb[32].mxu1 }
 0x14b   : > { %v1150_v28 = vadd.f32 %v1149_v17, %v876_v26  ;;  %v1223_v29 = vmul.f32 %v876_v26, %v876_v26  ;;  %v878_v31 = vpop.f32.mrb[33].mxu0  ;;  %v1006_v32 = vpop.f32.mrb[33].mxu1 }
 0x14c   : > { %v879_v34 = vpop.f32.mrb[34].mxu0  ;;  %v3035_v35 = vpop.f32.mrb[34].mxu1 }
 0x14d   : > { %v1286_v37 = vadd.f32 %v1285_v24, %v1223_v29  ;;  %v1075_v38 = vpack.c.bf16 %v879_v34, %v876_v26  ;;  %v1151_v39 = vadd.f32 %v1150_v28, %v879_v34  ;;  %v1224_v41 = vmul.f32 %v879_v34, %v879_v34  ;;  %v881_v42 = vpop.f32.mrb[35].mxu0  ;;  %v1009_v43 = vpop.f32.mrb[35].mxu1 }
 0x14e   : > { %v1091_v44 = vpack.c.bf16 %v3035_v35, %v3033_v27 }
 0x14f   : > { %1110 = vst [vmem:[#allocation2 + $0x40] sm:$0xff] %v1075_v38  ;;  %v1287_v45 = vadd.f32 %v1286_v37, %v1224_v41 }
 0x150   : > { %1126 = vst [vmem:[#allocation2 + $0xc0] sm:$0xff] %v1091_v44 }
 0x152   : > { %v884_v47 = vpop.f32.mrb[36].mxu0  ;;  %v3039_v48 = vpop.f32.mrb[36].mxu1 }
 0x153   : > { %v1152_v49 = vadd.f32 %v1151_v39, %v884_v47  ;;  %v1225_v50 = vmul.f32 %v884_v47, %v884_v47  ;;  %v886_v53 = vpop.f32.mrb[37].mxu0  ;;  %v1014_v54 = vpop.f32.mrb[37].mxu1 }
 0x154   : > { %v887_v55 = vpop.f32.mrb[38].mxu0  ;;  %v3041_v56 = vpop.f32.mrb[38].mxu1 }
 0x155   : > { %v1288_v57 = vadd.f32 %v1287_v45, %v1225_v50  ;;  %v1076_v59 = vpack.c.bf16 %v887_v55, %v884_v47  ;;  %v1153_v60 = vadd.f32 %v1152_v49, %v887_v55  ;;  %v1226_v61 = vmul.f32 %v887_v55, %v887_v55  ;;  %v889_v63 = vpop.f32.mrb[39].mxu0  ;;  %v1017_v0 = vpop.f32.mrb[39].mxu1 }
 0x156   : > { %v1092_v1 = vpack.c.bf16 %v3041_v56, %v3039_v48 }
 0x157   : > { %1111 = vst [vmem:[#allocation2 + $0x48] sm:$0xff] %v1076_v59  ;;  %v1289_v2 = vadd.f32 %v1288_v57, %v1226_v61 }
 0x158   : > { %1127 = vst [vmem:[#allocation2 + $0xc8] sm:$0xff] %v1092_v1 }
 0x15a   : > { %v892_v3 = vpop.f32.mrb[40].mxu0  ;;  %v3045_v5 = vpop.f32.mrb[40].mxu1 }
 0x15b   : > { %v1154_v7 = vadd.f32 %v1153_v60, %v892_v3  ;;  %v1227_v8 = vmul.f32 %v892_v3, %v892_v3  ;;  %v894_v9 = vpop.f32.mrb[41].mxu0  ;;  %v1022_v10 = vpop.f32.mrb[41].mxu1 }
 0x15c   : > { %v895_v11 = vpop.f32.mrb[42].mxu0  ;;  %v3047_v13 = vpop.f32.mrb[42].mxu1 }
 0x15d   : > { %v1290_v15 = vadd.f32 %v1289_v2, %v1227_v8  ;;  %v1077_v17 = vpack.c.bf16 %v895_v11, %v892_v3  ;;  %v1155_v18 = vadd.f32 %v1154_v7, %v895_v11  ;;  %v1228_v19 = vmul.f32 %v895_v11, %v895_v11  ;;  %v897_v20 = vpop.f32.mrb[43].mxu0  ;;  %v1025_v23 = vpop.f32.mrb[43].mxu1 }
 0x15e   : > { %v1093_v24 = vpack.c.bf16 %v3047_v13, %v3045_v5 }
 0x15f   : > { %1112 = vst [vmem:[#allocation2 + $0x50] sm:$0xff] %v1077_v17  ;;  %v1291_v25 = vadd.f32 %v1290_v15, %v1228_v19 }
 0x160   : > { %1128 = vst [vmem:[#allocation2 + $0xd0] sm:$0xff] %v1093_v24 }
 0x162   : > { %v900_v26 = vpop.f32.mrb[44].mxu0  ;;  %v3051_v28 = vpop.f32.mrb[44].mxu1 }
 0x163   : > { %v1156_v29 = vadd.f32 %v1155_v18, %v900_v26  ;;  %v1229_v31 = vmul.f32 %v900_v26, %v900_v26  ;;  %v902_v32 = vpop.f32.mrb[45].mxu0  ;;  %v1030_v34 = vpop.f32.mrb[45].mxu1 }
 0x164   : > { %v903_v37 = vpop.f32.mrb[46].mxu0  ;;  %v3053_v38 = vpop.f32.mrb[46].mxu1 }
 0x165   : > { %v1292_v39 = vadd.f32 %v1291_v25, %v1229_v31  ;;  %v1078_v41 = vpack.c.bf16 %v903_v37, %v900_v26  ;;  %v1157_v42 = vadd.f32 %v1156_v29, %v903_v37  ;;  %v1230_v43 = vmul.f32 %v903_v37, %v903_v37  ;;  %v905_v44 = vpop.f32.mrb[47].mxu0  ;;  %v1033_v45 = vpop.f32.mrb[47].mxu1 }
 0x166   : > { %v1094_v47 = vpack.c.bf16 %v3053_v38, %v3051_v28 }
 0x167   : > { %1113 = vst [vmem:[#allocation2 + $0x58] sm:$0xff] %v1078_v41  ;;  %v1293_v49 = vadd.f32 %v1292_v39, %v1230_v43 }
 0x168   : > { %1129 = vst [vmem:[#allocation2 + $0xd8] sm:$0xff] %v1094_v47 }
 0x16a   : > { %v908_v50 = vpop.f32.mrb[48].mxu0  ;;  %v3057_v53 = vpop.f32.mrb[48].mxu1 }
 0x16b   : > { %v1158_v54 = vadd.f32 %v1157_v42, %v908_v50  ;;  %v1231_v55 = vmul.f32 %v908_v50, %v908_v50  ;;  %v910_v57 = vpop.f32.mrb[49].mxu0  ;;  %v1038_v59 = vpop.f32.mrb[49].mxu1 }
 0x16c   : > { %v911_v60 = vpop.f32.mrb[50].mxu0  ;;  %v3059_v61 = vpop.f32.mrb[50].mxu1 }
 0x16d   : > { %v1294_v63 = vadd.f32 %v1293_v49, %v1231_v55  ;;  %v1079_v0 = vpack.c.bf16 %v911_v60, %v908_v50  ;;  %v1159_v1 = vadd.f32 %v1158_v54, %v911_v60  ;;  %v1232_v2 = vmul.f32 %v911_v60, %v911_v60  ;;  %v913_v3 = vpop.f32.mrb[51].mxu0  ;;  %v1041_v7 = vpop.f32.mrb[51].mxu1 }
 0x16e   : > { %v1095_v8 = vpack.c.bf16 %v3059_v61, %v3057_v53 }
 0x16f   : > { %1114 = vst [vmem:[#allocation2 + $0x60] sm:$0xff] %v1079_v0  ;;  %v1295_v9 = vadd.f32 %v1294_v63, %v1232_v2 }
 0x170   : > { %1130 = vst [vmem:[#allocation2 + $0xe0] sm:$0xff] %v1095_v8 }
 0x172   : > { %v916_v10 = vpop.f32.mrb[52].mxu0  ;;  %v3063_v11 = vpop.f32.mrb[52].mxu1 }
 0x173   : > { %v1160_v15 = vadd.f32 %v1159_v1, %v916_v10  ;;  %v1233_v17 = vmul.f32 %v916_v10, %v916_v10  ;;  %v918_v18 = vpop.f32.mrb[53].mxu0  ;;  %v1046_v19 = vpop.f32.mrb[53].mxu1 }
 0x174   : > { %v919_v20 = vpop.f32.mrb[54].mxu0  ;;  %v3065_v23 = vpop.f32.mrb[54].mxu1 }
 0x175   : > { %v1296_v24 = vadd.f32 %v1295_v9, %v1233_v17  ;;  %v1080_v25 = vpack.c.bf16 %v919_v20, %v916_v10  ;;  %v1161_v26 = vadd.f32 %v1160_v15, %v919_v20  ;;  %v1234_v29 = vmul.f32 %v919_v20, %v919_v20  ;;  %v921_v31 = vpop.f32.mrb[55].mxu0  ;;  %v1049_v32 = vpop.f32.mrb[55].mxu1 }
 0x176   : > { %v1096_v34 = vpack.c.bf16 %v3065_v23, %v3063_v11 }
 0x177   : > { %1115 = vst [vmem:[#allocation2 + $0x68] sm:$0xff] %v1080_v25  ;;  %v1297_v37 = vadd.f32 %v1296_v24, %v1234_v29  ;;  %v1239_v29 = vmul.f32 %v2985_v16, %v2985_v16 }
 0x178   : > { %1131 = vst [vmem:[#allocation2 + $0xe8] sm:$0xff] %v1096_v34  ;;  %v1240_v34 = vmul.f32 %v2987_v21, %v2987_v21 }
 0x17a   : > { %v924_v39 = vpop.f32.mrb[56].mxu0  ;;  %v3069_v41 = vpop.f32.mrb[56].mxu1 }
 0x17b   : > { %v1162_v42 = vadd.f32 %v1161_v26, %v924_v39  ;;  %v1235_v43 = vmul.f32 %v924_v39, %v924_v39  ;;  %v926_v44 = vpop.f32.mrb[57].mxu0  ;;  %v1054_v45 = vpop.f32.mrb[57].mxu1 }
 0x17c   : > { %v927_v47 = vpop.f32.mrb[58].mxu0  ;;  %v3071_v49 = vpop.f32.mrb[58].mxu1  ;;  %v1242_v45 = vmul.f32 %v2993_v36, %v2993_v36 }
 0x17d   : > { %v1298_v50 = vadd.f32 %v1297_v37, %v1235_v43  ;;  %v1081_v54 = vpack.c.bf16 %v927_v47, %v924_v39  ;;  %v1163_v55 = vadd.f32 %v1162_v42, %v927_v47  ;;  %v1236_v57 = vmul.f32 %v927_v47, %v927_v47  ;;  %v929_v59 = vpop.f32.mrb[59].mxu0  ;;  %v1057_v60 = vpop.f32.mrb[59].mxu1 }
 0x17e   : > { %v1097_v63 = vpack.c.bf16 %v3071_v49, %v3069_v41  ;;  %v1241_v42 = vmul.f32 %v2991_v30, %v2991_v30 }
 0x17f   : > { %1116 = vst [vmem:[#allocation2 + $0x70] sm:$0xff] %v1081_v54  ;;  %v1299_v0 = vadd.f32 %v1298_v50, %v1236_v57  ;;  %v1243_v50 = vmul.f32 %v2997_v46, %v2997_v46 }
 0x180   : > { %1132 = vst [vmem:[#allocation2 + $0xf0] sm:$0xff] %v1097_v63 }
 0x182   : > { %v932_v1 = vpop.f32.mrb[60].mxu0  ;;  %v3075_v2 = vpop.f32.mrb[60].mxu1 }
 0x183   : > { %v1164_v3 = vadd.f32 %v1163_v55, %v932_v1  ;;  %v1237_v7 = vmul.f32 %v932_v1, %v932_v1  ;;  %v934_v8 = vpop.f32.mrb[61].mxu0  ;;  %v1062_v9 = vpop.f32.mrb[61].mxu1 }
 0x184   : > { %v935_v10 = vpop.f32.mrb[62].mxu0  ;;  %v3077_v15 = vpop.f32.mrb[62].mxu1 }
 0x185   : > { %v1300_v17 = vadd.f32 %v1299_v0, %v1237_v7  ;;  %v1082_v18 = vpack.c.bf16 %v935_v10, %v932_v1  ;;  %v1165_v19 = vadd.f32 %v1164_v3, %v935_v10  ;;  %v1238_v20 = vmul.f32 %v935_v10, %v935_v10  ;;  %v937_v24 = vpop.f32.mrb[63].mxu0  ;;  %v1065_v25 = vpop.f32.mrb[63].mxu1 }
 0x186   : > { %v1098_v26 = vpack.c.bf16 %v3077_v15, %v3075_v2 }
 0x187   : > { %1117 = vst [vmem:[#allocation2 + $0x78] sm:$0xff] %v1082_v18  ;;  %v1166_v31 = vadd.f32 %v1165_v19, %v2985_v16  ;;  %v1301_v32 = vadd.f32 %v1300_v17, %v1238_v20 }
 0x188   : > { %1133 = vst [vmem:[#allocation2 + $0xf8] sm:$0xff] %v1098_v26 }
 0x189   : > { %v1167_v37 = vadd.f32 %v1166_v31, %v2987_v21  ;;  %v1302_v39 = vadd.f32 %v1301_v32, %v1239_v29  ;;  %v1244_v21 = vmul.f32 %v2999_v52, %v2999_v52 }
 0x18b   : > { %v1168_v43 = vadd.f32 %v1167_v37, %v2991_v30  ;;  %v1303_v44 = vadd.f32 %v1302_v39, %v1240_v34  ;;  %v1245_v30 = vmul.f32 %v3003_v62, %v3003_v62  ;;  %v1255_v37 = vmul.f32 %v3033_v27, %v3033_v27 }
 0x18d   : > { %v1169_v47 = vadd.f32 %v1168_v43, %v2993_v36  ;;  %v1304_v16 = vadd.f32 %v1303_v44, %v1241_v42  ;;  %v1246_v36 = vmul.f32 %v3005_v4, %v3005_v4  ;;  %v1256_v43 = vmul.f32 %v3035_v35, %v3035_v35 }
 0x18f   : > { %v1170_v54 = vadd.f32 %v1169_v47, %v2997_v46  ;;  %v1305_v55 = vadd.f32 %v1304_v16, %v1242_v45  ;;  %v1247_v46 = vmul.f32 %v3009_v14, %v3009_v14  ;;  %v1257_v45 = vmul.f32 %v3039_v48, %v3039_v48 }
 0x190   : > { %v1258_v16 = vmul.f32 %v3041_v56, %v3041_v56 }
 0x191   : > { %v1171_v57 = vadd.f32 %v1170_v54, %v2999_v52  ;;  %v1306_v59 = vadd.f32 %v1305_v55, %v1243_v50  ;;  %v1248_v52 = vmul.f32 %v3011_v22, %v3011_v22  ;;  %v1259_v54 = vmul.f32 %v3045_v5, %v3045_v5 }
 0x193   : > { %v1172_v60 = vadd.f32 %v1171_v57, %v3003_v62  ;;  %v1307_v63 = vadd.f32 %v1306_v59, %v1244_v21  ;;  %v1249_v62 = vmul.f32 %v3015_v33, %v3015_v33  ;;  %v1260_v21 = vmul.f32 %v3047_v13, %v3047_v13 }
 0x194   : > { %v1261_v59 = vmul.f32 %v3051_v28, %v3051_v28 }
 0x195   : > { %v1173_v0 = vadd.f32 %v1172_v60, %v3005_v4  ;;  %v1308_v1 = vadd.f32 %v1307_v63, %v1245_v30  ;;  %v1250_v4 = vmul.f32 %v3017_v40, %v3017_v40  ;;  %v1262_v60 = vmul.f32 %v3053_v38, %v3053_v38 }
 0x197   : > { %v1309_v3 = vadd.f32 %v1308_v1, %v1246_v36  ;;  %v1174_v7 = vadd.f32 %v1173_v0, %v3009_v14  ;;  %v1251_v14 = vmul.f32 %v3021_v51, %v3021_v51  ;;  %v1263_v36 = vmul.f32 %v3057_v53, %v3057_v53 }
 0x198   : > { %v1264_v1 = vmul.f32 %v3059_v61, %v3059_v61 }
 0x199   : > { %v1175_v8 = vadd.f32 %v1174_v7, %v3011_v22  ;;  %v1310_v9 = vadd.f32 %v1309_v3, %v1247_v46  ;;  %v1252_v22 = vmul.f32 %v3023_v58, %v3023_v58  ;;  %v1265_v3 = vmul.f32 %v3063_v11, %v3063_v11 }
 0x19b   : > { %v1176_v10 = vadd.f32 %v1175_v8, %v3015_v33  ;;  %v1311_v17 = vadd.f32 %v1310_v9, %v1248_v52  ;;  %v1253_v33 = vmul.f32 %v3027_v6, %v3027_v6  ;;  %v1266_v52 = vmul.f32 %v3065_v23, %v3065_v23 }
 0x19c   : > { %v1267_v9 = vmul.f32 %v3069_v41, %v3069_v41 }
 0x19d   : > { %v1177_v18 = vadd.f32 %v1176_v10, %v3017_v40  ;;  %v1312_v19 = vadd.f32 %v1311_v17, %v1249_v62  ;;  %v1254_v40 = vmul.f32 %v3029_v12, %v3029_v12  ;;  %v1268_v10 = vmul.f32 %v3071_v49, %v3071_v49 }
 0x19f   : > { %v1178_v20 = vadd.f32 %v1177_v18, %v3021_v51  ;;  %v1313_v24 = vadd.f32 %v1312_v19, %v1250_v4  ;;  %v1270_v19 = vmul.f32 %v3077_v15, %v3077_v15 }
 0x1a1   : > { %v1179_v25 = vadd.f32 %v1178_v20, %v3023_v58  ;;  %v1314_v26 = vadd.f32 %v1313_v24, %v1251_v14 }
 0x1a3   : > { %v1180_v29 = vadd.f32 %v1179_v25, %v3027_v6  ;;  %v1315_v31 = vadd.f32 %v1314_v26, %v1252_v22 }
 0x1a5   : > { %v1181_v32 = vadd.f32 %v1180_v29, %v3029_v12  ;;  %v1316_v34 = vadd.f32 %v1315_v31, %v1253_v33  ;;  %v1134_v31 = vld [vmem:[#allocation3] sm:$0x1] }
 0x1a7   : > { %v1182_v51 = vadd.f32 %v1181_v32, %v3033_v27  ;;  %v1317_v39 = vadd.f32 %v1316_v34, %v1254_v40 }
 0x1a9   : > { %v1318_v58 = vadd.f32 %v1317_v39, %v1255_v37  ;;  %v1183_v42 = vadd.f32 %v1182_v51, %v3035_v35 }
 0x1ab   : > { %v1319_v6 = vadd.f32 %v1318_v58, %v1256_v43  ;;  %v1184_v44 = vadd.f32 %v1183_v42, %v3039_v48 }
 0x1ad   : > { %v1320_v12 = vadd.f32 %v1319_v6, %v1257_v45  ;;  %v1185_v47 = vadd.f32 %v1184_v44, %v3041_v56 }
 0x1af   : > { %v1321_v27 = vadd.f32 %v1320_v12, %v1258_v16  ;;  %v1186_v50 = vadd.f32 %v1185_v47, %v3045_v5 }
 0x1b1   : > { %v1322_v55 = vadd.f32 %v1321_v27, %v1259_v54  ;;  %v1187_v35 = vadd.f32 %v1186_v50, %v3047_v13 }
 0x1b3   : > { %v1323_v57 = vadd.f32 %v1322_v55, %v1260_v21  ;;  %v1188_v48 = vadd.f32 %v1187_v35, %v3051_v28 }
 0x1b5   : > { %v1324_v30 = vadd.f32 %v1323_v57, %v1261_v59  ;;  %v1189_v56 = vadd.f32 %v1188_v48, %v3053_v38 }
 0x1b7   : > { %v1325_v63 = vadd.f32 %v1324_v30, %v1262_v60  ;;  %v1190_v5 = vadd.f32 %v1189_v56, %v3057_v53 }
 0x1b9   : > { %v1326_v0 = vadd.f32 %v1325_v63, %v1263_v36  ;;  %v1191_v13 = vadd.f32 %v1190_v5, %v3059_v61 }
 0x1bb   : > { %v1327_v46 = vadd.f32 %v1326_v0, %v1264_v1  ;;  %v1192_v28 = vadd.f32 %v1191_v13, %v3063_v11  ;;  %v1269_v11 = vmul.f32 %v3075_v2, %v3075_v2 }
 0x1bd   : > { %v1328_v7 = vadd.f32 %v1327_v46, %v1265_v3  ;;  %v1193_v38 = vadd.f32 %v1192_v28, %v3065_v23 }
 0x1bf   : > { %v1329_v8 = vadd.f32 %v1328_v7, %v1266_v52  ;;  %v1194_v53 = vadd.f32 %v1193_v38, %v3069_v41 }
 0x1c1   : > { %v1330_v62 = vadd.f32 %v1329_v8, %v1267_v9  ;;  %v1195_v61 = vadd.f32 %v1194_v53, %v3071_v49 }
 0x1c3   : > { %v1331_v17 = vadd.f32 %v1330_v62, %v1268_v10  ;;  %v1196_v4 = vadd.f32 %v1195_v61, %v3075_v2  ;;  %v1206_v2 = vld [vmem:[#allocation4] sm:$0x1] }
 0x1c5   : > { %v1332_v18 = vadd.f32 %v1331_v17, %v1269_v11  ;;  %v1197_v23 = vadd.f32 %v1196_v4, %v3077_v15 }
 0x1c7   : > { %v1198_v14 = vrot.slane %v1197_v23, 4  ;;  %v1333_v41 = vadd.f32 %v1332_v18, %v1270_v19 }
 0x1c9   : > { %v1199_v20 = vadd.f32 %v1198_v14, %v1197_v23  ;;  %v1334_v24 = vrot.slane %v1333_v41, 4 }
 0x1cb   : > { %v1200_v22 = vrot.slane %v1199_v20, 2  ;;  %v1335_v25 = vadd.f32 %v1334_v24, %v1333_v41 }
 0x1cd   : > { %v1201_v26 = vadd.f32 %v1200_v22, %v1199_v20  ;;  %v1336_v49 = vrot.slane %v1335_v25, 2 }
 0x1cf   : > { %v1202_v33 = vrot.slane %v1201_v26, 1  ;;  %v1337_v29 = vadd.f32 %v1336_v49, %v1335_v25 }
 0x1d1   : > { %v1203_v40 = vadd.f32 %v1202_v33, %v1201_v26  ;;  %v1338_v32 = vrot.slane %v1337_v29, 1 }
 0x1d3   : > { %v1204_v34 = vadd.f32 %v1203_v40, %v1134_v31  ;;  %v1339_v51 = vadd.f32 %v1338_v32, %v1337_v29 }
 0x1d5   : > { %1205 = vst [vmem:[#allocation3] sm:$0x1] %v1204_v34  ;;  %v1340_v37 = vadd.f32 %v1339_v51, %v1206_v2 }
 0x1d7   : > { %1341 = vst [vmem:[#allocation4] sm:$0x1] %v1340_v37 }
 0x1d8 PF: > { %p2177_p5 = scmp.ne.s32.totalorder %s2672_s15, 1 }
 0x1d9   : > { %v3182_v12 = vld [vmem:[#allocation2] sm:$0xff] (!%p2177_p5)  ;;  %v3184_v47 = vld [vmem:[#allocation2 + $0x8] sm:$0xff] (!%p2177_p5)  ;;  %v3186_v16 = vld [vmem:[#allocation2 + $0x10] sm:$0xff] (!%p2177_p5) }
 0x1da   : > { %1345 = sbr.rel (%p2177_p5) target bundleno = 581 (0x245), region = 48  ;;  %v3188_v27 = vld [vmem:[#allocation2 + $0x18] sm:$0xff] (!%p2177_p5)  ;;  %v3190_v50 = vld [vmem:[#allocation2 + $0x20] sm:$0xff] (!%p2177_p5)  ;;  %v3192_v54 = vld [vmem:[#allocation2 + $0x28] sm:$0xff] (!%p2177_p5)  ;;  %v1402_v55 = vunpack.c.l.bf16 (!%p2177_p5), %v3182_v12  ;;  %v1403_v35 = vunpack.c.h.bf16 (!%p2177_p5), %v3182_v12  ;;  %v1404_v21 = vunpack.c.l.bf16 (!%p2177_p5), %v3184_v47  ;;  %v1405_v59 = vunpack.c.h.bf16 (!%p2177_p5), %v3184_v47 }
 0x1db   : > { %v3197_v57 = vld [vmem:[#allocation2 + $0x30] sm:$0xff] (!%p2177_p5)  ;;  %v3199_v48 = vld [vmem:[#allocation2 + $0x38] sm:$0xff] (!%p2177_p5)  ;;  %v1406_v30 = vunpack.c.l.bf16 (!%p2177_p5), %v3186_v16  ;;  %v1407_v56 = vunpack.c.h.bf16 (!%p2177_p5), %v3186_v16  ;;  %v1408_v60 = vunpack.c.l.bf16 (!%p2177_p5), %v3188_v27  ;;  %v3205_v63 = vld [vmem:[#allocation2 + $0x40] sm:$0xff] (!%p2177_p5)  ;;  %v1409_v36 = vunpack.c.h.bf16 (!%p2177_p5), %v3188_v27 }
 0x1dc   : > { %v1350_v15 = vld [vmem:[#allocation3] sm:$0x1] (!%p2177_p5)  ;;  %v3207_v5 = vld [vmem:[#allocation2 + $0x48] sm:$0xff] (!%p2177_p5)  ;;  %v1410_v0 = vunpack.c.l.bf16 (!%p2177_p5), %v3190_v50  ;;  %v1411_v13 = vunpack.c.h.bf16 (!%p2177_p5), %v3190_v50  ;;  %v1412_v1 = vunpack.c.l.bf16 (!%p2177_p5), %v3192_v54  ;;  %v3213_v46 = vld [vmem:[#allocation2 + $0x50] sm:$0xff] (!%p2177_p5)  ;;  %v1413_v3 = vunpack.c.h.bf16 (!%p2177_p5), %v3192_v54 }
 0x1dd   : > { %v3178_v58 = vmul.f32 (!%p2177_p5), 0.001953125, %v1350_v15  ;;  %v3215_v28 = vld [vmem:[#allocation2 + $0x58] sm:$0xff] (!%p2177_p5)  ;;  %v1414_v7 = vunpack.c.l.bf16 (!%p2177_p5), %v3197_v57  ;;  %v1415_v38 = vunpack.c.h.bf16 (!%p2177_p5), %v3197_v57  ;;  %v1416_v52 = vunpack.c.l.bf16 (!%p2177_p5), %v3199_v48  ;;  %v3221_v8 = vld [vmem:[#allocation2 + $0x60] sm:$0xff] (!%p2177_p5)  ;;  %v3223_v53 = vld [vmem:[#allocation2 + $0x68] sm:$0xff] (!%p2177_p5) }
 0x1de   : > { %v1353_v39 = vld [vmem:[#allocation4] sm:$0x1] (!%p2177_p5)  ;;  %v1358_v9 = vld [vmem:[%s3684_s2] sm:$0x1] (!%p2177_p5)  ;;  %v1417_v62 = vunpack.c.h.bf16 (!%p2177_p5), %v3199_v48  ;;  %v1418_v61 = vunpack.c.l.bf16 (!%p2177_p5), %v3205_v63  ;;  %v1419_v10 = vunpack.c.h.bf16 (!%p2177_p5), %v3205_v63  ;;  %v1420_v11 = vunpack.c.l.bf16 (!%p2177_p5), %v3207_v5  ;;  %v3232_v17 = vld [vmem:[#allocation2 + $0x70] sm:$0xff] (!%p2177_p5) }
 0x1df   : > { %v1354_v42 = vmul.f32 (!%p2177_p5), 0.001953125, %v1353_v39  ;;  %v1355_v43 = vmul.f32 (!%p2177_p5), %v3178_v58, %v3178_v58  ;;  %v1421_v4 = vunpack.c.h.bf16 (!%p2177_p5), %v3207_v5  ;;  %v1422_v18 = vunpack.c.l.bf16 (!%p2177_p5), %v3213_v46  ;;  %v3238_v14 = vld [vmem:[#allocation2 + $0x78] sm:$0xff] (!%p2177_p5)  ;;  %v3240_v41 = vld [vmem:[#allocation2 + $0x80] sm:$0xff] (!%p2177_p5)  ;;  %v3246_v49 = vld [vmem:[#allocation2 + $0x88] sm:$0xff] (!%p2177_p5) }
 0x1e0   : > { %v1423_v23 = vunpack.c.h.bf16 (!%p2177_p5), %v3213_v46  ;;  %v3248_v33 = vld [vmem:[#allocation2 + $0x90] sm:$0xff] (!%p2177_p5)  ;;  %v3253_v2 = vld [vmem:[#allocation2 + $0x98] sm:$0xff] (!%p2177_p5)  ;;  %v3255_v34 = vld [vmem:[#allocation2 + $0xa0] sm:$0xff] (!%p2177_p5) }
 0x1e1   : > { %v1356_v6 = vsub.f32 %v1354_v42, %v1355_v43  ;;  %v1363_v51 = vld [vmem:[%s3685_s3] sm:$0x1]  ;;  %v3264_v43 = vld [vmem:[#allocation2 + $0xa8] sm:$0xff]  ;;  %v3272_v37 = vld [vmem:[#allocation2 + $0xb8] sm:$0xff] }
 0x1e2   : > { %v3278_v40 = vld [vmem:[#allocation2 + $0xc0] sm:$0xff]  ;;  %v3285_v31 = vld [vmem:[#allocation2 + $0xd0] sm:$0xff]  ;;  %v3287_v15 = vld [vmem:[#allocation2 + $0xd8] sm:$0xff] }
 0x1e3   : > { %v1357_v44 = vmax.f32 %v1356_v6, 0.0  ;;  %v3293_v25 = vld [vmem:[#allocation2 + $0xe0] sm:$0xff]  ;;  %v3301_v39 = vld [vmem:[#allocation2 + $0xf0] sm:$0xff]  ;;  %v3303_v42 = vld [vmem:[#allocation2 + $0xf8] sm:$0xff] }
 0x1e5   : > { %v1359_v45 = vadd.f32 1e-05, %v1357_v44 }
 0x1e7   : > { %2656 = vrsqrt.f32 %v1359_v45 }
 0x1f1   : > { %v2657_v20 = vpop.eup %2656 }
 0x1f2   : > { %v1361_v29 = vmul.f32 %v2657_v20, %v1358_v9  ;;  %v3270_v20 = vld [vmem:[#allocation2 + $0xb0] sm:$0xff] }
 0x1f4   : > { %1362 = vst [vmem:[#allocation5] sm:$0x1] %v1361_v29  ;;  %v1364_v6 = vmul.f32 %v1361_v29, %v3178_v58  ;;  %v3280_v58 = vld [vmem:[#allocation2 + $0xc8] sm:$0xff] }
 0x1f6   : > { %v1365_v29 = vsub.f32 %v1363_v51, %v1364_v6  ;;  %v3295_v51 = vld [vmem:[#allocation2 + $0xe8] sm:$0xff] }
 0x1f8   : > { %1366 = vst [vmem:[#allocation6] sm:$0x1] %v1365_v29 }
 0x1fb   : > { %v3313_v24 = vld [vmem:[#allocation5] ss:$0 sm:$0xff] }
 0x1fc   : > { %v1473_v6 = vmul.f32 %v3313_v24, %v1402_v55  ;;  %v1474_v9 = vmul.f32 %v3313_v24, %v1403_v35  ;;  %v1475_v45 = vmul.f32 %v3313_v24, %v1404_v21  ;;  %v1476_v32 = vmul.f32 %v3313_v24, %v1405_v59 }
 0x1fd   : > { %v1477_v22 = vmul.f32 %v3313_v24, %v1406_v30  ;;  %v1478_v55 = vmul.f32 %v3313_v24, %v1407_v56  ;;  %v1479_v12 = vmul.f32 %v3313_v24, %v1408_v60  ;;  %v1480_v35 = vmul.f32 %v3313_v24, %v1409_v36 }
 0x1fe   : > { %v1481_v47 = vmul.f32 %v3313_v24, %v1410_v0  ;;  %v1482_v21 = vmul.f32 %v3313_v24, %v1411_v13  ;;  %v1483_v16 = vmul.f32 %v3313_v24, %v1412_v1  ;;  %v1484_v59 = vmul.f32 %v3313_v24, %v1413_v3 }
 0x1ff   : > { %v3355_v30 = vld [vmem:[#allocation6] ss:$0 sm:$0xff]  ;;  %v1485_v27 = vmul.f32 %v3313_v24, %v1414_v7  ;;  %v1486_v50 = vmul.f32 %v3313_v24, %v1415_v38  ;;  %v1487_v56 = vmul.f32 %v3313_v24, %v1416_v52  ;;  %v1488_v54 = vmul.f32 %v3313_v24, %v1417_v62 }
 0x200   : > { %v1544_v60 = vadd.f32 %v3355_v30, %v1473_v6  ;;  %v1545_v36 = vadd.f32 %v3355_v30, %v1474_v9  ;;  %v1546_v0 = vadd.f32 %v3355_v30, %v1475_v45  ;;  %v1547_v13 = vadd.f32 %v3355_v30, %v1476_v32 }
 0x201   : > { %v1548_v57 = vadd.f32 %v3355_v30, %v1477_v22  ;;  %v1549_v1 = vadd.f32 %v3355_v30, %v1478_v55  ;;  %v1550_v3 = vadd.f32 %v3355_v30, %v1479_v12  ;;  %v1551_v7 = vadd.f32 %v3355_v30, %v1480_v35 }
 0x202   : > { %v1608_v38 = vmax.f32 %v1544_v60, 0.0  ;;  %v1609_v48 = vmax.f32 %v1545_v36, 0.0  ;;  %v1610_v52 = vmax.f32 %v1546_v0, 0.0  ;;  %v1611_v62 = vmax.f32 %v1547_v13, 0.0 }
 0x203   : > { %v1612_v26 = vmax.f32 %v1548_v57, 0.0  ;;  %v1613_v6 = vmax.f32 %v1549_v1, 0.0  ;;  %v1614_v19 = vmax.f32 %v1550_v3, 0.0  ;;  %v1615_v9 = vmax.f32 %v1551_v7, 0.0 }
 0x204   : > { %v2315_v44 = vpack.c.bf16 %v1609_v48, %v1608_v38  ;;  %v2320_v45 = vpack.c.bf16 %v1611_v62, %v1610_v52  ;;  %v1552_v32 = vadd.f32 %v3355_v30, %v1481_v47  ;;  %v1553_v22 = vadd.f32 %v3355_v30, %v1482_v21 }
 0x205   : > { %v2325_v29 = vpack.c.bf16 %v1613_v6, %v1612_v26  ;;  %v2330_v55 = vpack.c.bf16 %v1615_v9, %v1614_v19  ;;  %v1554_v12 = vadd.f32 %v3355_v30, %v1483_v16  ;;  %v1555_v35 = vadd.f32 %v3355_v30, %v1484_v59 }
 0x206   : > { %2316 = vst [vmem:[%s3686_s4] sm:$0xff] %v2315_v44   ;;  %2472 = vst [vmem:[%s3686_s4 + $0x8] sm:$0xff] %v2320_v45   ;;  %v1616_v60 = vmax.f32 %v1552_v32, 0.0  ;;  %v1617_v36 = vmax.f32 %v1553_v22, 0.0  ;;  %v1556_v47 = vadd.f32 %v3355_v30, %v1485_v27  ;;  %v1557_v21 = vadd.f32 %v3355_v30, %v1486_v50 }
 0x207   : > { %2473 = vst [vmem:[%s3686_s4 + $0x10] sm:$0xff] %v2325_v29   ;;  %2474 = vst [vmem:[%s3686_s4 + $0x18] sm:$0xff] %v2330_v55   ;;  %v1618_v19 = vmax.f32 %v1554_v12, 0.0  ;;  %v1619_v26 = vmax.f32 %v1555_v35, 0.0  ;;  %v1558_v44 = vadd.f32 %v3355_v30, %v1487_v56  ;;  %v1559_v16 = vadd.f32 %v3355_v30, %v1488_v54 }
 0x208   : > { %v2335_v59 = vpack.c.bf16 %v1617_v36, %v1616_v60  ;;  %v1620_v0 = vmax.f32 %v1556_v47, 0.0  ;;  %v1621_v13 = vmax.f32 %v1557_v21, 0.0  ;;  %v1489_v27 = vmul.f32 %v3313_v24, %v1418_v61 }
 0x209   : > { %v2340_v50 = vpack.c.bf16 %v1619_v26, %v1618_v19  ;;  %v1622_v57 = vmax.f32 %v1558_v44, 0.0  ;;  %v1623_v29 = vmax.f32 %v1559_v16, 0.0  ;;  %v1490_v1 = vmul.f32 %v3313_v24, %v1419_v10 }
 0x20a   : > { %2475 = vst [vmem:[%s3686_s4 + $0x20] sm:$0xff] %v2335_v59   ;;  %v2345_v56 = vpack.c.bf16 %v1621_v13, %v1620_v0  ;;  %v1560_v54 = vadd.f32 %v3355_v30, %v1489_v27  ;;  %v1491_v3 = vmul.f32 %v3313_v24, %v1420_v11  ;;  %v1492_v61 = vmul.f32 %v3313_v24, %v1421_v4 }
 0x20b   : > { %2476 = vst [vmem:[%s3686_s4 + $0x28] sm:$0xff] %v2340_v50   ;;  %v2350_v63 = vpack.c.bf16 %v1623_v29, %v1622_v57  ;;  %v1561_v10 = vadd.f32 %v3355_v30, %v1490_v1  ;;  %v1493_v7 = vmul.f32 %v3313_v24, %v1422_v18  ;;  %v1494_v38 = vmul.f32 %v3313_v24, %v1423_v23 }
 0x20c   : > { %2477 = vst [vmem:[%s3686_s4 + $0x30] sm:$0xff] %v2345_v56   ;;  %v1624_v5 = vmax.f32 %v1560_v54, 0.0  ;;  %v1562_v11 = vadd.f32 %v3355_v30, %v1491_v3  ;;  %v1563_v4 = vadd.f32 %v3355_v30, %v1492_v61  ;;  %v3687_v48 = vunpack.c.l.bf16 %v3215_v28 }
 0x20d   : > { %2478 = vst [vmem:[%s3686_s4 + $0x38] sm:$0xff] %v2350_v63   ;;  %v1625_v46 = vmax.f32 %v1561_v10, 0.0  ;;  %v1564_v18 = vadd.f32 %v3355_v30, %v1493_v7  ;;  %v1565_v23 = vadd.f32 %v3355_v30, %v1494_v38  ;;  %v3688_v62 = vunpack.c.h.bf16 %v3215_v28 }
 0x20e   : > { %v1495_v52 = vmul.f32 %v3313_v24, %v3687_v48  ;;  %v1626_v9 = vmax.f32 %v1562_v11, 0.0  ;;  %v1627_v45 = vmax.f32 %v1563_v4, 0.0  ;;  %v3689_v22 = vunpack.c.l.bf16 %v3221_v8 }
 0x20f   : > { %v1496_v6 = vmul.f32 %v3313_v24, %v3688_v62  ;;  %v2355_v12 = vpack.c.bf16 %v1625_v46, %v1624_v5  ;;  %v1628_v35 = vmax.f32 %v1564_v18, 0.0  ;;  %v1629_v60 = vmax.f32 %v1565_v23, 0.0 }
 0x210   : > { %v1566_v32 = vadd.f32 %v3355_v30, %v1495_v52  ;;  %v1497_v55 = vmul.f32 %v3313_v24, %v3689_v22  ;;  %v2360_v47 = vpack.c.bf16 %v1627_v45, %v1626_v9  ;;  %v3690_v19 = vunpack.c.h.bf16 %v3221_v8 }
 0x211   : > { %v1567_v36 = vadd.f32 %v3355_v30, %v1496_v6  ;;  %2479 = vst [vmem:[%s3686_s4 + $0x40] sm:$0xff] %v2355_v12   ;;  %v2365_v44 = vpack.c.bf16 %v1629_v60, %v1628_v35  ;;  %v3691_v59 = vunpack.c.l.bf16 %v3223_v53  ;;  %v3692_v13 = vunpack.c.h.bf16 %v3223_v53 }
 0x212   : > { %v1630_v21 = vmax.f32 %v1566_v32, 0.0  ;;  %v1498_v28 = vmul.f32 %v3313_v24, %v3690_v19  ;;  %v1568_v26 = vadd.f32 %v3355_v30, %v1497_v55  ;;  %2480 = vst [vmem:[%s3686_s4 + $0x48] sm:$0xff] %v2360_v47   ;;  %v3693_v57 = vunpack.c.l.bf16 %v3232_v17 }
 0x213   : > { %v1631_v16 = vmax.f32 %v1567_v36, 0.0  ;;  %v1499_v0 = vmul.f32 %v3313_v24, %v3691_v59  ;;  %v1500_v27 = vmul.f32 %v3313_v24, %v3692_v13  ;;  %v3694_v1 = vunpack.c.h.bf16 %v3232_v17  ;;  %2481 = vst [vmem:[%s3686_s4 + $0x50] sm:$0xff] %v2365_v44  }
 0x214   : > { %v1569_v8 = vadd.f32 %v3355_v30, %v1498_v28  ;;  %v1632_v50 = vmax.f32 %v1568_v26, 0.0  ;;  %v1501_v29 = vmul.f32 %v3313_v24, %v3693_v57  ;;  %v3695_v61 = vunpack.c.l.bf16 %v3238_v14 }
 0x215   : > { %v1502_v56 = vmul.f32 %v3313_v24, %v3694_v1  ;;  %v2370_v53 = vpack.c.bf16 %v1631_v16, %v1630_v21  ;;  %v1570_v54 = vadd.f32 %v3355_v30, %v1499_v0  ;;  %v1571_v3 = vadd.f32 %v3355_v30, %v1500_v27 }
 0x216   : > { %v1503_v63 = vmul.f32 %v3313_v24, %v3695_v61  ;;  %v1633_v10 = vmax.f32 %v1569_v8, 0.0  ;;  %v1572_v7 = vadd.f32 %v3355_v30, %v1501_v29  ;;  %v3696_v38 = vunpack.c.h.bf16 %v3238_v14 }
 0x217   : > { %v1573_v17 = vadd.f32 %v3355_v30, %v1502_v56  ;;  %2482 = vst [vmem:[%s3686_s4 + $0x58] sm:$0xff] %v2370_v53   ;;  %v1634_v11 = vmax.f32 %v1570_v54, 0.0  ;;  %v1635_v4 = vmax.f32 %v1571_v3, 0.0  ;;  %v3697_v52 = vunpack.c.l.bf16 %v3240_v41 }
 0x218   : > { %v1504_v5 = vmul.f32 %v3313_v24, %v3696_v38  ;;  %v1574_v48 = vadd.f32 %v3355_v30, %v1503_v63  ;;  %v2375_v18 = vpack.c.bf16 %v1633_v10, %v1632_v50  ;;  %v1636_v23 = vmax.f32 %v1572_v7, 0.0 }
 0x219   : > { %v1505_v46 = vmul.f32 %v3313_v24, %v3697_v52  ;;  %v1637_v62 = vmax.f32 %v1573_v17, 0.0  ;;  %v2380_v14 = vpack.c.bf16 %v1635_v4, %v1634_v11  ;;  %v3698_v45 = vunpack.c.h.bf16 %v3240_v41 }
 0x21a   : > { %v1575_v6 = vadd.f32 %v3355_v30, %v1504_v5  ;;  %v1638_v9 = vmax.f32 %v1574_v48, 0.0  ;;  %2483 = vst [vmem:[%s3686_s4 + $0x60] sm:$0xff] %v2375_v18   ;;  %v3699_v35 = vunpack.c.l.bf16 %v3246_v49  ;;  %v3700_v36 = vunpack.c.h.bf16 %v3246_v49 }
 0x21b   : > { %v1506_v32 = vmul.f32 %v3313_v24, %v3698_v45  ;;  %v1576_v22 = vadd.f32 %v3355_v30, %v1505_v46  ;;  %v2385_v55 = vpack.c.bf16 %v1637_v62, %v1636_v23  ;;  %2484 = vst [vmem:[%s3686_s4 + $0x68] sm:$0xff] %v2380_v14   ;;  %v3701_v19 = vunpack.c.l.bf16 %v3248_v33 }
 0x21c   : > { %v1639_v12 = vmax.f32 %v1575_v6, 0.0  ;;  %v1507_v60 = vmul.f32 %v3313_v24, %v3699_v35  ;;  %v1508_v47 = vmul.f32 %v3313_v24, %v3700_v36  ;;  %v3702_v26 = vunpack.c.h.bf16 %v3248_v33 }
 0x21d   : > { %v1577_v41 = vadd.f32 %v3355_v30, %v1506_v32  ;;  %v1640_v21 = vmax.f32 %v1576_v22, 0.0  ;;  %v1509_v28 = vmul.f32 %v3313_v24, %v3701_v19  ;;  %2485 = vst [vmem:[%s3686_s4 + $0x70] sm:$0xff] %v2385_v55   ;;  %v3703_v0 = vunpack.c.l.bf16 %v3253_v2 }
 0x21e   : > { %v1510_v44 = vmul.f32 %v3313_v24, %v3702_v26  ;;  %v2390_v49 = vpack.c.bf16 %v1639_v12, %v1638_v9  ;;  %v1578_v16 = vadd.f32 %v3355_v30, %v1507_v60  ;;  %v1579_v59 = vadd.f32 %v3355_v30, %v1508_v47 }
 0x21f   : > { %v1511_v13 = vmul.f32 %v3313_v24, %v3703_v0  ;;  %v1641_v27 = vmax.f32 %v1577_v41, 0.0  ;;  %v1580_v8 = vadd.f32 %v3355_v30, %v1509_v28  ;;  %v3704_v50 = vunpack.c.h.bf16 %v3253_v2 }
 0x220   : > { %v1581_v33 = vadd.f32 %v3355_v30, %v1510_v44  ;;  %2486 = vst [vmem:[%s3686_s4 + $0x78] sm:$0xff] %v2390_v49   ;;  %v1642_v29 = vmax.f32 %v1578_v16, 0.0  ;;  %v1643_v1 = vmax.f32 %v1579_v59, 0.0  ;;  %v3705_v53 = vunpack.c.l.bf16 %v3255_v34 }
 0x221   : > { %v1512_v57 = vmul.f32 %v3313_v24, %v3704_v50  ;;  %v1582_v56 = vadd.f32 %v3355_v30, %v1511_v13  ;;  %v2395_v3 = vpack.c.bf16 %v1641_v27, %v1640_v21  ;;  %v1644_v61 = vmax.f32 %v1580_v8, 0.0 }
 0x222   : > { %v1513_v54 = vmul.f32 %v3313_v24, %v3705_v53  ;;  %v1645_v63 = vmax.f32 %v1581_v33, 0.0  ;;  %v2400_v2 = vpack.c.bf16 %v1643_v1, %v1642_v29  ;;  %v3706_v17 = vunpack.c.h.bf16 %v3255_v34 }
 0x223   : > { %v1583_v10 = vadd.f32 %v3355_v30, %v1512_v57  ;;  %v1646_v7 = vmax.f32 %v1582_v56, 0.0  ;;  %2487 = vst [vmem:[%s3686_s4 + $0x80] sm:$0xff] %v2395_v3   ;;  %v3707_v48 = vunpack.c.l.bf16 %v3264_v43  ;;  %v3708_v46 = vunpack.c.h.bf16 %v3264_v43 }
 0x224   : > { %v1514_v38 = vmul.f32 %v3313_v24, %v3706_v17  ;;  %v1584_v5 = vadd.f32 %v3355_v30, %v1513_v54  ;;  %v2405_v11 = vpack.c.bf16 %v1645_v63, %v1644_v61  ;;  %2488 = vst [vmem:[%s3686_s4 + $0x88] sm:$0xff] %v2400_v2   ;;  %v3709_v62 = vunpack.c.l.bf16 %v3270_v20 }
 0x225   : > { %v1647_v4 = vmax.f32 %v1583_v10, 0.0  ;;  %v1515_v52 = vmul.f32 %v3313_v24, %v3707_v48  ;;  %v1516_v18 = vmul.f32 %v3313_v24, %v3708_v46  ;;  %v3710_v14 = vunpack.c.h.bf16 %v3270_v20 }
 0x226   : > { %v1585_v34 = vadd.f32 %v3355_v30, %v1514_v38  ;;  %v1648_v23 = vmax.f32 %v1584_v5, 0.0  ;;  %v1517_v6 = vmul.f32 %v3313_v24, %v3709_v62  ;;  %2489 = vst [vmem:[%s3686_s4 + $0x90] sm:$0xff] %v2405_v11   ;;  %v3711_v22 = vunpack.c.l.bf16 %v3272_v37 }
 0x227   : > { %v1518_v9 = vmul.f32 %v3313_v24, %v3710_v14  ;;  %v2410_v43 = vpack.c.bf16 %v1647_v4, %v1646_v7  ;;  %v1586_v45 = vadd.f32 %v3355_v30, %v1515_v52  ;;  %v1587_v32 = vadd.f32 %v3355_v30, %v1516_v18 }
 0x228   : > { %v1519_v55 = vmul.f32 %v3313_v24, %v3711_v22  ;;  %v1649_v12 = vmax.f32 %v1585_v34, 0.0  ;;  %v1588_v35 = vadd.f32 %v3355_v30, %v1517_v6  ;;  %v3712_v60 = vunpack.c.h.bf16 %v3272_v37 }
 0x229   : > { %v1589_v20 = vadd.f32 %v3355_v30, %v1518_v9  ;;  %2490 = vst [vmem:[%s3686_s4 + $0x98] sm:$0xff] %v2410_v43   ;;  %v1650_v47 = vmax.f32 %v1586_v45, 0.0  ;;  %v1651_v41 = vmax.f32 %v1587_v32, 0.0  ;;  %v3713_v19 = vunpack.c.l.bf16 %v3278_v40 }
 0x22a   : > { %v1520_v36 = vmul.f32 %v3313_v24, %v3712_v60  ;;  %v1590_v21 = vadd.f32 %v3355_v30, %v1519_v55  ;;  %v2415_v26 = vpack.c.bf16 %v1649_v12, %v1648_v23  ;;  %v1652_v44 = vmax.f32 %v1588_v35, 0.0 }
 0x22b   : > { %v1521_v28 = vmul.f32 %v3313_v24, %v3713_v19  ;;  %v1653_v49 = vmax.f32 %v1589_v20, 0.0  ;;  %v2420_v37 = vpack.c.bf16 %v1651_v41, %v1650_v47  ;;  %v3714_v0 = vunpack.c.h.bf16 %v3278_v40 }
 0x22c   : > { %v1591_v16 = vadd.f32 %v3355_v30, %v1520_v36  ;;  %v1654_v59 = vmax.f32 %v1590_v21, 0.0  ;;  %2491 = vst [vmem:[%s3686_s4 + $0xa0] sm:$0xff] %v2415_v26   ;;  %v3715_v50 = vunpack.c.l.bf16 %v3280_v58  ;;  %v3716_v29 = vunpack.c.h.bf16 %v3280_v58 }
 0x22d   : > { %v1522_v13 = vmul.f32 %v3313_v24, %v3714_v0  ;;  %v1592_v27 = vadd.f32 %v3355_v30, %v1521_v28  ;;  %v2425_v8 = vpack.c.bf16 %v1653_v49, %v1652_v44  ;;  %2492 = vst [vmem:[%s3686_s4 + $0xa8] sm:$0xff] %v2420_v37   ;;  %v3717_v53 = vunpack.c.l.bf16 %v3285_v31 }
 0x22e   : > { %v1655_v33 = vmax.f32 %v1591_v16, 0.0  ;;  %v1523_v57 = vmul.f32 %v3313_v24, %v3715_v50  ;;  %v1524_v1 = vmul.f32 %v3313_v24, %v3716_v29  ;;  %v3718_v3 = vunpack.c.h.bf16 %v3285_v31 }
 0x22f   : > { %v1593_v40 = vadd.f32 %v3355_v30, %v1522_v13  ;;  %v1656_v56 = vmax.f32 %v1592_v27, 0.0  ;;  %v1525_v54 = vmul.f32 %v3313_v24, %v3717_v53  ;;  %2493 = vst [vmem:[%s3686_s4 + $0xb0] sm:$0xff] %v2425_v8   ;;  %v3719_v2 = vunpack.c.l.bf16 %v3287_v15 }
 0x230   : > { %v1526_v61 = vmul.f32 %v3313_v24, %v3718_v3  ;;  %v2430_v58 = vpack.c.bf16 %v1655_v33, %v1654_v59  ;;  %v1594_v63 = vadd.f32 %v3355_v30, %v1523_v57  ;;  %v1595_v10 = vadd.f32 %v3355_v30, %v1524_v1 }
 0x231   : > { %v1527_v7 = vmul.f32 %v3313_v24, %v3719_v2  ;;  %v1657_v17 = vmax.f32 %v1593_v40, 0.0  ;;  %v1596_v38 = vadd.f32 %v3355_v30, %v1525_v54  ;;  %v3720_v5 = vunpack.c.h.bf16 %v3287_v15 }
 0x232   : > { %v1597_v31 = vadd.f32 %v3355_v30, %v1526_v61  ;;  %2494 = vst [vmem:[%s3686_s4 + $0xb8] sm:$0xff] %v2430_v58   ;;  %v1658_v4 = vmax.f32 %v1594_v63, 0.0  ;;  %v1659_v48 = vmax.f32 %v1595_v10, 0.0  ;;  %v3721_v46 = vunpack.c.l.bf16 %v3293_v25 }
 0x233   : > { %v1528_v11 = vmul.f32 %v3313_v24, %v3720_v5  ;;  %v1598_v52 = vadd.f32 %v3355_v30, %v1527_v7  ;;  %v2435_v34 = vpack.c.bf16 %v1657_v17, %v1656_v56  ;;  %v1660_v23 = vmax.f32 %v1596_v38, 0.0 }
 0x234   : > { %v1529_v18 = vmul.f32 %v3313_v24, %v3721_v46  ;;  %v1661_v62 = vmax.f32 %v1597_v31, 0.0  ;;  %v2440_v15 = vpack.c.bf16 %v1659_v48, %v1658_v4  ;;  %v3722_v9 = vunpack.c.h.bf16 %v3293_v25 }
 0x235   : > { %v1599_v6 = vadd.f32 %v3355_v30, %v1528_v11  ;;  %v1662_v14 = vmax.f32 %v1598_v52, 0.0  ;;  %2495 = vst [vmem:[%s3686_s4 + $0xc0] sm:$0xff] %v2435_v34   ;;  %v3723_v55 = vunpack.c.l.bf16 %v3295_v51  ;;  %v3724_v35 = vunpack.c.h.bf16 %v3295_v51 }
 0x236   : > { %v1530_v43 = vmul.f32 %v3313_v24, %v3722_v9  ;;  %v1600_v45 = vadd.f32 %v3355_v30, %v1529_v18  ;;  %v2445_v32 = vpack.c.bf16 %v1661_v62, %v1660_v23  ;;  %2496 = vst [vmem:[%s3686_s4 + $0xc8] sm:$0xff] %v2440_v15   ;;  %v3725_v36 = vunpack.c.l.bf16 %v3301_v39 }
 0x237   : > { %v1663_v22 = vmax.f32 %v1599_v6, 0.0  ;;  %v1531_v12 = vmul.f32 %v3313_v24, %v3723_v55  ;;  %v1532_v20 = vmul.f32 %v3313_v24, %v3724_v35  ;;  %v3726_v41 = vunpack.c.h.bf16 %v3301_v39 }
 0x238   : > { %v1601_v25 = vadd.f32 %v3355_v30, %v1530_v43  ;;  %v1664_v60 = vmax.f32 %v1600_v45, 0.0  ;;  %v1533_v47 = vmul.f32 %v3313_v24, %v3725_v36  ;;  %2497 = vst [vmem:[%s3686_s4 + $0xd0] sm:$0xff] %v2445_v32   ;;  %v3727_v26 = vunpack.c.l.bf16 %v3303_v42 }
 0x239   : > { %v1534_v21 = vmul.f32 %v3313_v24, %v3726_v41  ;;  %v2450_v51 = vpack.c.bf16 %v1663_v22, %v1662_v14  ;;  %v1602_v19 = vadd.f32 %v3355_v30, %v1531_v12  ;;  %v1603_v28 = vadd.f32 %v3355_v30, %v1532_v20 }
 0x23a   : > { %v1535_v44 = vmul.f32 %v3313_v24, %v3727_v26  ;;  %v1665_v49 = vmax.f32 %v1601_v25, 0.0  ;;  %v1604_v16 = vadd.f32 %v3355_v30, %v1533_v47  ;;  %v3728_v37 = vunpack.c.h.bf16 %v3303_v42 }
 0x23b   : > { %v1605_v39 = vadd.f32 %v3355_v30, %v1534_v21  ;;  %2498 = vst [vmem:[%s3686_s4 + $0xd8] sm:$0xff] %v2450_v51   ;;  %v1666_v0 = vmax.f32 %v1602_v19, 0.0  ;;  %v1667_v13 = vmax.f32 %v1603_v28, 0.0 }
 0x23c   : > { %v1536_v59 = vmul.f32 %v3313_v24, %v3728_v37  ;;  %v1606_v27 = vadd.f32 %v3355_v30, %v1535_v44  ;;  %v2455_v8 = vpack.c.bf16 %v1665_v49, %v1664_v60  ;;  %v1668_v33 = vmax.f32 %v1604_v16, 0.0 }
 0x23d   : > { %v1669_v50 = vmax.f32 %v1605_v39, 0.0  ;;  %v2460_v29 = vpack.c.bf16 %v1667_v13, %v1666_v0 }
 0x23e   : > { %v1607_v57 = vadd.f32 %v3355_v30, %v1536_v59  ;;  %v1670_v1 = vmax.f32 %v1606_v27, 0.0  ;;  %2499 = vst [vmem:[%s3686_s4 + $0xe0] sm:$0xff] %v2455_v8  }
 0x23f   : > { %v2465_v24 = vpack.c.bf16 %v1669_v50, %v1668_v33  ;;  %2500 = vst [vmem:[%s3686_s4 + $0xe8] sm:$0xff] %v2460_v29  }
 0x240   : > { %v1671_v42 = vmax.f32 %v1607_v57, 0.0 }
 0x241   : > { %2501 = vst [vmem:[%s3686_s4 + $0xf0] sm:$0xff] %v2465_v24  }
 0x242   : > { %v2470_v40 = vpack.c.bf16 %v1671_v42, %v1670_v1 }
 0x244   : > { %2502 = vst [vmem:[%s3686_s4 + $0xf8] sm:$0xff] %v2470_v40  }
 0x245 PF: > { %s14_s17 = sadd.s32 1, %s2680_s17   ;;  %s3729_s15 = smov %s2676_s16 }
 0x246   : > { %p11_p6 = scmp.ge.s32.totalorder %s14_s17, 4   ;;  %s3730_s16 = smov %s3732_s18 }
 0x248   :  { %13 = sbr.rel (!%p11_p6) target bundleno = 2 (0x2), region = 84 }

// kernel: generator_forward.27
= control target key start
LH: loop header
LB: loop body
LE: loop exit
PB: predicated region body
PF: predicated region fallthrough
CT: control target
= control target key end

     0   :  { %s1065_s15 = smov 0   ;;  %s1067_s16 = smov 0   ;;  %s1173_s0 = inlined_call_operand.vmem [shape: bf16[128,72], index: 0, kind: input, shape index: {}]   ;;  %s1174_s1 = inlined_call_operand.vmem [shape: bf16[72,128], index: 1, kind: input, shape index: {}]   ;;  %s1175_s2 = inlined_call_operand.vmem [shape: f32[1,128], index: 2, kind: input, shape index: {}]   ;;  %s1176_s3 = inlined_call_operand.vmem [shape: f32[1,128], index: 3, kind: input, shape index: {}]   ;;  %s1177_s4 = inlined_call_operand.vmem [shape: bf16[128,128], index: 4, kind: output, shape index: {}]  }
   0x1   :  { %s1069_s17 = smov 0  }
   0x2 LB: > { %s26_s18 = sadd.s32 1, %s1033_s16  ;;  %p815_p0 = scmp.ge.s32.totalorder %s1037_s17, 1  ;;  %s1037_s17 = sphi %s1069_s17, %s14_s17   ;;  %s1033_s16 = sphi %s1067_s16, %s1179_s16   ;;  %s1029_s15 = sphi %s1065_s15, %s1178_s15  }
   0x3   : > { %p28_p1 = scmp.ge.s32.totalorder %s26_s18, 2  ;;  %p185_p2 = scmp.lt.s32.totalorder %s1037_s17, 3 }
   0x5   : > { %s1181_s18 = smov (%p28_p1, %s26_s18), 0  ;;  %p186_p3 = pnand %p815_p0, %p185_p2 }
   0x6   : > { %p816_p4 = scmp.ne.s32.totalorder (!%p186_p3), %s1029_s15, 0 }
   0x7   : > { %189 = sbr.rel (%p186_p3) target bundleno = 351 (0x15f), region = 36 }
   0xe   : > { %236 = sbr.rel (%p816_p4) target bundleno = 297 (0x129), region = 40  ;;  %v1000_v0 = vld [vmem:[%s1174_s1] sm:$0xff] (!%p816_p4)   ;;  %v1001_v1 = vld [vmem:[%s1174_s1 + $0x8] sm:$0xff] (!%p816_p4)   ;;  %v1002_v2 = vld [vmem:[%s1174_s1 + $0x10] sm:$0xff] (!%p816_p4)   ;;  %vm335_vm0 = vcmask (!%p816_p4), 588800   ;;  %vm360_vm1 = vcmask (!%p816_p4), 1043456  }
   0xf   : > { %937 = vmatprep.subr.bf16.mxu0 (!%p816_p4), %v1000_v0  ;;  %963 = vmatprep.subr.bf16.mxu1 (!%p816_p4), %v1000_v0  ;;  %v1005_v3 = vld [vmem:[%s1173_s0] sm:$0xff] (!%p816_p4)   ;;  %v1003_v4 = vld [vmem:[%s1174_s1 + $0x18] sm:$0xff] (!%p816_p4)   ;;  %v1006_v8 = vld [vmem:[%s1173_s0 + $0x8] sm:$0xff] (!%p816_p4)   ;;  %v1039_v14 = vmov (!%p816_p4), 0.0  }
  0x10   : > { %938 = vmatpush3.bf16.msra.mxu0 (!%p816_p4), %v1000_v0  ;;  %968 = vmatpush3.bf16.msra.mxu1 (!%p816_p4), %v1000_v0  ;;  %v1009_v5 = vld [vmem:[%s1173_s0 + $0x20] sm:$0xff] (!%p816_p4)   ;;  %v1010_v9 = vld [vmem:[%s1173_s0 + $0x28] sm:$0xff] (!%p816_p4)   ;;  %v1007_v10 = vld [vmem:[%s1173_s0 + $0x10] sm:$0xff] (!%p816_p4)   ;;  %241 = vst [vmem:[#allocation3] sm:$0x1] (!%p816_p4), %v1039_v14 }
  0x11   : > { %939 = vmatprep.subr.bf16.mxu0 (!%p816_p4), %v1001_v1  ;;  %964 = vmatprep.subr.bf16.mxu1 (!%p816_p4), %v1001_v1  ;;  %v1004_v6 = vld [vmem:[%s1174_s1 + $0x20] ss:$0 sps:$4 sm:$0xff] (!%p816_p4)   ;;  %v1011_v11 = vld [vmem:[%s1173_s0 + $0x30] sm:$0xff] (!%p816_p4)   ;;  %v1008_v12 = vld [vmem:[%s1173_s0 + $0x18] sm:$0xff] (!%p816_p4)   ;;  %242 = vst [vmem:[#allocation4] sm:$0x1] (!%p816_p4), %v1039_v14 }
  0x12   : > { %947 = vmatprep.mubr.msk.bf16.mxu0 (!%p816_p4), %vm335_vm0, %v1005_v3  ;;  %955 = vmatprep.mubr.msk.bf16.mxu1 (!%p816_p4), %vm335_vm0, %v1009_v5  ;;  %v362_v7 = vsel (!%p816_p4), %vm360_vm1, %v1004_v6, 0  ;;  %v1012_v13 = vld [vmem:[%s1173_s0 + $0x38] sm:$0xff] (!%p816_p4)  }
  0x14   : > { %940 = vmatpush3.bf16.msra.mxu0 (!%p816_p4), %v1001_v1  ;;  %969 = vmatpush3.bf16.msra.mxu1 (!%p816_p4), %v1001_v1 }
  0x15   : > { %941 = vmatprep.subr.bf16.mxu0 %v1002_v2  ;;  %965 = vmatprep.subr.bf16.mxu1 %v1002_v2 }
  0x18   : > { %942 = vmatpush3.bf16.msra.mxu0 %v1002_v2  ;;  %970 = vmatpush3.bf16.msra.mxu1 %v1002_v2 }
  0x19   : > { %943 = vmatprep.subr.bf16.mxu0 %v1003_v4  ;;  %966 = vmatprep.subr.bf16.mxu1 %v1003_v4 }
  0x1c   : > { %944 = vmatpush3.bf16.msra.mxu0 %v1003_v4  ;;  %971 = vmatpush3.bf16.msra.mxu1 %v1003_v4 }
  0x1d   : > { %973 = vmatprep.subr.msk.bf16.mxu0 %vm360_vm1, %v1004_v6  ;;  %974 = vmatprep.subr.msk.bf16.mxu1 %vm360_vm1, %v1004_v6 }
  0x20   : > { %946 = vmatpush3.bf16.msra.mxu0 %v362_v7  ;;  %972 = vmatpush3.bf16.msra.mxu1 %v362_v7 }
  0x23   : > { %948 = vmatmul.mubr.msk.bf16.vlgmr.msra.gmra.mrb[0].mxu0 %vm335_vm0, %v1006_v8  ;;  %956 = vmatmul.mubr.msk.bf16.vlgmr.msra.gmra.mrb[0].mxu1 %vm335_vm0, %v1010_v9 }
  0x24   : > { %951 = vmatprep.mubr.msk.bf16.mxu0 %vm335_vm0, %v1007_v10  ;;  %959 = vmatprep.mubr.msk.bf16.mxu1 %vm335_vm0, %v1011_v11 }
  0x2b   : > { %952 = vmatmul.mubr.msk.bf16.gmra.mrb[4].mxu0 %vm335_vm0, %v1008_v12  ;;  %960 = vmatmul.mubr.msk.bf16.gmra.mrb[4].mxu1 %vm335_vm0, %v1012_v13 }
  0xf6   : > { %v949_v15 = vpop.f32.mrb[0].mxu0  ;;  %v957_v16 = vpop.f32.mrb[0].mxu1 }
  0xf7   : > { %v398_v17 = vpop.f32.mrb[1].mxu0  ;;  %v430_v18 = vpop.f32.mrb[1].mxu1  ;;  %v507_v30 = vmul.f32 %v949_v15, %v949_v15  ;;  %v515_v2 = vmul.f32 %v957_v16, %v957_v16 }
  0xf8   : > { %v950_v19 = vpop.f32.mrb[2].mxu0  ;;  %v958_v20 = vpop.f32.mrb[2].mxu1  ;;  %v505_v21 = vmul.f32 %v398_v17, %v398_v17  ;;  %v513_v60 = vmul.f32 %v430_v18, %v430_v18 }
  0xf9   : > { %v462_v22 = vpack.c.bf16 %v950_v19, %v949_v15  ;;  %v401_v23 = vpop.f32.mrb[3].mxu0  ;;  %v466_v24 = vpack.c.bf16 %v958_v20, %v957_v16  ;;  %v433_v25 = vpop.f32.mrb[3].mxu1  ;;  %v508_v33 = vmul.f32 %v950_v19, %v950_v19  ;;  %v516_v5 = vmul.f32 %v958_v20, %v958_v20 }
  0xfa   : > { %v461_v26 = vpack.c.bf16 %v401_v23, %v398_v17  ;;  %v481_v27 = vadd.f32 %v401_v23, %v398_v17  ;;  %v506_v28 = vmul.f32 %v401_v23, %v401_v23  ;;  %v465_v29 = vpack.c.bf16 %v433_v25, %v430_v18 }
  0xfb   : > { %473 = vst [vmem:[#allocation2 + $0x8] sm:$0xff] %v462_v22  ;;  %477 = vst [vmem:[#allocation2 + $0x28] sm:$0xff] %v466_v24  ;;  %v514_v1 = vmul.f32 %v433_v25, %v433_v25 }
  0xfc   : > { %472 = vst [vmem:[#allocation2] sm:$0xff] %v461_v26  ;;  %v482_v31 = vadd.f32 %v949_v15, %v481_v27  ;;  %v521_v32 = vadd.f32 %v506_v28, %v505_v21  ;;  %476 = vst [vmem:[#allocation2 + $0x20] sm:$0xff] %v465_v29 }
  0xfe   : > { %v522_v34 = vadd.f32 %v521_v32, %v507_v30  ;;  %v953_v35 = vpop.f32.mrb[4].mxu0  ;;  %v483_v36 = vadd.f32 %v950_v19, %v482_v31  ;;  %v961_v37 = vpop.f32.mrb[4].mxu1  ;;  %v480_v30 = vld [vmem:[#allocation3] sm:$0x1] }
  0xff   : > { %v414_v38 = vpop.f32.mrb[5].mxu0  ;;  %v446_v39 = vpop.f32.mrb[5].mxu1  ;;  %v511_v54 = vmul.f32 %v953_v35, %v953_v35  ;;  %v519_v14 = vmul.f32 %v961_v37, %v961_v37 }
 0x100   : > { %v484_v40 = vadd.f32 %v483_v36, %v414_v38  ;;  %v509_v41 = vmul.f32 %v414_v38, %v414_v38  ;;  %v523_v42 = vadd.f32 %v522_v34, %v508_v33  ;;  %v954_v43 = vpop.f32.mrb[6].mxu0  ;;  %v962_v44 = vpop.f32.mrb[6].mxu1  ;;  %v517_v8 = vmul.f32 %v446_v39, %v446_v39  ;;  %v504_v33 = vld [vmem:[#allocation4] sm:$0x1] }
 0x101   : > { %v464_v45 = vpack.c.bf16 %v954_v43, %v953_v35  ;;  %v417_v46 = vpop.f32.mrb[7].mxu0  ;;  %v468_v47 = vpack.c.bf16 %v962_v44, %v961_v37  ;;  %v449_v48 = vpop.f32.mrb[7].mxu1  ;;  %v512_v57 = vmul.f32 %v954_v43, %v954_v43 }
 0x102   : > { %v524_v49 = vadd.f32 %v523_v42, %v509_v41  ;;  %v463_v50 = vpack.c.bf16 %v417_v46, %v414_v38  ;;  %v485_v51 = vadd.f32 %v484_v40, %v417_v46  ;;  %v510_v52 = vmul.f32 %v417_v46, %v417_v46 }
 0x103   : > { %475 = vst [vmem:[#allocation2 + $0x18] sm:$0xff] %v464_v45  ;;  %479 = vst [vmem:[#allocation2 + $0x38] sm:$0xff] %v468_v47  ;;  %v467_v53 = vpack.c.bf16 %v449_v48, %v446_v39  ;;  %v518_v13 = vmul.f32 %v449_v48, %v449_v48 }
 0x104   : > { %474 = vst [vmem:[#allocation2 + $0x10] sm:$0xff] %v463_v50  ;;  %v486_v55 = vadd.f32 %v953_v35, %v485_v51  ;;  %v525_v56 = vadd.f32 %v524_v49, %v510_v52 }
 0x105   : > { %478 = vst [vmem:[#allocation2 + $0x30] sm:$0xff] %v467_v53 }
 0x106   : > { %v526_v58 = vadd.f32 %v525_v56, %v511_v54  ;;  %v487_v59 = vadd.f32 %v954_v43, %v486_v55 }
 0x108   : > { %v488_v61 = vadd.f32 %v487_v59, %v430_v18  ;;  %v527_v62 = vadd.f32 %v526_v58, %v512_v57  ;;  %v520_v18 = vmul.f32 %v962_v44, %v962_v44 }
 0x10a   : > { %v528_v63 = vadd.f32 %v527_v62, %v513_v60  ;;  %v489_v0 = vadd.f32 %v488_v61, %v433_v25 }
 0x10c   : > { %v490_v3 = vadd.f32 %v957_v16, %v489_v0  ;;  %v529_v4 = vadd.f32 %v528_v63, %v514_v1 }
 0x10e   : > { %v530_v6 = vadd.f32 %v529_v4, %v515_v2  ;;  %v491_v7 = vadd.f32 %v958_v20, %v490_v3 }
 0x110   : > { %v492_v9 = vadd.f32 %v491_v7, %v446_v39  ;;  %v531_v10 = vadd.f32 %v530_v6, %v516_v5 }
 0x112   : > { %v532_v11 = vadd.f32 %v531_v10, %v517_v8  ;;  %v493_v12 = vadd.f32 %v492_v9, %v449_v48 }
 0x114   : > { %v494_v15 = vadd.f32 %v961_v37, %v493_v12  ;;  %v533_v17 = vadd.f32 %v532_v11, %v518_v13 }
 0x116   : > { %v495_v19 = vadd.f32 %v962_v44, %v494_v15  ;;  %v534_v21 = vadd.f32 %v533_v17, %v519_v14 }
 0x118   : > { %v496_v22 = vrot.slane %v495_v19, 4  ;;  %v535_v23 = vadd.f32 %v534_v21, %v520_v18 }
 0x11a   : > { %v497_v24 = vadd.f32 %v496_v22, %v495_v19  ;;  %v536_v16 = vrot.slane %v535_v23, 4 }
 0x11c   : > { %v498_v25 = vrot.slane %v497_v24, 2  ;;  %v537_v26 = vadd.f32 %v536_v16, %v535_v23 }
 0x11e   : > { %v499_v27 = vadd.f32 %v498_v25, %v497_v24  ;;  %v538_v20 = vrot.slane %v537_v26, 2 }
 0x120   : > { %v500_v28 = vrot.slane %v499_v27, 1  ;;  %v539_v29 = vadd.f32 %v538_v20, %v537_v26 }
 0x122   : > { %v501_v31 = vadd.f32 %v500_v28, %v499_v27  ;;  %v540_v32 = vrot.slane %v539_v29, 1 }
 0x124   : > { %v502_v34 = vadd.f32 %v501_v31, %v480_v30  ;;  %v541_v35 = vadd.f32 %v540_v32, %v539_v29 }
 0x126   : > { %503 = vst [vmem:[#allocation3] sm:$0x1] %v502_v34  ;;  %v542_v36 = vadd.f32 %v541_v35, %v504_v33 }
 0x128   : > { %543 = vst [vmem:[#allocation4] sm:$0x1] %v542_v36 }
 0x129 PF: > { %p838_p5 = scmp.ne.s32.totalorder %s1029_s15, 1 }
 0x12a   : > { %v560_v45 = vld [vmem:[%s1175_s2] sm:$0x1] (!%p838_p5)  ;;  %v573_v51 = vld [vmem:[#allocation2 + $0x8] sm:$0xff] (!%p838_p5)  ;;  %v574_v53 = vld [vmem:[#allocation2 + $0x10] sm:$0xff] (!%p838_p5) }
 0x12b   : > { %547 = sbr.rel (%p838_p5) target bundleno = 351 (0x15f), region = 48  ;;  %v565_v48 = vld [vmem:[%s1176_s3] sm:$0x1] (!%p838_p5)  ;;  %v575_v54 = vld [vmem:[#allocation2 + $0x18] sm:$0xff] (!%p838_p5)  ;;  %v577_v56 = vld [vmem:[#allocation2 + $0x28] sm:$0xff] (!%p838_p5)  ;;  %v582_v59 = vunpack.c.l.bf16 (!%p838_p5), %v573_v51  ;;  %v583_v60 = vunpack.c.h.bf16 (!%p838_p5), %v573_v51  ;;  %v584_v63 = vunpack.c.l.bf16 (!%p838_p5), %v574_v53  ;;  %v585_v0 = vunpack.c.h.bf16 (!%p838_p5), %v574_v53 }
 0x12c   : > { %v572_v50 = vld [vmem:[#allocation2] sm:$0xff] (!%p838_p5)  ;;  %v578_v61 = vld [vmem:[#allocation2 + $0x30] sm:$0xff] (!%p838_p5)  ;;  %v579_v62 = vld [vmem:[#allocation2 + $0x38] sm:$0xff] (!%p838_p5)  ;;  %v586_v1 = vunpack.c.l.bf16 (!%p838_p5), %v575_v54  ;;  %v587_v2 = vunpack.c.h.bf16 (!%p838_p5), %v575_v54  ;;  %v590_v5 = vunpack.c.l.bf16 (!%p838_p5), %v577_v56  ;;  %v591_v6 = vunpack.c.h.bf16 (!%p838_p5), %v577_v56 }
 0x12d   : > { %v552_v37 = vld [vmem:[#allocation3] sm:$0x1] (!%p838_p5)  ;;  %v580_v57 = vunpack.c.l.bf16 (!%p838_p5), %v572_v50  ;;  %v581_v58 = vunpack.c.h.bf16 (!%p838_p5), %v572_v50  ;;  %v592_v8 = vunpack.c.l.bf16 (!%p838_p5), %v578_v61  ;;  %v593_v9 = vunpack.c.h.bf16 (!%p838_p5), %v578_v61 }
 0x12e   : > { %v554_v39 = vmul.f32 (!%p838_p5), 0.0078125, %v552_v37  ;;  %v576_v55 = vld [vmem:[#allocation2 + $0x20] sm:$0xff] (!%p838_p5)  ;;  %v594_v10 = vunpack.c.l.bf16 (!%p838_p5), %v579_v62  ;;  %v595_v11 = vunpack.c.h.bf16 (!%p838_p5), %v579_v62 }
 0x12f   : > { %v555_v38 = vld [vmem:[#allocation4] sm:$0x1] (!%p838_p5)  ;;  %v588_v3 = vunpack.c.l.bf16 (!%p838_p5), %v576_v55  ;;  %v589_v4 = vunpack.c.h.bf16 (!%p838_p5), %v576_v55 }
 0x130   : > { %v556_v40 = vmul.f32 (!%p838_p5), 0.0078125, %v555_v38  ;;  %v557_v41 = vmul.f32 (!%p838_p5), %v554_v39, %v554_v39 }
 0x132   : > { %v558_v42 = vsub.f32 %v556_v40, %v557_v41 }
 0x134   : > { %v559_v43 = vmax.f32 %v558_v42, 0.0 }
 0x136   : > { %v561_v44 = vadd.f32 1e-05, %v559_v43 }
 0x138   : > { %1013 = vrsqrt.f32 %v561_v44 }
 0x142   : > { %v1014_v46 = vpop.eup %1013 }
 0x143   : > { %v563_v47 = vmul.f32 %v1014_v46, %v560_v45 }
 0x145   : > { %564 = vst [vmem:[#allocation5] sm:$0x1] %v563_v47  ;;  %v566_v49 = vmul.f32 %v563_v47, %v554_v39 }
 0x147   : > { %v567_v52 = vsub.f32 %v565_v48, %v566_v49 }
 0x149   : > { %568 = vst [vmem:[#allocation6] sm:$0x1] %v567_v52 }
 0x14c   : > { %v839_v7 = vld [vmem:[#allocation5] ss:$0 sm:$0xff] }
 0x14d   : > { %v603_v12 = vmul.f32 %v839_v7, %v580_v57  ;;  %v604_v13 = vmul.f32 %v839_v7, %v581_v58  ;;  %v605_v14 = vmul.f32 %v839_v7, %v582_v59  ;;  %v606_v15 = vmul.f32 %v839_v7, %v583_v60 }
 0x14e   : > { %v607_v17 = vmul.f32 %v839_v7, %v584_v63  ;;  %v608_v18 = vmul.f32 %v839_v7, %v585_v0  ;;  %v609_v19 = vmul.f32 %v839_v7, %v586_v1  ;;  %v610_v21 = vmul.f32 %v839_v7, %v587_v2 }
 0x14f   : > { %v611_v22 = vmul.f32 %v839_v7, %v588_v3  ;;  %v612_v23 = vmul.f32 %v839_v7, %v589_v4  ;;  %v613_v24 = vmul.f32 %v839_v7, %v590_v5  ;;  %v614_v16 = vmul.f32 %v839_v7, %v591_v6 }
 0x150   : > { %v840_v25 = vld [vmem:[#allocation6] ss:$0 sm:$0xff]  ;;  %v615_v26 = vmul.f32 %v839_v7, %v592_v8  ;;  %v616_v27 = vmul.f32 %v839_v7, %v593_v9  ;;  %v617_v20 = vmul.f32 %v839_v7, %v594_v10  ;;  %v618_v28 = vmul.f32 %v839_v7, %v595_v11 }
 0x151   : > { %v626_v29 = vadd.f32 %v840_v25, %v603_v12  ;;  %v627_v30 = vadd.f32 %v840_v25, %v604_v13  ;;  %v628_v31 = vadd.f32 %v840_v25, %v605_v14  ;;  %v629_v32 = vadd.f32 %v840_v25, %v606_v15 }
 0x152   : > { %v630_v33 = vadd.f32 %v840_v25, %v607_v17  ;;  %v631_v34 = vadd.f32 %v840_v25, %v608_v18  ;;  %v632_v35 = vadd.f32 %v840_v25, %v609_v19  ;;  %v633_v36 = vadd.f32 %v840_v25, %v610_v21 }
 0x153   : > { %v642_v37 = vmax.f32 %v626_v29, 0.0  ;;  %v643_v38 = vmax.f32 %v627_v30, 0.0  ;;  %v644_v39 = vmax.f32 %v628_v31, 0.0  ;;  %v645_v40 = vmax.f32 %v629_v32, 0.0 }
 0x154   : > { %v646_v41 = vmax.f32 %v630_v33, 0.0  ;;  %v647_v42 = vmax.f32 %v631_v34, 0.0  ;;  %v648_v43 = vmax.f32 %v632_v35, 0.0  ;;  %v649_v44 = vmax.f32 %v633_v36, 0.0 }
 0x155   : > { %v880_v45 = vpack.c.bf16 %v643_v38, %v642_v37  ;;  %v885_v46 = vpack.c.bf16 %v645_v40, %v644_v39  ;;  %v634_v47 = vadd.f32 %v840_v25, %v611_v22  ;;  %v635_v48 = vadd.f32 %v840_v25, %v612_v23 }
 0x156   : > { %v890_v49 = vpack.c.bf16 %v647_v42, %v646_v41  ;;  %v895_v50 = vpack.c.bf16 %v649_v44, %v648_v43  ;;  %v636_v51 = vadd.f32 %v840_v25, %v613_v24  ;;  %v637_v52 = vadd.f32 %v840_v25, %v614_v16 }
 0x157   : > { %881 = vst [vmem:[%s1177_s4] sm:$0xff] %v880_v45   ;;  %917 = vst [vmem:[%s1177_s4 + $0x8] sm:$0xff] %v885_v46   ;;  %v650_v53 = vmax.f32 %v634_v47, 0.0  ;;  %v651_v54 = vmax.f32 %v635_v48, 0.0  ;;  %v638_v55 = vadd.f32 %v840_v25, %v615_v26  ;;  %v639_v56 = vadd.f32 %v840_v25, %v616_v27 }
 0x158   : > { %918 = vst [vmem:[%s1177_s4 + $0x10] sm:$0xff] %v890_v49   ;;  %919 = vst [vmem:[%s1177_s4 + $0x18] sm:$0xff] %v895_v50   ;;  %v652_v57 = vmax.f32 %v636_v51, 0.0  ;;  %v653_v58 = vmax.f32 %v637_v52, 0.0  ;;  %v640_v59 = vadd.f32 %v840_v25, %v617_v20  ;;  %v641_v60 = vadd.f32 %v840_v25, %v618_v28 }
 0x159   : > { %v900_v61 = vpack.c.bf16 %v651_v54, %v650_v53  ;;  %v654_v62 = vmax.f32 %v638_v55, 0.0  ;;  %v655_v63 = vmax.f32 %v639_v56, 0.0 }
 0x15a   : > { %v905_v0 = vpack.c.bf16 %v653_v58, %v652_v57  ;;  %v656_v1 = vmax.f32 %v640_v59, 0.0  ;;  %v657_v2 = vmax.f32 %v641_v60, 0.0 }
 0x15b   : > { %920 = vst [vmem:[%s1177_s4 + $0x20] sm:$0xff] %v900_v61   ;;  %v910_v3 = vpack.c.bf16 %v655_v63, %v654_v62 }
 0x15c   : > { %921 = vst [vmem:[%s1177_s4 + $0x28] sm:$0xff] %v905_v0   ;;  %v915_v4 = vpack.c.bf16 %v657_v2, %v656_v1 }
 0x15d   : > { %922 = vst [vmem:[%s1177_s4 + $0x30] sm:$0xff] %v910_v3  }
 0x15e   : > { %923 = vst [vmem:[%s1177_s4 + $0x38] sm:$0xff] %v915_v4  }
 0x15f PF: > { %s14_s17 = sadd.s32 1, %s1037_s17   ;;  %s1178_s15 = smov %s1033_s16 }
 0x160   : > { %p11_p6 = scmp.ge.s32.totalorder %s14_s17, 4   ;;  %s1179_s16 = smov %s1181_s18 }
 0x162   :  { %13 = sbr.rel (!%p11_p6) target bundleno = 2 (0x2), region = 84 }

// kernel: generator_forward.28
= control target key start
LH: loop header
LB: loop body
LE: loop exit
PB: predicated region body
PF: predicated region fallthrough
CT: control target
= control target key end

     0   :  { %s743_s15 = smov 0   ;;  %s745_s16 = smov 0   ;;  %s825_s0 = inlined_call_operand.vmem [shape: bf16[32,144], index: 0, kind: input, shape index: {}]   ;;  %s826_s1 = inlined_call_operand.vmem [shape: bf16[144,128], index: 1, kind: input, shape index: {}]   ;;  %s827_s2 = inlined_call_operand.vmem [shape: f32[1,128], index: 2, kind: input, shape index: {}]   ;;  %s828_s3 = inlined_call_operand.vmem [shape: f32[1,128], index: 3, kind: input, shape index: {}]   ;;  %s829_s4 = inlined_call_operand.vmem [shape: bf16[32,128], index: 4, kind: output, shape index: {}]  }
   0x1   :  { %s747_s17 = smov 0  }
   0x2 LB: > { %s26_s18 = sadd.s32 1, %s710_s16  ;;  %p588_p0 = scmp.ge.s32.totalorder %s714_s17, 1  ;;  %s714_s17 = sphi %s747_s17, %s14_s17   ;;  %s710_s16 = sphi %s745_s16, %s831_s16   ;;  %s706_s15 = sphi %s743_s15, %s830_s15  }
   0x3   : > { %p28_p1 = scmp.ge.s32.totalorder %s26_s18, 2  ;;  %p186_p2 = scmp.lt.s32.totalorder %s714_s17, 3 }
   0x5   : > { %s833_s18 = smov (%p28_p1, %s26_s18), 0  ;;  %p187_p3 = pnand %p588_p0, %p186_p2 }
   0x6   : > { %p589_p4 = scmp.ne.s32.totalorder (!%p187_p3), %s706_s15, 0 }
   0x7   : > { %190 = sbr.rel (%p187_p3) target bundleno = 335 (0x14f), region = 36 }
   0xe   : > { %239 = sbr.rel (%p589_p4) target bundleno = 288 (0x120), region = 40  ;;  %v675_v0 = vld [vmem:[%s826_s1] sm:$0xff] (!%p589_p4)   ;;  %v716_v1 = vmov (!%p589_p4), 0   ;;  %v676_v2 = vld [vmem:[%s826_s1 + $0x8] sm:$0xff] (!%p589_p4)   ;;  %v677_v3 = vld [vmem:[%s826_s1 + $0x10] sm:$0xff] (!%p589_p4)   ;;  %vm340_vm0 = vcmask (!%p589_p4), 130048  }
   0xf   : > { %347 = vmatprep.subr.bf16.mxu0 (!%p589_p4), %v716_v1  ;;  %631 = vmatprep.subr.bf16.mxu1 (!%p589_p4), %v716_v1  ;;  %v678_v4 = vld [vmem:[%s826_s1 + $0x18] sm:$0xff] (!%p589_p4)   ;;  %v686_v5 = vld [vmem:[%s825_s0 + $0x4] ss:$8 sps:$4 sm:$0xff] (!%p589_p4)   ;;  %v681_v9 = vld [vmem:[%s826_s1 + $0x30] sm:$0xff] (!%p589_p4)   ;;  %v717_v14 = vmov (!%p589_p4), 0.0  }
  0x10   : > { %348 = vmatpush1.bf16.msra.mxu0 (!%p589_p4), %v675_v0  ;;  %640 = vmatpush1.bf16.msra.mxu1 (!%p589_p4), %v675_v0  ;;  %v689_v6 = vld [vmem:[%s825_s0 + $0x14] ss:$8 sps:$4 sm:$0xff] (!%p589_p4)   ;;  %v679_v7 = vld [vmem:[%s826_s1 + $0x20] sm:$0xff] (!%p589_p4)   ;;  %v680_v8 = vld [vmem:[%s826_s1 + $0x28] sm:$0xff] (!%p589_p4)   ;;  %244 = vst [vmem:[#allocation3] sm:$0x1] (!%p589_p4), %v717_v14 }
  0x11   : > { %349 = vmatprep.subr.bf16.mxu0 (!%p589_p4), %v716_v1  ;;  %632 = vmatprep.subr.bf16.mxu1 (!%p589_p4), %v716_v1  ;;  %v682_v10 = vld [vmem:[%s826_s1 + $0x38] sm:$0xff] (!%p589_p4)   ;;  %v683_v11 = vld [vmem:[%s826_s1 + $0x40] sm:$0xff] (!%p589_p4)   ;;  %245 = vst [vmem:[#allocation4] sm:$0x1] (!%p589_p4), %v717_v14 }
  0x12   : > { %603 = vmatprep.mubr.msk.bf16.mxu0 (!%p589_p4), %vm340_vm0, %v686_v5  ;;  %604 = vmatprep.mubr.msk.bf16.mxu1 (!%p589_p4), %vm340_vm0, %v689_v6  ;;  %v684_v12 = vld [vmem:[%s825_s0] ss:$8 sps:$4 sm:$0xff] (!%p589_p4)   ;;  %v687_v13 = vld [vmem:[%s825_s0 + $0x10] ss:$8 sps:$4 sm:$0xff] (!%p589_p4)  }
  0x14   : > { %350 = vmatpush1.bf16.msra.mxu0 (!%p589_p4), %v676_v2  ;;  %641 = vmatpush1.bf16.msra.mxu1 (!%p589_p4), %v676_v2 }
  0x15   : > { %351 = vmatprep.subr.bf16.mxu0 %v716_v1  ;;  %633 = vmatprep.subr.bf16.mxu1 %v716_v1 }
  0x17   : > { %v403_v44 = vld [vmem:[#allocation3] sm:$0x1] }
  0x18   : > { %352 = vmatpush1.bf16.msra.mxu0 %v677_v3  ;;  %642 = vmatpush1.bf16.msra.mxu1 %v677_v3  ;;  %v415_v47 = vld [vmem:[#allocation4] sm:$0x1] }
  0x19   : > { %353 = vmatprep.subr.bf16.mxu0 %v716_v1  ;;  %634 = vmatprep.subr.bf16.mxu1 %v716_v1 }
  0x1c   : > { %354 = vmatpush1.bf16.msra.mxu0 %v678_v4  ;;  %643 = vmatpush1.bf16.msra.mxu1 %v678_v4 }
  0x1d   : > { %355 = vmatprep.subr.bf16.mxu0 %v716_v1  ;;  %635 = vmatprep.subr.bf16.mxu1 %v716_v1 }
  0x20   : > { %356 = vmatpush1.bf16.msra.mxu0 %v679_v7  ;;  %644 = vmatpush1.bf16.msra.mxu1 %v679_v7 }
  0x21   : > { %357 = vmatprep.subr.bf16.mxu0 %v716_v1  ;;  %636 = vmatprep.subr.bf16.mxu1 %v716_v1 }
  0x24   : > { %358 = vmatpush1.bf16.msra.mxu0 %v680_v8  ;;  %645 = vmatpush1.bf16.msra.mxu1 %v680_v8 }
  0x25   : > { %359 = vmatprep.subr.bf16.mxu0 %v716_v1  ;;  %637 = vmatprep.subr.bf16.mxu1 %v716_v1 }
  0x28   : > { %360 = vmatpush1.bf16.msra.mxu0 %v681_v9  ;;  %646 = vmatpush1.bf16.msra.mxu1 %v681_v9 }
  0x29   : > { %361 = vmatprep.subr.bf16.mxu0 %v716_v1  ;;  %638 = vmatprep.subr.bf16.mxu1 %v716_v1 }
  0x2c   : > { %362 = vmatpush1.bf16.msra.mxu0 %v682_v10  ;;  %647 = vmatpush1.bf16.msra.mxu1 %v682_v10 }
  0x2d   : > { %363 = vmatprep.subr.bf16.mxu0 %v716_v1  ;;  %639 = vmatprep.subr.bf16.mxu1 %v716_v1 }
  0x30   : > { %364 = vmatpush1.bf16.msra.mxu0 %v683_v11  ;;  %648 = vmatpush1.bf16.msra.mxu1 %v683_v11 }
  0x33   : > { %380 = vmatmul.mubr.bf16.vlgmr.msra.gmra.mrb[0].mxu0 %v684_v12  ;;  %388 = vmatmul.mubr.bf16.vlgmr.msra.gmra.mrb[0].mxu1 %v687_v13 }
 0x106   : > { %v381_v15 = vpop.f32.mrb[0].mxu0  ;;  %v389_v16 = vpop.f32.mrb[0].mxu1 }
 0x107   : > { %v383_v17 = vpop.f32.mrb[1].mxu0  ;;  %v391_v18 = vpop.f32.mrb[1].mxu1  ;;  %v416_v19 = vmul.f32 %v381_v15, %v381_v15  ;;  %v418_v20 = vmul.f32 %v389_v16, %v389_v16 }
 0x108   : > { %v384_v21 = vpop.f32.mrb[2].mxu0  ;;  %v392_v22 = vpop.f32.mrb[2].mxu1 }
 0x109   : > { %v396_v23 = vpack.c.bf16 %v384_v21, %v381_v15  ;;  %v404_v24 = vadd.f32 %v384_v21, %v381_v15  ;;  %v417_v25 = vmul.f32 %v384_v21, %v384_v21  ;;  %v386_v26 = vpop.f32.mrb[3].mxu0  ;;  %v397_v27 = vpack.c.bf16 %v392_v22, %v389_v16  ;;  %v394_v28 = vpop.f32.mrb[3].mxu1 }
 0x10a   : > { %v419_v32 = vmul.f32 %v392_v22, %v392_v22 }
 0x10b   : > { %401 = vst [vmem:[#allocation2] sm:$0xff] %v396_v23  ;;  %v420_v29 = vadd.f32 %v417_v25, %v416_v19  ;;  %402 = vst [vmem:[#allocation2 + $0x8] sm:$0xff] %v397_v27  ;;  %v405_v30 = vadd.f32 %v404_v24, %v389_v16 }
 0x10d   : > { %v406_v31 = vadd.f32 %v405_v30, %v392_v22  ;;  %v421_v33 = vadd.f32 %v420_v29, %v418_v20 }
 0x10f   : > { %v407_v34 = vrot.slane %v406_v31, 4  ;;  %v422_v35 = vadd.f32 %v421_v33, %v419_v32 }
 0x111   : > { %v408_v36 = vadd.f32 %v407_v34, %v406_v31  ;;  %v423_v37 = vrot.slane %v422_v35, 4 }
 0x113   : > { %v409_v38 = vrot.slane %v408_v36, 2  ;;  %v424_v39 = vadd.f32 %v423_v37, %v422_v35 }
 0x115   : > { %v410_v40 = vadd.f32 %v409_v38, %v408_v36  ;;  %v425_v41 = vrot.slane %v424_v39, 2 }
 0x117   : > { %v411_v42 = vrot.slane %v410_v40, 1  ;;  %v426_v43 = vadd.f32 %v425_v41, %v424_v39 }
 0x119   : > { %v412_v45 = vadd.f32 %v411_v42, %v410_v40  ;;  %v427_v46 = vrot.slane %v426_v43, 1 }
 0x11b   : > { %v413_v48 = vadd.f32 %v412_v45, %v403_v44  ;;  %v428_v49 = vadd.f32 %v427_v46, %v426_v43 }
 0x11d   : > { %414 = vst [vmem:[#allocation3] sm:$0x1] %v413_v48  ;;  %v429_v50 = vadd.f32 %v428_v49, %v415_v47 }
 0x11f   : > { %430 = vst [vmem:[#allocation4] sm:$0x1] %v429_v50 }
 0x120 PF: > { %p605_p5 = scmp.ne.s32.totalorder %s706_s15, 1 }
 0x121   : > { %v447_v59 = vld [vmem:[%s827_s2] sm:$0x1] (!%p605_p5)  ;;  %v460_v1 = vld [vmem:[#allocation2 + $0x8] sm:$0xff] (!%p605_p5) }
 0x122   : > { %434 = sbr.rel (%p605_p5) target bundleno = 335 (0x14f), region = 48  ;;  %v452_v62 = vld [vmem:[%s828_s3] sm:$0x1] (!%p605_p5)  ;;  %v463_v5 = vunpack.c.l.bf16 (!%p605_p5), %v460_v1  ;;  %v464_v6 = vunpack.c.h.bf16 (!%p605_p5), %v460_v1 }
 0x123   : > { %v459_v0 = vld [vmem:[#allocation2] sm:$0xff] (!%p605_p5) }
 0x124   : > { %v439_v51 = vld [vmem:[#allocation3] sm:$0x1] (!%p605_p5)  ;;  %v461_v3 = vunpack.c.l.bf16 (!%p605_p5), %v459_v0  ;;  %v462_v4 = vunpack.c.h.bf16 (!%p605_p5), %v459_v0 }
 0x125   : > { %v441_v53 = vmul.f32 (!%p605_p5), 0.03125, %v439_v51 }
 0x126   : > { %v442_v52 = vld [vmem:[#allocation4] sm:$0x1] (!%p605_p5) }
 0x127   : > { %v443_v54 = vmul.f32 (!%p605_p5), 0.03125, %v442_v52  ;;  %v444_v55 = vmul.f32 (!%p605_p5), %v441_v53, %v441_v53 }
 0x129   : > { %v445_v56 = vsub.f32 %v443_v54, %v444_v55 }
 0x12b   : > { %v446_v57 = vmax.f32 %v445_v56, 0.0 }
 0x12d   : > { %v448_v58 = vadd.f32 1e-05, %v446_v57 }
 0x12f   : > { %690 = vrsqrt.f32 %v448_v58 }
 0x139   : > { %v691_v60 = vpop.eup %690 }
 0x13a   : > { %v450_v61 = vmul.f32 %v691_v60, %v447_v59 }
 0x13c   : > { %451 = vst [vmem:[#allocation5] sm:$0x1] %v450_v61  ;;  %v453_v63 = vmul.f32 %v450_v61, %v441_v53 }
 0x13e   : > { %v454_v2 = vsub.f32 %v452_v62, %v453_v63 }
 0x140   : > { %455 = vst [vmem:[#allocation6] sm:$0x1] %v454_v2 }
 0x143   : > { %v606_v7 = vld [vmem:[#allocation5] ss:$0 sm:$0xff] }
 0x144   : > { %v472_v8 = vmul.f32 %v606_v7, %v461_v3  ;;  %v473_v9 = vmul.f32 %v606_v7, %v462_v4  ;;  %v474_v10 = vmul.f32 %v606_v7, %v463_v5  ;;  %v475_v11 = vmul.f32 %v606_v7, %v464_v6 }
 0x147   : > { %v607_v12 = vld [vmem:[#allocation6] ss:$0 sm:$0xff] }
 0x148   : > { %v483_v13 = vadd.f32 %v607_v12, %v472_v8  ;;  %v484_v14 = vadd.f32 %v607_v12, %v473_v9  ;;  %v485_v15 = vadd.f32 %v607_v12, %v474_v10  ;;  %v486_v16 = vadd.f32 %v607_v12, %v475_v11 }
 0x14a   : > { %v487_v17 = vmax.f32 %v483_v13, 0.0  ;;  %v488_v18 = vmax.f32 %v484_v14, 0.0  ;;  %v489_v19 = vmax.f32 %v485_v15, 0.0  ;;  %v490_v20 = vmax.f32 %v486_v16, 0.0 }
 0x14c   : > { %v623_v21 = vpack.c.bf16 %v488_v18, %v487_v17  ;;  %v628_v22 = vpack.c.bf16 %v490_v20, %v489_v19 }
 0x14e   : > { %624 = vst [vmem:[%s829_s4] sm:$0xff] %v623_v21   ;;  %630 = vst [vmem:[%s829_s4 + $0x8] sm:$0xff] %v628_v22  }
 0x14f PF: > { %s14_s17 = sadd.s32 1, %s714_s17   ;;  %s830_s15 = smov %s710_s16 }
 0x150   : > { %p11_p6 = scmp.ge.s32.totalorder %s14_s17, 4   ;;  %s831_s16 = smov %s833_s18 }
 0x152   :  { %13 = sbr.rel (!%p11_p6) target bundleno = 2 (0x2), region = 84 }

// kernel: generator_forward.29
= control target key start
LH: loop header
LB: loop body
LE: loop exit
PB: predicated region body
PF: predicated region fallthrough
CT: control target
= control target key end

     0   :  { %s922_s15 = smov 0   ;;  %s924_s16 = smov 0   ;;  %s1037_s0 = inlined_call_operand.vmem [shape: bf16[32,288], index: 0, kind: input, shape index: {}]   ;;  %s1038_s1 = inlined_call_operand.vmem [shape: bf16[288,128], index: 1, kind: input, shape index: {}]   ;;  %s1039_s2 = inlined_call_operand.vmem [shape: f32[1,128], index: 2, kind: input, shape index: {}]   ;;  %s1040_s3 = inlined_call_operand.vmem [shape: f32[1,128], index: 3, kind: input, shape index: {}]   ;;  %s1041_s4 = inlined_call_operand.vmem [shape: bf16[32,128], index: 4, kind: output, shape index: {}]  }
   0x1   :  { %s926_s17 = smov 0  }
   0x2 LB: > { %s26_s18 = sadd.s32 1, %s890_s16  ;;  %p725_p0 = scmp.ge.s32.totalorder %s894_s17, 1  ;;  %s894_s17 = sphi %s926_s17, %s14_s17   ;;  %s890_s16 = sphi %s924_s16, %s1043_s16   ;;  %s886_s15 = sphi %s922_s15, %s1042_s15  }
   0x3   : > { %p28_p1 = scmp.ge.s32.totalorder %s26_s18, 2  ;;  %p186_p2 = scmp.lt.s32.totalorder %s894_s17, 3 }
   0x5   : > { %s1045_s18 = smov (%p28_p1, %s26_s18), 0  ;;  %p187_p3 = pnand %p725_p0, %p186_p2 }
   0x6   : > { %p726_p4 = scmp.ne.s32.totalorder (!%p187_p3), %s886_s15, 0 }
   0x7   : > { %190 = sbr.rel (%p187_p3) target bundleno = 340 (0x154), region = 36 }
   0xe   : > { %239 = sbr.rel (%p726_p4) target bundleno = 293 (0x125), region = 40  ;;  %v844_v0 = vld [vmem:[%s1038_s1 + $0x40] sm:$0xff] (!%p726_p4)   ;;  %v846_v2 = vld [vmem:[%s1038_s1 + $0x48] sm:$0xff] (!%p726_p4)   ;;  %v848_v4 = vld [vmem:[%s1038_s1 + $0x50] sm:$0xff] (!%p726_p4)   ;;  %vm428_vm0 = vcmask (!%p726_p4), 261120   ;;  %v896_v24 = vmov (!%p726_p4), 0.0  }
   0xf   : > { %v845_v1 = vld [vmem:[%s1038_s1] sm:$0xff] (!%p726_p4)   ;;  %779 = vmatprep.subr.bf16.mxu0 (!%p726_p4), %v844_v0  ;;  %v847_v3 = vld [vmem:[%s1038_s1 + $0x8] sm:$0xff] (!%p726_p4)   ;;  %v849_v5 = vld [vmem:[%s1038_s1 + $0x10] sm:$0xff] (!%p726_p4)   ;;  %244 = vst [vmem:[#allocation3] sm:$0x1] (!%p726_p4), %v896_v24 }
  0x10   : > { %780 = vmatpush3.bf16.msra.mxu0 (!%p726_p4), %v845_v1  ;;  %v850_v6 = vld [vmem:[%s1038_s1 + $0x58] sm:$0xff] (!%p726_p4)   ;;  %v852_v8 = vld [vmem:[%s1038_s1 + $0x60] sm:$0xff] (!%p726_p4)   ;;  %v854_v11 = vld [vmem:[%s1038_s1 + $0x68] sm:$0xff] (!%p726_p4)   ;;  %245 = vst [vmem:[#allocation4] sm:$0x1] (!%p726_p4), %v896_v24 }
  0x11   : > { %781 = vmatprep.subr.bf16.mxu0 (!%p726_p4), %v846_v2  ;;  %v851_v7 = vld [vmem:[%s1038_s1 + $0x18] sm:$0xff] (!%p726_p4)   ;;  %v858_v9 = vld [vmem:[%s1038_s1 + $0x80] sm:$0xff] (!%p726_p4)   ;;  %v855_v12 = vld [vmem:[%s1038_s1 + $0x28] sm:$0xff] (!%p726_p4)  }
  0x12   : > { %v853_v10 = vld [vmem:[%s1038_s1 + $0x20] sm:$0xff] (!%p726_p4)   ;;  %811 = vmatprep.subr.bf16.mxu1 (!%p726_p4), %v858_v9  ;;  %v861_v13 = vld [vmem:[%s1038_s1 + $0x88] sm:$0xff] (!%p726_p4)   ;;  %v856_v14 = vld [vmem:[%s1038_s1 + $0x70] sm:$0xff] (!%p726_p4)  }
  0x13   : > { %812 = vmatpush3.bf16.msra.mxu1 (!%p726_p4), %v858_v9  ;;  %v864_v15 = vld [vmem:[%s1037_s0 + $0x4] ss:$12 sps:$4 sm:$0xff] (!%p726_p4)   ;;  %v865_v16 = vld [vmem:[%s1037_s0 + $0x8] ss:$12 sps:$4 sm:$0xff] (!%p726_p4)   ;;  %v866_v17 = vld [vmem:[%s1037_s0 + $0x20] ss:$12 sps:$4 sm:$0xff] (!%p726_p4)  }
  0x14   : > { %782 = vmatpush3.bf16.msra.mxu0 (!%p726_p4), %v847_v3  ;;  %813 = vmatprep.subr.bf16.mxu1 (!%p726_p4), %v861_v13  ;;  %v857_v18 = vld [vmem:[%s1038_s1 + $0x30] sm:$0xff] (!%p726_p4)   ;;  %v859_v19 = vld [vmem:[%s1038_s1 + $0x78] sm:$0xff] (!%p726_p4)   ;;  %v862_v21 = vld [vmem:[%s1037_s0] ss:$12 sps:$4 sm:$0xff] (!%p726_p4)  }
  0x15   : > { %783 = vmatprep.subr.bf16.mxu0 %v848_v4  ;;  %467 = vmatprep.mubr.bf16.mxu0 %v864_v15  ;;  %v860_v20 = vld [vmem:[%s1038_s1 + $0x38] sm:$0xff]  }
  0x16   : > { %815 = vmatprep.mubr.msk.bf16.mxu1 %vm428_vm0, %v865_v16  ;;  %v867_v22 = vld [vmem:[%s1037_s0 + $0x1c] ss:$12 sps:$4 sm:$0xff]   ;;  %v869_v23 = vld [vmem:[%s1037_s0 + $0x18] ss:$12 sps:$4 sm:$0xff]   ;;  %v540_v2 = vld [vmem:[#allocation3] sm:$0x1] }
  0x17   : > { %814 = vmatpush3.bf16.msra.mxu1 %v861_v13 }
  0x18   : > { %784 = vmatpush3.bf16.msra.mxu0 %v849_v5  ;;  %v552_v5 = vld [vmem:[#allocation4] sm:$0x1] }
  0x19   : > { %785 = vmatprep.subr.bf16.mxu0 %v850_v6 }
  0x1a   : > { %816 = vmatmul.mubr.msk.bf16.vlgmr.msra.gmra.mrb[0].mxu1 %vm428_vm0, %v866_v17 }
  0x1c   : > { %786 = vmatpush3.bf16.msra.mxu0 %v851_v7 }
  0x1d   : > { %787 = vmatprep.subr.bf16.mxu0 %v852_v8 }
  0x20   : > { %788 = vmatpush3.bf16.msra.mxu0 %v853_v10 }
  0x21   : > { %789 = vmatprep.subr.bf16.mxu0 %v854_v11 }
  0x24   : > { %790 = vmatpush3.bf16.msra.mxu0 %v855_v12 }
  0x25   : > { %791 = vmatprep.subr.bf16.mxu0 %v856_v14 }
  0x28   : > { %792 = vmatpush3.bf16.msra.mxu0 %v857_v18 }
  0x29   : > { %793 = vmatprep.subr.bf16.mxu0 %v859_v19 }
  0x2c   : > { %794 = vmatpush3.bf16.msra.mxu0 %v860_v20 }
  0x2f   : > { %468 = vmatmul.mubr.bf16.vlgmr.msra.gmra.mrb[0].mxu0 %v862_v21 }
  0x30   : > { %475 = vmatprep.mubr.bf16.mxu0 %v867_v22 }
  0x37   : > { %476 = vmatmul.mubr.bf16.gmra.mrb[4].mxu0 %v869_v23 }
  0xed   : > { %v817_v25 = vpop.f32.mrb[0].mxu1 }
  0xee   : > { %v518_v26 = vpop.f32.mrb[1].mxu1 }
  0xef   : > { %v818_v27 = vpop.f32.mrb[2].mxu1 }
  0xf0   : > { %v521_v28 = vpop.f32.mrb[3].mxu1 }
 0x102   : > { %v795_v29 = vpop.f32.mrb[0].mxu0 }
 0x103   : > { %v796_v30 = vpop.f32.mrb[1].mxu0 }
 0x104   : > { %v797_v31 = vadd.f32 %v796_v30, %v795_v29  ;;  %v798_v32 = vpop.f32.mrb[2].mxu0 }
 0x105   : > { %v799_v33 = vpop.f32.mrb[3].mxu0 }
 0x106   : > { %v800_v34 = vadd.f32 %v799_v33, %v798_v32  ;;  %v519_v35 = vadd.f32 %v797_v31, %v518_v26 }
 0x108   : > { %v522_v36 = vadd.f32 %v800_v34, %v521_v28  ;;  %v553_v37 = vmul.f32 %v519_v35, %v519_v35 }
 0x10a   : > { %v533_v38 = vpack.c.bf16 %v522_v36, %v519_v35  ;;  %v541_v39 = vadd.f32 %v522_v36, %v519_v35  ;;  %v554_v40 = vmul.f32 %v522_v36, %v522_v36  ;;  %v801_v41 = vpop.f32.mrb[4].mxu0 }
 0x10b   : > { %v802_v42 = vpop.f32.mrb[5].mxu0 }
 0x10c   : > { %538 = vst [vmem:[#allocation2] sm:$0xff] %v533_v38  ;;  %v557_v43 = vadd.f32 %v554_v40, %v553_v37  ;;  %v803_v44 = vadd.f32 %v802_v42, %v801_v41  ;;  %v804_v45 = vpop.f32.mrb[6].mxu0 }
 0x10d   : > { %v805_v46 = vpop.f32.mrb[7].mxu0 }
 0x10e   : > { %v527_v47 = vadd.f32 %v817_v25, %v803_v44  ;;  %v806_v48 = vadd.f32 %v805_v46, %v804_v45 }
 0x110   : > { %v542_v49 = vadd.f32 %v541_v39, %v527_v47  ;;  %v555_v50 = vmul.f32 %v527_v47, %v527_v47  ;;  %v530_v51 = vadd.f32 %v818_v27, %v806_v48 }
 0x112   : > { %v558_v52 = vadd.f32 %v557_v43, %v555_v50  ;;  %v534_v53 = vpack.c.bf16 %v530_v51, %v527_v47  ;;  %v543_v54 = vadd.f32 %v542_v49, %v530_v51  ;;  %v556_v55 = vmul.f32 %v530_v51, %v530_v51 }
 0x114   : > { %539 = vst [vmem:[#allocation2 + $0x8] sm:$0xff] %v534_v53  ;;  %v544_v56 = vrot.slane %v543_v54, 4  ;;  %v559_v57 = vadd.f32 %v558_v52, %v556_v55 }
 0x116   : > { %v545_v58 = vadd.f32 %v544_v56, %v543_v54  ;;  %v560_v59 = vrot.slane %v559_v57, 4 }
 0x118   : > { %v546_v60 = vrot.slane %v545_v58, 2  ;;  %v561_v61 = vadd.f32 %v560_v59, %v559_v57 }
 0x11a   : > { %v547_v62 = vadd.f32 %v546_v60, %v545_v58  ;;  %v562_v63 = vrot.slane %v561_v61, 2 }
 0x11c   : > { %v548_v0 = vrot.slane %v547_v62, 1  ;;  %v563_v1 = vadd.f32 %v562_v63, %v561_v61 }
 0x11e   : > { %v549_v3 = vadd.f32 %v548_v0, %v547_v62  ;;  %v564_v4 = vrot.slane %v563_v1, 1 }
 0x120   : > { %v550_v6 = vadd.f32 %v549_v3, %v540_v2  ;;  %v565_v7 = vadd.f32 %v564_v4, %v563_v1 }
 0x122   : > { %551 = vst [vmem:[#allocation3] sm:$0x1] %v550_v6  ;;  %v566_v8 = vadd.f32 %v565_v7, %v552_v5 }
 0x124   : > { %567 = vst [vmem:[#allocation4] sm:$0x1] %v566_v8 }
 0x125 PF: > { %p753_p5 = scmp.ne.s32.totalorder %s886_s15, 1 }
 0x126   : > { %v584_v17 = vld [vmem:[%s1039_s2] sm:$0x1] (!%p753_p5)  ;;  %v597_v23 = vld [vmem:[#allocation2 + $0x8] sm:$0xff] (!%p753_p5) }
 0x127   : > { %571 = sbr.rel (%p753_p5) target bundleno = 340 (0x154), region = 48  ;;  %v589_v20 = vld [vmem:[%s1040_s3] sm:$0x1] (!%p753_p5)  ;;  %v600_v27 = vunpack.c.l.bf16 (!%p753_p5), %v597_v23  ;;  %v601_v28 = vunpack.c.h.bf16 (!%p753_p5), %v597_v23 }
 0x128   : > { %v596_v22 = vld [vmem:[#allocation2] sm:$0xff] (!%p753_p5) }
 0x129   : > { %v576_v9 = vld [vmem:[#allocation3] sm:$0x1] (!%p753_p5)  ;;  %v598_v25 = vunpack.c.l.bf16 (!%p753_p5), %v596_v22  ;;  %v599_v26 = vunpack.c.h.bf16 (!%p753_p5), %v596_v22 }
 0x12a   : > { %v578_v11 = vmul.f32 (!%p753_p5), 0.03125, %v576_v9 }
 0x12b   : > { %v579_v10 = vld [vmem:[#allocation4] sm:$0x1] (!%p753_p5) }
 0x12c   : > { %v580_v12 = vmul.f32 (!%p753_p5), 0.03125, %v579_v10  ;;  %v581_v13 = vmul.f32 (!%p753_p5), %v578_v11, %v578_v11 }
 0x12e   : > { %v582_v14 = vsub.f32 %v580_v12, %v581_v13 }
 0x130   : > { %v583_v15 = vmax.f32 %v582_v14, 0.0 }
 0x132   : > { %v585_v16 = vadd.f32 1e-05, %v583_v15 }
 0x134   : > { %870 = vrsqrt.f32 %v585_v16 }
 0x13e   : > { %v871_v18 = vpop.eup %870 }
 0x13f   : > { %v587_v19 = vmul.f32 %v871_v18, %v584_v17 }
 0x141   : > { %588 = vst [vmem:[#allocation5] sm:$0x1] %v587_v19  ;;  %v590_v21 = vmul.f32 %v587_v19, %v578_v11 }
 0x143   : > { %v591_v24 = vsub.f32 %v589_v20, %v590_v21 }
 0x145   : > { %592 = vst [vmem:[#allocation6] sm:$0x1] %v591_v24 }
 0x148   : > { %v754_v29 = vld [vmem:[#allocation5] ss:$0 sm:$0xff] }
 0x149   : > { %v609_v30 = vmul.f32 %v754_v29, %v598_v25  ;;  %v610_v31 = vmul.f32 %v754_v29, %v599_v26  ;;  %v611_v32 = vmul.f32 %v754_v29, %v600_v27  ;;  %v612_v33 = vmul.f32 %v754_v29, %v601_v28 }
 0x14c   : > { %v755_v34 = vld [vmem:[#allocation6] ss:$0 sm:$0xff] }
 0x14d   : > { %v620_v35 = vadd.f32 %v755_v34, %v609_v30  ;;  %v621_v36 = vadd.f32 %v755_v34, %v610_v31  ;;  %v622_v37 = vadd.f32 %v755_v34, %v611_v32  ;;  %v623_v38 = vadd.f32 %v755_v34, %v612_v33 }
 0x14f   : > { %v624_v39 = vmax.f32 %v620_v35, 0.0  ;;  %v625_v40 = vmax.f32 %v621_v36, 0.0  ;;  %v626_v41 = vmax.f32 %v622_v37, 0.0  ;;  %v627_v42 = vmax.f32 %v623_v38, 0.0 }
 0x151   : > { %v771_v43 = vpack.c.bf16 %v625_v40, %v624_v39  ;;  %v776_v44 = vpack.c.bf16 %v627_v42, %v626_v41 }
 0x153   : > { %772 = vst [vmem:[%s1041_s4] sm:$0xff] %v771_v43   ;;  %778 = vst [vmem:[%s1041_s4 + $0x8] sm:$0xff] %v776_v44  }
 0x154 PF: > { %s14_s17 = sadd.s32 1, %s894_s17   ;;  %s1042_s15 = smov %s890_s16 }
 0x155   : > { %p11_p6 = scmp.ge.s32.totalorder %s14_s17, 4   ;;  %s1043_s16 = smov %s1045_s18 }
 0x157   :  { %13 = sbr.rel (!%p11_p6) target bundleno = 2 (0x2), region = 84 }

// kernel: generator_forward.30
= control target key start
LH: loop header
LB: loop body
LE: loop exit
PB: predicated region body
PF: predicated region fallthrough
CT: control target
= control target key end

     0   :  { %s1013_s18 = smov 0   ;;  %s1015_s19 = smov 0   ;;  %s1134_s0 = inlined_call_operand.vmem [shape: bf16[32,288], index: 0, kind: input, shape index: {}]   ;;  %s1135_s1 = inlined_call_operand.vmem [shape: bf16[288,128], index: 1, kind: input, shape index: {}]   ;;  %s1136_s2 = inlined_call_operand.vmem [shape: f32[1,128], index: 2, kind: input, shape index: {}]   ;;  %s1137_s3 = inlined_call_operand.vmem [shape: f32[1,128], index: 3, kind: input, shape index: {}]   ;;  %s1138_s4 = inlined_call_operand.vmem [shape: bf16[32,128], index: 4, kind: input, shape index: {}]   ;;  %s1139_s5 = inlined_call_operand.vmem [shape: bf16[32,128], index: 5, kind: output, shape index: {}]  }
   0x1   :  { %s1017_s20 = smov 0  }
   0x2 LB: > { %s27_s21 = sadd.s32 1, %s976_s19  ;;  %p802_p0 = scmp.ge.s32.totalorder %s980_s20, 1  ;;  %s980_s20 = sphi %s1017_s20, %s15_s20   ;;  %s976_s19 = sphi %s1015_s19, %s1141_s19   ;;  %s972_s18 = sphi %s1013_s18, %s1140_s18  }
   0x3   : > { %p29_p1 = scmp.ge.s32.totalorder %s27_s21, 2  ;;  %p226_p2 = scmp.lt.s32.totalorder %s980_s20, 3 }
   0x5   : > { %s1143_s21 = smov (%p29_p1, %s27_s21), 0  ;;  %p227_p3 = pnand %p802_p0, %p226_p2 }
   0x6   : > { %p803_p4 = scmp.ne.s32.totalorder (!%p227_p3), %s972_s18, 0 }
   0x7   : > { %230 = sbr.rel (%p227_p3) target bundleno = 340 (0x154), region = 40 }
   0xe   : > { %295 = sbr.rel (%p803_p4) target bundleno = 293 (0x125), region = 44  ;;  %v930_v0 = vld [vmem:[%s1135_s1 + $0x40] sm:$0xff] (!%p803_p4)   ;;  %v932_v2 = vld [vmem:[%s1135_s1 + $0x48] sm:$0xff] (!%p803_p4)   ;;  %v934_v4 = vld [vmem:[%s1135_s1 + $0x50] sm:$0xff] (!%p803_p4)   ;;  %vm484_vm0 = vcmask (!%p803_p4), 261120   ;;  %v982_v24 = vmov (!%p803_p4), 0.0  }
   0xf   : > { %v931_v1 = vld [vmem:[%s1135_s1] sm:$0xff] (!%p803_p4)   ;;  %865 = vmatprep.subr.bf16.mxu0 (!%p803_p4), %v930_v0  ;;  %v933_v3 = vld [vmem:[%s1135_s1 + $0x8] sm:$0xff] (!%p803_p4)   ;;  %v935_v5 = vld [vmem:[%s1135_s1 + $0x10] sm:$0xff] (!%p803_p4)   ;;  %300 = vst [vmem:[#allocation3] sm:$0x1] (!%p803_p4), %v982_v24 }
  0x10   : > { %866 = vmatpush3.bf16.msra.mxu0 (!%p803_p4), %v931_v1  ;;  %v936_v6 = vld [vmem:[%s1135_s1 + $0x58] sm:$0xff] (!%p803_p4)   ;;  %v938_v8 = vld [vmem:[%s1135_s1 + $0x60] sm:$0xff] (!%p803_p4)   ;;  %v940_v11 = vld [vmem:[%s1135_s1 + $0x68] sm:$0xff] (!%p803_p4)   ;;  %301 = vst [vmem:[#allocation4] sm:$0x1] (!%p803_p4), %v982_v24 }
  0x11   : > { %867 = vmatprep.subr.bf16.mxu0 (!%p803_p4), %v932_v2  ;;  %v937_v7 = vld [vmem:[%s1135_s1 + $0x18] sm:$0xff] (!%p803_p4)   ;;  %v944_v9 = vld [vmem:[%s1135_s1 + $0x80] sm:$0xff] (!%p803_p4)   ;;  %v941_v12 = vld [vmem:[%s1135_s1 + $0x28] sm:$0xff] (!%p803_p4)  }
  0x12   : > { %v939_v10 = vld [vmem:[%s1135_s1 + $0x20] sm:$0xff] (!%p803_p4)   ;;  %897 = vmatprep.subr.bf16.mxu1 (!%p803_p4), %v944_v9  ;;  %v947_v13 = vld [vmem:[%s1135_s1 + $0x88] sm:$0xff] (!%p803_p4)   ;;  %v942_v14 = vld [vmem:[%s1135_s1 + $0x70] sm:$0xff] (!%p803_p4)  }
  0x13   : > { %898 = vmatpush3.bf16.msra.mxu1 (!%p803_p4), %v944_v9  ;;  %v950_v15 = vld [vmem:[%s1134_s0 + $0x4] ss:$12 sps:$4 sm:$0xff] (!%p803_p4)   ;;  %v951_v16 = vld [vmem:[%s1134_s0 + $0x8] ss:$12 sps:$4 sm:$0xff] (!%p803_p4)   ;;  %v952_v17 = vld [vmem:[%s1134_s0 + $0x20] ss:$12 sps:$4 sm:$0xff] (!%p803_p4)  }
  0x14   : > { %868 = vmatpush3.bf16.msra.mxu0 (!%p803_p4), %v933_v3  ;;  %899 = vmatprep.subr.bf16.mxu1 (!%p803_p4), %v947_v13  ;;  %v943_v18 = vld [vmem:[%s1135_s1 + $0x30] sm:$0xff] (!%p803_p4)   ;;  %v945_v19 = vld [vmem:[%s1135_s1 + $0x78] sm:$0xff] (!%p803_p4)   ;;  %v948_v21 = vld [vmem:[%s1134_s0] ss:$12 sps:$4 sm:$0xff] (!%p803_p4)  }
  0x15   : > { %869 = vmatprep.subr.bf16.mxu0 %v934_v4  ;;  %523 = vmatprep.mubr.bf16.mxu0 %v950_v15  ;;  %v946_v20 = vld [vmem:[%s1135_s1 + $0x38] sm:$0xff]  }
  0x16   : > { %901 = vmatprep.mubr.msk.bf16.mxu1 %vm484_vm0, %v951_v16  ;;  %v953_v22 = vld [vmem:[%s1134_s0 + $0x1c] ss:$12 sps:$4 sm:$0xff]   ;;  %v955_v23 = vld [vmem:[%s1134_s0 + $0x18] ss:$12 sps:$4 sm:$0xff]   ;;  %v596_v2 = vld [vmem:[#allocation3] sm:$0x1] }
  0x17   : > { %900 = vmatpush3.bf16.msra.mxu1 %v947_v13 }
  0x18   : > { %870 = vmatpush3.bf16.msra.mxu0 %v935_v5  ;;  %v608_v5 = vld [vmem:[#allocation4] sm:$0x1] }
  0x19   : > { %871 = vmatprep.subr.bf16.mxu0 %v936_v6 }
  0x1a   : > { %902 = vmatmul.mubr.msk.bf16.vlgmr.msra.gmra.mrb[0].mxu1 %vm484_vm0, %v952_v17 }
  0x1c   : > { %872 = vmatpush3.bf16.msra.mxu0 %v937_v7 }
  0x1d   : > { %873 = vmatprep.subr.bf16.mxu0 %v938_v8 }
  0x20   : > { %874 = vmatpush3.bf16.msra.mxu0 %v939_v10 }
  0x21   : > { %875 = vmatprep.subr.bf16.mxu0 %v940_v11 }
  0x24   : > { %876 = vmatpush3.bf16.msra.mxu0 %v941_v12 }
  0x25   : > { %877 = vmatprep.subr.bf16.mxu0 %v942_v14 }
  0x28   : > { %878 = vmatpush3.bf16.msra.mxu0 %v943_v18 }
  0x29   : > { %879 = vmatprep.subr.bf16.mxu0 %v945_v19 }
  0x2c   : > { %880 = vmatpush3.bf16.msra.mxu0 %v946_v20 }
  0x2f   : > { %524 = vmatmul.mubr.bf16.vlgmr.msra.gmra.mrb[0].mxu0 %v948_v21 }
  0x30   : > { %531 = vmatprep.mubr.bf16.mxu0 %v953_v22 }
  0x37   : > { %532 = vmatmul.mubr.bf16.gmra.mrb[4].mxu0 %v955_v23 }
  0xed   : > { %v903_v25 = vpop.f32.mrb[0].mxu1 }
  0xee   : > { %v574_v26 = vpop.f32.mrb[1].mxu1 }
  0xef   : > { %v904_v27 = vpop.f32.mrb[2].mxu1 }
  0xf0   : > { %v577_v28 = vpop.f32.mrb[3].mxu1 }
 0x102   : > { %v881_v29 = vpop.f32.mrb[0].mxu0 }
 0x103   : > { %v882_v30 = vpop.f32.mrb[1].mxu0 }
 0x104   : > { %v883_v31 = vadd.f32 %v882_v30, %v881_v29  ;;  %v884_v32 = vpop.f32.mrb[2].mxu0 }
 0x105   : > { %v885_v33 = vpop.f32.mrb[3].mxu0 }
 0x106   : > { %v886_v34 = vadd.f32 %v885_v33, %v884_v32  ;;  %v575_v35 = vadd.f32 %v883_v31, %v574_v26 }
 0x108   : > { %v578_v36 = vadd.f32 %v886_v34, %v577_v28  ;;  %v609_v37 = vmul.f32 %v575_v35, %v575_v35 }
 0x10a   : > { %v589_v38 = vpack.c.bf16 %v578_v36, %v575_v35  ;;  %v597_v39 = vadd.f32 %v578_v36, %v575_v35  ;;  %v610_v40 = vmul.f32 %v578_v36, %v578_v36  ;;  %v887_v41 = vpop.f32.mrb[4].mxu0 }
 0x10b   : > { %v888_v42 = vpop.f32.mrb[5].mxu0 }
 0x10c   : > { %594 = vst [vmem:[#allocation2] sm:$0xff] %v589_v38  ;;  %v613_v43 = vadd.f32 %v610_v40, %v609_v37  ;;  %v889_v44 = vadd.f32 %v888_v42, %v887_v41  ;;  %v890_v45 = vpop.f32.mrb[6].mxu0 }
 0x10d   : > { %v891_v46 = vpop.f32.mrb[7].mxu0 }
 0x10e   : > { %v583_v47 = vadd.f32 %v903_v25, %v889_v44  ;;  %v892_v48 = vadd.f32 %v891_v46, %v890_v45 }
 0x110   : > { %v598_v49 = vadd.f32 %v597_v39, %v583_v47  ;;  %v611_v50 = vmul.f32 %v583_v47, %v583_v47  ;;  %v586_v51 = vadd.f32 %v904_v27, %v892_v48 }
 0x112   : > { %v614_v52 = vadd.f32 %v613_v43, %v611_v50  ;;  %v590_v53 = vpack.c.bf16 %v586_v51, %v583_v47  ;;  %v599_v54 = vadd.f32 %v598_v49, %v586_v51  ;;  %v612_v55 = vmul.f32 %v586_v51, %v586_v51 }
 0x114   : > { %595 = vst [vmem:[#allocation2 + $0x8] sm:$0xff] %v590_v53  ;;  %v600_v56 = vrot.slane %v599_v54, 4  ;;  %v615_v57 = vadd.f32 %v614_v52, %v612_v55 }
 0x116   : > { %v601_v58 = vadd.f32 %v600_v56, %v599_v54  ;;  %v616_v59 = vrot.slane %v615_v57, 4 }
 0x118   : > { %v602_v60 = vrot.slane %v601_v58, 2  ;;  %v617_v61 = vadd.f32 %v616_v59, %v615_v57 }
 0x11a   : > { %v603_v62 = vadd.f32 %v602_v60, %v601_v58  ;;  %v618_v63 = vrot.slane %v617_v61, 2 }
 0x11c   : > { %v604_v0 = vrot.slane %v603_v62, 1  ;;  %v619_v1 = vadd.f32 %v618_v63, %v617_v61 }
 0x11e   : > { %v605_v3 = vadd.f32 %v604_v0, %v603_v62  ;;  %v620_v4 = vrot.slane %v619_v1, 1 }
 0x120   : > { %v606_v6 = vadd.f32 %v605_v3, %v596_v2  ;;  %v621_v7 = vadd.f32 %v620_v4, %v619_v1 }
 0x122   : > { %607 = vst [vmem:[#allocation3] sm:$0x1] %v606_v6  ;;  %v622_v8 = vadd.f32 %v621_v7, %v608_v5 }
 0x124   : > { %623 = vst [vmem:[#allocation4] sm:$0x1] %v622_v8 }
 0x125 PF: > { %p830_p5 = scmp.ne.s32.totalorder %s972_s18, 1 }
 0x126   : > { %v640_v17 = vld [vmem:[%s1136_s2] sm:$0x1] (!%p830_p5)  ;;  %v653_v23 = vld [vmem:[#allocation2 + $0x8] sm:$0xff] (!%p830_p5) }
 0x127   : > { %627 = sbr.rel (%p830_p5) target bundleno = 340 (0x154), region = 52  ;;  %v645_v20 = vld [vmem:[%s1137_s3] sm:$0x1] (!%p830_p5)  ;;  %v656_v27 = vunpack.c.l.bf16 (!%p830_p5), %v653_v23  ;;  %v657_v28 = vunpack.c.h.bf16 (!%p830_p5), %v653_v23  ;;  %v863_v31 = vld [vmem:[%s1138_s4 + $0x8] sm:$0xff] (!%p830_p5)  }
 0x128   : > { %v652_v22 = vld [vmem:[#allocation2] sm:$0xff] (!%p830_p5)  ;;  %v851_v38 = vunpack.c.l.bf16 (!%p830_p5), %v863_v31  ;;  %v852_v39 = vunpack.c.h.bf16 (!%p830_p5), %v863_v31 }
 0x129   : > { %v632_v9 = vld [vmem:[#allocation3] sm:$0x1] (!%p830_p5)  ;;  %v654_v25 = vunpack.c.l.bf16 (!%p830_p5), %v652_v22  ;;  %v655_v26 = vunpack.c.h.bf16 (!%p830_p5), %v652_v22  ;;  %v846_v30 = vld [vmem:[%s1138_s4] sm:$0xff] (!%p830_p5)  }
 0x12a   : > { %v634_v11 = vmul.f32 (!%p830_p5), 0.03125, %v632_v9  ;;  %v847_v36 = vunpack.c.l.bf16 (!%p830_p5), %v846_v30  ;;  %v848_v37 = vunpack.c.h.bf16 (!%p830_p5), %v846_v30 }
 0x12b   : > { %v635_v10 = vld [vmem:[#allocation4] sm:$0x1] (!%p830_p5) }
 0x12c   : > { %v636_v12 = vmul.f32 (!%p830_p5), 0.03125, %v635_v10  ;;  %v637_v13 = vmul.f32 (!%p830_p5), %v634_v11, %v634_v11 }
 0x12e   : > { %v638_v14 = vsub.f32 %v636_v12, %v637_v13 }
 0x130   : > { %v639_v15 = vmax.f32 %v638_v14, 0.0 }
 0x132   : > { %v641_v16 = vadd.f32 1e-05, %v639_v15 }
 0x134   : > { %956 = vrsqrt.f32 %v641_v16 }
 0x13e   : > { %v957_v18 = vpop.eup %956 }
 0x13f   : > { %v643_v19 = vmul.f32 %v957_v18, %v640_v17 }
 0x141   : > { %644 = vst [vmem:[#allocation5] sm:$0x1] %v643_v19  ;;  %v646_v21 = vmul.f32 %v643_v19, %v634_v11 }
 0x143   : > { %v647_v24 = vsub.f32 %v645_v20, %v646_v21 }
 0x145   : > { %648 = vst [vmem:[#allocation6] sm:$0x1] %v647_v24 }
 0x148   : > { %v831_v29 = vld [vmem:[#allocation5] ss:$0 sm:$0xff] }
 0x149   : > { %v665_v32 = vmul.f32 %v831_v29, %v654_v25  ;;  %v666_v33 = vmul.f32 %v831_v29, %v655_v26  ;;  %v667_v34 = vmul.f32 %v831_v29, %v656_v27  ;;  %v668_v35 = vmul.f32 %v831_v29, %v657_v28 }
 0x14c   : > { %v832_v40 = vld [vmem:[#allocation6] ss:$0 sm:$0xff] }
 0x14d   : > { %v676_v41 = vadd.f32 %v832_v40, %v665_v32  ;;  %v677_v42 = vadd.f32 %v832_v40, %v666_v33  ;;  %v678_v43 = vadd.f32 %v832_v40, %v667_v34  ;;  %v679_v44 = vadd.f32 %v832_v40, %v668_v35 }
 0x14f   : > { %v688_v45 = vadd.f32 %v847_v36, %v676_v41  ;;  %v689_v46 = vadd.f32 %v848_v37, %v677_v42  ;;  %v690_v47 = vadd.f32 %v851_v38, %v678_v43  ;;  %v691_v48 = vadd.f32 %v852_v39, %v679_v44 }
 0x151   : > { %v856_v49 = vpack.c.bf16 %v689_v46, %v688_v45  ;;  %v861_v50 = vpack.c.bf16 %v691_v48, %v690_v47 }
 0x153   : > { %857 = vst [vmem:[%s1139_s5] sm:$0xff] %v856_v49   ;;  %864 = vst [vmem:[%s1139_s5 + $0x8] sm:$0xff] %v861_v50  }
 0x154 PF: > { %s15_s20 = sadd.s32 1, %s980_s20   ;;  %s1140_s18 = smov %s976_s19 }
 0x155   : > { %p12_p6 = scmp.ge.s32.totalorder %s15_s20, 4   ;;  %s1141_s19 = smov %s1143_s21 }
 0x157   :  { %14 = sbr.rel (!%p12_p6) target bundleno = 2 (0x2), region = 91 }

// kernel: tile.28
= control target key start
LH: loop header
LB: loop body
LE: loop exit
PB: predicated region body
PF: predicated region fallthrough
CT: control target
= control target key end

     0   :  { %s22_s0 = inlined_call_operand.vmem [shape: f32[16], index: 0, kind: input, shape index: {}]   ;;  %s23_s1 = inlined_call_operand.vmem [shape: f32[4,16], index: 1, kind: output, shape index: {}]  }
   0x1   :  { %v4_v0 = vld [vmem:[%s22_s0] ss:$0 sm:$0xff] }
   0x2   :  { %5 = vst [vmem:[%s23_s1] sm:$0xf] %v4_v0 }

// kernel: tile.29
= control target key start
LH: loop header
LB: loop body
LE: loop exit
PB: predicated region body
PF: predicated region fallthrough
CT: control target
= control target key end

     0   :  { %vm7_vm0 = vcmask 130048   ;;  %s37_s8 = smov 16   ;;  %s38_s9 = smov 32   ;;  %vm13_vm1 = vcmask 523648   ;;  %vm19_vm2 = vcmask 392448   ;;  %vm25_vm3 = vcmask 261248   ;;  %s55_s0 = inlined_call_operand.vmem [shape: f32[4,16], index: 0, kind: input, shape index: {}]   ;;  %s56_s1 = inlined_call_operand.vmem [shape: f32[64], index: 1, kind: output, shape index: {}]  }
   0x1   :  { %v4_v0 = vld [vmem:[%s55_s0] sm:$0xf]  ;;  %s36_s0 = smov 48  }
   0x2   :  { %5 = vst [vmem:[#allocation1] sm:$0xf] %v4_v0 }
   0x9   :  { %v10_v1 = vld [vmem:[#allocation1 + $0x3] sm:$0x1]   ;;  %v22_v2 = vld [vmem:[#allocation1 + $0x1] sm:$0x1]   ;;  %v6_v3 = vld [vmem:[#allocation1] sm:$0x1]  }
   0xa   :  { %11 = vrot.lane.b32.xlu0 %v10_v1, %s36_s0  ;;  %23 = vrot.lane.b32.xlu1 %v22_v2, %s37_s8  ;;  %v16_v4 = vld [vmem:[#allocation1 + $0x2] sm:$0x1]   ;;  %8 = vst.msk [vmem:[#allocation0] sm:$0x1] %vm7_vm0, %v6_v3  }
   0xe   :  { %17 = vrot.lane.b32.xlu0 %v16_v4, %s38_s9 }
  0x7c   :  { %v12_v5 = vpop.permute.xlu0 %11   ;;  %v24_v6 = vpop.permute.xlu1 %23  }
  0x7d   :  { %14 = vst.msk [vmem:[#allocation0] sm:$0x1] %vm13_vm1, %v12_v5  }
  0x80   :  { %v18_v7 = vpop.permute.xlu0 %17  }
  0x81   :  { %20 = vst.msk [vmem:[#allocation0] sm:$0x1] %vm19_vm2, %v18_v7  }
  0x82   :  { %26 = vst.msk [vmem:[#allocation0] sm:$0x1] %vm25_vm3, %v24_v6  }
  0x89   :  { %v30_v8 = vld [vmem:[#allocation0] sm:$0x1] }
  0x8a   :  { %32 = vst [vmem:[%s56_s1] sm:$0x1] %v30_v8 }

// kernel: generator_forward.47
= control target key start
LH: loop header
LB: loop body
LE: loop exit
PB: predicated region body
PF: predicated region fallthrough
CT: control target
= control target key end

     0   :  { %s336_s1 = inlined_call_operand.vmem [shape: bf16[128,128], index: 1, kind: input, shape index: {}]   ;;  %s337_s0 = inlined_call_operand.vmem [shape: bf16[32,128], index: 0, kind: input, shape index: {}]   ;;  %s338_s2 = inlined_call_operand.vmem [shape: bf16[32,128], index: 2, kind: output, shape index: {0}]   ;;  %s339_s3 = inlined_call_operand.vmem [shape: f32[1,1,128], index: 3, kind: output, shape index: {1}]   ;;  %s340_s4 = inlined_call_operand.vmem [shape: f32[1,1,128], index: 4, kind: output, shape index: {2}]  }
   0x1   :  { %v259_v0 = vld [vmem:[%s336_s1] sm:$0xff]   ;;  %v260_v1 = vld [vmem:[%s336_s1 + $0x8] sm:$0xff]   ;;  %v261_v2 = vld [vmem:[%s336_s1 + $0x10] sm:$0xff]  }
   0x2   :  { %239 = vmatprep.subr.bf16.mxu0 %v259_v0  ;;  %v262_v3 = vld [vmem:[%s336_s1 + $0x18] sm:$0xff]   ;;  %v267_v4 = vld [vmem:[%s337_s0] sm:$0xff]   ;;  %v264_v6 = vld [vmem:[%s336_s1 + $0x28] sm:$0xff]  }
   0x3   :  { %240 = vmatpush3.bf16.msra.mxu0 %v259_v0  ;;  %255 = vmatprep.mubr.bf16.mxu0 %v267_v4  ;;  %v263_v5 = vld [vmem:[%s336_s1 + $0x20] sm:$0xff]   ;;  %v265_v7 = vld [vmem:[%s336_s1 + $0x30] sm:$0xff]   ;;  %v266_v8 = vld [vmem:[%s336_s1 + $0x38] sm:$0xff]  }
   0x4   :  { %241 = vmatprep.subr.bf16.mxu0 %v260_v1  ;;  %v268_v9 = vld [vmem:[%s337_s0 + $0x8] sm:$0xff]  }
   0x7   :  { %242 = vmatpush3.bf16.msra.mxu0 %v260_v1 }
   0x8   :  { %243 = vmatprep.subr.bf16.mxu0 %v261_v2 }
   0xb   :  { %244 = vmatpush3.bf16.msra.mxu0 %v261_v2 }
   0xc   :  { %245 = vmatprep.subr.bf16.mxu0 %v262_v3 }
   0xf   :  { %246 = vmatpush3.bf16.msra.mxu0 %v262_v3 }
  0x10   :  { %247 = vmatprep.subr.bf16.mxu0 %v263_v5 }
  0x13   :  { %248 = vmatpush3.bf16.msra.mxu0 %v263_v5 }
  0x14   :  { %249 = vmatprep.subr.bf16.mxu0 %v264_v6 }
  0x17   :  { %250 = vmatpush3.bf16.msra.mxu0 %v264_v6 }
  0x18   :  { %251 = vmatprep.subr.bf16.mxu0 %v265_v7 }
  0x1b   :  { %252 = vmatpush3.bf16.msra.mxu0 %v265_v7 }
  0x1c   :  { %253 = vmatprep.subr.bf16.mxu0 %v266_v8 }
  0x1f   :  { %254 = vmatpush3.bf16.msra.mxu0 %v266_v8 }
  0x22   :  { %256 = vmatmul.mubr.bf16.vlgmr.msra.gmra.mrb[0].mxu0 %v268_v9 }
  0xf5   :  { %v257_v10 = vpop.f32.mrb[0].mxu0 }
  0xf6   :  { %v129_v11 = vpop.f32.mrb[1].mxu0  ;;  %v176_v19 = vmul.f32 %v257_v10, %v257_v10 }
  0xf7   :  { %v258_v12 = vpop.f32.mrb[2].mxu0  ;;  %v174_v15 = vmul.f32 %v129_v11, %v129_v11 }
  0xf8   :  { %v226_v13 = vpack.c.bf16 %v258_v12, %v257_v10  ;;  %v132_v14 = vpop.f32.mrb[3].mxu0  ;;  %v177_v22 = vmul.f32 %v258_v12, %v258_v12 }
  0xf9   :  { %v221_v16 = vpack.c.bf16 %v132_v14, %v129_v11  ;;  %v164_v17 = vadd.f32 %v132_v14, %v129_v11  ;;  %v175_v18 = vmul.f32 %v132_v14, %v132_v14 }
  0xfa   :  { %228 = vst [vmem:[%s338_s2 + $0x8] sm:$0xff] %v226_v13  }
  0xfb   :  { %222 = vst [vmem:[%s338_s2] sm:$0xff] %v221_v16   ;;  %v165_v20 = vadd.f32 %v257_v10, %v164_v17  ;;  %v178_v21 = vadd.f32 %v175_v18, %v174_v15 }
  0xfd   :  { %v166_v23 = vadd.f32 %v258_v12, %v165_v20  ;;  %v179_v24 = vadd.f32 %v178_v21, %v176_v19 }
  0xff   :  { %v167_v25 = vrot.slane %v166_v23, 4  ;;  %v180_v26 = vadd.f32 %v179_v24, %v177_v22 }
 0x101   :  { %v168_v27 = vadd.f32 %v167_v25, %v166_v23  ;;  %v181_v28 = vrot.slane %v180_v26, 4 }
 0x103   :  { %v169_v29 = vrot.slane %v168_v27, 2  ;;  %v182_v30 = vadd.f32 %v181_v28, %v180_v26 }
 0x105   :  { %v170_v31 = vadd.f32 %v169_v29, %v168_v27  ;;  %v183_v32 = vrot.slane %v182_v30, 2 }
 0x107   :  { %v171_v33 = vrot.slane %v170_v31, 1  ;;  %v184_v34 = vadd.f32 %v183_v32, %v182_v30 }
 0x109   :  { %v172_v35 = vadd.f32 %v171_v33, %v170_v31  ;;  %v185_v36 = vrot.slane %v184_v34, 1 }
 0x10b   :  { %173 = vst [vmem:[%s339_s3] sm:$0x1] %v172_v35  ;;  %v186_v37 = vadd.f32 %v185_v36, %v184_v34 }
 0x10d   :  { %187 = vst [vmem:[%s340_s4] sm:$0x1] %v186_v37 }

// kernel: generator_forward.48
= control target key start
LH: loop header
LB: loop body
LE: loop exit
PB: predicated region body
PF: predicated region fallthrough
CT: control target
= control target key end

     0   :  { %s140_s0 = inlined_call_operand.vmem [shape: bf16[32,128], index: 0, kind: input, shape index: {}]   ;;  %s141_s1 = inlined_call_operand.vmem [shape: f32[1,128], index: 1, kind: input, shape index: {}]   ;;  %s142_s2 = inlined_call_operand.vmem [shape: f32[1,128], index: 2, kind: input, shape index: {}]   ;;  %s143_s3 = inlined_call_operand.vmem [shape: bf16[32,128], index: 3, kind: output, shape index: {}]  }
   0x1   :  { %v83_v0 = vld [vmem:[%s140_s0] sm:$0xff]   ;;  %v100_v4 = vld [vmem:[%s140_s0 + $0x8] sm:$0xff]  }
   0x2   :  { %v72_v1 = vld [vmem:[%s141_s1] ss:$0 sm:$0xff]  ;;  %v84_v2 = vunpack.c.l.bf16 %v83_v0  ;;  %v85_v3 = vunpack.c.h.bf16 %v83_v0  ;;  %v88_v6 = vunpack.c.l.bf16 %v100_v4  ;;  %v89_v7 = vunpack.c.h.bf16 %v100_v4 }
   0x3   :  { %v73_v5 = vld [vmem:[%s142_s2] ss:$0 sm:$0xff] }
   0x4   :  { %v29_v8 = vmul.f32 %v84_v2, %v72_v1  ;;  %v30_v9 = vmul.f32 %v85_v3, %v72_v1  ;;  %v31_v10 = vmul.f32 %v88_v6, %v72_v1  ;;  %v32_v11 = vmul.f32 %v89_v7, %v72_v1 }
   0x6   :  { %v40_v12 = vadd.f32 %v73_v5, %v29_v8  ;;  %v41_v13 = vadd.f32 %v73_v5, %v30_v9  ;;  %v42_v14 = vadd.f32 %v73_v5, %v31_v10  ;;  %v43_v15 = vadd.f32 %v73_v5, %v32_v11 }
   0x8   :  { %v44_v16 = vmax.f32 %v40_v12, 0.0  ;;  %v45_v17 = vmax.f32 %v41_v13, 0.0  ;;  %v46_v18 = vmax.f32 %v42_v14, 0.0  ;;  %v47_v19 = vmax.f32 %v43_v15, 0.0 }
   0xa   :  { %v93_v20 = vpack.c.bf16 %v45_v17, %v44_v16  ;;  %v98_v21 = vpack.c.bf16 %v47_v19, %v46_v18 }
   0xc   :  { %94 = vst [vmem:[%s143_s3] sm:$0xff] %v93_v20   ;;  %101 = vst [vmem:[%s143_s3 + $0x8] sm:$0xff] %v98_v21  }

// kernel: tile.38
= control target key start
LH: loop header
LB: loop body
LE: loop exit
PB: predicated region body
PF: predicated region fallthrough
CT: control target
= control target key end

     0   :  { %s22_s0 = inlined_call_operand.vmem [shape: f32[8], index: 0, kind: input, shape index: {}]   ;;  %s23_s1 = inlined_call_operand.vmem [shape: f32[4,8], index: 1, kind: output, shape index: {}]  }
   0x1   :  { %v4_v0 = vld [vmem:[%s22_s0] ss:$0 sm:$0xff] }
   0x2   :  { %5 = vst [vmem:[%s23_s1] sm:$0xf] %v4_v0 }

// kernel: tile.39
= control target key start
LH: loop header
LB: loop body
LE: loop exit
PB: predicated region body
PF: predicated region fallthrough
CT: control target
= control target key end

     0   :  { %vm7_vm0 = vcmask 64512   ;;  %s37_s8 = smov 8   ;;  %s38_s9 = smov 16   ;;  %vm13_vm1 = vcmask 261312   ;;  %vm19_vm2 = vcmask 195712   ;;  %vm25_vm3 = vcmask 130112   ;;  %s55_s0 = inlined_call_operand.vmem [shape: f32[4,8], index: 0, kind: input, shape index: {}]   ;;  %s56_s1 = inlined_call_operand.vmem [shape: f32[32], index: 1, kind: output, shape index: {}]  }
   0x1   :  { %v4_v0 = vld [vmem:[%s55_s0] sm:$0xf]  ;;  %s36_s0 = smov 24  }
   0x2   :  { %5 = vst [vmem:[#allocation1] sm:$0xf] %v4_v0 }
   0x9   :  { %v10_v1 = vld [vmem:[#allocation1 + $0x3] sm:$0x1]   ;;  %v22_v2 = vld [vmem:[#allocation1 + $0x1] sm:$0x1]   ;;  %v6_v3 = vld [vmem:[#allocation1] sm:$0x1]  }
   0xa   :  { %11 = vrot.lane.b32.xlu0 %v10_v1, %s36_s0  ;;  %23 = vrot.lane.b32.xlu1 %v22_v2, %s37_s8  ;;  %v16_v4 = vld [vmem:[#allocation1 + $0x2] sm:$0x1]   ;;  %8 = vst.msk [vmem:[#allocation0] sm:$0x1] %vm7_vm0, %v6_v3  }
   0xe   :  { %17 = vrot.lane.b32.xlu0 %v16_v4, %s38_s9 }
  0x7c   :  { %v12_v5 = vpop.permute.xlu0 %11   ;;  %v24_v6 = vpop.permute.xlu1 %23  }
  0x7d   :  { %14 = vst.msk [vmem:[#allocation0] sm:$0x1] %vm13_vm1, %v12_v5  }
  0x80   :  { %v18_v7 = vpop.permute.xlu0 %17  }
  0x81   :  { %20 = vst.msk [vmem:[#allocation0] sm:$0x1] %vm19_vm2, %v18_v7  }
  0x82   :  { %26 = vst.msk [vmem:[#allocation0] sm:$0x1] %vm25_vm3, %v24_v6  }
  0x89   :  { %v30_v8 = vld [vmem:[#allocation0] sm:$0x1] }
  0x8a   :  { %32 = vst [vmem:[%s56_s1] sm:$0x1] %v30_v8 }

// kernel: generator_forward.50
= control target key start
LH: loop header
LB: loop body
LE: loop exit
PB: predicated region body
PF: predicated region fallthrough
CT: control target
= control target key end

     0   :  { %s422_s0 = inlined_call_operand.vmem [shape: bf16[128,128], index: 0, kind: input, shape index: {}]   ;;  %s423_s1 = inlined_call_operand.vmem [shape: f32[1,128], index: 1, kind: input, shape index: {}]   ;;  %s424_s2 = inlined_call_operand.vmem [shape: f32[1,128], index: 2, kind: input, shape index: {}]   ;;  %s425_s3 = inlined_call_operand.vmem [shape: bf16[128,128], index: 3, kind: output, shape index: {}]  }
   0x1   :  { %v227_v0 = vld [vmem:[%s422_s0] sm:$0xff]   ;;  %v298_v4 = vld [vmem:[%s422_s0 + $0x8] sm:$0xff]   ;;  %v299_v5 = vld [vmem:[%s422_s0 + $0x10] sm:$0xff]  }
   0x2   :  { %v338_v1 = vld [vmem:[%s423_s1] ss:$0 sm:$0xff]  ;;  %v228_v2 = vunpack.c.l.bf16 %v227_v0  ;;  %v229_v3 = vunpack.c.h.bf16 %v227_v0  ;;  %v300_v6 = vld [vmem:[%s422_s0 + $0x18] sm:$0xff]   ;;  %v232_v8 = vunpack.c.l.bf16 %v298_v4  ;;  %v233_v9 = vunpack.c.h.bf16 %v298_v4  ;;  %v302_v33 = vld [vmem:[%s422_s0 + $0x28] sm:$0xff]  }
   0x3   :  { %v352_v7 = vld [vmem:[%s424_s2] ss:$0 sm:$0xff]  ;;  %v236_v10 = vunpack.c.l.bf16 %v299_v5  ;;  %v237_v11 = vunpack.c.h.bf16 %v299_v5  ;;  %v240_v14 = vunpack.c.l.bf16 %v300_v6  ;;  %v241_v15 = vunpack.c.h.bf16 %v300_v6  ;;  %v303_v38 = vld [vmem:[%s422_s0 + $0x30] sm:$0xff]   ;;  %v304_v43 = vld [vmem:[%s422_s0 + $0x38] sm:$0xff]  }
   0x4   :  { %v53_v12 = vmul.f32 %v228_v2, %v338_v1  ;;  %v54_v13 = vmul.f32 %v229_v3, %v338_v1  ;;  %v55_v16 = vmul.f32 %v232_v8, %v338_v1  ;;  %v56_v17 = vmul.f32 %v233_v9, %v338_v1  ;;  %v301_v28 = vld [vmem:[%s422_s0 + $0x20] sm:$0xff]  }
   0x5   :  { %v57_v18 = vmul.f32 %v236_v10, %v338_v1  ;;  %v58_v19 = vmul.f32 %v237_v11, %v338_v1  ;;  %v59_v22 = vmul.f32 %v240_v14, %v338_v1  ;;  %v60_v23 = vmul.f32 %v241_v15, %v338_v1 }
   0x6   :  { %v76_v20 = vadd.f32 %v352_v7, %v53_v12  ;;  %v77_v21 = vadd.f32 %v352_v7, %v54_v13  ;;  %v78_v24 = vadd.f32 %v352_v7, %v55_v16  ;;  %v79_v25 = vadd.f32 %v352_v7, %v56_v17 }
   0x7   :  { %v80_v26 = vadd.f32 %v352_v7, %v57_v18  ;;  %v81_v27 = vadd.f32 %v352_v7, %v58_v19  ;;  %v82_v31 = vadd.f32 %v352_v7, %v59_v22  ;;  %v83_v32 = vadd.f32 %v352_v7, %v60_v23 }
   0x8   :  { %v92_v29 = vmax.f32 %v76_v20, 0.0  ;;  %v93_v30 = vmax.f32 %v77_v21, 0.0  ;;  %v94_v34 = vmax.f32 %v78_v24, 0.0  ;;  %v95_v35 = vmax.f32 %v79_v25, 0.0 }
   0x9   :  { %v96_v36 = vmax.f32 %v80_v26, 0.0  ;;  %v97_v37 = vmax.f32 %v81_v27, 0.0  ;;  %v98_v40 = vmax.f32 %v82_v31, 0.0  ;;  %v99_v41 = vmax.f32 %v83_v32, 0.0 }
   0xa   :  { %v261_v39 = vpack.c.bf16 %v93_v30, %v92_v29  ;;  %v244_v42 = vunpack.c.l.bf16 %v301_v28  ;;  %v266_v44 = vpack.c.bf16 %v95_v35, %v94_v34  ;;  %v245_v46 = vunpack.c.h.bf16 %v301_v28 }
   0xb   :  { %v271_v45 = vpack.c.bf16 %v97_v37, %v96_v36  ;;  %v248_v47 = vunpack.c.l.bf16 %v302_v33  ;;  %v276_v48 = vpack.c.bf16 %v99_v41, %v98_v40  ;;  %v249_v50 = vunpack.c.h.bf16 %v302_v33 }
   0xc   :  { %262 = vst [vmem:[%s425_s3] sm:$0xff] %v261_v39   ;;  %v61_v49 = vmul.f32 %v244_v42, %v338_v1  ;;  %v252_v51 = vunpack.c.l.bf16 %v303_v38  ;;  %305 = vst [vmem:[%s425_s3 + $0x8] sm:$0xff] %v266_v44   ;;  %v62_v52 = vmul.f32 %v245_v46, %v338_v1  ;;  %v253_v54 = vunpack.c.h.bf16 %v303_v38 }
   0xd   :  { %306 = vst [vmem:[%s425_s3 + $0x10] sm:$0xff] %v271_v45   ;;  %v63_v53 = vmul.f32 %v248_v47, %v338_v1  ;;  %v256_v55 = vunpack.c.l.bf16 %v304_v43  ;;  %307 = vst [vmem:[%s425_s3 + $0x18] sm:$0xff] %v276_v48   ;;  %v64_v57 = vmul.f32 %v249_v50, %v338_v1  ;;  %v257_v59 = vunpack.c.h.bf16 %v304_v43 }
   0xe   :  { %v84_v56 = vadd.f32 %v352_v7, %v61_v49  ;;  %v65_v58 = vmul.f32 %v252_v51, %v338_v1  ;;  %v85_v60 = vadd.f32 %v352_v7, %v62_v52  ;;  %v66_v62 = vmul.f32 %v253_v54, %v338_v1 }
   0xf   :  { %v86_v61 = vadd.f32 %v352_v7, %v63_v53  ;;  %v67_v63 = vmul.f32 %v256_v55, %v338_v1  ;;  %v87_v2 = vadd.f32 %v352_v7, %v64_v57  ;;  %v68_v4 = vmul.f32 %v257_v59, %v338_v1 }
  0x10   :  { %v100_v0 = vmax.f32 %v84_v56, 0.0  ;;  %v88_v3 = vadd.f32 %v352_v7, %v65_v58  ;;  %v101_v5 = vmax.f32 %v85_v60, 0.0  ;;  %v89_v8 = vadd.f32 %v352_v7, %v66_v62 }
  0x11   :  { %v102_v6 = vmax.f32 %v86_v61, 0.0  ;;  %v90_v9 = vadd.f32 %v352_v7, %v67_v63  ;;  %v103_v10 = vmax.f32 %v87_v2, 0.0  ;;  %v91_v12 = vadd.f32 %v352_v7, %v68_v4 }
  0x12   :  { %v104_v11 = vmax.f32 %v88_v3, 0.0  ;;  %v281_v13 = vpack.c.bf16 %v101_v5, %v100_v0  ;;  %v105_v14 = vmax.f32 %v89_v8, 0.0 }
  0x13   :  { %v106_v15 = vmax.f32 %v90_v9, 0.0  ;;  %v286_v16 = vpack.c.bf16 %v103_v10, %v102_v6  ;;  %v107_v17 = vmax.f32 %v91_v12, 0.0 }
  0x14   :  { %308 = vst [vmem:[%s425_s3 + $0x20] sm:$0xff] %v281_v13   ;;  %v291_v1 = vpack.c.bf16 %v105_v14, %v104_v11 }
  0x15   :  { %309 = vst [vmem:[%s425_s3 + $0x28] sm:$0xff] %v286_v16   ;;  %v296_v18 = vpack.c.bf16 %v107_v17, %v106_v15 }
  0x16   :  { %310 = vst [vmem:[%s425_s3 + $0x30] sm:$0xff] %v291_v1  }
  0x17   :  { %311 = vst [vmem:[%s425_s3 + $0x38] sm:$0xff] %v296_v18  }

// kernel: generator_forward.49
= control target key start
LH: loop header
LB: loop body
LE: loop exit
PB: predicated region body
PF: predicated region fallthrough
CT: control target
= control target key end

     0   :  { %vm103_vm0 = vcmask 523264   ;;  %s631_s1 = inlined_call_operand.vmem [shape: bf16[64,128], index: 1, kind: input, shape index: {}]   ;;  %s632_s0 = inlined_call_operand.vmem [shape: bf16[128,64], index: 0, kind: input, shape index: {}]   ;;  %s633_s2 = inlined_call_operand.vmem [shape: bf16[128,128], index: 2, kind: output, shape index: {0}]   ;;  %s634_s3 = inlined_call_operand.vmem [shape: f32[1,1,128], index: 3, kind: output, shape index: {1}]   ;;  %s635_s4 = inlined_call_operand.vmem [shape: f32[1,1,128], index: 4, kind: output, shape index: {2}]  }
   0x1   :  { %v520_v0 = vld [vmem:[%s631_s1] sm:$0xff]   ;;  %v521_v1 = vld [vmem:[%s631_s1 + $0x8] sm:$0xff]   ;;  %v522_v2 = vld [vmem:[%s631_s1 + $0x10] sm:$0xff]  }
   0x2   :  { %488 = vmatprep.subr.bf16.mxu0 %v520_v0  ;;  %512 = vmatprep.subr.bf16.mxu1 %v520_v0  ;;  %v524_v3 = vld [vmem:[%s632_s0] sm:$0xff]   ;;  %v523_v4 = vld [vmem:[%s631_s1 + $0x18] sm:$0xff]   ;;  %v525_v6 = vld [vmem:[%s632_s0 + $0x8] sm:$0xff]  }
   0x3   :  { %489 = vmatpush3.bf16.msra.mxu0 %v520_v0  ;;  %516 = vmatpush3.bf16.msra.mxu1 %v520_v0  ;;  %v528_v5 = vld [vmem:[%s632_s0 + $0x20] sm:$0xff]   ;;  %v529_v7 = vld [vmem:[%s632_s0 + $0x28] sm:$0xff]   ;;  %v526_v8 = vld [vmem:[%s632_s0 + $0x10] sm:$0xff]  }
   0x4   :  { %490 = vmatprep.subr.bf16.mxu0 %v521_v1  ;;  %513 = vmatprep.subr.bf16.mxu1 %v521_v1  ;;  %v530_v9 = vld [vmem:[%s632_s0 + $0x30] sm:$0xff]   ;;  %v527_v10 = vld [vmem:[%s632_s0 + $0x18] sm:$0xff]  }
   0x5   :  { %496 = vmatprep.mubr.msk.bf16.mxu0 %vm103_vm0, %v524_v3  ;;  %504 = vmatprep.mubr.msk.bf16.mxu1 %vm103_vm0, %v528_v5  ;;  %v531_v11 = vld [vmem:[%s632_s0 + $0x38] sm:$0xff]  }
   0x7   :  { %491 = vmatpush3.bf16.msra.mxu0 %v521_v1  ;;  %517 = vmatpush3.bf16.msra.mxu1 %v521_v1 }
   0x8   :  { %492 = vmatprep.subr.bf16.mxu0 %v522_v2  ;;  %514 = vmatprep.subr.bf16.mxu1 %v522_v2 }
   0xb   :  { %493 = vmatpush3.bf16.msra.mxu0 %v522_v2  ;;  %518 = vmatpush3.bf16.msra.mxu1 %v522_v2 }
   0xc   :  { %494 = vmatprep.subr.bf16.mxu0 %v523_v4  ;;  %515 = vmatprep.subr.bf16.mxu1 %v523_v4 }
   0xf   :  { %495 = vmatpush3.bf16.msra.mxu0 %v523_v4  ;;  %519 = vmatpush3.bf16.msra.mxu1 %v523_v4 }
  0x12   :  { %497 = vmatmul.mubr.msk.bf16.vlgmr.msra.gmra.mrb[0].mxu0 %vm103_vm0, %v525_v6  ;;  %505 = vmatmul.mubr.msk.bf16.vlgmr.msra.gmra.mrb[0].mxu1 %vm103_vm0, %v529_v7 }
  0x13   :  { %500 = vmatprep.mubr.msk.bf16.mxu0 %vm103_vm0, %v526_v8  ;;  %508 = vmatprep.mubr.msk.bf16.mxu1 %vm103_vm0, %v530_v9 }
  0x1a   :  { %501 = vmatmul.mubr.msk.bf16.gmra.mrb[4].mxu0 %vm103_vm0, %v527_v10  ;;  %509 = vmatmul.mubr.msk.bf16.gmra.mrb[4].mxu1 %vm103_vm0, %v531_v11 }
  0xe5   :  { %v498_v12 = vpop.f32.mrb[0].mxu0  ;;  %v506_v13 = vpop.f32.mrb[0].mxu1 }
  0xe6   :  { %v162_v14 = vpop.f32.mrb[1].mxu0  ;;  %v194_v15 = vpop.f32.mrb[1].mxu1  ;;  %v329_v27 = vmul.f32 %v498_v12, %v498_v12  ;;  %v337_v63 = vmul.f32 %v506_v13, %v506_v13 }
  0xe7   :  { %v499_v16 = vpop.f32.mrb[2].mxu0  ;;  %v507_v17 = vpop.f32.mrb[2].mxu1  ;;  %v327_v18 = vmul.f32 %v162_v14, %v162_v14  ;;  %v335_v57 = vmul.f32 %v194_v15, %v194_v15 }
  0xe8   :  { %v437_v19 = vpack.c.bf16 %v499_v16, %v498_v12  ;;  %v165_v20 = vpop.f32.mrb[3].mxu0  ;;  %v457_v21 = vpack.c.bf16 %v507_v17, %v506_v13  ;;  %v197_v22 = vpop.f32.mrb[3].mxu1  ;;  %v330_v30 = vmul.f32 %v499_v16, %v499_v16  ;;  %v338_v2 = vmul.f32 %v507_v17, %v507_v17 }
  0xe9   :  { %v432_v23 = vpack.c.bf16 %v165_v20, %v162_v14  ;;  %v305_v24 = vadd.f32 %v165_v20, %v162_v14  ;;  %v328_v25 = vmul.f32 %v165_v20, %v165_v20  ;;  %v452_v26 = vpack.c.bf16 %v197_v22, %v194_v15 }
  0xea   :  { %469 = vst [vmem:[%s633_s2 + $0x8] sm:$0xff] %v437_v19   ;;  %473 = vst [vmem:[%s633_s2 + $0x28] sm:$0xff] %v457_v21   ;;  %v336_v62 = vmul.f32 %v197_v22, %v197_v22 }
  0xeb   :  { %433 = vst [vmem:[%s633_s2] sm:$0xff] %v432_v23   ;;  %v306_v28 = vadd.f32 %v498_v12, %v305_v24  ;;  %v343_v29 = vadd.f32 %v328_v25, %v327_v18  ;;  %472 = vst [vmem:[%s633_s2 + $0x20] sm:$0xff] %v452_v26  }
  0xed   :  { %v344_v31 = vadd.f32 %v343_v29, %v329_v27  ;;  %v502_v32 = vpop.f32.mrb[4].mxu0  ;;  %v307_v33 = vadd.f32 %v499_v16, %v306_v28  ;;  %v510_v34 = vpop.f32.mrb[4].mxu1 }
  0xee   :  { %v178_v35 = vpop.f32.mrb[5].mxu0  ;;  %v210_v36 = vpop.f32.mrb[5].mxu1  ;;  %v333_v51 = vmul.f32 %v502_v32, %v502_v32  ;;  %v341_v11 = vmul.f32 %v510_v34, %v510_v34 }
  0xef   :  { %v308_v37 = vadd.f32 %v307_v33, %v178_v35  ;;  %v331_v38 = vmul.f32 %v178_v35, %v178_v35  ;;  %v345_v39 = vadd.f32 %v344_v31, %v330_v30  ;;  %v503_v40 = vpop.f32.mrb[6].mxu0  ;;  %v511_v41 = vpop.f32.mrb[6].mxu1  ;;  %v339_v5 = vmul.f32 %v210_v36, %v210_v36 }
  0xf0   :  { %v447_v42 = vpack.c.bf16 %v503_v40, %v502_v32  ;;  %v181_v43 = vpop.f32.mrb[7].mxu0  ;;  %v467_v44 = vpack.c.bf16 %v511_v41, %v510_v34  ;;  %v213_v45 = vpop.f32.mrb[7].mxu1  ;;  %v334_v54 = vmul.f32 %v503_v40, %v503_v40 }
  0xf1   :  { %v346_v46 = vadd.f32 %v345_v39, %v331_v38  ;;  %v442_v47 = vpack.c.bf16 %v181_v43, %v178_v35  ;;  %v309_v48 = vadd.f32 %v308_v37, %v181_v43  ;;  %v332_v49 = vmul.f32 %v181_v43, %v181_v43 }
  0xf2   :  { %471 = vst [vmem:[%s633_s2 + $0x18] sm:$0xff] %v447_v42   ;;  %475 = vst [vmem:[%s633_s2 + $0x38] sm:$0xff] %v467_v44   ;;  %v462_v50 = vpack.c.bf16 %v213_v45, %v210_v36  ;;  %v340_v10 = vmul.f32 %v213_v45, %v213_v45 }
  0xf3   :  { %470 = vst [vmem:[%s633_s2 + $0x10] sm:$0xff] %v442_v47   ;;  %v310_v52 = vadd.f32 %v502_v32, %v309_v48  ;;  %v347_v53 = vadd.f32 %v346_v46, %v332_v49 }
  0xf4   :  { %474 = vst [vmem:[%s633_s2 + $0x30] sm:$0xff] %v462_v50  }
  0xf5   :  { %v348_v55 = vadd.f32 %v347_v53, %v333_v51  ;;  %v311_v56 = vadd.f32 %v503_v40, %v310_v52 }
  0xf7   :  { %v312_v58 = vadd.f32 %v311_v56, %v194_v15  ;;  %v349_v59 = vadd.f32 %v348_v55, %v334_v54  ;;  %v342_v15 = vmul.f32 %v511_v41, %v511_v41 }
  0xf9   :  { %v350_v60 = vadd.f32 %v349_v59, %v335_v57  ;;  %v313_v61 = vadd.f32 %v312_v58, %v197_v22 }
  0xfb   :  { %v314_v0 = vadd.f32 %v506_v13, %v313_v61  ;;  %v351_v1 = vadd.f32 %v350_v60, %v336_v62 }
  0xfd   :  { %v352_v3 = vadd.f32 %v351_v1, %v337_v63  ;;  %v315_v4 = vadd.f32 %v507_v17, %v314_v0 }
  0xff   :  { %v316_v6 = vadd.f32 %v315_v4, %v210_v36  ;;  %v353_v7 = vadd.f32 %v352_v3, %v338_v2 }
 0x101   :  { %v354_v8 = vadd.f32 %v353_v7, %v339_v5  ;;  %v317_v9 = vadd.f32 %v316_v6, %v213_v45 }
 0x103   :  { %v318_v12 = vadd.f32 %v510_v34, %v317_v9  ;;  %v355_v14 = vadd.f32 %v354_v8, %v340_v10 }
 0x105   :  { %v319_v16 = vadd.f32 %v511_v41, %v318_v12  ;;  %v356_v18 = vadd.f32 %v355_v14, %v341_v11 }
 0x107   :  { %v320_v19 = vrot.slane %v319_v16, 4  ;;  %v357_v20 = vadd.f32 %v356_v18, %v342_v15 }
 0x109   :  { %v321_v21 = vadd.f32 %v320_v19, %v319_v16  ;;  %v358_v13 = vrot.slane %v357_v20, 4 }
 0x10b   :  { %v322_v22 = vrot.slane %v321_v21, 2  ;;  %v359_v23 = vadd.f32 %v358_v13, %v357_v20 }
 0x10d   :  { %v323_v24 = vadd.f32 %v322_v22, %v321_v21  ;;  %v360_v17 = vrot.slane %v359_v23, 2 }
 0x10f   :  { %v324_v25 = vrot.slane %v323_v24, 1  ;;  %v361_v26 = vadd.f32 %v360_v17, %v359_v23 }
 0x111   :  { %v325_v27 = vadd.f32 %v324_v25, %v323_v24  ;;  %v362_v28 = vrot.slane %v361_v26, 1 }
 0x113   :  { %326 = vst [vmem:[%s634_s3] sm:$0x1] %v325_v27  ;;  %v363_v29 = vadd.f32 %v362_v28, %v361_v26 }
 0x115   :  { %364 = vst [vmem:[%s635_s4] sm:$0x1] %v363_v29 }

// kernel: generator_forward.51
= control target key start
LH: loop header
LB: loop body
LE: loop exit
PB: predicated region body
PF: predicated region fallthrough
CT: control target
= control target key end

     0   :  { %v3001_v0 = vmov 0   ;;  %vm954_vm0 = vcmask 64512   ;;  %vm1051_vm1 = vcmask 1043456   ;;  %s3726_s1 = inlined_call_operand.vmem [shape: bf16[392,128], index: 1, kind: input, shape index: {}]   ;;  %s3727_s0 = inlined_call_operand.vmem [shape: bf16[512,392], index: 0, kind: input, shape index: {}]   ;;  %s3728_s2 = inlined_call_operand.vmem [shape: f32[1,128], index: 2, kind: input, shape index: {}]   ;;  %s3729_s3 = inlined_call_operand.vmem [shape: bf16[512,128], index: 3, kind: output, shape index: {}]  }
   0x1   :  { %1055 = vmatprep.subr.bf16.mxu1 %v3001_v0  ;;  %v2655_v1 = vld [vmem:[%s3726_s1] sm:$0xff]   ;;  %1344 = vmatprep.subr.bf16.mxu0 %v3001_v0  ;;  %v2656_v2 = vld [vmem:[%s3726_s1 + $0x8] sm:$0xff]   ;;  %v2657_v3 = vld [vmem:[%s3726_s1 + $0x10] sm:$0xff]  }
   0x2   :  { %1056 = vmatpush1.bf16.msra.mxu1 %v2655_v1  ;;  %v2662_v4 = vld [vmem:[%s3726_s1 + $0x80] sm:$0xff]   ;;  %v2664_v5 = vld [vmem:[%s3726_s1 + $0x88] sm:$0xff]   ;;  %v2658_v6 = vld [vmem:[%s3726_s1 + $0x18] sm:$0xff]  }
   0x3   :  { %1057 = vmatprep.subr.bf16.mxu1 %v3001_v0  ;;  %1345 = vmatpush1.bf16.msra.mxu0 %v2662_v4  ;;  %v2666_v7 = vld [vmem:[%s3726_s1 + $0x90] sm:$0xff]   ;;  %v2659_v8 = vld [vmem:[%s3726_s1 + $0x20] sm:$0xff]   ;;  %v2668_v9 = vld [vmem:[%s3726_s1 + $0x98] sm:$0xff]  }
   0x4   :  { %1346 = vmatprep.subr.bf16.mxu0 %v3001_v0  ;;  %v2660_v10 = vld [vmem:[%s3726_s1 + $0x28] sm:$0xff]   ;;  %v2670_v11 = vld [vmem:[%s3726_s1 + $0xa0] sm:$0xff]   ;;  %v2661_v12 = vld [vmem:[%s3726_s1 + $0x30] sm:$0xff]  }
   0x5   :  { %v2672_v13 = vld [vmem:[%s3726_s1 + $0xa8] sm:$0xff]   ;;  %v2663_v15 = vld [vmem:[%s3726_s1 + $0x38] sm:$0xff]   ;;  %v2685_v16 = vld [vmem:[%s3727_s0 + $0x4] ss:$16 sps:$4 sm:$0xff]  }
   0x6   :  { %1058 = vmatpush1.bf16.msra.mxu1 %v2656_v2  ;;  %v2682_v14 = vld [vmem:[%s3727_s0 + $0xc] ss:$16 sps:$4 sm:$0xff]   ;;  %v2674_v17 = vld [vmem:[%s3726_s1 + $0xb0] sm:$0xff]   ;;  %1087 = vmatprep.mubr.bf16.mxu1 %v2685_v16  ;;  %v2665_v18 = vld [vmem:[%s3726_s1 + $0x40] sm:$0xff]  }
   0x7   :  { %1059 = vmatprep.subr.bf16.mxu1 %v3001_v0  ;;  %1347 = vmatpush1.bf16.msra.mxu0 %v2664_v5  ;;  %v2676_v19 = vld [vmem:[%s3726_s1 + $0xb8] sm:$0xff]   ;;  %v2667_v20 = vld [vmem:[%s3726_s1 + $0x48] sm:$0xff]   ;;  %v2678_v21 = vld [vmem:[%s3726_s1 + $0xc0] ss:$0 sps:$4 sm:$0xff]  }
   0x8   :  { %1348 = vmatprep.subr.bf16.mxu0 %v3001_v0  ;;  %2175 = vmatprep.mubr.msk.bf16.mxu0 %vm954_vm0, %v2682_v14  ;;  %v2669_v22 = vld [vmem:[%s3726_s1 + $0x50] sm:$0xff]   ;;  %v1053_v23 = vsel %vm1051_vm1, %v2678_v21, 0  ;;  %v2680_v24 = vld [vmem:[%s3727_s0 + $0x8] ss:$16 sps:$4 sm:$0xff]   ;;  %v2686_v25 = vld [vmem:[%s3727_s0 + $0x2c] ss:$16 sps:$4 sm:$0xff]  }
   0x9   :  { %v2671_v26 = vld [vmem:[%s3726_s1 + $0x58] sm:$0xff]   ;;  %v2673_v27 = vld [vmem:[%s3726_s1 + $0x60] sm:$0xff]   ;;  %v2675_v30 = vld [vmem:[%s3726_s1 + $0x68] sm:$0xff]  }
   0xa   :  { %1060 = vmatpush1.bf16.msra.mxu1 %v2657_v3  ;;  %v2690_v28 = vld [vmem:[%s3727_s0 + $0x28] ss:$16 sps:$4 sm:$0xff]   ;;  %v2692_v29 = vld [vmem:[%s3727_s0 + $0x4c] ss:$16 sps:$4 sm:$0xff]   ;;  %v2677_v31 = vld [vmem:[%s3726_s1 + $0x70] sm:$0xff]  }
   0xb   :  { %1061 = vmatprep.subr.bf16.mxu1 %v3001_v0  ;;  %1349 = vmatpush1.bf16.msra.mxu0 %v2666_v7  ;;  %v2696_v32 = vld [vmem:[%s3727_s0 + $0x48] ss:$16 sps:$4 sm:$0xff]   ;;  %v2698_v33 = vld [vmem:[%s3727_s0 + $0x6c] ss:$16 sps:$4 sm:$0xff]   ;;  %v2683_v35 = vld [vmem:[%s3727_s0] ss:$16 sps:$4 sm:$0xff]  }
   0xc   :  { %1350 = vmatprep.subr.bf16.mxu0 %v3001_v0  ;;  %v2679_v34 = vld [vmem:[%s3726_s1 + $0x78] sm:$0xff]   ;;  %v2688_v36 = vld [vmem:[%s3727_s0 + $0x24] ss:$16 sps:$4 sm:$0xff]   ;;  %v2691_v39 = vld [vmem:[%s3727_s0 + $0x20] ss:$16 sps:$4 sm:$0xff]  }
   0xd   :  { %v2702_v37 = vld [vmem:[%s3727_s0 + $0x68] ss:$16 sps:$4 sm:$0xff]   ;;  %v2704_v38 = vld [vmem:[%s3727_s0 + $0x8c] ss:$16 sps:$4 sm:$0xff]   ;;  %v2694_v40 = vld [vmem:[%s3727_s0 + $0x44] ss:$16 sps:$4 sm:$0xff]  }
   0xe   :  { %1062 = vmatpush1.bf16.msra.mxu1 %v2658_v6  ;;  %v2708_v41 = vld [vmem:[%s3727_s0 + $0x88] ss:$16 sps:$4 sm:$0xff]   ;;  %v2710_v42 = vld [vmem:[%s3727_s0 + $0xac] ss:$16 sps:$4 sm:$0xff]   ;;  %v2697_v43 = vld [vmem:[%s3727_s0 + $0x40] ss:$16 sps:$4 sm:$0xff]  }
   0xf   :  { %1063 = vmatprep.subr.bf16.mxu1 %v3001_v0  ;;  %1351 = vmatpush1.bf16.msra.mxu0 %v2668_v9  ;;  %v2700_v44 = vld [vmem:[%s3727_s0 + $0x64] ss:$16 sps:$4 sm:$0xff]   ;;  %v2714_v45 = vld [vmem:[%s3727_s0 + $0xa8] ss:$16 sps:$4 sm:$0xff]   ;;  %v2716_v46 = vld [vmem:[%s3727_s0 + $0xcc] ss:$16 sps:$4 sm:$0xff]  }
  0x10   :  { %1352 = vmatprep.subr.bf16.mxu0 %v3001_v0  ;;  %v2703_v47 = vld [vmem:[%s3727_s0 + $0x60] ss:$16 sps:$4 sm:$0xff]   ;;  %v2706_v48 = vld [vmem:[%s3727_s0 + $0x84] ss:$16 sps:$4 sm:$0xff]   ;;  %v2720_v49 = vld [vmem:[%s3727_s0 + $0xc8] ss:$16 sps:$4 sm:$0xff]  }
  0x11   :  { %v2722_v50 = vld [vmem:[%s3727_s0 + $0xec] ss:$16 sps:$4 sm:$0xff]   ;;  %v2709_v51 = vld [vmem:[%s3727_s0 + $0x80] ss:$16 sps:$4 sm:$0xff]   ;;  %v2712_v52 = vld [vmem:[%s3727_s0 + $0xa4] ss:$16 sps:$4 sm:$0xff]  }
  0x12   :  { %1064 = vmatpush1.bf16.msra.mxu1 %v2659_v8  ;;  %v2726_v53 = vld [vmem:[%s3727_s0 + $0xe8] ss:$16 sps:$4 sm:$0xff]   ;;  %v2728_v54 = vld [vmem:[%s3727_s0 + $0x10c] ss:$16 sps:$4 sm:$0xff]   ;;  %v2715_v55 = vld [vmem:[%s3727_s0 + $0xa0] ss:$16 sps:$4 sm:$0xff]  }
  0x13   :  { %1065 = vmatprep.subr.bf16.mxu1 %v3001_v0  ;;  %1353 = vmatpush1.bf16.msra.mxu0 %v2670_v11  ;;  %v2718_v56 = vld [vmem:[%s3727_s0 + $0xc4] ss:$16 sps:$4 sm:$0xff]   ;;  %v2732_v57 = vld [vmem:[%s3727_s0 + $0x108] ss:$16 sps:$4 sm:$0xff]   ;;  %v2734_v58 = vld [vmem:[%s3727_s0 + $0x12c] ss:$16 sps:$4 sm:$0xff]  }
  0x14   :  { %1354 = vmatprep.subr.bf16.mxu0 %v3001_v0  ;;  %v2721_v59 = vld [vmem:[%s3727_s0 + $0xc0] ss:$16 sps:$4 sm:$0xff]   ;;  %v2724_v60 = vld [vmem:[%s3727_s0 + $0xe4] ss:$16 sps:$4 sm:$0xff]   ;;  %v2738_v61 = vld [vmem:[%s3727_s0 + $0x128] ss:$16 sps:$4 sm:$0xff]  }
  0x15   :  { %v2740_v62 = vld [vmem:[%s3727_s0 + $0x14c] ss:$16 sps:$4 sm:$0xff]   ;;  %v2727_v63 = vld [vmem:[%s3727_s0 + $0xe0] ss:$16 sps:$4 sm:$0xff]   ;;  %v2744_v1 = vld [vmem:[%s3727_s0 + $0x148] ss:$16 sps:$4 sm:$0xff]  }
  0x16   :  { %1066 = vmatpush1.bf16.msra.mxu1 %v2660_v10  ;;  %v2746_v2 = vld [vmem:[%s3727_s0 + $0x16c] ss:$16 sps:$4 sm:$0xff]   ;;  %v2733_v3 = vld [vmem:[%s3727_s0 + $0x100] ss:$16 sps:$4 sm:$0xff]   ;;  %v2736_v4 = vld [vmem:[%s3727_s0 + $0x124] ss:$16 sps:$4 sm:$0xff]  }
  0x17   :  { %1067 = vmatprep.subr.bf16.mxu1 %v3001_v0  ;;  %1355 = vmatpush1.bf16.msra.mxu0 %v2672_v13  ;;  %v2750_v5 = vld [vmem:[%s3727_s0 + $0x168] ss:$16 sps:$4 sm:$0xff]   ;;  %v2752_v6 = vld [vmem:[%s3727_s0 + $0x18c] ss:$16 sps:$4 sm:$0xff]   ;;  %v2739_v7 = vld [vmem:[%s3727_s0 + $0x120] ss:$16 sps:$4 sm:$0xff]  }
  0x18   :  { %1356 = vmatprep.subr.bf16.mxu0 %v3001_v0  ;;  %v2742_v8 = vld [vmem:[%s3727_s0 + $0x144] ss:$16 sps:$4 sm:$0xff]   ;;  %v2756_v9 = vld [vmem:[%s3727_s0 + $0x188] ss:$16 sps:$4 sm:$0xff]   ;;  %v2758_v10 = vld [vmem:[%s3727_s0 + $0x1ac] ss:$16 sps:$4 sm:$0xff]  }
  0x19   :  { %v2745_v11 = vld [vmem:[%s3727_s0 + $0x140] ss:$16 sps:$4 sm:$0xff]   ;;  %v2762_v13 = vld [vmem:[%s3727_s0 + $0x1a8] ss:$16 sps:$4 sm:$0xff]   ;;  %v2764_v14 = vld [vmem:[%s3727_s0 + $0x1cc] ss:$16 sps:$4 sm:$0xff]  }
  0x1a   :  { %1068 = vmatpush1.bf16.msra.mxu1 %v2661_v12  ;;  %v2748_v12 = vld [vmem:[%s3727_s0 + $0x164] ss:$16 sps:$4 sm:$0xff]   ;;  %v2774_v21 = vld [vmem:[%s3727_s0 + $0x1e8] ss:$16 sps:$4 sm:$0xff]  }
  0x1b   :  { %1069 = vmatprep.subr.bf16.mxu1 %v3001_v0  ;;  %1357 = vmatpush1.bf16.msra.mxu0 %v2674_v17  ;;  %v2754_v16 = vld [vmem:[%s3727_s0 + $0x184] ss:$16 sps:$4 sm:$0xff]   ;;  %v2768_v17 = vld [vmem:[%s3727_s0 + $0x1c8] ss:$16 sps:$4 sm:$0xff]  }
  0x1c   :  { %1358 = vmatprep.subr.bf16.mxu0 %v3001_v0 }
  0x1e   :  { %1070 = vmatpush1.bf16.msra.mxu1 %v2663_v15  ;;  %v2751_v15 = vld [vmem:[%s3727_s0 + $0x160] ss:$16 sps:$4 sm:$0xff]  }
  0x1f   :  { %1071 = vmatprep.subr.bf16.mxu1 %v3001_v0  ;;  %1359 = vmatpush1.bf16.msra.mxu0 %v2676_v19  ;;  %v2757_v19 = vld [vmem:[%s3727_s0 + $0x180] ss:$16 sps:$4 sm:$0xff]  }
  0x20   :  { %1360 = vmatprep.subr.bf16.mxu0 %v3001_v0 }
  0x22   :  { %1072 = vmatpush1.bf16.msra.mxu1 %v2665_v18  ;;  %v2770_v18 = vld [vmem:[%s3727_s0 + $0x1ec] ss:$16 sps:$4 sm:$0xff]  }
  0x23   :  { %1073 = vmatprep.subr.bf16.mxu1 %v3001_v0  ;;  %1361 = vmatpush1.bf16.msra.mxu0 %v1053_v23  ;;  %v2763_v23 = vld [vmem:[%s3727_s0 + $0x1a0] ss:$16 sps:$4 sm:$0xff]  }
  0x26   :  { %1074 = vmatpush1.bf16.msra.mxu1 %v2667_v20  ;;  %1377 = vmatmul.mubr.bf16.vlgmr.msra.gmra.mrb[0].mxu0 %v2680_v24  ;;  %v2760_v20 = vld [vmem:[%s3727_s0 + $0x1a4] ss:$16 sps:$4 sm:$0xff]  }
  0x27   :  { %1075 = vmatprep.subr.bf16.mxu1 %v3001_v0  ;;  %2176 = vmatprep.mubr.msk.bf16.mxu0 %vm954_vm0, %v2686_v25  ;;  %v2766_v24 = vld [vmem:[%s3727_s0 + $0x1c4] ss:$16 sps:$4 sm:$0xff]   ;;  %v2780_v25 = vld [vmem:[%s3727_s0 + $0x208] ss:$16 sps:$4 sm:$0xff]  }
  0x2a   :  { %1076 = vmatpush1.bf16.msra.mxu1 %v2669_v22  ;;  %v2776_v22 = vld [vmem:[%s3727_s0 + $0x20c] ss:$16 sps:$4 sm:$0xff]  }
  0x2b   :  { %1077 = vmatprep.subr.bf16.mxu1 %v3001_v0 }
  0x2e   :  { %1078 = vmatpush1.bf16.msra.mxu1 %v2671_v26  ;;  %1385 = vmatmul.mubr.bf16.gmra.mrb[4].mxu0 %v2690_v28  ;;  %v2782_v26 = vld [vmem:[%s3727_s0 + $0x22c] ss:$16 sps:$4 sm:$0xff]   ;;  %v2772_v28 = vld [vmem:[%s3727_s0 + $0x1e4] ss:$16 sps:$4 sm:$0xff]  }
  0x2f   :  { %1079 = vmatprep.subr.bf16.mxu1 %v3001_v0  ;;  %2177 = vmatprep.mubr.msk.bf16.mxu0 %vm954_vm0, %v2692_v29  ;;  %v2786_v29 = vld [vmem:[%s3727_s0 + $0x228] ss:$16 sps:$4 sm:$0xff]  }
  0x32   :  { %1080 = vmatpush1.bf16.msra.mxu1 %v2673_v27  ;;  %v2769_v27 = vld [vmem:[%s3727_s0 + $0x1c0] ss:$16 sps:$4 sm:$0xff]  }
  0x33   :  { %1081 = vmatprep.subr.bf16.mxu1 %v3001_v0 }
  0x36   :  { %1082 = vmatpush1.bf16.msra.mxu1 %v2675_v30  ;;  %1393 = vmatmul.mubr.bf16.gmra.mrb[8].mxu0 %v2696_v32  ;;  %v2788_v30 = vld [vmem:[%s3727_s0 + $0x24c] ss:$16 sps:$4 sm:$0xff]   ;;  %v2778_v32 = vld [vmem:[%s3727_s0 + $0x204] ss:$16 sps:$4 sm:$0xff]  }
  0x37   :  { %1083 = vmatprep.subr.bf16.mxu1 %v3001_v0  ;;  %2178 = vmatprep.mubr.msk.bf16.mxu0 %vm954_vm0, %v2698_v33  ;;  %v2792_v33 = vld [vmem:[%s3727_s0 + $0x248] ss:$16 sps:$4 sm:$0xff]  }
  0x3a   :  { %1084 = vmatpush1.bf16.msra.mxu1 %v2677_v31  ;;  %v2775_v31 = vld [vmem:[%s3727_s0 + $0x1e0] ss:$16 sps:$4 sm:$0xff]  }
  0x3b   :  { %1085 = vmatprep.subr.bf16.mxu1 %v3001_v0  ;;  %v2730_v0 = vld [vmem:[%s3727_s0 + $0x104] ss:$16 sps:$4 sm:$0xff]  }
  0x3e   :  { %1086 = vmatpush1.bf16.msra.mxu1 %v2679_v34  ;;  %1401 = vmatmul.mubr.bf16.gmra.mrb[12].mxu0 %v2702_v37  ;;  %v2794_v34 = vld [vmem:[%s3727_s0 + $0x26c] ss:$16 sps:$4 sm:$0xff]   ;;  %v2798_v37 = vld [vmem:[%s3727_s0 + $0x268] ss:$16 sps:$4 sm:$0xff]  }
  0x3f   :  { %2179 = vmatprep.mubr.msk.bf16.mxu0 %vm954_vm0, %v2704_v38  ;;  %v2800_v38 = vld [vmem:[%s3727_s0 + $0x28c] ss:$16 sps:$4 sm:$0xff]  }
  0x41   :  { %1088 = vmatmul.mubr.bf16.vlgmr.msra.gmra.mrb[0].mxu1 %v2683_v35  ;;  %v2781_v35 = vld [vmem:[%s3727_s0 + $0x200] ss:$16 sps:$4 sm:$0xff]  }
  0x42   :  { %1095 = vmatprep.mubr.bf16.mxu1 %v2688_v36  ;;  %v2784_v36 = vld [vmem:[%s3727_s0 + $0x224] ss:$16 sps:$4 sm:$0xff]  }
  0x46   :  { %1409 = vmatmul.mubr.bf16.gmra.mrb[16].mxu0 %v2708_v41  ;;  %v2804_v41 = vld [vmem:[%s3727_s0 + $0x288] ss:$16 sps:$4 sm:$0xff]  }
  0x47   :  { %2180 = vmatprep.mubr.msk.bf16.mxu0 %vm954_vm0, %v2710_v42  ;;  %v2806_v42 = vld [vmem:[%s3727_s0 + $0x2ac] ss:$16 sps:$4 sm:$0xff]  }
  0x49   :  { %1096 = vmatmul.mubr.bf16.gmra.mrb[4].mxu1 %v2691_v39  ;;  %v2787_v39 = vld [vmem:[%s3727_s0 + $0x220] ss:$16 sps:$4 sm:$0xff]  }
  0x4a   :  { %1103 = vmatprep.mubr.bf16.mxu1 %v2694_v40  ;;  %v2790_v40 = vld [vmem:[%s3727_s0 + $0x244] ss:$16 sps:$4 sm:$0xff]  }
  0x4e   :  { %1417 = vmatmul.mubr.bf16.gmra.mrb[20].mxu0 %v2714_v45  ;;  %v2810_v45 = vld [vmem:[%s3727_s0 + $0x2a8] ss:$16 sps:$4 sm:$0xff]  }
  0x4f   :  { %2181 = vmatprep.mubr.msk.bf16.mxu0 %vm954_vm0, %v2716_v46  ;;  %v2812_v46 = vld [vmem:[%s3727_s0 + $0x2cc] ss:$16 sps:$4 sm:$0xff]  }
  0x51   :  { %1104 = vmatmul.mubr.bf16.gmra.mrb[8].mxu1 %v2697_v43  ;;  %v2793_v43 = vld [vmem:[%s3727_s0 + $0x240] ss:$16 sps:$4 sm:$0xff]  }
  0x52   :  { %1111 = vmatprep.mubr.bf16.mxu1 %v2700_v44  ;;  %v2796_v44 = vld [vmem:[%s3727_s0 + $0x264] ss:$16 sps:$4 sm:$0xff]  }
  0x56   :  { %1425 = vmatmul.mubr.bf16.gmra.mrb[24].mxu0 %v2720_v49  ;;  %v2816_v49 = vld [vmem:[%s3727_s0 + $0x2c8] ss:$16 sps:$4 sm:$0xff]  }
  0x57   :  { %2182 = vmatprep.mubr.msk.bf16.mxu0 %vm954_vm0, %v2722_v50  ;;  %v2818_v50 = vld [vmem:[%s3727_s0 + $0x2ec] ss:$16 sps:$4 sm:$0xff]  }
  0x59   :  { %1112 = vmatmul.mubr.bf16.gmra.mrb[12].mxu1 %v2703_v47  ;;  %v2799_v47 = vld [vmem:[%s3727_s0 + $0x260] ss:$16 sps:$4 sm:$0xff]  }
  0x5a   :  { %1119 = vmatprep.mubr.bf16.mxu1 %v2706_v48  ;;  %v2802_v48 = vld [vmem:[%s3727_s0 + $0x284] ss:$16 sps:$4 sm:$0xff]  }
  0x5e   :  { %1433 = vmatmul.mubr.bf16.gmra.mrb[28].mxu0 %v2726_v53  ;;  %v2822_v53 = vld [vmem:[%s3727_s0 + $0x2e8] ss:$16 sps:$4 sm:$0xff]  }
  0x5f   :  { %2183 = vmatprep.mubr.msk.bf16.mxu0 %vm954_vm0, %v2728_v54  ;;  %v2824_v54 = vld [vmem:[%s3727_s0 + $0x30c] ss:$16 sps:$4 sm:$0xff]  }
  0x61   :  { %1120 = vmatmul.mubr.bf16.gmra.mrb[16].mxu1 %v2709_v51  ;;  %v2805_v51 = vld [vmem:[%s3727_s0 + $0x280] ss:$16 sps:$4 sm:$0xff]  }
  0x62   :  { %1127 = vmatprep.mubr.bf16.mxu1 %v2712_v52  ;;  %v2808_v52 = vld [vmem:[%s3727_s0 + $0x2a4] ss:$16 sps:$4 sm:$0xff]  }
  0x66   :  { %1441 = vmatmul.mubr.bf16.gmra.mrb[32].mxu0 %v2732_v57  ;;  %v2828_v57 = vld [vmem:[%s3727_s0 + $0x308] ss:$16 sps:$4 sm:$0xff]  }
  0x67   :  { %2184 = vmatprep.mubr.msk.bf16.mxu0 %vm954_vm0, %v2734_v58  ;;  %v2830_v58 = vld [vmem:[%s3727_s0 + $0x32c] ss:$16 sps:$4 sm:$0xff]  }
  0x69   :  { %1128 = vmatmul.mubr.bf16.gmra.mrb[20].mxu1 %v2715_v55  ;;  %v2811_v55 = vld [vmem:[%s3727_s0 + $0x2a0] ss:$16 sps:$4 sm:$0xff]  }
  0x6a   :  { %1135 = vmatprep.mubr.bf16.mxu1 %v2718_v56  ;;  %v2814_v56 = vld [vmem:[%s3727_s0 + $0x2c4] ss:$16 sps:$4 sm:$0xff]  }
  0x6e   :  { %1449 = vmatmul.mubr.bf16.gmra.mrb[36].mxu0 %v2738_v61  ;;  %v2834_v61 = vld [vmem:[%s3727_s0 + $0x328] ss:$16 sps:$4 sm:$0xff]  }
  0x6f   :  { %2185 = vmatprep.mubr.msk.bf16.mxu0 %vm954_vm0, %v2740_v62  ;;  %v2836_v62 = vld [vmem:[%s3727_s0 + $0x34c] ss:$16 sps:$4 sm:$0xff]  }
  0x71   :  { %1136 = vmatmul.mubr.bf16.gmra.mrb[24].mxu1 %v2721_v59  ;;  %v2817_v59 = vld [vmem:[%s3727_s0 + $0x2c0] ss:$16 sps:$4 sm:$0xff]  }
  0x72   :  { %1143 = vmatprep.mubr.bf16.mxu1 %v2724_v60  ;;  %v2820_v60 = vld [vmem:[%s3727_s0 + $0x2e4] ss:$16 sps:$4 sm:$0xff]  }
  0x76   :  { %1457 = vmatmul.mubr.bf16.gmra.mrb[40].mxu0 %v2744_v1  ;;  %v2840_v1 = vld [vmem:[%s3727_s0 + $0x348] ss:$16 sps:$4 sm:$0xff]  }
  0x77   :  { %2186 = vmatprep.mubr.msk.bf16.mxu0 %vm954_vm0, %v2746_v2  ;;  %v2842_v2 = vld [vmem:[%s3727_s0 + $0x36c] ss:$16 sps:$4 sm:$0xff]  }
  0x79   :  { %1144 = vmatmul.mubr.bf16.gmra.mrb[28].mxu1 %v2727_v63  ;;  %v2823_v63 = vld [vmem:[%s3727_s0 + $0x2e0] ss:$16 sps:$4 sm:$0xff]  }
  0x7a   :  { %1151 = vmatprep.mubr.bf16.mxu1 %v2730_v0  ;;  %v2826_v0 = vld [vmem:[%s3727_s0 + $0x304] ss:$16 sps:$4 sm:$0xff]  }
  0x7e   :  { %1465 = vmatmul.mubr.bf16.gmra.mrb[44].mxu0 %v2750_v5 }
  0x7f   :  { %2187 = vmatprep.mubr.msk.bf16.mxu0 %vm954_vm0, %v2752_v6 }
  0x81   :  { %1152 = vmatmul.mubr.bf16.gmra.mrb[32].mxu1 %v2733_v3  ;;  %v2829_v3 = vld [vmem:[%s3727_s0 + $0x300] ss:$16 sps:$4 sm:$0xff]  }
  0x82   :  { %1159 = vmatprep.mubr.bf16.mxu1 %v2736_v4  ;;  %v2832_v4 = vld [vmem:[%s3727_s0 + $0x324] ss:$16 sps:$4 sm:$0xff]  }
  0x86   :  { %1473 = vmatmul.mubr.bf16.gmra.mrb[48].mxu0 %v2756_v9  ;;  %v2848_v9 = vld [vmem:[%s3727_s0 + $0x38c] ss:$16 sps:$4 sm:$0xff]  }
  0x87   :  { %2188 = vmatprep.mubr.msk.bf16.mxu0 %vm954_vm0, %v2758_v10 }
  0x89   :  { %1160 = vmatmul.mubr.bf16.gmra.mrb[36].mxu1 %v2739_v7  ;;  %v2846_v7 = vld [vmem:[%s3727_s0 + $0x368] ss:$16 sps:$4 sm:$0xff]  }
  0x8a   :  { %1167 = vmatprep.mubr.bf16.mxu1 %v2742_v8 }
  0x8e   :  { %1481 = vmatmul.mubr.bf16.gmra.mrb[52].mxu0 %v2762_v13 }
  0x8f   :  { %2189 = vmatprep.mubr.msk.bf16.mxu0 %vm954_vm0, %v2764_v14 }
  0x91   :  { %1168 = vmatmul.mubr.bf16.gmra.mrb[40].mxu1 %v2745_v11  ;;  %v2835_v11 = vld [vmem:[%s3727_s0 + $0x320] ss:$16 sps:$4 sm:$0xff]  }
  0x92   :  { %1175 = vmatprep.mubr.bf16.mxu1 %v2748_v12  ;;  %v2838_v12 = vld [vmem:[%s3727_s0 + $0x344] ss:$16 sps:$4 sm:$0xff]  }
  0x96   :  { %1489 = vmatmul.mubr.bf16.gmra.mrb[56].mxu0 %v2768_v17  ;;  %v2854_v17 = vld [vmem:[%s3727_s0 + $0x3ac] ss:$16 sps:$4 sm:$0xff]  }
  0x97   :  { %2190 = vmatprep.mubr.msk.bf16.mxu0 %vm954_vm0, %v2770_v18 }
  0x99   :  { %1176 = vmatmul.mubr.bf16.gmra.mrb[44].mxu1 %v2751_v15  ;;  %v2852_v15 = vld [vmem:[%s3727_s0 + $0x388] ss:$16 sps:$4 sm:$0xff]  }
  0x9a   :  { %1183 = vmatprep.mubr.bf16.mxu1 %v2754_v16 }
  0x9e   :  { %1497 = vmatmul.mubr.bf16.gmra.mrb[60].mxu0 %v2774_v21 }
  0x9f   :  { %2191 = vmatprep.mubr.msk.bf16.mxu0 %vm954_vm0, %v2776_v22 }
  0xa1   :  { %1184 = vmatmul.mubr.bf16.gmra.mrb[48].mxu1 %v2757_v19  ;;  %v2841_v19 = vld [vmem:[%s3727_s0 + $0x340] ss:$16 sps:$4 sm:$0xff]  }
  0xa2   :  { %1191 = vmatprep.mubr.bf16.mxu1 %v2760_v20  ;;  %v2844_v20 = vld [vmem:[%s3727_s0 + $0x364] ss:$16 sps:$4 sm:$0xff]  }
  0xa6   :  { %1505 = vmatmul.mubr.bf16.gmra.mrb[64].mxu0 %v2780_v25  ;;  %v2860_v25 = vld [vmem:[%s3727_s0 + $0x3cc] ss:$16 sps:$4 sm:$0xff]  }
  0xa7   :  { %2192 = vmatprep.mubr.msk.bf16.mxu0 %vm954_vm0, %v2782_v26  ;;  %v3507_v26 = vld [vmem:[%s3728_s2] ss:$0 sm:$0xff] }
  0xa9   :  { %1192 = vmatmul.mubr.bf16.gmra.mrb[52].mxu1 %v2763_v23  ;;  %v2858_v23 = vld [vmem:[%s3727_s0 + $0x3a8] ss:$16 sps:$4 sm:$0xff]  }
  0xaa   :  { %1199 = vmatprep.mubr.bf16.mxu1 %v2766_v24 }
  0xae   :  { %1513 = vmatmul.mubr.bf16.gmra.mrb[68].mxu0 %v2786_v29 }
  0xaf   :  { %2193 = vmatprep.mubr.msk.bf16.mxu0 %vm954_vm0, %v2788_v30 }
  0xb1   :  { %1200 = vmatmul.mubr.bf16.gmra.mrb[56].mxu1 %v2769_v27 }
  0xb2   :  { %1207 = vmatprep.mubr.bf16.mxu1 %v2772_v28 }
  0xb6   :  { %1521 = vmatmul.mubr.bf16.gmra.mrb[72].mxu0 %v2792_v33  ;;  %v2850_v33 = vld [vmem:[%s3727_s0 + $0x384] ss:$16 sps:$4 sm:$0xff]  }
  0xb7   :  { %2194 = vmatprep.mubr.msk.bf16.mxu0 %vm954_vm0, %v2794_v34 }
  0xb9   :  { %1208 = vmatmul.mubr.bf16.gmra.mrb[60].mxu1 %v2775_v31  ;;  %v2847_v31 = vld [vmem:[%s3727_s0 + $0x360] ss:$16 sps:$4 sm:$0xff]  }
  0xba   :  { %1215 = vmatprep.mubr.bf16.mxu1 %v2778_v32 }
  0xbe   :  { %1529 = vmatmul.mubr.bf16.gmra.mrb[76].mxu0 %v2798_v37 }
  0xbf   :  { %2195 = vmatprep.mubr.msk.bf16.mxu0 %vm954_vm0, %v2800_v38 }
  0xc1   :  { %1216 = vmatmul.mubr.bf16.gmra.mrb[64].mxu1 %v2781_v35 }
  0xc2   :  { %1223 = vmatprep.mubr.bf16.mxu1 %v2784_v36 }
  0xc6   :  { %1537 = vmatmul.mubr.bf16.gmra.mrb[80].mxu0 %v2804_v41 }
  0xc7   :  { %2196 = vmatprep.mubr.msk.bf16.mxu0 %vm954_vm0, %v2806_v42  ;;  %v2866_v42 = vld [vmem:[%s3727_s0 + $0x3ec] ss:$16 sps:$4 sm:$0xff]  }
  0xc9   :  { %1224 = vmatmul.mubr.bf16.gmra.mrb[68].mxu1 %v2787_v39  ;;  %v2864_v39 = vld [vmem:[%s3727_s0 + $0x3c8] ss:$16 sps:$4 sm:$0xff]  }
  0xca   :  { %1231 = vmatprep.mubr.bf16.mxu1 %v2790_v40 }
  0xce   :  { %1545 = vmatmul.mubr.bf16.gmra.mrb[84].mxu0 %v2810_v45 }
  0xcf   :  { %2197 = vmatprep.mubr.msk.bf16.mxu0 %vm954_vm0, %v2812_v46 }
  0xd1   :  { %1232 = vmatmul.mubr.bf16.gmra.mrb[72].mxu1 %v2793_v43 }
  0xd2   :  { %1239 = vmatprep.mubr.bf16.mxu1 %v2796_v44 }
  0xd6   :  { %1553 = vmatmul.mubr.bf16.gmra.mrb[88].mxu0 %v2816_v49  ;;  %v2856_v49 = vld [vmem:[%s3727_s0 + $0x3a4] ss:$16 sps:$4 sm:$0xff]  }
  0xd7   :  { %2198 = vmatprep.mubr.msk.bf16.mxu0 %vm954_vm0, %v2818_v50 }
  0xd9   :  { %1240 = vmatmul.mubr.bf16.gmra.mrb[76].mxu1 %v2799_v47  ;;  %v2853_v47 = vld [vmem:[%s3727_s0 + $0x380] ss:$16 sps:$4 sm:$0xff]  }
  0xda   :  { %1247 = vmatprep.mubr.bf16.mxu1 %v2802_v48 }
  0xde   :  { %1561 = vmatmul.mubr.bf16.gmra.mrb[92].mxu0 %v2822_v53 }
  0xdf   :  { %2199 = vmatprep.mubr.msk.bf16.mxu0 %vm954_vm0, %v2824_v54 }
  0xe1   :  { %1248 = vmatmul.mubr.bf16.gmra.mrb[80].mxu1 %v2805_v51 }
  0xe2   :  { %1255 = vmatprep.mubr.bf16.mxu1 %v2808_v52 }
  0xe6   :  { %1569 = vmatmul.mubr.bf16.gmra.mrb[96].mxu0 %v2828_v57 }
  0xe7   :  { %2200 = vmatprep.mubr.msk.bf16.mxu0 %vm954_vm0, %v2830_v58 }
  0xe9   :  { %1256 = vmatmul.mubr.bf16.gmra.mrb[84].mxu1 %v2811_v55  ;;  %v2870_v55 = vld [vmem:[%s3727_s0 + $0x3e8] ss:$16 sps:$4 sm:$0xff]  }
  0xea   :  { %1263 = vmatprep.mubr.bf16.mxu1 %v2814_v56 }
  0xee   :  { %1577 = vmatmul.mubr.bf16.gmra.mrb[100].mxu0 %v2834_v61 }
  0xef   :  { %2201 = vmatprep.mubr.msk.bf16.mxu0 %vm954_vm0, %v2836_v62 }
  0xf1   :  { %1264 = vmatmul.mubr.bf16.gmra.mrb[88].mxu1 %v2817_v59 }
  0xf2   :  { %1271 = vmatprep.mubr.bf16.mxu1 %v2820_v60 }
  0xf6   :  { %1585 = vmatmul.mubr.bf16.gmra.mrb[104].mxu0 %v2840_v1 }
  0xf7   :  { %2202 = vmatprep.mubr.msk.bf16.mxu0 %vm954_vm0, %v2842_v2 }
  0xf9   :  { %1272 = vmatmul.mubr.bf16.gmra.mrb[92].mxu1 %v2823_v63  ;;  %v1378_v5 = vpop.f32.mrb[0].mxu0 }
  0xfa   :  { %1279 = vmatprep.mubr.bf16.mxu1 %v2826_v0  ;;  %v1380_v6 = vpop.f32.mrb[1].mxu0  ;;  %v2859_v0 = vld [vmem:[%s3727_s0 + $0x3a0] ss:$16 sps:$4 sm:$0xff]  }
  0xfb   :  { %v1381_v8 = vpop.f32.mrb[2].mxu0 }
  0xfc   :  { %v1383_v10 = vpop.f32.mrb[3].mxu0 }
  0xfe   :  { %1593 = vmatmul.mubr.bf16.gmra.mrb[108].mxu0 %v2846_v7 }
  0xff   :  { %2203 = vmatprep.mubr.msk.bf16.mxu0 %vm954_vm0, %v2848_v9 }
 0x101   :  { %1280 = vmatmul.mubr.bf16.gmra.mrb[96].mxu1 %v2829_v3  ;;  %v1386_v13 = vpop.f32.mrb[4].mxu0  ;;  %v2862_v3 = vld [vmem:[%s3727_s0 + $0x3c4] ss:$16 sps:$4 sm:$0xff]  }
 0x102   :  { %1287 = vmatprep.mubr.bf16.mxu1 %v2832_v4  ;;  %v1388_v14 = vpop.f32.mrb[5].mxu0 }
 0x103   :  { %v1389_v16 = vpop.f32.mrb[6].mxu0 }
 0x104   :  { %v1391_v18 = vpop.f32.mrb[7].mxu0 }
 0x106   :  { %1601 = vmatmul.mubr.bf16.gmra.mrb[112].mxu0 %v2852_v15 }
 0x107   :  { %2204 = vmatprep.mubr.msk.bf16.mxu0 %vm954_vm0, %v2854_v17  ;;  %v2865_v17 = vld [vmem:[%s3727_s0 + $0x3c0] ss:$16 sps:$4 sm:$0xff]  }
 0x109   :  { %1288 = vmatmul.mubr.bf16.gmra.mrb[100].mxu1 %v2835_v11  ;;  %v3494_v21 = vpop.f32.mrb[8].mxu0 }
 0x10a   :  { %1295 = vmatprep.mubr.bf16.mxu1 %v2838_v12  ;;  %v1396_v22 = vpop.f32.mrb[9].mxu0 }
 0x10b   :  { %v3499_v24 = vpop.f32.mrb[10].mxu0 }
 0x10c   :  { %v1399_v27 = vpop.f32.mrb[11].mxu0 }
 0x10e   :  { %1609 = vmatmul.mubr.bf16.gmra.mrb[116].mxu0 %v2858_v23 }
 0x10f   :  { %2205 = vmatprep.mubr.msk.bf16.mxu0 %vm954_vm0, %v2860_v25 }
 0x111   :  { %1296 = vmatmul.mubr.bf16.gmra.mrb[104].mxu1 %v2841_v19  ;;  %v3518_v37 = vpop.f32.mrb[12].mxu0 }
 0x112   :  { %1303 = vmatprep.mubr.bf16.mxu1 %v2844_v20  ;;  %v1404_v38 = vpop.f32.mrb[13].mxu0  ;;  %v2868_v20 = vld [vmem:[%s3727_s0 + $0x3e4] ss:$16 sps:$4 sm:$0xff]  }
 0x113   :  { %v3523_v41 = vpop.f32.mrb[14].mxu0 }
 0x114   :  { %v1089_v28 = vpop.f32.mrb[0].mxu1  ;;  %v1407_v43 = vpop.f32.mrb[15].mxu0 }
 0x115   :  { %v1090_v29 = vadd.f32 %v3507_v26, %v1089_v28  ;;  %v1091_v30 = vpop.f32.mrb[1].mxu1 }
 0x116   :  { %v1092_v32 = vpop.f32.mrb[2].mxu1  ;;  %1617 = vmatmul.mubr.bf16.gmra.mrb[120].mxu0 %v2864_v39 }
 0x117   :  { %v1379_v34 = vadd.f32 %v1378_v5, %v1090_v29  ;;  %v1093_v35 = vadd.f32 %v3507_v26, %v1092_v32  ;;  %v1094_v36 = vpop.f32.mrb[3].mxu1  ;;  %2206 = vmatprep.mubr.msk.bf16.mxu0 %vm954_vm0, %v2866_v42 }
 0x119   :  { %v1382_v40 = vadd.f32 %v1381_v8, %v1093_v35  ;;  %1304 = vmatmul.mubr.bf16.gmra.mrb[108].mxu1 %v2847_v31  ;;  %2872 = vtanh.f32 %v1379_v34  ;;  %v3537_v53 = vpop.f32.mrb[16].mxu0  ;;  %v2871_v35 = vld [vmem:[%s3727_s0 + $0x3e0] ss:$16 sps:$4 sm:$0xff]  }
 0x11a   :  { %1311 = vmatprep.mubr.bf16.mxu1 %v2850_v33  ;;  %v1412_v54 = vpop.f32.mrb[17].mxu0 }
 0x11b   :  { %2874 = vtanh.f32 %v1382_v40  ;;  %v3542_v57 = vpop.f32.mrb[18].mxu0 }
 0x11c   :  { %v1097_v44 = vpop.f32.mrb[4].mxu1  ;;  %v1415_v58 = vpop.f32.mrb[19].mxu0 }
 0x11d   :  { %v1098_v45 = vadd.f32 %v3507_v26, %v1097_v44  ;;  %v1099_v46 = vpop.f32.mrb[5].mxu1 }
 0x11e   :  { %v1100_v48 = vpop.f32.mrb[6].mxu1  ;;  %1625 = vmatmul.mubr.bf16.gmra.mrb[124].mxu0 %v2870_v55 }
 0x11f   :  { %v1387_v50 = vadd.f32 %v1386_v13, %v1098_v45  ;;  %v1101_v51 = vadd.f32 %v3507_v26, %v1100_v48  ;;  %v1102_v52 = vpop.f32.mrb[7].mxu1 }
 0x121   :  { %v1390_v56 = vadd.f32 %v1389_v16, %v1101_v51  ;;  %1312 = vmatmul.mubr.bf16.gmra.mrb[112].mxu1 %v2853_v47  ;;  %2876 = vtanh.f32 %v1387_v50  ;;  %v1418_v7 = vpop.f32.mrb[20].mxu0 }
 0x122   :  { %1319 = vmatprep.mubr.bf16.mxu1 %v2856_v49  ;;  %v1420_v8 = vpop.f32.mrb[21].mxu0 }
 0x123   :  { %2878 = vtanh.f32 %v1390_v56  ;;  %v2873_v59 = vpop.eup %2872  ;;  %v1421_v10 = vpop.f32.mrb[22].mxu0 }
 0x124   :  { %v1105_v60 = vpop.f32.mrb[8].mxu1  ;;  %v1423_v11 = vpop.f32.mrb[23].mxu0 }
 0x125   :  { %v2875_v61 = vpop.eup %2874  ;;  %v1106_v62 = vadd.f32 %v3507_v26, %v1105_v60  ;;  %v1107_v63 = vpop.f32.mrb[9].mxu1 }
 0x126   :  { %v2338_v1 = vpack.c.bf16 %v2875_v61, %v2873_v59  ;;  %v1108_v2 = vpop.f32.mrb[10].mxu1 }
 0x127   :  { %v1395_v4 = vadd.f32 %v3494_v21, %v1106_v62  ;;  %v1109_v5 = vadd.f32 %v3507_v26, %v1108_v2  ;;  %v1110_v6 = vpop.f32.mrb[11].mxu1 }
 0x128   :  { %2339 = vst [vmem:[%s3729_s3] sm:$0xff] %v2338_v1  }
 0x129   :  { %v1398_v9 = vadd.f32 %v3499_v24, %v1109_v5  ;;  %1320 = vmatmul.mubr.bf16.gmra.mrb[116].mxu1 %v2859_v0  ;;  %2880 = vtanh.f32 %v1395_v4  ;;  %v1426_v24 = vpop.f32.mrb[24].mxu0 }
 0x12a   :  { %1327 = vmatprep.mubr.bf16.mxu1 %v2862_v3  ;;  %v1428_v25 = vpop.f32.mrb[25].mxu0 }
 0x12b   :  { %2882 = vtanh.f32 %v1398_v9  ;;  %v2877_v12 = vpop.eup %2876  ;;  %v1429_v28 = vpop.f32.mrb[26].mxu0 }
 0x12c   :  { %v1113_v13 = vpop.f32.mrb[12].mxu1  ;;  %v1431_v29 = vpop.f32.mrb[27].mxu0 }
 0x12d   :  { %v2879_v14 = vpop.eup %2878  ;;  %v1114_v15 = vadd.f32 %v3507_v26, %v1113_v13  ;;  %v1115_v16 = vpop.f32.mrb[13].mxu1 }
 0x12e   :  { %v2343_v18 = vpack.c.bf16 %v2879_v14, %v2877_v12  ;;  %v1116_v19 = vpop.f32.mrb[14].mxu1 }
 0x12f   :  { %v1403_v21 = vadd.f32 %v3518_v37, %v1114_v15  ;;  %v1117_v22 = vadd.f32 %v3507_v26, %v1116_v19  ;;  %v1118_v23 = vpop.f32.mrb[15].mxu1 }
 0x130   :  { %2495 = vst [vmem:[%s3729_s3 + $0x8] sm:$0xff] %v2343_v18  }
 0x131   :  { %v1406_v27 = vadd.f32 %v3523_v41, %v1117_v22  ;;  %1328 = vmatmul.mubr.bf16.gmra.mrb[120].mxu1 %v2865_v17  ;;  %2884 = vtanh.f32 %v1403_v21  ;;  %v1434_v41 = vpop.f32.mrb[28].mxu0 }
 0x132   :  { %1335 = vmatprep.mubr.bf16.mxu1 %v2868_v20  ;;  %v1436_v42 = vpop.f32.mrb[29].mxu0 }
 0x133   :  { %2886 = vtanh.f32 %v1406_v27  ;;  %v2881_v30 = vpop.eup %2880  ;;  %v1437_v44 = vpop.f32.mrb[30].mxu0 }
 0x134   :  { %v1121_v31 = vpop.f32.mrb[16].mxu1  ;;  %v1439_v45 = vpop.f32.mrb[31].mxu0 }
 0x135   :  { %v2883_v32 = vpop.eup %2882  ;;  %v1122_v33 = vadd.f32 %v3507_v26, %v1121_v31  ;;  %v1123_v34 = vpop.f32.mrb[17].mxu1 }
 0x136   :  { %v2348_v36 = vpack.c.bf16 %v2883_v32, %v2881_v30  ;;  %v1124_v37 = vpop.f32.mrb[18].mxu1 }
 0x137   :  { %v1411_v38 = vadd.f32 %v3537_v53, %v1122_v33  ;;  %v1125_v39 = vadd.f32 %v3507_v26, %v1124_v37  ;;  %v1126_v40 = vpop.f32.mrb[19].mxu1 }
 0x138   :  { %2496 = vst [vmem:[%s3729_s3 + $0x10] sm:$0xff] %v2348_v36  }
 0x139   :  { %v1414_v43 = vadd.f32 %v3542_v57, %v1125_v39  ;;  %1336 = vmatmul.mubr.bf16.gmra.mrb[124].mxu1 %v2871_v35  ;;  %2888 = vtanh.f32 %v1411_v38  ;;  %v1442_v56 = vpop.f32.mrb[32].mxu0 }
 0x13a   :  { %v1444_v57 = vpop.f32.mrb[33].mxu0 }
 0x13b   :  { %2890 = vtanh.f32 %v1414_v43  ;;  %v2885_v46 = vpop.eup %2884  ;;  %v1445_v59 = vpop.f32.mrb[34].mxu0 }
 0x13c   :  { %v1129_v47 = vpop.f32.mrb[20].mxu1  ;;  %v1447_v60 = vpop.f32.mrb[35].mxu0 }
 0x13d   :  { %v2887_v48 = vpop.eup %2886  ;;  %v1130_v49 = vadd.f32 %v3507_v26, %v1129_v47  ;;  %v1131_v50 = vpop.f32.mrb[21].mxu1 }
 0x13e   :  { %v2353_v51 = vpack.c.bf16 %v2887_v48, %v2885_v46  ;;  %v1132_v52 = vpop.f32.mrb[22].mxu1 }
 0x13f   :  { %v1419_v53 = vadd.f32 %v1418_v7, %v1130_v49  ;;  %v1133_v54 = vadd.f32 %v3507_v26, %v1132_v52  ;;  %v1134_v55 = vpop.f32.mrb[23].mxu1 }
 0x140   :  { %2497 = vst [vmem:[%s3729_s3 + $0x18] sm:$0xff] %v2353_v51  }
 0x141   :  { %v1422_v58 = vadd.f32 %v1421_v10, %v1133_v54  ;;  %2892 = vtanh.f32 %v1419_v53  ;;  %v1450_v7 = vpop.f32.mrb[36].mxu0 }
 0x142   :  { %v1452_v8 = vpop.f32.mrb[37].mxu0 }
 0x143   :  { %2894 = vtanh.f32 %v1422_v58  ;;  %v2889_v61 = vpop.eup %2888  ;;  %v1453_v10 = vpop.f32.mrb[38].mxu0 }
 0x144   :  { %v1137_v62 = vpop.f32.mrb[24].mxu1  ;;  %v1455_v11 = vpop.f32.mrb[39].mxu0 }
 0x145   :  { %v2891_v63 = vpop.eup %2890  ;;  %v1138_v0 = vadd.f32 %v3507_v26, %v1137_v62  ;;  %v1139_v1 = vpop.f32.mrb[25].mxu1 }
 0x146   :  { %v2358_v2 = vpack.c.bf16 %v2891_v63, %v2889_v61  ;;  %v1140_v3 = vpop.f32.mrb[26].mxu1 }
 0x147   :  { %v1427_v4 = vadd.f32 %v1426_v24, %v1138_v0  ;;  %v1141_v5 = vadd.f32 %v3507_v26, %v1140_v3  ;;  %v1142_v6 = vpop.f32.mrb[27].mxu1 }
 0x148   :  { %2498 = vst [vmem:[%s3729_s3 + $0x20] sm:$0xff] %v2358_v2  }
 0x149   :  { %v1430_v9 = vadd.f32 %v1429_v28, %v1141_v5  ;;  %2896 = vtanh.f32 %v1427_v4  ;;  %v1458_v22 = vpop.f32.mrb[40].mxu0 }
 0x14a   :  { %v1460_v23 = vpop.f32.mrb[41].mxu0 }
 0x14b   :  { %2898 = vtanh.f32 %v1430_v9  ;;  %v2893_v12 = vpop.eup %2892  ;;  %v1461_v25 = vpop.f32.mrb[42].mxu0 }
 0x14c   :  { %v1145_v13 = vpop.f32.mrb[28].mxu1  ;;  %v1463_v27 = vpop.f32.mrb[43].mxu0 }
 0x14d   :  { %v2895_v14 = vpop.eup %2894  ;;  %v1146_v15 = vadd.f32 %v3507_v26, %v1145_v13  ;;  %v1147_v16 = vpop.f32.mrb[29].mxu1 }
 0x14e   :  { %v2363_v17 = vpack.c.bf16 %v2895_v14, %v2893_v12  ;;  %v1148_v18 = vpop.f32.mrb[30].mxu1 }
 0x14f   :  { %v1435_v19 = vadd.f32 %v1434_v41, %v1146_v15  ;;  %v1149_v20 = vadd.f32 %v3507_v26, %v1148_v18  ;;  %v1150_v21 = vpop.f32.mrb[31].mxu1 }
 0x150   :  { %2499 = vst [vmem:[%s3729_s3 + $0x28] sm:$0xff] %v2363_v17  }
 0x151   :  { %v1438_v24 = vadd.f32 %v1437_v44, %v1149_v20  ;;  %2900 = vtanh.f32 %v1435_v19  ;;  %v1466_v38 = vpop.f32.mrb[44].mxu0 }
 0x152   :  { %v1468_v39 = vpop.f32.mrb[45].mxu0 }
 0x153   :  { %2902 = vtanh.f32 %v1438_v24  ;;  %v2897_v28 = vpop.eup %2896  ;;  %v1469_v41 = vpop.f32.mrb[46].mxu0 }
 0x154   :  { %v1153_v29 = vpop.f32.mrb[32].mxu1  ;;  %v1471_v42 = vpop.f32.mrb[47].mxu0 }
 0x155   :  { %v2899_v30 = vpop.eup %2898  ;;  %v1154_v31 = vadd.f32 %v3507_v26, %v1153_v29  ;;  %v1155_v32 = vpop.f32.mrb[33].mxu1 }
 0x156   :  { %v2368_v33 = vpack.c.bf16 %v2899_v30, %v2897_v28  ;;  %v1156_v34 = vpop.f32.mrb[34].mxu1 }
 0x157   :  { %v1443_v35 = vadd.f32 %v1442_v56, %v1154_v31  ;;  %v1157_v36 = vadd.f32 %v3507_v26, %v1156_v34  ;;  %v1158_v37 = vpop.f32.mrb[35].mxu1 }
 0x158   :  { %2500 = vst [vmem:[%s3729_s3 + $0x30] sm:$0xff] %v2368_v33  }
 0x159   :  { %v1446_v40 = vadd.f32 %v1445_v59, %v1157_v36  ;;  %2904 = vtanh.f32 %v1443_v35  ;;  %v1474_v53 = vpop.f32.mrb[48].mxu0 }
 0x15a   :  { %v1476_v54 = vpop.f32.mrb[49].mxu0 }
 0x15b   :  { %2906 = vtanh.f32 %v1446_v40  ;;  %v2901_v43 = vpop.eup %2900  ;;  %v1477_v56 = vpop.f32.mrb[50].mxu0 }
 0x15c   :  { %v1161_v44 = vpop.f32.mrb[36].mxu1  ;;  %v1479_v57 = vpop.f32.mrb[51].mxu0 }
 0x15d   :  { %v2903_v45 = vpop.eup %2902  ;;  %v1162_v46 = vadd.f32 %v3507_v26, %v1161_v44  ;;  %v1163_v47 = vpop.f32.mrb[37].mxu1 }
 0x15e   :  { %v2373_v48 = vpack.c.bf16 %v2903_v45, %v2901_v43  ;;  %v1164_v49 = vpop.f32.mrb[38].mxu1 }
 0x15f   :  { %v1451_v50 = vadd.f32 %v1450_v7, %v1162_v46  ;;  %v1165_v51 = vadd.f32 %v3507_v26, %v1164_v49  ;;  %v1166_v52 = vpop.f32.mrb[39].mxu1 }
 0x160   :  { %2501 = vst [vmem:[%s3729_s3 + $0x38] sm:$0xff] %v2373_v48  }
 0x161   :  { %v1454_v55 = vadd.f32 %v1453_v10, %v1165_v51  ;;  %2908 = vtanh.f32 %v1451_v50  ;;  %v1482_v4 = vpop.f32.mrb[52].mxu0 }
 0x162   :  { %v1484_v5 = vpop.f32.mrb[53].mxu0 }
 0x163   :  { %2910 = vtanh.f32 %v1454_v55  ;;  %v2905_v58 = vpop.eup %2904  ;;  %v1485_v7 = vpop.f32.mrb[54].mxu0 }
 0x164   :  { %v1169_v59 = vpop.f32.mrb[40].mxu1  ;;  %v1487_v8 = vpop.f32.mrb[55].mxu0 }
 0x165   :  { %v2907_v60 = vpop.eup %2906  ;;  %v1170_v61 = vadd.f32 %v3507_v26, %v1169_v59  ;;  %v1171_v62 = vpop.f32.mrb[41].mxu1 }
 0x166   :  { %v2378_v63 = vpack.c.bf16 %v2907_v60, %v2905_v58  ;;  %v1172_v0 = vpop.f32.mrb[42].mxu1 }
 0x167   :  { %v1459_v1 = vadd.f32 %v1458_v22, %v1170_v61  ;;  %v1173_v2 = vadd.f32 %v3507_v26, %v1172_v0  ;;  %v1174_v3 = vpop.f32.mrb[43].mxu1 }
 0x168   :  { %2502 = vst [vmem:[%s3729_s3 + $0x40] sm:$0xff] %v2378_v63  }
 0x169   :  { %v1462_v6 = vadd.f32 %v1461_v25, %v1173_v2  ;;  %2912 = vtanh.f32 %v1459_v1  ;;  %v1490_v19 = vpop.f32.mrb[56].mxu0 }
 0x16a   :  { %v1492_v20 = vpop.f32.mrb[57].mxu0 }
 0x16b   :  { %2914 = vtanh.f32 %v1462_v6  ;;  %v2909_v9 = vpop.eup %2908  ;;  %v1493_v22 = vpop.f32.mrb[58].mxu0 }
 0x16c   :  { %v1177_v10 = vpop.f32.mrb[44].mxu1  ;;  %v1495_v23 = vpop.f32.mrb[59].mxu0 }
 0x16d   :  { %v2911_v11 = vpop.eup %2910  ;;  %v1178_v12 = vadd.f32 %v3507_v26, %v1177_v10  ;;  %v1179_v13 = vpop.f32.mrb[45].mxu1 }
 0x16e   :  { %v2383_v14 = vpack.c.bf16 %v2911_v11, %v2909_v9  ;;  %v1180_v15 = vpop.f32.mrb[46].mxu1 }
 0x16f   :  { %v1467_v16 = vadd.f32 %v1466_v38, %v1178_v12  ;;  %v1181_v17 = vadd.f32 %v3507_v26, %v1180_v15  ;;  %v1182_v18 = vpop.f32.mrb[47].mxu1 }
 0x170   :  { %2503 = vst [vmem:[%s3729_s3 + $0x48] sm:$0xff] %v2383_v14  }
 0x171   :  { %v1470_v21 = vadd.f32 %v1469_v41, %v1181_v17  ;;  %2916 = vtanh.f32 %v1467_v16  ;;  %v1498_v35 = vpop.f32.mrb[60].mxu0 }
 0x172   :  { %v1500_v36 = vpop.f32.mrb[61].mxu0 }
 0x173   :  { %2918 = vtanh.f32 %v1470_v21  ;;  %v2913_v24 = vpop.eup %2912  ;;  %v1501_v38 = vpop.f32.mrb[62].mxu0 }
 0x174   :  { %v1185_v25 = vpop.f32.mrb[48].mxu1  ;;  %v1503_v39 = vpop.f32.mrb[63].mxu0 }
 0x175   :  { %v2915_v27 = vpop.eup %2914  ;;  %v1186_v28 = vadd.f32 %v3507_v26, %v1185_v25  ;;  %v1187_v29 = vpop.f32.mrb[49].mxu1 }
 0x176   :  { %v2388_v30 = vpack.c.bf16 %v2915_v27, %v2913_v24  ;;  %v1188_v31 = vpop.f32.mrb[50].mxu1 }
 0x177   :  { %v1475_v32 = vadd.f32 %v1474_v53, %v1186_v28  ;;  %v1189_v33 = vadd.f32 %v3507_v26, %v1188_v31  ;;  %v1190_v34 = vpop.f32.mrb[51].mxu1 }
 0x178   :  { %2504 = vst [vmem:[%s3729_s3 + $0x50] sm:$0xff] %v2388_v30  }
 0x179   :  { %v1478_v37 = vadd.f32 %v1477_v56, %v1189_v33  ;;  %2920 = vtanh.f32 %v1475_v32  ;;  %v1506_v50 = vpop.f32.mrb[64].mxu0 }
 0x17a   :  { %v1508_v51 = vpop.f32.mrb[65].mxu0 }
 0x17b   :  { %2922 = vtanh.f32 %v1478_v37  ;;  %v2917_v40 = vpop.eup %2916  ;;  %v1509_v53 = vpop.f32.mrb[66].mxu0 }
 0x17c   :  { %v1193_v41 = vpop.f32.mrb[52].mxu1  ;;  %v1511_v54 = vpop.f32.mrb[67].mxu0 }
 0x17d   :  { %v2919_v42 = vpop.eup %2918  ;;  %v1194_v43 = vadd.f32 %v3507_v26, %v1193_v41  ;;  %v1195_v44 = vpop.f32.mrb[53].mxu1 }
 0x17e   :  { %v2393_v45 = vpack.c.bf16 %v2919_v42, %v2917_v40  ;;  %v1196_v46 = vpop.f32.mrb[54].mxu1 }
 0x17f   :  { %v1483_v47 = vadd.f32 %v1482_v4, %v1194_v43  ;;  %v1197_v48 = vadd.f32 %v3507_v26, %v1196_v46  ;;  %v1198_v49 = vpop.f32.mrb[55].mxu1 }
 0x180   :  { %2505 = vst [vmem:[%s3729_s3 + $0x58] sm:$0xff] %v2393_v45  }
 0x181   :  { %v1486_v52 = vadd.f32 %v1485_v7, %v1197_v48  ;;  %2924 = vtanh.f32 %v1483_v47  ;;  %v1514_v1 = vpop.f32.mrb[68].mxu0 }
 0x182   :  { %v1516_v2 = vpop.f32.mrb[69].mxu0 }
 0x183   :  { %2926 = vtanh.f32 %v1486_v52  ;;  %v2921_v55 = vpop.eup %2920  ;;  %v1517_v4 = vpop.f32.mrb[70].mxu0 }
 0x184   :  { %v1201_v56 = vpop.f32.mrb[56].mxu1  ;;  %v1519_v5 = vpop.f32.mrb[71].mxu0 }
 0x185   :  { %v2923_v57 = vpop.eup %2922  ;;  %v1202_v58 = vadd.f32 %v3507_v26, %v1201_v56  ;;  %v1203_v59 = vpop.f32.mrb[57].mxu1 }
 0x186   :  { %v2398_v60 = vpack.c.bf16 %v2923_v57, %v2921_v55  ;;  %v1204_v61 = vpop.f32.mrb[58].mxu1 }
 0x187   :  { %v1491_v62 = vadd.f32 %v1490_v19, %v1202_v58  ;;  %v1205_v63 = vadd.f32 %v3507_v26, %v1204_v61  ;;  %v1206_v0 = vpop.f32.mrb[59].mxu1 }
 0x188   :  { %2506 = vst [vmem:[%s3729_s3 + $0x60] sm:$0xff] %v2398_v60  }
 0x189   :  { %v1494_v3 = vadd.f32 %v1493_v22, %v1205_v63  ;;  %2928 = vtanh.f32 %v1491_v62  ;;  %v1522_v16 = vpop.f32.mrb[72].mxu0 }
 0x18a   :  { %v1524_v17 = vpop.f32.mrb[73].mxu0 }
 0x18b   :  { %2930 = vtanh.f32 %v1494_v3  ;;  %v2925_v6 = vpop.eup %2924  ;;  %v1525_v19 = vpop.f32.mrb[74].mxu0 }
 0x18c   :  { %v1209_v7 = vpop.f32.mrb[60].mxu1  ;;  %v1527_v20 = vpop.f32.mrb[75].mxu0 }
 0x18d   :  { %v2927_v8 = vpop.eup %2926  ;;  %v1210_v9 = vadd.f32 %v3507_v26, %v1209_v7  ;;  %v1211_v10 = vpop.f32.mrb[61].mxu1 }
 0x18e   :  { %v2403_v11 = vpack.c.bf16 %v2927_v8, %v2925_v6  ;;  %v1212_v12 = vpop.f32.mrb[62].mxu1 }
 0x18f   :  { %v1499_v13 = vadd.f32 %v1498_v35, %v1210_v9  ;;  %v1213_v14 = vadd.f32 %v3507_v26, %v1212_v12  ;;  %v1214_v15 = vpop.f32.mrb[63].mxu1 }
 0x190   :  { %2507 = vst [vmem:[%s3729_s3 + $0x68] sm:$0xff] %v2403_v11  }
 0x191   :  { %v1502_v18 = vadd.f32 %v1501_v38, %v1213_v14  ;;  %2932 = vtanh.f32 %v1499_v13  ;;  %v1530_v32 = vpop.f32.mrb[76].mxu0 }
 0x192   :  { %v1532_v33 = vpop.f32.mrb[77].mxu0 }
 0x193   :  { %2934 = vtanh.f32 %v1502_v18  ;;  %v2929_v21 = vpop.eup %2928  ;;  %v1533_v35 = vpop.f32.mrb[78].mxu0 }
 0x194   :  { %v1217_v22 = vpop.f32.mrb[64].mxu1  ;;  %v1535_v36 = vpop.f32.mrb[79].mxu0 }
 0x195   :  { %v2931_v23 = vpop.eup %2930  ;;  %v1218_v24 = vadd.f32 %v3507_v26, %v1217_v22  ;;  %v1219_v25 = vpop.f32.mrb[65].mxu1 }
 0x196   :  { %v2408_v27 = vpack.c.bf16 %v2931_v23, %v2929_v21  ;;  %v1220_v28 = vpop.f32.mrb[66].mxu1 }
 0x197   :  { %v1507_v29 = vadd.f32 %v1506_v50, %v1218_v24  ;;  %v1221_v30 = vadd.f32 %v3507_v26, %v1220_v28  ;;  %v1222_v31 = vpop.f32.mrb[67].mxu1 }
 0x198   :  { %2508 = vst [vmem:[%s3729_s3 + $0x70] sm:$0xff] %v2408_v27  }
 0x199   :  { %v1510_v34 = vadd.f32 %v1509_v53, %v1221_v30  ;;  %2936 = vtanh.f32 %v1507_v29  ;;  %v1538_v47 = vpop.f32.mrb[80].mxu0 }
 0x19a   :  { %v1540_v48 = vpop.f32.mrb[81].mxu0 }
 0x19b   :  { %2938 = vtanh.f32 %v1510_v34  ;;  %v2933_v37 = vpop.eup %2932  ;;  %v1541_v50 = vpop.f32.mrb[82].mxu0 }
 0x19c   :  { %v1225_v38 = vpop.f32.mrb[68].mxu1  ;;  %v1543_v51 = vpop.f32.mrb[83].mxu0 }
 0x19d   :  { %v2935_v39 = vpop.eup %2934  ;;  %v1226_v40 = vadd.f32 %v3507_v26, %v1225_v38  ;;  %v1227_v41 = vpop.f32.mrb[69].mxu1 }
 0x19e   :  { %v2413_v42 = vpack.c.bf16 %v2935_v39, %v2933_v37  ;;  %v1228_v43 = vpop.f32.mrb[70].mxu1 }
 0x19f   :  { %v1515_v44 = vadd.f32 %v1514_v1, %v1226_v40  ;;  %v1229_v45 = vadd.f32 %v3507_v26, %v1228_v43  ;;  %v1230_v46 = vpop.f32.mrb[71].mxu1 }
 0x1a0   :  { %2509 = vst [vmem:[%s3729_s3 + $0x78] sm:$0xff] %v2413_v42  }
 0x1a1   :  { %v1518_v49 = vadd.f32 %v1517_v4, %v1229_v45  ;;  %2940 = vtanh.f32 %v1515_v44  ;;  %v1546_v62 = vpop.f32.mrb[84].mxu0 }
 0x1a2   :  { %v1548_v63 = vpop.f32.mrb[85].mxu0 }
 0x1a3   :  { %2942 = vtanh.f32 %v1518_v49  ;;  %v2937_v52 = vpop.eup %2936  ;;  %v1549_v1 = vpop.f32.mrb[86].mxu0 }
 0x1a4   :  { %v1233_v53 = vpop.f32.mrb[72].mxu1  ;;  %v1551_v2 = vpop.f32.mrb[87].mxu0 }
 0x1a5   :  { %v2939_v54 = vpop.eup %2938  ;;  %v1234_v55 = vadd.f32 %v3507_v26, %v1233_v53  ;;  %v1235_v56 = vpop.f32.mrb[73].mxu1 }
 0x1a6   :  { %v2418_v57 = vpack.c.bf16 %v2939_v54, %v2937_v52  ;;  %v1236_v58 = vpop.f32.mrb[74].mxu1 }
 0x1a7   :  { %v1523_v59 = vadd.f32 %v1522_v16, %v1234_v55  ;;  %v1237_v60 = vadd.f32 %v3507_v26, %v1236_v58  ;;  %v1238_v61 = vpop.f32.mrb[75].mxu1 }
 0x1a8   :  { %2510 = vst [vmem:[%s3729_s3 + $0x80] sm:$0xff] %v2418_v57  }
 0x1a9   :  { %v1526_v0 = vadd.f32 %v1525_v19, %v1237_v60  ;;  %2944 = vtanh.f32 %v1523_v59  ;;  %v1554_v13 = vpop.f32.mrb[88].mxu0 }
 0x1aa   :  { %v1556_v14 = vpop.f32.mrb[89].mxu0 }
 0x1ab   :  { %2946 = vtanh.f32 %v1526_v0  ;;  %v2941_v3 = vpop.eup %2940  ;;  %v1557_v16 = vpop.f32.mrb[90].mxu0 }
 0x1ac   :  { %v1241_v4 = vpop.f32.mrb[76].mxu1  ;;  %v1559_v17 = vpop.f32.mrb[91].mxu0 }
 0x1ad   :  { %v2943_v5 = vpop.eup %2942  ;;  %v1242_v6 = vadd.f32 %v3507_v26, %v1241_v4  ;;  %v1243_v7 = vpop.f32.mrb[77].mxu1 }
 0x1ae   :  { %v2423_v8 = vpack.c.bf16 %v2943_v5, %v2941_v3  ;;  %v1244_v9 = vpop.f32.mrb[78].mxu1 }
 0x1af   :  { %v1531_v10 = vadd.f32 %v1530_v32, %v1242_v6  ;;  %v1245_v11 = vadd.f32 %v3507_v26, %v1244_v9  ;;  %v1246_v12 = vpop.f32.mrb[79].mxu1 }
 0x1b0   :  { %2511 = vst [vmem:[%s3729_s3 + $0x88] sm:$0xff] %v2423_v8  }
 0x1b1   :  { %v1534_v15 = vadd.f32 %v1533_v35, %v1245_v11  ;;  %2948 = vtanh.f32 %v1531_v10  ;;  %v1562_v29 = vpop.f32.mrb[92].mxu0 }
 0x1b2   :  { %v1564_v30 = vpop.f32.mrb[93].mxu0 }
 0x1b3   :  { %2950 = vtanh.f32 %v1534_v15  ;;  %v2945_v18 = vpop.eup %2944  ;;  %v1565_v32 = vpop.f32.mrb[94].mxu0 }
 0x1b4   :  { %v1249_v19 = vpop.f32.mrb[80].mxu1  ;;  %v1567_v33 = vpop.f32.mrb[95].mxu0 }
 0x1b5   :  { %v2947_v20 = vpop.eup %2946  ;;  %v1250_v21 = vadd.f32 %v3507_v26, %v1249_v19  ;;  %v1251_v22 = vpop.f32.mrb[81].mxu1 }
 0x1b6   :  { %v2428_v23 = vpack.c.bf16 %v2947_v20, %v2945_v18  ;;  %v1252_v24 = vpop.f32.mrb[82].mxu1 }
 0x1b7   :  { %v1539_v25 = vadd.f32 %v1538_v47, %v1250_v21  ;;  %v1253_v27 = vadd.f32 %v3507_v26, %v1252_v24  ;;  %v1254_v28 = vpop.f32.mrb[83].mxu1 }
 0x1b8   :  { %2512 = vst [vmem:[%s3729_s3 + $0x90] sm:$0xff] %v2428_v23  }
 0x1b9   :  { %v1542_v31 = vadd.f32 %v1541_v50, %v1253_v27  ;;  %2952 = vtanh.f32 %v1539_v25  ;;  %v1570_v44 = vpop.f32.mrb[96].mxu0 }
 0x1ba   :  { %v1572_v45 = vpop.f32.mrb[97].mxu0 }
 0x1bb   :  { %2954 = vtanh.f32 %v1542_v31  ;;  %v2949_v34 = vpop.eup %2948  ;;  %v1573_v47 = vpop.f32.mrb[98].mxu0 }
 0x1bc   :  { %v1257_v35 = vpop.f32.mrb[84].mxu1  ;;  %v1575_v48 = vpop.f32.mrb[99].mxu0 }
 0x1bd   :  { %v2951_v36 = vpop.eup %2950  ;;  %v1258_v37 = vadd.f32 %v3507_v26, %v1257_v35  ;;  %v1259_v38 = vpop.f32.mrb[85].mxu1 }
 0x1be   :  { %v2433_v39 = vpack.c.bf16 %v2951_v36, %v2949_v34  ;;  %v1260_v40 = vpop.f32.mrb[86].mxu1 }
 0x1bf   :  { %v1547_v41 = vadd.f32 %v1546_v62, %v1258_v37  ;;  %v1261_v42 = vadd.f32 %v3507_v26, %v1260_v40  ;;  %v1262_v43 = vpop.f32.mrb[87].mxu1 }
 0x1c0   :  { %2513 = vst [vmem:[%s3729_s3 + $0x98] sm:$0xff] %v2433_v39  }
 0x1c1   :  { %v1550_v46 = vadd.f32 %v1549_v1, %v1261_v42  ;;  %2956 = vtanh.f32 %v1547_v41  ;;  %v1578_v59 = vpop.f32.mrb[100].mxu0 }
 0x1c2   :  { %v1580_v60 = vpop.f32.mrb[101].mxu0 }
 0x1c3   :  { %2958 = vtanh.f32 %v1550_v46  ;;  %v2953_v49 = vpop.eup %2952  ;;  %v1581_v62 = vpop.f32.mrb[102].mxu0 }
 0x1c4   :  { %v1265_v50 = vpop.f32.mrb[88].mxu1  ;;  %v1583_v63 = vpop.f32.mrb[103].mxu0 }
 0x1c5   :  { %v2955_v51 = vpop.eup %2954  ;;  %v1266_v52 = vadd.f32 %v3507_v26, %v1265_v50  ;;  %v1267_v53 = vpop.f32.mrb[89].mxu1 }
 0x1c6   :  { %v2438_v54 = vpack.c.bf16 %v2955_v51, %v2953_v49  ;;  %v1268_v55 = vpop.f32.mrb[90].mxu1 }
 0x1c7   :  { %v1555_v56 = vadd.f32 %v1554_v13, %v1266_v52  ;;  %v1269_v57 = vadd.f32 %v3507_v26, %v1268_v55  ;;  %v1270_v58 = vpop.f32.mrb[91].mxu1 }
 0x1c8   :  { %2514 = vst [vmem:[%s3729_s3 + $0xa0] sm:$0xff] %v2438_v54  }
 0x1c9   :  { %v1558_v61 = vadd.f32 %v1557_v16, %v1269_v57  ;;  %2960 = vtanh.f32 %v1555_v56  ;;  %v1586_v10 = vpop.f32.mrb[104].mxu0 }
 0x1ca   :  { %v1588_v11 = vpop.f32.mrb[105].mxu0 }
 0x1cb   :  { %2962 = vtanh.f32 %v1558_v61  ;;  %v2957_v0 = vpop.eup %2956  ;;  %v1589_v13 = vpop.f32.mrb[106].mxu0 }
 0x1cc   :  { %v1273_v1 = vpop.f32.mrb[92].mxu1  ;;  %v1591_v14 = vpop.f32.mrb[107].mxu0 }
 0x1cd   :  { %v2959_v2 = vpop.eup %2958  ;;  %v1274_v3 = vadd.f32 %v3507_v26, %v1273_v1  ;;  %v1275_v4 = vpop.f32.mrb[93].mxu1 }
 0x1ce   :  { %v2443_v5 = vpack.c.bf16 %v2959_v2, %v2957_v0  ;;  %v1276_v6 = vpop.f32.mrb[94].mxu1 }
 0x1cf   :  { %v1563_v7 = vadd.f32 %v1562_v29, %v1274_v3  ;;  %v1277_v8 = vadd.f32 %v3507_v26, %v1276_v6  ;;  %v1278_v9 = vpop.f32.mrb[95].mxu1 }
 0x1d0   :  { %2515 = vst [vmem:[%s3729_s3 + $0xa8] sm:$0xff] %v2443_v5   ;;  %v3694_v5 = vld [vmem:[%s3728_s2] ss:$0 sm:$0xff] }
 0x1d1   :  { %v1566_v12 = vadd.f32 %v1565_v32, %v1277_v8  ;;  %2964 = vtanh.f32 %v1563_v7  ;;  %v1594_v25 = vpop.f32.mrb[108].mxu0 }
 0x1d2   :  { %v1596_v27 = vpop.f32.mrb[109].mxu0 }
 0x1d3   :  { %2966 = vtanh.f32 %v1566_v12  ;;  %v2961_v15 = vpop.eup %2960  ;;  %v1597_v29 = vpop.f32.mrb[110].mxu0 }
 0x1d4   :  { %v1281_v16 = vpop.f32.mrb[96].mxu1  ;;  %v1599_v30 = vpop.f32.mrb[111].mxu0 }
 0x1d5   :  { %v2963_v17 = vpop.eup %2962  ;;  %v1282_v18 = vadd.f32 %v3507_v26, %v1281_v16  ;;  %v1283_v19 = vpop.f32.mrb[97].mxu1 }
 0x1d6   :  { %v2448_v20 = vpack.c.bf16 %v2963_v17, %v2961_v15  ;;  %v1284_v21 = vpop.f32.mrb[98].mxu1 }
 0x1d7   :  { %v1571_v22 = vadd.f32 %v1570_v44, %v1282_v18  ;;  %v1285_v23 = vadd.f32 %v3507_v26, %v1284_v21  ;;  %v1286_v24 = vpop.f32.mrb[99].mxu1 }
 0x1d8   :  { %2516 = vst [vmem:[%s3729_s3 + $0xb0] sm:$0xff] %v2448_v20  }
 0x1d9   :  { %v1574_v28 = vadd.f32 %v1573_v47, %v1285_v23  ;;  %2968 = vtanh.f32 %v1571_v22  ;;  %v1602_v41 = vpop.f32.mrb[112].mxu0 }
 0x1da   :  { %v1604_v42 = vpop.f32.mrb[113].mxu0 }
 0x1db   :  { %2970 = vtanh.f32 %v1574_v28  ;;  %v2965_v31 = vpop.eup %2964  ;;  %v1605_v44 = vpop.f32.mrb[114].mxu0 }
 0x1dc   :  { %v1289_v32 = vpop.f32.mrb[100].mxu1  ;;  %v1607_v45 = vpop.f32.mrb[115].mxu0 }
 0x1dd   :  { %v2967_v33 = vpop.eup %2966  ;;  %v1290_v34 = vadd.f32 %v3507_v26, %v1289_v32  ;;  %v1291_v35 = vpop.f32.mrb[101].mxu1 }
 0x1de   :  { %v2453_v36 = vpack.c.bf16 %v2967_v33, %v2965_v31  ;;  %v1292_v37 = vpop.f32.mrb[102].mxu1 }
 0x1df   :  { %v1579_v38 = vadd.f32 %v1578_v59, %v1290_v34  ;;  %v1293_v39 = vadd.f32 %v3507_v26, %v1292_v37  ;;  %v1294_v40 = vpop.f32.mrb[103].mxu1 }
 0x1e0   :  { %2517 = vst [vmem:[%s3729_s3 + $0xb8] sm:$0xff] %v2453_v36  }
 0x1e1   :  { %v1582_v43 = vadd.f32 %v1581_v62, %v1293_v39  ;;  %2972 = vtanh.f32 %v1579_v38  ;;  %v1610_v56 = vpop.f32.mrb[116].mxu0 }
 0x1e2   :  { %v1612_v57 = vpop.f32.mrb[117].mxu0 }
 0x1e3   :  { %2974 = vtanh.f32 %v1582_v43  ;;  %v2969_v46 = vpop.eup %2968  ;;  %v1613_v59 = vpop.f32.mrb[118].mxu0 }
 0x1e4   :  { %v1297_v47 = vpop.f32.mrb[104].mxu1  ;;  %v1615_v60 = vpop.f32.mrb[119].mxu0 }
 0x1e5   :  { %v2971_v48 = vpop.eup %2970  ;;  %v1298_v49 = vadd.f32 %v3507_v26, %v1297_v47  ;;  %v1299_v50 = vpop.f32.mrb[105].mxu1 }
 0x1e6   :  { %v2458_v51 = vpack.c.bf16 %v2971_v48, %v2969_v46  ;;  %v1300_v52 = vpop.f32.mrb[106].mxu1 }
 0x1e7   :  { %v1587_v53 = vadd.f32 %v1586_v10, %v1298_v49  ;;  %v1301_v54 = vadd.f32 %v3507_v26, %v1300_v52  ;;  %v1302_v55 = vpop.f32.mrb[107].mxu1 }
 0x1e8   :  { %2518 = vst [vmem:[%s3729_s3 + $0xc0] sm:$0xff] %v2458_v51  }
 0x1e9   :  { %v1590_v58 = vadd.f32 %v1589_v13, %v1301_v54  ;;  %2976 = vtanh.f32 %v1587_v53  ;;  %v1618_v8 = vpop.f32.mrb[120].mxu0 }
 0x1ea   :  { %v1620_v9 = vpop.f32.mrb[121].mxu0 }
 0x1eb   :  { %2978 = vtanh.f32 %v1590_v58  ;;  %v2973_v61 = vpop.eup %2972 }
 0x1ec   :  { %v1305_v62 = vpop.f32.mrb[108].mxu1 }
 0x1ed   :  { %v2975_v63 = vpop.eup %2974  ;;  %v1306_v0 = vadd.f32 %v3507_v26, %v1305_v62  ;;  %v1307_v1 = vpop.f32.mrb[109].mxu1 }
 0x1ee   :  { %v2463_v2 = vpack.c.bf16 %v2975_v63, %v2973_v61  ;;  %v1308_v3 = vpop.f32.mrb[110].mxu1  ;;  %v1621_v26 = vpop.f32.mrb[122].mxu0 }
 0x1ef   :  { %v1595_v4 = vadd.f32 %v1594_v25, %v1306_v0  ;;  %v1309_v6 = vadd.f32 %v3694_v5, %v1308_v3  ;;  %v1310_v7 = vpop.f32.mrb[111].mxu1  ;;  %v1623_v11 = vpop.f32.mrb[123].mxu0 }
 0x1f0   :  { %2519 = vst [vmem:[%s3729_s3 + $0xc8] sm:$0xff] %v2463_v2  }
 0x1f1   :  { %v1598_v10 = vadd.f32 %v1597_v29, %v1309_v6  ;;  %2980 = vtanh.f32 %v1595_v4  ;;  %v1626_v22 = vpop.f32.mrb[124].mxu0 }
 0x1f2   :  { %v1628_v23 = vpop.f32.mrb[125].mxu0 }
 0x1f3   :  { %2982 = vtanh.f32 %v1598_v10  ;;  %v2977_v12 = vpop.eup %2976  ;;  %v1629_v25 = vpop.f32.mrb[126].mxu0 }
 0x1f4   :  { %v1313_v13 = vpop.f32.mrb[112].mxu1  ;;  %v1631_v27 = vpop.f32.mrb[127].mxu0 }
 0x1f5   :  { %v2979_v14 = vpop.eup %2978  ;;  %v1314_v15 = vadd.f32 %v3694_v5, %v1313_v13  ;;  %v1315_v16 = vpop.f32.mrb[113].mxu1 }
 0x1f6   :  { %v2468_v17 = vpack.c.bf16 %v2979_v14, %v2977_v12  ;;  %v1316_v18 = vpop.f32.mrb[114].mxu1 }
 0x1f7   :  { %v1603_v19 = vadd.f32 %v1602_v41, %v1314_v15  ;;  %v1317_v20 = vadd.f32 %v3694_v5, %v1316_v18  ;;  %v1318_v21 = vpop.f32.mrb[115].mxu1 }
 0x1f8   :  { %2520 = vst [vmem:[%s3729_s3 + $0xd0] sm:$0xff] %v2468_v17  }
 0x1f9   :  { %v1606_v24 = vadd.f32 %v1605_v44, %v1317_v20  ;;  %2984 = vtanh.f32 %v1603_v19 }
 0x1fb   :  { %2986 = vtanh.f32 %v1606_v24  ;;  %v2981_v28 = vpop.eup %2980 }
 0x1fc   :  { %v1321_v29 = vpop.f32.mrb[116].mxu1 }
 0x1fd   :  { %v2983_v30 = vpop.eup %2982  ;;  %v1322_v31 = vadd.f32 %v3694_v5, %v1321_v29  ;;  %v1323_v32 = vpop.f32.mrb[117].mxu1 }
 0x1fe   :  { %v2473_v33 = vpack.c.bf16 %v2983_v30, %v2981_v28  ;;  %v1324_v34 = vpop.f32.mrb[118].mxu1 }
 0x1ff   :  { %v1611_v35 = vadd.f32 %v1610_v56, %v1322_v31  ;;  %v1325_v36 = vadd.f32 %v3694_v5, %v1324_v34  ;;  %v1326_v37 = vpop.f32.mrb[119].mxu1 }
 0x200   :  { %2521 = vst [vmem:[%s3729_s3 + $0xd8] sm:$0xff] %v2473_v33  }
 0x201   :  { %v1614_v38 = vadd.f32 %v1613_v59, %v1325_v36  ;;  %2988 = vtanh.f32 %v1611_v35 }
 0x203   :  { %2990 = vtanh.f32 %v1614_v38  ;;  %v2985_v39 = vpop.eup %2984 }
 0x204   :  { %v1329_v40 = vpop.f32.mrb[120].mxu1 }
 0x205   :  { %v2987_v41 = vpop.eup %2986  ;;  %v1330_v42 = vadd.f32 %v3694_v5, %v1329_v40  ;;  %v1331_v43 = vpop.f32.mrb[121].mxu1 }
 0x206   :  { %v2478_v44 = vpack.c.bf16 %v2987_v41, %v2985_v39  ;;  %v1332_v45 = vpop.f32.mrb[122].mxu1 }
 0x207   :  { %v1619_v46 = vadd.f32 %v1618_v8, %v1330_v42  ;;  %v1333_v47 = vadd.f32 %v3694_v5, %v1332_v45  ;;  %v1334_v48 = vpop.f32.mrb[123].mxu1 }
 0x208   :  { %2522 = vst [vmem:[%s3729_s3 + $0xe0] sm:$0xff] %v2478_v44  }
 0x209   :  { %v1622_v49 = vadd.f32 %v1621_v26, %v1333_v47  ;;  %2992 = vtanh.f32 %v1619_v46 }
 0x20b   :  { %2994 = vtanh.f32 %v1622_v49  ;;  %v2989_v50 = vpop.eup %2988 }
 0x20c   :  { %v1337_v51 = vpop.f32.mrb[124].mxu1 }
 0x20d   :  { %v2991_v52 = vpop.eup %2990  ;;  %v1338_v53 = vadd.f32 %v3694_v5, %v1337_v51  ;;  %v1339_v54 = vpop.f32.mrb[125].mxu1 }
 0x20e   :  { %v2483_v55 = vpack.c.bf16 %v2991_v52, %v2989_v50  ;;  %v1340_v56 = vpop.f32.mrb[126].mxu1 }
 0x20f   :  { %v1627_v57 = vadd.f32 %v1626_v22, %v1338_v53  ;;  %v1341_v58 = vadd.f32 %v3694_v5, %v1340_v56  ;;  %v1342_v59 = vpop.f32.mrb[127].mxu1 }
 0x210   :  { %2523 = vst [vmem:[%s3729_s3 + $0xe8] sm:$0xff] %v2483_v55  }
 0x211   :  { %v1630_v60 = vadd.f32 %v1629_v25, %v1341_v58  ;;  %2996 = vtanh.f32 %v1627_v57 }
 0x213   :  { %2998 = vtanh.f32 %v1630_v60  ;;  %v2993_v61 = vpop.eup %2992 }
 0x215   :  { %v2995_v62 = vpop.eup %2994 }
 0x216   :  { %v2488_v63 = vpack.c.bf16 %v2995_v62, %v2993_v61 }
 0x218   :  { %2524 = vst [vmem:[%s3729_s3 + $0xf0] sm:$0xff] %v2488_v63  }
 0x21b   :  { %v2997_v0 = vpop.eup %2996 }
 0x21d   :  { %v2999_v1 = vpop.eup %2998 }
 0x21e   :  { %v2493_v2 = vpack.c.bf16 %v2999_v1, %v2997_v0 }
 0x220   :  { %2525 = vst [vmem:[%s3729_s3 + $0xf8] sm:$0xff] %v2493_v2  }

</bundles_post_ra>
